<compile_context>
chip_gen: v7x
topology: tpu7x:2x2x1
jax: 0.10.0
libtpu: 0.0.40
codegen_flags: <defaults>
</compile_context>

<pallas_src>
import functools

import jax
import jax.numpy as jnp
from jax.experimental import pallas as pl
from jax.experimental.pallas import tpu as pltpu

BN_EPS = 1e-5


# ----------------------------------------------------------------------------
# Pallas kernels
# ----------------------------------------------------------------------------
def _make_direct_conv_kernel(kh, kw, ho, wo, sh, sw, cin, splits):
    """Direct conv for one batch image: accumulate kh*kw taps on the MXU (fp32
    accumulation), apply folded-BN scale/bias + per-column ReLU lower bound,
    and write each output-channel group to its own lane-dense output ref."""

    def kernel(x_ref, w_ref, sb_ref, *out_refs):
        x = x_ref[0]                                       # (Hp, Wp, Cin) bf16
        acc = None
        for t in range(kh * kw):
            i, j = divmod(t, kw)
            slab = x[i:i + sh * (ho - 1) + 1:sh,
                     j:j + sw * (wo - 1) + 1:sw, :]        # (Ho, Wo, Cin)
            slab = slab.reshape(ho * wo, cin)
            d = jnp.dot(slab, w_ref[t], preferred_element_type=jnp.float32)
            acc = d if acc is None else acc + d
        # Epilogue (fp32): y = acc*scale + bias ; relu via per-column lower bound.
        y = acc * sb_ref[0:1, :] + sb_ref[1:2, :]
        y = jnp.maximum(y, sb_ref[2:3, :])
        start = 0
        for r, n in zip(out_refs, splits):
            r[0] = y[:, start:start + n].reshape(ho, wo, n).astype(r.dtype)
            start += n

    return kernel


def direct_conv_bn_act(x_bf16, w_bf16, sb, *, kernel, stride, splits, out_dtypes):
    """NHWC direct conv (+folded BN, +optional per-column ReLU).

    x_bf16 : (B, H, W, Cin) bf16
    w_bf16 : (kh*kw, Cin, sum(splits)) bf16
    sb     : (8, sum(splits)) f32 -- row0 scale, row1 bias, row2 ReLU lower bound
    Returns one (B, Ho, Wo, n) array per entry of `splits`.
    """
    B, H, W, Cin = x_bf16.shape
    kh, kw = kernel
    sh, sw = stride
    ph, pw = (kh - 1) // 2, (kw - 1) // 2
    Ho = (H + 2 * ph - kh) // sh + 1
    Wo = (W + 2 * pw - kw) // sw + 1
    Hp, Wp = H + 2 * ph, W + 2 * pw
    Ntot = int(sum(splits))

    xp = jnp.pad(x_bf16, ((0, 0), (ph, ph), (pw, pw), (0, 0)))

    kern = _make_direct_conv_kernel(kh, kw, Ho, Wo, sh, sw, Cin, splits)
    outs = pl.pallas_call(
        kern,
        out_shape=tuple(jax.ShapeDtypeStruct((B, Ho, Wo, n), dt)
                        for n, dt in zip(splits, out_dtypes)),
        grid=(B,),
        in_specs=[
            pl.BlockSpec((1, Hp, Wp, Cin), lambda b: (b, 0, 0, 0)),   # one padded image
            pl.BlockSpec((kh * kw, Cin, Ntot), lambda b: (0, 0, 0)),  # weights, fetched once
            pl.BlockSpec((8, Ntot), lambda b: (0, 0)),                # scale/bias/relu-lo
        ],
        out_specs=tuple(pl.BlockSpec((1, Ho, Wo, n), lambda b: (b, 0, 0, 0))
                        for n in splits),
        compiler_params=pltpu.CompilerParams(
            dimension_semantics=("parallel",)),
    )(xp, w_bf16, sb)
    if not isinstance(outs, (list, tuple)):
        outs = (outs,)
    return tuple(outs)


def _se_excite_combine_kernel(out_ref, res_ref, wd_ref, wu_ref, o_ref):
    """Fused SE tail for one batch: avgpool -> w_down -> ReLU -> w_up -> sigmoid
    -> relu(score * out + residual).  Inputs bf16, math in fp32, stays in VMEM."""
    out = out_ref[0].astype(jnp.float32)                    # (HW, C)
    pooled = jnp.mean(out, axis=0, keepdims=True)           # (1, C) f32
    s = jnp.dot(pooled.astype(jnp.bfloat16), wd_ref[...],
                preferred_element_type=jnp.float32)          # (1, C//r)
    s = jnp.maximum(s, 0.0)
    score = jax.nn.sigmoid(
        jnp.dot(s.astype(jnp.bfloat16), wu_ref[...],
                preferred_element_type=jnp.float32))         # (1, C)
    res = res_ref[0].astype(jnp.float32)
    o_ref[0] = jnp.maximum(score * out + res, 0.0).astype(o_ref.dtype)


def se_excite_combine(out_bf16, res_bf16, w_down_bf16, w_up_bf16):
    B, HW, C = out_bf16.shape
    Cr = w_down_bf16.shape[1]
    return pl.pallas_call(
        _se_excite_combine_kernel,
        out_shape=jax.ShapeDtypeStruct((B, HW, C), jnp.float32),
        grid=(B,),
        in_specs=[
            pl.BlockSpec((1, HW, C), lambda b: (b, 0, 0)),
            pl.BlockSpec((1, HW, C), lambda b: (b, 0, 0)),
            pl.BlockSpec((C, Cr), lambda b: (0, 0)),
            pl.BlockSpec((Cr, C), lambda b: (0, 0)),
        ],
        out_specs=pl.BlockSpec((1, HW, C), lambda b: (b, 0, 0)),
        compiler_params=pltpu.CompilerParams(
            dimension_semantics=("parallel",)),
    )(out_bf16, res_bf16, w_down_bf16, w_up_bf16)


# ----------------------------------------------------------------------------
# Parameter init (deterministic, synthetic; BN folded, weights pre-cast to bf16)
# ----------------------------------------------------------------------------
class KeyGen:
    def __init__(self, seed=0):
        self.key = jax.random.PRNGKey(seed)

    def __call__(self):
        self.key, sub = jax.random.split(self.key)
        return sub


def _init_conv(kg, kh, kw, cin, cout, use_bias=True):
    fan_in = kh * kw * cin
    w = jax.random.normal(kg(), (kh, kw, cin, cout), jnp.float32) / jnp.sqrt(fan_in)
    b = (0.01 * jax.random.normal(kg(), (cout,), jnp.float32)
         if use_bias else jnp.zeros((cout,), jnp.float32))
    return w, b


def _init_bn(kg, c):
    gamma = 1.0 + 0.1 * jax.random.normal(kg(), (c,), jnp.float32)
    beta = 0.1 * jax.random.normal(kg(), (c,), jnp.float32)
    mean = 0.1 * jax.random.normal(kg(), (c,), jnp.float32)
    var = 1.0 + 0.1 * jax.random.uniform(kg(), (c,), jnp.float32)
    scale = gamma / jnp.sqrt(var + BN_EPS)
    shift = beta - mean * scale
    return scale, shift


def _pack_sb(scale, bias, relu_on):
    """Pack scale / bias / ReLU lower bound into one (8, N) f32 operand."""
    n = scale.shape[0]
    lo = jnp.where(relu_on > 0, 0.0, -jnp.inf).astype(jnp.float32)
    sb = jnp.zeros((8, n), jnp.float32)
    return sb.at[0].set(scale).at[1].set(bias).at[2].set(lo)


def init_seblock(seed, inplanes, planes, kernel=(3, 7), reduction=16,
                 downsample=False, stride=(1, 4)):
    kg = KeyGen(seed)
    kh, kw = kernel

    w1, b1 = _init_conv(kg, kh, kw, inplanes, planes)          # conv1
    s1, sh1 = _init_bn(kg, planes)                             # bn1
    wr, br = _init_conv(kg, kh, kw, inplanes, planes)          # residual / downsample conv
    if downsample:
        sd, shd = _init_bn(kg, planes)                         # bn_down
        s_res, b_res = sd, br * sd + shd
    else:
        s_res, b_res = jnp.ones((planes,), jnp.float32), br
    w2, b2 = _init_conv(kg, kh, kw, planes, planes)            # conv2
    s2, sh2 = _init_bn(kg, planes)                             # bn2
    wd, _ = _init_conv(kg, 1, 1, planes, planes // reduction, use_bias=False)
    wu, _ = _init_conv(kg, 1, 1, planes // reduction, planes, use_bias=False)

    ones = jnp.ones((planes,), jnp.float32)
    zeros = jnp.zeros((planes,), jnp.float32)

    return {
        "kernel": kernel,
        "stride": stride if downsample else (1, 1),
        "planes": planes,
        # conv1 + residual conv fused into ONE direct-conv launch (shared input);
        # ReLU only on the conv1 half (via the per-column lower bound).
        "w_cat": jnp.concatenate([w1, wr], axis=-1)
                   .reshape(kh * kw, inplanes, 2 * planes).astype(jnp.bfloat16),
        "sb_cat": _pack_sb(jnp.concatenate([s1, s_res]),
                           jnp.concatenate([b1 * s1 + sh1, b_res]),
                           jnp.concatenate([ones, zeros])),
        # conv2 + bn2 (+ReLU on every column):
        "w2": w2.reshape(kh * kw, planes, planes).astype(jnp.bfloat16),
        "sb2": _pack_sb(s2, b2 * s2 + sh2, ones),
        # squeeze-excite 1x1 convs (no bias):
        "w_down": wd.reshape(planes, planes // reduction).astype(jnp.bfloat16),
        "w_up": wu.reshape(planes // reduction, planes).astype(jnp.bfloat16),
    }


# ----------------------------------------------------------------------------
# Forward pass (matches SEblock.forward, inference mode)
# ----------------------------------------------------------------------------
def seblock_forward(p, x_nchw):
    kh, kw = p["kernel"]
    planes = p["planes"]

    x = jnp.transpose(x_nchw, (0, 2, 3, 1)).astype(jnp.bfloat16)   # NCHW -> NHWC

    # conv1(+bn1+relu) and residual/downsample(+bn_down) share the input:
    # one launch, two separate lane-dense bf16 outputs (no channel slicing).
    out, residual = direct_conv_bn_act(
        x, p["w_cat"], p["sb_cat"], kernel=(kh, kw), stride=p["stride"],
        splits=(planes, planes), out_dtypes=(jnp.bfloat16, jnp.bfloat16))
    # dropout -> identity (inference)

    # conv2 + bn2 + relu (stride 1, same padding); bf16 output feeds the SE kernel.
    (out2,) = direct_conv_bn_act(
        out, p["w2"], p["sb2"], kernel=(kh, kw), stride=(1, 1),
        splits=(planes,), out_dtypes=(jnp.bfloat16,))

    # Fused squeeze-excite + recombination:
    # relu(sigmoid(conv_up(relu(conv_down(pool(out2)))))*out2 + residual)
    B, Ho, Wo, _ = out2.shape
    res = se_excite_combine(out2.reshape(B, Ho * Wo, planes),
                            residual.reshape(B, Ho * Wo, planes),
                            p["w_down"], p["w_up"])
    res = res.reshape(B, Ho, Wo, planes)
    return jnp.transpose(res, (0, 3, 1, 2))                        # NHWC -> NCHW


if __name__ == "__main__":
    # planes=128 keeps every Pallas output lane-dense (full 128-lane stores);
    # reduction=16 -> squeeze width 8.
    inplanes, planes = 64, 128
    B, H, W = 2, 16, 16

    x = jax.random.normal(jax.random.PRNGKey(0), (B, inplanes, H, W), jnp.float32)
    params = init_seblock(seed=1, inplanes=inplanes, planes=planes,
                          kernel=(3, 7), reduction=16, downsample=False)

    fwd = jax.jit(functools.partial(seblock_forward, params))
    out = fwd(x)
    jax.block_until_ready(out)
    assert out.shape == (B, planes, H, W), out.shape
    print("KERNEL_OK")
</pallas_src>

<mosaic_0001>
module attributes {stable_mosaic.version = 11 : i64} {
  func.func @kernel(%arg0: i32, %arg1: memref<1x18x22x64xbf16, #tpu.memory_space<vmem>>, %arg2: memref<21x64x256xbf16, #tpu.memory_space<vmem>>, %arg3: memref<8x256xf32, #tpu.memory_space<vmem>>, %arg4: memref<1x16x16x128xbf16, #tpu.memory_space<vmem>>, %arg5: memref<1x16x16x128xbf16, #tpu.memory_space<vmem>>) attributes {dimension_semantics = [#tpu.dimension_semantics<parallel>], iteration_bounds = array<i64: 2>, scalar_prefetch = 0 : i64, scratch_operands = 0 : i64, tpu.core_type = #tpu.core_type<tc>, window_params = [{transform_indices = @transform_0, window_bounds = array<i64: 1, 18, 22, 64>}, {pipeline_mode = #tpu.pipeline_mode<synchronous>, transform_indices = @transform_1, window_bounds = array<i64: 21, 64, 256>}, {pipeline_mode = #tpu.pipeline_mode<synchronous>, transform_indices = @transform_2, window_bounds = array<i64: 8, 256>}, {transform_indices = @transform_3, window_bounds = array<i64: 1, 16, 16, 128>}, {transform_indices = @transform_4, window_bounds = array<i64: 1, 16, 16, 128>}]} {
    %c0 = arith.constant 0 : index
    %c0_0 = arith.constant 0 : index
    %c0_1 = arith.constant 0 : index
    %c0_2 = arith.constant 0 : index
    %0 = vector.load %arg1[%c0, %c0_0, %c0_1, %c0_2] : memref<1x18x22x64xbf16, #tpu.memory_space<vmem>>, vector<1x18x22x64xbf16>
    %1 = vector.shape_cast %0 : vector<1x18x22x64xbf16> to vector<18x22x64xbf16>
    %2 = vector.extract_strided_slice %1 {offsets = [0, 0, 0], sizes = [16, 16, 64], strides = [1, 1, 1]} : vector<18x22x64xbf16> to vector<16x16x64xbf16>
    %3 = vector.shape_cast %2 : vector<16x16x64xbf16> to vector<256x64xbf16>
    %c0_3 = arith.constant 0 : index
    %c0_4 = arith.constant 0 : index
    %c0_5 = arith.constant 0 : index
    %4 = vector.load %arg2[%c0_3, %c0_4, %c0_5] : memref<21x64x256xbf16, #tpu.memory_space<vmem>>, vector<1x64x256xbf16>
    %5 = vector.shape_cast %4 : vector<1x64x256xbf16> to vector<64x256xbf16>
    %cst = arith.constant dense<0.000000e+00> : vector<256x256xf32>
    %6 = tpu.matmul %3, %5, %cst {dimension_numbers = #tpu.dot_dimension_numbers<[1], [0], [0], [1], [0, 0, 1, 1], [], []>} : vector<256x64xbf16>, vector<64x256xbf16>, vector<256x256xf32> -> vector<256x256xf32>
    %7 = vector.extract_strided_slice %1 {offsets = [0, 1, 0], sizes = [16, 16, 64], strides = [1, 1, 1]} : vector<18x22x64xbf16> to vector<16x16x64xbf16>
    %8 = vector.shape_cast %7 : vector<16x16x64xbf16> to vector<256x64xbf16>
    %c1 = arith.constant 1 : index
    %c0_6 = arith.constant 0 : index
    %c0_7 = arith.constant 0 : index
    %9 = vector.load %arg2[%c1, %c0_6, %c0_7] : memref<21x64x256xbf16, #tpu.memory_space<vmem>>, vector<1x64x256xbf16>
    %10 = vector.shape_cast %9 : vector<1x64x256xbf16> to vector<64x256xbf16>
    %cst_8 = arith.constant dense<0.000000e+00> : vector<256x256xf32>
    %11 = tpu.matmul %8, %10, %cst_8 {dimension_numbers = #tpu.dot_dimension_numbers<[1], [0], [0], [1], [0, 0, 1, 1], [], []>} : vector<256x64xbf16>, vector<64x256xbf16>, vector<256x256xf32> -> vector<256x256xf32>
    %12 = arith.addf %6, %11 : vector<256x256xf32>
    %13 = vector.extract_strided_slice %1 {offsets = [0, 2, 0], sizes = [16, 16, 64], strides = [1, 1, 1]} : vector<18x22x64xbf16> to vector<16x16x64xbf16>
    %14 = vector.shape_cast %13 : vector<16x16x64xbf16> to vector<256x64xbf16>
    %c2 = arith.constant 2 : index
    %c0_9 = arith.constant 0 : index
    %c0_10 = arith.constant 0 : index
    %15 = vector.load %arg2[%c2, %c0_9, %c0_10] : memref<21x64x256xbf16, #tpu.memory_space<vmem>>, vector<1x64x256xbf16>
    %16 = vector.shape_cast %15 : vector<1x64x256xbf16> to vector<64x256xbf16>
    %cst_11 = arith.constant dense<0.000000e+00> : vector<256x256xf32>
    %17 = tpu.matmul %14, %16, %cst_11 {dimension_numbers = #tpu.dot_dimension_numbers<[1], [0], [0], [1], [0, 0, 1, 1], [], []>} : vector<256x64xbf16>, vector<64x256xbf16>, vector<256x256xf32> -> vector<256x256xf32>
    %18 = arith.addf %12, %17 : vector<256x256xf32>
    %19 = vector.extract_strided_slice %1 {offsets = [0, 3, 0], sizes = [16, 16, 64], strides = [1, 1, 1]} : vector<18x22x64xbf16> to vector<16x16x64xbf16>
    %20 = vector.shape_cast %19 : vector<16x16x64xbf16> to vector<256x64xbf16>
    %c3 = arith.constant 3 : index
    %c0_12 = arith.constant 0 : index
    %c0_13 = arith.constant 0 : index
    %21 = vector.load %arg2[%c3, %c0_12, %c0_13] : memref<21x64x256xbf16, #tpu.memory_space<vmem>>, vector<1x64x256xbf16>
    %22 = vector.shape_cast %21 : vector<1x64x256xbf16> to vector<64x256xbf16>
    %cst_14 = arith.constant dense<0.000000e+00> : vector<256x256xf32>
    %23 = tpu.matmul %20, %22, %cst_14 {dimension_numbers = #tpu.dot_dimension_numbers<[1], [0], [0], [1], [0, 0, 1, 1], [], []>} : vector<256x64xbf16>, vector<64x256xbf16>, vector<256x256xf32> -> vector<256x256xf32>
    %24 = arith.addf %18, %23 : vector<256x256xf32>
    %25 = vector.extract_strided_slice %1 {offsets = [0, 4, 0], sizes = [16, 16, 64], strides = [1, 1, 1]} : vector<18x22x64xbf16> to vector<16x16x64xbf16>
    %26 = vector.shape_cast %25 : vector<16x16x64xbf16> to vector<256x64xbf16>
    %c4 = arith.constant 4 : index
    %c0_15 = arith.constant 0 : index
    %c0_16 = arith.constant 0 : index
    %27 = vector.load %arg2[%c4, %c0_15, %c0_16] : memref<21x64x256xbf16, #tpu.memory_space<vmem>>, vector<1x64x256xbf16>
    %28 = vector.shape_cast %27 : vector<1x64x256xbf16> to vector<64x256xbf16>
    %cst_17 = arith.constant dense<0.000000e+00> : vector<256x256xf32>
    %29 = tpu.matmul %26, %28, %cst_17 {dimension_numbers = #tpu.dot_dimension_numbers<[1], [0], [0], [1], [0, 0, 1, 1], [], []>} : vector<256x64xbf16>, vector<64x256xbf16>, vector<256x256xf32> -> vector<256x256xf32>
    %30 = arith.addf %24, %29 : vector<256x256xf32>
    %31 = vector.extract_strided_slice %1 {offsets = [0, 5, 0], sizes = [16, 16, 64], strides = [1, 1, 1]} : vector<18x22x64xbf16> to vector<16x16x64xbf16>
    %32 = vector.shape_cast %31 : vector<16x16x64xbf16> to vector<256x64xbf16>
    %c5 = arith.constant 5 : index
    %c0_18 = arith.constant 0 : index
    %c0_19 = arith.constant 0 : index
    %33 = vector.load %arg2[%c5, %c0_18, %c0_19] : memref<21x64x256xbf16, #tpu.memory_space<vmem>>, vector<1x64x256xbf16>
    %34 = vector.shape_cast %33 : vector<1x64x256xbf16> to vector<64x256xbf16>
    %cst_20 = arith.constant dense<0.000000e+00> : vector<256x256xf32>
    %35 = tpu.matmul %32, %34, %cst_20 {dimension_numbers = #tpu.dot_dimension_numbers<[1], [0], [0], [1], [0, 0, 1, 1], [], []>} : vector<256x64xbf16>, vector<64x256xbf16>, vector<256x256xf32> -> vector<256x256xf32>
    %36 = arith.addf %30, %35 : vector<256x256xf32>
    %37 = vector.extract_strided_slice %1 {offsets = [0, 6, 0], sizes = [16, 16, 64], strides = [1, 1, 1]} : vector<18x22x64xbf16> to vector<16x16x64xbf16>
    %38 = vector.shape_cast %37 : vector<16x16x64xbf16> to vector<256x64xbf16>
    %c6 = arith.constant 6 : index
    %c0_21 = arith.constant 0 : index
    %c0_22 = arith.constant 0 : index
    %39 = vector.load %arg2[%c6, %c0_21, %c0_22] : memref<21x64x256xbf16, #tpu.memory_space<vmem>>, vector<1x64x256xbf16>
    %40 = vector.shape_cast %39 : vector<1x64x256xbf16> to vector<64x256xbf16>
    %cst_23 = arith.constant dense<0.000000e+00> : vector<256x256xf32>
    %41 = tpu.matmul %38, %40, %cst_23 {dimension_numbers = #tpu.dot_dimension_numbers<[1], [0], [0], [1], [0, 0, 1, 1], [], []>} : vector<256x64xbf16>, vector<64x256xbf16>, vector<256x256xf32> -> vector<256x256xf32>
    %42 = arith.addf %36, %41 : vector<256x256xf32>
    %43 = vector.extract_strided_slice %1 {offsets = [1, 0, 0], sizes = [16, 16, 64], strides = [1, 1, 1]} : vector<18x22x64xbf16> to vector<16x16x64xbf16>
    %44 = vector.shape_cast %43 : vector<16x16x64xbf16> to vector<256x64xbf16>
    %c7 = arith.constant 7 : index
    %c0_24 = arith.constant 0 : index
    %c0_25 = arith.constant 0 : index
    %45 = vector.load %arg2[%c7, %c0_24, %c0_25] : memref<21x64x256xbf16, #tpu.memory_space<vmem>>, vector<1x64x256xbf16>
    %46 = vector.shape_cast %45 : vector<1x64x256xbf16> to vector<64x256xbf16>
    %cst_26 = arith.constant dense<0.000000e+00> : vector<256x256xf32>
    %47 = tpu.matmul %44, %46, %cst_26 {dimension_numbers = #tpu.dot_dimension_numbers<[1], [0], [0], [1], [0, 0, 1, 1], [], []>} : vector<256x64xbf16>, vector<64x256xbf16>, vector<256x256xf32> -> vector<256x256xf32>
    %48 = arith.addf %42, %47 : vector<256x256xf32>
    %49 = vector.extract_strided_slice %1 {offsets = [1, 1, 0], sizes = [16, 16, 64], strides = [1, 1, 1]} : vector<18x22x64xbf16> to vector<16x16x64xbf16>
    %50 = vector.shape_cast %49 : vector<16x16x64xbf16> to vector<256x64xbf16>
    %c8 = arith.constant 8 : index
    %c0_27 = arith.constant 0 : index
    %c0_28 = arith.constant 0 : index
    %51 = vector.load %arg2[%c8, %c0_27, %c0_28] : memref<21x64x256xbf16, #tpu.memory_space<vmem>>, vector<1x64x256xbf16>
    %52 = vector.shape_cast %51 : vector<1x64x256xbf16> to vector<64x256xbf16>
    %cst_29 = arith.constant dense<0.000000e+00> : vector<256x256xf32>
    %53 = tpu.matmul %50, %52, %cst_29 {dimension_numbers = #tpu.dot_dimension_numbers<[1], [0], [0], [1], [0, 0, 1, 1], [], []>} : vector<256x64xbf16>, vector<64x256xbf16>, vector<256x256xf32> -> vector<256x256xf32>
    %54 = arith.addf %48, %53 : vector<256x256xf32>
    %55 = vector.extract_strided_slice %1 {offsets = [1, 2, 0], sizes = [16, 16, 64], strides = [1, 1, 1]} : vector<18x22x64xbf16> to vector<16x16x64xbf16>
    %56 = vector.shape_cast %55 : vector<16x16x64xbf16> to vector<256x64xbf16>
    %c9 = arith.constant 9 : index
    %c0_30 = arith.constant 0 : index
    %c0_31 = arith.constant 0 : index
    %57 = vector.load %arg2[%c9, %c0_30, %c0_31] : memref<21x64x256xbf16, #tpu.memory_space<vmem>>, vector<1x64x256xbf16>
    %58 = vector.shape_cast %57 : vector<1x64x256xbf16> to vector<64x256xbf16>
    %cst_32 = arith.constant dense<0.000000e+00> : vector<256x256xf32>
    %59 = tpu.matmul %56, %58, %cst_32 {dimension_numbers = #tpu.dot_dimension_numbers<[1], [0], [0], [1], [0, 0, 1, 1], [], []>} : vector<256x64xbf16>, vector<64x256xbf16>, vector<256x256xf32> -> vector<256x256xf32>
    %60 = arith.addf %54, %59 : vector<256x256xf32>
    %61 = vector.extract_strided_slice %1 {offsets = [1, 3, 0], sizes = [16, 16, 64], strides = [1, 1, 1]} : vector<18x22x64xbf16> to vector<16x16x64xbf16>
    %62 = vector.shape_cast %61 : vector<16x16x64xbf16> to vector<256x64xbf16>
    %c10 = arith.constant 10 : index
    %c0_33 = arith.constant 0 : index
    %c0_34 = arith.constant 0 : index
    %63 = vector.load %arg2[%c10, %c0_33, %c0_34] : memref<21x64x256xbf16, #tpu.memory_space<vmem>>, vector<1x64x256xbf16>
    %64 = vector.shape_cast %63 : vector<1x64x256xbf16> to vector<64x256xbf16>
    %cst_35 = arith.constant dense<0.000000e+00> : vector<256x256xf32>
    %65 = tpu.matmul %62, %64, %cst_35 {dimension_numbers = #tpu.dot_dimension_numbers<[1], [0], [0], [1], [0, 0, 1, 1], [], []>} : vector<256x64xbf16>, vector<64x256xbf16>, vector<256x256xf32> -> vector<256x256xf32>
    %66 = arith.addf %60, %65 : vector<256x256xf32>
    %67 = vector.extract_strided_slice %1 {offsets = [1, 4, 0], sizes = [16, 16, 64], strides = [1, 1, 1]} : vector<18x22x64xbf16> to vector<16x16x64xbf16>
    %68 = vector.shape_cast %67 : vector<16x16x64xbf16> to vector<256x64xbf16>
    %c11 = arith.constant 11 : index
    %c0_36 = arith.constant 0 : index
    %c0_37 = arith.constant 0 : index
    %69 = vector.load %arg2[%c11, %c0_36, %c0_37] : memref<21x64x256xbf16, #tpu.memory_space<vmem>>, vector<1x64x256xbf16>
    %70 = vector.shape_cast %69 : vector<1x64x256xbf16> to vector<64x256xbf16>
    %cst_38 = arith.constant dense<0.000000e+00> : vector<256x256xf32>
    %71 = tpu.matmul %68, %70, %cst_38 {dimension_numbers = #tpu.dot_dimension_numbers<[1], [0], [0], [1], [0, 0, 1, 1], [], []>} : vector<256x64xbf16>, vector<64x256xbf16>, vector<256x256xf32> -> vector<256x256xf32>
    %72 = arith.addf %66, %71 : vector<256x256xf32>
    %73 = vector.extract_strided_slice %1 {offsets = [1, 5, 0], sizes = [16, 16, 64], strides = [1, 1, 1]} : vector<18x22x64xbf16> to vector<16x16x64xbf16>
    %74 = vector.shape_cast %73 : vector<16x16x64xbf16> to vector<256x64xbf16>
    %c12 = arith.constant 12 : index
    %c0_39 = arith.constant 0 : index
    %c0_40 = arith.constant 0 : index
    %75 = vector.load %arg2[%c12, %c0_39, %c0_40] : memref<21x64x256xbf16, #tpu.memory_space<vmem>>, vector<1x64x256xbf16>
    %76 = vector.shape_cast %75 : vector<1x64x256xbf16> to vector<64x256xbf16>
    %cst_41 = arith.constant dense<0.000000e+00> : vector<256x256xf32>
    %77 = tpu.matmul %74, %76, %cst_41 {dimension_numbers = #tpu.dot_dimension_numbers<[1], [0], [0], [1], [0, 0, 1, 1], [], []>} : vector<256x64xbf16>, vector<64x256xbf16>, vector<256x256xf32> -> vector<256x256xf32>
    %78 = arith.addf %72, %77 : vector<256x256xf32>
    %79 = vector.extract_strided_slice %1 {offsets = [1, 6, 0], sizes = [16, 16, 64], strides = [1, 1, 1]} : vector<18x22x64xbf16> to vector<16x16x64xbf16>
    %80 = vector.shape_cast %79 : vector<16x16x64xbf16> to vector<256x64xbf16>
    %c13 = arith.constant 13 : index
    %c0_42 = arith.constant 0 : index
    %c0_43 = arith.constant 0 : index
    %81 = vector.load %arg2[%c13, %c0_42, %c0_43] : memref<21x64x256xbf16, #tpu.memory_space<vmem>>, vector<1x64x256xbf16>
    %82 = vector.shape_cast %81 : vector<1x64x256xbf16> to vector<64x256xbf16>
    %cst_44 = arith.constant dense<0.000000e+00> : vector<256x256xf32>
    %83 = tpu.matmul %80, %82, %cst_44 {dimension_numbers = #tpu.dot_dimension_numbers<[1], [0], [0], [1], [0, 0, 1, 1], [], []>} : vector<256x64xbf16>, vector<64x256xbf16>, vector<256x256xf32> -> vector<256x256xf32>
    %84 = arith.addf %78, %83 : vector<256x256xf32>
    %85 = vector.extract_strided_slice %1 {offsets = [2, 0, 0], sizes = [16, 16, 64], strides = [1, 1, 1]} : vector<18x22x64xbf16> to vector<16x16x64xbf16>
    %86 = vector.shape_cast %85 : vector<16x16x64xbf16> to vector<256x64xbf16>
    %c14 = arith.constant 14 : index
    %c0_45 = arith.constant 0 : index
    %c0_46 = arith.constant 0 : index
    %87 = vector.load %arg2[%c14, %c0_45, %c0_46] : memref<21x64x256xbf16, #tpu.memory_space<vmem>>, vector<1x64x256xbf16>
    %88 = vector.shape_cast %87 : vector<1x64x256xbf16> to vector<64x256xbf16>
    %cst_47 = arith.constant dense<0.000000e+00> : vector<256x256xf32>
    %89 = tpu.matmul %86, %88, %cst_47 {dimension_numbers = #tpu.dot_dimension_numbers<[1], [0], [0], [1], [0, 0, 1, 1], [], []>} : vector<256x64xbf16>, vector<64x256xbf16>, vector<256x256xf32> -> vector<256x256xf32>
    %90 = arith.addf %84, %89 : vector<256x256xf32>
    %91 = vector.extract_strided_slice %1 {offsets = [2, 1, 0], sizes = [16, 16, 64], strides = [1, 1, 1]} : vector<18x22x64xbf16> to vector<16x16x64xbf16>
    %92 = vector.shape_cast %91 : vector<16x16x64xbf16> to vector<256x64xbf16>
    %c15 = arith.constant 15 : index
    %c0_48 = arith.constant 0 : index
    %c0_49 = arith.constant 0 : index
    %93 = vector.load %arg2[%c15, %c0_48, %c0_49] : memref<21x64x256xbf16, #tpu.memory_space<vmem>>, vector<1x64x256xbf16>
    %94 = vector.shape_cast %93 : vector<1x64x256xbf16> to vector<64x256xbf16>
    %cst_50 = arith.constant dense<0.000000e+00> : vector<256x256xf32>
    %95 = tpu.matmul %92, %94, %cst_50 {dimension_numbers = #tpu.dot_dimension_numbers<[1], [0], [0], [1], [0, 0, 1, 1], [], []>} : vector<256x64xbf16>, vector<64x256xbf16>, vector<256x256xf32> -> vector<256x256xf32>
    %96 = arith.addf %90, %95 : vector<256x256xf32>
    %97 = vector.extract_strided_slice %1 {offsets = [2, 2, 0], sizes = [16, 16, 64], strides = [1, 1, 1]} : vector<18x22x64xbf16> to vector<16x16x64xbf16>
    %98 = vector.shape_cast %97 : vector<16x16x64xbf16> to vector<256x64xbf16>
    %c16 = arith.constant 16 : index
    %c0_51 = arith.constant 0 : index
    %c0_52 = arith.constant 0 : index
    %99 = vector.load %arg2[%c16, %c0_51, %c0_52] : memref<21x64x256xbf16, #tpu.memory_space<vmem>>, vector<1x64x256xbf16>
    %100 = vector.shape_cast %99 : vector<1x64x256xbf16> to vector<64x256xbf16>
    %cst_53 = arith.constant dense<0.000000e+00> : vector<256x256xf32>
    %101 = tpu.matmul %98, %100, %cst_53 {dimension_numbers = #tpu.dot_dimension_numbers<[1], [0], [0], [1], [0, 0, 1, 1], [], []>} : vector<256x64xbf16>, vector<64x256xbf16>, vector<256x256xf32> -> vector<256x256xf32>
    %102 = arith.addf %96, %101 : vector<256x256xf32>
    %103 = vector.extract_strided_slice %1 {offsets = [2, 3, 0], sizes = [16, 16, 64], strides = [1, 1, 1]} : vector<18x22x64xbf16> to vector<16x16x64xbf16>
    %104 = vector.shape_cast %103 : vector<16x16x64xbf16> to vector<256x64xbf16>
    %c17 = arith.constant 17 : index
    %c0_54 = arith.constant 0 : index
    %c0_55 = arith.constant 0 : index
    %105 = vector.load %arg2[%c17, %c0_54, %c0_55] : memref<21x64x256xbf16, #tpu.memory_space<vmem>>, vector<1x64x256xbf16>
    %106 = vector.shape_cast %105 : vector<1x64x256xbf16> to vector<64x256xbf16>
    %cst_56 = arith.constant dense<0.000000e+00> : vector<256x256xf32>
    %107 = tpu.matmul %104, %106, %cst_56 {dimension_numbers = #tpu.dot_dimension_numbers<[1], [0], [0], [1], [0, 0, 1, 1], [], []>} : vector<256x64xbf16>, vector<64x256xbf16>, vector<256x256xf32> -> vector<256x256xf32>
    %108 = arith.addf %102, %107 : vector<256x256xf32>
    %109 = vector.extract_strided_slice %1 {offsets = [2, 4, 0], sizes = [16, 16, 64], strides = [1, 1, 1]} : vector<18x22x64xbf16> to vector<16x16x64xbf16>
    %110 = vector.shape_cast %109 : vector<16x16x64xbf16> to vector<256x64xbf16>
    %c18 = arith.constant 18 : index
    %c0_57 = arith.constant 0 : index
    %c0_58 = arith.constant 0 : index
    %111 = vector.load %arg2[%c18, %c0_57, %c0_58] : memref<21x64x256xbf16, #tpu.memory_space<vmem>>, vector<1x64x256xbf16>
    %112 = vector.shape_cast %111 : vector<1x64x256xbf16> to vector<64x256xbf16>
    %cst_59 = arith.constant dense<0.000000e+00> : vector<256x256xf32>
    %113 = tpu.matmul %110, %112, %cst_59 {dimension_numbers = #tpu.dot_dimension_numbers<[1], [0], [0], [1], [0, 0, 1, 1], [], []>} : vector<256x64xbf16>, vector<64x256xbf16>, vector<256x256xf32> -> vector<256x256xf32>
    %114 = arith.addf %108, %113 : vector<256x256xf32>
    %115 = vector.extract_strided_slice %1 {offsets = [2, 5, 0], sizes = [16, 16, 64], strides = [1, 1, 1]} : vector<18x22x64xbf16> to vector<16x16x64xbf16>
    %116 = vector.shape_cast %115 : vector<16x16x64xbf16> to vector<256x64xbf16>
    %c19 = arith.constant 19 : index
    %c0_60 = arith.constant 0 : index
    %c0_61 = arith.constant 0 : index
    %117 = vector.load %arg2[%c19, %c0_60, %c0_61] : memref<21x64x256xbf16, #tpu.memory_space<vmem>>, vector<1x64x256xbf16>
    %118 = vector.shape_cast %117 : vector<1x64x256xbf16> to vector<64x256xbf16>
    %cst_62 = arith.constant dense<0.000000e+00> : vector<256x256xf32>
    %119 = tpu.matmul %116, %118, %cst_62 {dimension_numbers = #tpu.dot_dimension_numbers<[1], [0], [0], [1], [0, 0, 1, 1], [], []>} : vector<256x64xbf16>, vector<64x256xbf16>, vector<256x256xf32> -> vector<256x256xf32>
    %120 = arith.addf %114, %119 : vector<256x256xf32>
    %121 = vector.extract_strided_slice %1 {offsets = [2, 6, 0], sizes = [16, 16, 64], strides = [1, 1, 1]} : vector<18x22x64xbf16> to vector<16x16x64xbf16>
    %122 = vector.shape_cast %121 : vector<16x16x64xbf16> to vector<256x64xbf16>
    %c20 = arith.constant 20 : index
    %c0_63 = arith.constant 0 : index
    %c0_64 = arith.constant 0 : index
    %123 = vector.load %arg2[%c20, %c0_63, %c0_64] : memref<21x64x256xbf16, #tpu.memory_space<vmem>>, vector<1x64x256xbf16>
    %124 = vector.shape_cast %123 : vector<1x64x256xbf16> to vector<64x256xbf16>
    %cst_65 = arith.constant dense<0.000000e+00> : vector<256x256xf32>
    %125 = tpu.matmul %122, %124, %cst_65 {dimension_numbers = #tpu.dot_dimension_numbers<[1], [0], [0], [1], [0, 0, 1, 1], [], []>} : vector<256x64xbf16>, vector<64x256xbf16>, vector<256x256xf32> -> vector<256x256xf32>
    %126 = arith.addf %120, %125 : vector<256x256xf32>
    %c0_66 = arith.constant 0 : index
    %c0_67 = arith.constant 0 : index
    %127 = vector.load %arg3[%c0_66, %c0_67] : memref<8x256xf32, #tpu.memory_space<vmem>>, vector<1x256xf32>
    %128 = vector.broadcast %127 : vector<1x256xf32> to vector<256x256xf32>
    %129 = arith.mulf %126, %128 : vector<256x256xf32>
    %c1_68 = arith.constant 1 : index
    %c0_69 = arith.constant 0 : index
    %130 = vector.load %arg3[%c1_68, %c0_69] : memref<8x256xf32, #tpu.memory_space<vmem>>, vector<1x256xf32>
    %131 = vector.broadcast %130 : vector<1x256xf32> to vector<256x256xf32>
    %132 = arith.addf %129, %131 : vector<256x256xf32>
    %c2_70 = arith.constant 2 : index
    %c0_71 = arith.constant 0 : index
    %133 = vector.load %arg3[%c2_70, %c0_71] : memref<8x256xf32, #tpu.memory_space<vmem>>, vector<1x256xf32>
    %134 = vector.broadcast %133 : vector<1x256xf32> to vector<256x256xf32>
    %135 = arith.maximumf %132, %134 : vector<256x256xf32>
    %136 = vector.extract_strided_slice %135 {offsets = [0, 0], sizes = [256, 128], strides = [1, 1]} : vector<256x256xf32> to vector<256x128xf32>
    %137 = vector.shape_cast %136 : vector<256x128xf32> to vector<16x16x128xf32>
    %138 = arith.truncf %137 : vector<16x16x128xf32> to vector<16x16x128xbf16>
    %c0_72 = arith.constant 0 : index
    %c0_73 = arith.constant 0 : index
    %c0_74 = arith.constant 0 : index
    %c0_75 = arith.constant 0 : index
    %139 = vector.load %arg4[%c0_72, %c0_73, %c0_74, %c0_75] : memref<1x16x16x128xbf16, #tpu.memory_space<vmem>>, vector<1x16x16x128xbf16>
    %140 = vector.shape_cast %139 : vector<1x16x16x128xbf16> to vector<16x16x128xbf16>
    %141 = vector.shape_cast %138 : vector<16x16x128xbf16> to vector<1x16x16x128xbf16>
    tpu.vector_store %arg4[%c0_72, %c0_73, %c0_74, %c0_75], %141 {strides = array<i32>} : memref<1x16x16x128xbf16, #tpu.memory_space<vmem>>, vector<1x16x16x128xbf16>,
    %142 = vector.extract_strided_slice %135 {offsets = [0, 128], sizes = [256, 128], strides = [1, 1]} : vector<256x256xf32> to vector<256x128xf32>
    %143 = vector.shape_cast %142 : vector<256x128xf32> to vector<16x16x128xf32>
    %144 = arith.truncf %143 : vector<16x16x128xf32> to vector<16x16x128xbf16>
    %c0_76 = arith.constant 0 : index
    %c0_77 = arith.constant 0 : index
    %c0_78 = arith.constant 0 : index
    %c0_79 = arith.constant 0 : index
    %145 = vector.load %arg5[%c0_76, %c0_77, %c0_78, %c0_79] : memref<1x16x16x128xbf16, #tpu.memory_space<vmem>>, vector<1x16x16x128xbf16>
    %146 = vector.shape_cast %145 : vector<1x16x16x128xbf16> to vector<16x16x128xbf16>
    %147 = vector.shape_cast %144 : vector<16x16x128xbf16> to vector<1x16x16x128xbf16>
    tpu.vector_store %arg5[%c0_76, %c0_77, %c0_78, %c0_79], %147 {strides = array<i32>} : memref<1x16x16x128xbf16, #tpu.memory_space<vmem>>, vector<1x16x16x128xbf16>,
    return
  }
  func.func @transform_0(%arg0: i32) -> (i32, i32, i32, i32) {
    %c0_i32 = arith.constant 0 : i32
    %c0_i32_0 = arith.constant 0 : i32
    %c0_i32_1 = arith.constant 0 : i32
    %c0_i32_2 = arith.constant 0 : i32
    return %arg0, %c0_i32, %c0_i32_0, %c0_i32_1 : i32, i32, i32, i32
  }
  func.func @transform_1(%arg0: i32) -> (i32, i32, i32) {
    %c0_i32 = arith.constant 0 : i32
    %c0_i32_0 = arith.constant 0 : i32
    %c0_i32_1 = arith.constant 0 : i32
    %c0_i32_2 = arith.constant 0 : i32
    return %c0_i32, %c0_i32_0, %c0_i32_1 : i32, i32, i32
  }
  func.func @transform_2(%arg0: i32) -> (i32, i32) {
    %c0_i32 = arith.constant 0 : i32
    %c0_i32_0 = arith.constant 0 : i32
    %c0_i32_1 = arith.constant 0 : i32
    return %c0_i32, %c0_i32_0 : i32, i32
  }
  func.func @transform_3(%arg0: i32) -> (i32, i32, i32, i32) {
    %c0_i32 = arith.constant 0 : i32
    %c0_i32_0 = arith.constant 0 : i32
    %c0_i32_1 = arith.constant 0 : i32
    %c0_i32_2 = arith.constant 0 : i32
    return %arg0, %c0_i32, %c0_i32_0, %c0_i32_1 : i32, i32, i32, i32
  }
  func.func @transform_4(%arg0: i32) -> (i32, i32, i32, i32) {
    %c0_i32 = arith.constant 0 : i32
    %c0_i32_0 = arith.constant 0 : i32
    %c0_i32_1 = arith.constant 0 : i32
    %c0_i32_2 = arith.constant 0 : i32
    return %arg0, %c0_i32, %c0_i32_0, %c0_i32_1 : i32, i32, i32, i32
  }
}

module attributes {stable_mosaic.version = 11 : i64} {
  func.func @kernel(%arg0: i32, %arg1: memref<1x18x22x128xbf16, #tpu.memory_space<vmem>>, %arg2: memref<21x128x128xbf16, #tpu.memory_space<vmem>>, %arg3: memref<8x128xf32, #tpu.memory_space<vmem>>, %arg4: memref<1x16x16x128xbf16, #tpu.memory_space<vmem>>) attributes {dimension_semantics = [#tpu.dimension_semantics<parallel>], iteration_bounds = array<i64: 2>, scalar_prefetch = 0 : i64, scratch_operands = 0 : i64, tpu.core_type = #tpu.core_type<tc>, window_params = [{transform_indices = @transform_0, window_bounds = array<i64: 1, 18, 22, 128>}, {pipeline_mode = #tpu.pipeline_mode<synchronous>, transform_indices = @transform_1, window_bounds = array<i64: 21, 128, 128>}, {pipeline_mode = #tpu.pipeline_mode<synchronous>, transform_indices = @transform_2, window_bounds = array<i64: 8, 128>}, {transform_indices = @transform_3, window_bounds = array<i64: 1, 16, 16, 128>}]} {
    %c0 = arith.constant 0 : index
    %c0_0 = arith.constant 0 : index
    %c0_1 = arith.constant 0 : index
    %c0_2 = arith.constant 0 : index
    %0 = vector.load %arg1[%c0, %c0_0, %c0_1, %c0_2] : memref<1x18x22x128xbf16, #tpu.memory_space<vmem>>, vector<1x18x22x128xbf16>
    %1 = vector.shape_cast %0 : vector<1x18x22x128xbf16> to vector<18x22x128xbf16>
    %2 = vector.extract_strided_slice %1 {offsets = [0, 0, 0], sizes = [16, 16, 128], strides = [1, 1, 1]} : vector<18x22x128xbf16> to vector<16x16x128xbf16>
    %3 = vector.shape_cast %2 : vector<16x16x128xbf16> to vector<256x128xbf16>
    %c0_3 = arith.constant 0 : index
    %c0_4 = arith.constant 0 : index
    %c0_5 = arith.constant 0 : index
    %4 = vector.load %arg2[%c0_3, %c0_4, %c0_5] : memref<21x128x128xbf16, #tpu.memory_space<vmem>>, vector<1x128x128xbf16>
    %5 = vector.shape_cast %4 : vector<1x128x128xbf16> to vector<128x128xbf16>
    %cst = arith.constant dense<0.000000e+00> : vector<256x128xf32>
    %6 = tpu.matmul %3, %5, %cst {dimension_numbers = #tpu.dot_dimension_numbers<[1], [0], [0], [1], [0, 0, 1, 1], [], []>} : vector<256x128xbf16>, vector<128x128xbf16>, vector<256x128xf32> -> vector<256x128xf32>
    %7 = vector.extract_strided_slice %1 {offsets = [0, 1, 0], sizes = [16, 16, 128], strides = [1, 1, 1]} : vector<18x22x128xbf16> to vector<16x16x128xbf16>
    %8 = vector.shape_cast %7 : vector<16x16x128xbf16> to vector<256x128xbf16>
    %c1 = arith.constant 1 : index
    %c0_6 = arith.constant 0 : index
    %c0_7 = arith.constant 0 : index
    %9 = vector.load %arg2[%c1, %c0_6, %c0_7] : memref<21x128x128xbf16, #tpu.memory_space<vmem>>, vector<1x128x128xbf16>
    %10 = vector.shape_cast %9 : vector<1x128x128xbf16> to vector<128x128xbf16>
    %cst_8 = arith.constant dense<0.000000e+00> : vector<256x128xf32>
    %11 = tpu.matmul %8, %10, %cst_8 {dimension_numbers = #tpu.dot_dimension_numbers<[1], [0], [0], [1], [0, 0, 1, 1], [], []>} : vector<256x128xbf16>, vector<128x128xbf16>, vector<256x128xf32> -> vector<256x128xf32>
    %12 = arith.addf %6, %11 : vector<256x128xf32>
    %13 = vector.extract_strided_slice %1 {offsets = [0, 2, 0], sizes = [16, 16, 128], strides = [1, 1, 1]} : vector<18x22x128xbf16> to vector<16x16x128xbf16>
    %14 = vector.shape_cast %13 : vector<16x16x128xbf16> to vector<256x128xbf16>
    %c2 = arith.constant 2 : index
    %c0_9 = arith.constant 0 : index
    %c0_10 = arith.constant 0 : index
    %15 = vector.load %arg2[%c2, %c0_9, %c0_10] : memref<21x128x128xbf16, #tpu.memory_space<vmem>>, vector<1x128x128xbf16>
    %16 = vector.shape_cast %15 : vector<1x128x128xbf16> to vector<128x128xbf16>
    %cst_11 = arith.constant dense<0.000000e+00> : vector<256x128xf32>
    %17 = tpu.matmul %14, %16, %cst_11 {dimension_numbers = #tpu.dot_dimension_numbers<[1], [0], [0], [1], [0, 0, 1, 1], [], []>} : vector<256x128xbf16>, vector<128x128xbf16>, vector<256x128xf32> -> vector<256x128xf32>
    %18 = arith.addf %12, %17 : vector<256x128xf32>
    %19 = vector.extract_strided_slice %1 {offsets = [0, 3, 0], sizes = [16, 16, 128], strides = [1, 1, 1]} : vector<18x22x128xbf16> to vector<16x16x128xbf16>
    %20 = vector.shape_cast %19 : vector<16x16x128xbf16> to vector<256x128xbf16>
    %c3 = arith.constant 3 : index
    %c0_12 = arith.constant 0 : index
    %c0_13 = arith.constant 0 : index
    %21 = vector.load %arg2[%c3, %c0_12, %c0_13] : memref<21x128x128xbf16, #tpu.memory_space<vmem>>, vector<1x128x128xbf16>
    %22 = vector.shape_cast %21 : vector<1x128x128xbf16> to vector<128x128xbf16>
    %cst_14 = arith.constant dense<0.000000e+00> : vector<256x128xf32>
    %23 = tpu.matmul %20, %22, %cst_14 {dimension_numbers = #tpu.dot_dimension_numbers<[1], [0], [0], [1], [0, 0, 1, 1], [], []>} : vector<256x128xbf16>, vector<128x128xbf16>, vector<256x128xf32> -> vector<256x128xf32>
    %24 = arith.addf %18, %23 : vector<256x128xf32>
    %25 = vector.extract_strided_slice %1 {offsets = [0, 4, 0], sizes = [16, 16, 128], strides = [1, 1, 1]} : vector<18x22x128xbf16> to vector<16x16x128xbf16>
    %26 = vector.shape_cast %25 : vector<16x16x128xbf16> to vector<256x128xbf16>
    %c4 = arith.constant 4 : index
    %c0_15 = arith.constant 0 : index
    %c0_16 = arith.constant 0 : index
    %27 = vector.load %arg2[%c4, %c0_15, %c0_16] : memref<21x128x128xbf16, #tpu.memory_space<vmem>>, vector<1x128x128xbf16>
    %28 = vector.shape_cast %27 : vector<1x128x128xbf16> to vector<128x128xbf16>
    %cst_17 = arith.constant dense<0.000000e+00> : vector<256x128xf32>
    %29 = tpu.matmul %26, %28, %cst_17 {dimension_numbers = #tpu.dot_dimension_numbers<[1], [0], [0], [1], [0, 0, 1, 1], [], []>} : vector<256x128xbf16>, vector<128x128xbf16>, vector<256x128xf32> -> vector<256x128xf32>
    %30 = arith.addf %24, %29 : vector<256x128xf32>
    %31 = vector.extract_strided_slice %1 {offsets = [0, 5, 0], sizes = [16, 16, 128], strides = [1, 1, 1]} : vector<18x22x128xbf16> to vector<16x16x128xbf16>
    %32 = vector.shape_cast %31 : vector<16x16x128xbf16> to vector<256x128xbf16>
    %c5 = arith.constant 5 : index
    %c0_18 = arith.constant 0 : index
    %c0_19 = arith.constant 0 : index
    %33 = vector.load %arg2[%c5, %c0_18, %c0_19] : memref<21x128x128xbf16, #tpu.memory_space<vmem>>, vector<1x128x128xbf16>
    %34 = vector.shape_cast %33 : vector<1x128x128xbf16> to vector<128x128xbf16>
    %cst_20 = arith.constant dense<0.000000e+00> : vector<256x128xf32>
    %35 = tpu.matmul %32, %34, %cst_20 {dimension_numbers = #tpu.dot_dimension_numbers<[1], [0], [0], [1], [0, 0, 1, 1], [], []>} : vector<256x128xbf16>, vector<128x128xbf16>, vector<256x128xf32> -> vector<256x128xf32>
    %36 = arith.addf %30, %35 : vector<256x128xf32>
    %37 = vector.extract_strided_slice %1 {offsets = [0, 6, 0], sizes = [16, 16, 128], strides = [1, 1, 1]} : vector<18x22x128xbf16> to vector<16x16x128xbf16>
    %38 = vector.shape_cast %37 : vector<16x16x128xbf16> to vector<256x128xbf16>
    %c6 = arith.constant 6 : index
    %c0_21 = arith.constant 0 : index
    %c0_22 = arith.constant 0 : index
    %39 = vector.load %arg2[%c6, %c0_21, %c0_22] : memref<21x128x128xbf16, #tpu.memory_space<vmem>>, vector<1x128x128xbf16>
    %40 = vector.shape_cast %39 : vector<1x128x128xbf16> to vector<128x128xbf16>
    %cst_23 = arith.constant dense<0.000000e+00> : vector<256x128xf32>
    %41 = tpu.matmul %38, %40, %cst_23 {dimension_numbers = #tpu.dot_dimension_numbers<[1], [0], [0], [1], [0, 0, 1, 1], [], []>} : vector<256x128xbf16>, vector<128x128xbf16>, vector<256x128xf32> -> vector<256x128xf32>
    %42 = arith.addf %36, %41 : vector<256x128xf32>
    %43 = vector.extract_strided_slice %1 {offsets = [1, 0, 0], sizes = [16, 16, 128], strides = [1, 1, 1]} : vector<18x22x128xbf16> to vector<16x16x128xbf16>
    %44 = vector.shape_cast %43 : vector<16x16x128xbf16> to vector<256x128xbf16>
    %c7 = arith.constant 7 : index
    %c0_24 = arith.constant 0 : index
    %c0_25 = arith.constant 0 : index
    %45 = vector.load %arg2[%c7, %c0_24, %c0_25] : memref<21x128x128xbf16, #tpu.memory_space<vmem>>, vector<1x128x128xbf16>
    %46 = vector.shape_cast %45 : vector<1x128x128xbf16> to vector<128x128xbf16>
    %cst_26 = arith.constant dense<0.000000e+00> : vector<256x128xf32>
    %47 = tpu.matmul %44, %46, %cst_26 {dimension_numbers = #tpu.dot_dimension_numbers<[1], [0], [0], [1], [0, 0, 1, 1], [], []>} : vector<256x128xbf16>, vector<128x128xbf16>, vector<256x128xf32> -> vector<256x128xf32>
    %48 = arith.addf %42, %47 : vector<256x128xf32>
    %49 = vector.extract_strided_slice %1 {offsets = [1, 1, 0], sizes = [16, 16, 128], strides = [1, 1, 1]} : vector<18x22x128xbf16> to vector<16x16x128xbf16>
    %50 = vector.shape_cast %49 : vector<16x16x128xbf16> to vector<256x128xbf16>
    %c8 = arith.constant 8 : index
    %c0_27 = arith.constant 0 : index
    %c0_28 = arith.constant 0 : index
    %51 = vector.load %arg2[%c8, %c0_27, %c0_28] : memref<21x128x128xbf16, #tpu.memory_space<vmem>>, vector<1x128x128xbf16>
    %52 = vector.shape_cast %51 : vector<1x128x128xbf16> to vector<128x128xbf16>
    %cst_29 = arith.constant dense<0.000000e+00> : vector<256x128xf32>
    %53 = tpu.matmul %50, %52, %cst_29 {dimension_numbers = #tpu.dot_dimension_numbers<[1], [0], [0], [1], [0, 0, 1, 1], [], []>} : vector<256x128xbf16>, vector<128x128xbf16>, vector<256x128xf32> -> vector<256x128xf32>
    %54 = arith.addf %48, %53 : vector<256x128xf32>
    %55 = vector.extract_strided_slice %1 {offsets = [1, 2, 0], sizes = [16, 16, 128], strides = [1, 1, 1]} : vector<18x22x128xbf16> to vector<16x16x128xbf16>
    %56 = vector.shape_cast %55 : vector<16x16x128xbf16> to vector<256x128xbf16>
    %c9 = arith.constant 9 : index
    %c0_30 = arith.constant 0 : index
    %c0_31 = arith.constant 0 : index
    %57 = vector.load %arg2[%c9, %c0_30, %c0_31] : memref<21x128x128xbf16, #tpu.memory_space<vmem>>, vector<1x128x128xbf16>
    %58 = vector.shape_cast %57 : vector<1x128x128xbf16> to vector<128x128xbf16>
    %cst_32 = arith.constant dense<0.000000e+00> : vector<256x128xf32>
    %59 = tpu.matmul %56, %58, %cst_32 {dimension_numbers = #tpu.dot_dimension_numbers<[1], [0], [0], [1], [0, 0, 1, 1], [], []>} : vector<256x128xbf16>, vector<128x128xbf16>, vector<256x128xf32> -> vector<256x128xf32>
    %60 = arith.addf %54, %59 : vector<256x128xf32>
    %61 = vector.extract_strided_slice %1 {offsets = [1, 3, 0], sizes = [16, 16, 128], strides = [1, 1, 1]} : vector<18x22x128xbf16> to vector<16x16x128xbf16>
    %62 = vector.shape_cast %61 : vector<16x16x128xbf16> to vector<256x128xbf16>
    %c10 = arith.constant 10 : index
    %c0_33 = arith.constant 0 : index
    %c0_34 = arith.constant 0 : index
    %63 = vector.load %arg2[%c10, %c0_33, %c0_34] : memref<21x128x128xbf16, #tpu.memory_space<vmem>>, vector<1x128x128xbf16>
    %64 = vector.shape_cast %63 : vector<1x128x128xbf16> to vector<128x128xbf16>
    %cst_35 = arith.constant dense<0.000000e+00> : vector<256x128xf32>
    %65 = tpu.matmul %62, %64, %cst_35 {dimension_numbers = #tpu.dot_dimension_numbers<[1], [0], [0], [1], [0, 0, 1, 1], [], []>} : vector<256x128xbf16>, vector<128x128xbf16>, vector<256x128xf32> -> vector<256x128xf32>
    %66 = arith.addf %60, %65 : vector<256x128xf32>
    %67 = vector.extract_strided_slice %1 {offsets = [1, 4, 0], sizes = [16, 16, 128], strides = [1, 1, 1]} : vector<18x22x128xbf16> to vector<16x16x128xbf16>
    %68 = vector.shape_cast %67 : vector<16x16x128xbf16> to vector<256x128xbf16>
    %c11 = arith.constant 11 : index
    %c0_36 = arith.constant 0 : index
    %c0_37 = arith.constant 0 : index
    %69 = vector.load %arg2[%c11, %c0_36, %c0_37] : memref<21x128x128xbf16, #tpu.memory_space<vmem>>, vector<1x128x128xbf16>
    %70 = vector.shape_cast %69 : vector<1x128x128xbf16> to vector<128x128xbf16>
    %cst_38 = arith.constant dense<0.000000e+00> : vector<256x128xf32>
    %71 = tpu.matmul %68, %70, %cst_38 {dimension_numbers = #tpu.dot_dimension_numbers<[1], [0], [0], [1], [0, 0, 1, 1], [], []>} : vector<256x128xbf16>, vector<128x128xbf16>, vector<256x128xf32> -> vector<256x128xf32>
    %72 = arith.addf %66, %71 : vector<256x128xf32>
    %73 = vector.extract_strided_slice %1 {offsets = [1, 5, 0], sizes = [16, 16, 128], strides = [1, 1, 1]} : vector<18x22x128xbf16> to vector<16x16x128xbf16>
    %74 = vector.shape_cast %73 : vector<16x16x128xbf16> to vector<256x128xbf16>
    %c12 = arith.constant 12 : index
    %c0_39 = arith.constant 0 : index
    %c0_40 = arith.constant 0 : index
    %75 = vector.load %arg2[%c12, %c0_39, %c0_40] : memref<21x128x128xbf16, #tpu.memory_space<vmem>>, vector<1x128x128xbf16>
    %76 = vector.shape_cast %75 : vector<1x128x128xbf16> to vector<128x128xbf16>
    %cst_41 = arith.constant dense<0.000000e+00> : vector<256x128xf32>
    %77 = tpu.matmul %74, %76, %cst_41 {dimension_numbers = #tpu.dot_dimension_numbers<[1], [0], [0], [1], [0, 0, 1, 1], [], []>} : vector<256x128xbf16>, vector<128x128xbf16>, vector<256x128xf32> -> vector<256x128xf32>
    %78 = arith.addf %72, %77 : vector<256x128xf32>
    %79 = vector.extract_strided_slice %1 {offsets = [1, 6, 0], sizes = [16, 16, 128], strides = [1, 1, 1]} : vector<18x22x128xbf16> to vector<16x16x128xbf16>
    %80 = vector.shape_cast %79 : vector<16x16x128xbf16> to vector<256x128xbf16>
    %c13 = arith.constant 13 : index
    %c0_42 = arith.constant 0 : index
    %c0_43 = arith.constant 0 : index
    %81 = vector.load %arg2[%c13, %c0_42, %c0_43] : memref<21x128x128xbf16, #tpu.memory_space<vmem>>, vector<1x128x128xbf16>
    %82 = vector.shape_cast %81 : vector<1x128x128xbf16> to vector<128x128xbf16>
    %cst_44 = arith.constant dense<0.000000e+00> : vector<256x128xf32>
    %83 = tpu.matmul %80, %82, %cst_44 {dimension_numbers = #tpu.dot_dimension_numbers<[1], [0], [0], [1], [0, 0, 1, 1], [], []>} : vector<256x128xbf16>, vector<128x128xbf16>, vector<256x128xf32> -> vector<256x128xf32>
    %84 = arith.addf %78, %83 : vector<256x128xf32>
    %85 = vector.extract_strided_slice %1 {offsets = [2, 0, 0], sizes = [16, 16, 128], strides = [1, 1, 1]} : vector<18x22x128xbf16> to vector<16x16x128xbf16>
    %86 = vector.shape_cast %85 : vector<16x16x128xbf16> to vector<256x128xbf16>
    %c14 = arith.constant 14 : index
    %c0_45 = arith.constant 0 : index
    %c0_46 = arith.constant 0 : index
    %87 = vector.load %arg2[%c14, %c0_45, %c0_46] : memref<21x128x128xbf16, #tpu.memory_space<vmem>>, vector<1x128x128xbf16>
    %88 = vector.shape_cast %87 : vector<1x128x128xbf16> to vector<128x128xbf16>
    %cst_47 = arith.constant dense<0.000000e+00> : vector<256x128xf32>
    %89 = tpu.matmul %86, %88, %cst_47 {dimension_numbers = #tpu.dot_dimension_numbers<[1], [0], [0], [1], [0, 0, 1, 1], [], []>} : vector<256x128xbf16>, vector<128x128xbf16>, vector<256x128xf32> -> vector<256x128xf32>
    %90 = arith.addf %84, %89 : vector<256x128xf32>
    %91 = vector.extract_strided_slice %1 {offsets = [2, 1, 0], sizes = [16, 16, 128], strides = [1, 1, 1]} : vector<18x22x128xbf16> to vector<16x16x128xbf16>
    %92 = vector.shape_cast %91 : vector<16x16x128xbf16> to vector<256x128xbf16>
    %c15 = arith.constant 15 : index
    %c0_48 = arith.constant 0 : index
    %c0_49 = arith.constant 0 : index
    %93 = vector.load %arg2[%c15, %c0_48, %c0_49] : memref<21x128x128xbf16, #tpu.memory_space<vmem>>, vector<1x128x128xbf16>
    %94 = vector.shape_cast %93 : vector<1x128x128xbf16> to vector<128x128xbf16>
    %cst_50 = arith.constant dense<0.000000e+00> : vector<256x128xf32>
    %95 = tpu.matmul %92, %94, %cst_50 {dimension_numbers = #tpu.dot_dimension_numbers<[1], [0], [0], [1], [0, 0, 1, 1], [], []>} : vector<256x128xbf16>, vector<128x128xbf16>, vector<256x128xf32> -> vector<256x128xf32>
    %96 = arith.addf %90, %95 : vector<256x128xf32>
    %97 = vector.extract_strided_slice %1 {offsets = [2, 2, 0], sizes = [16, 16, 128], strides = [1, 1, 1]} : vector<18x22x128xbf16> to vector<16x16x128xbf16>
    %98 = vector.shape_cast %97 : vector<16x16x128xbf16> to vector<256x128xbf16>
    %c16 = arith.constant 16 : index
    %c0_51 = arith.constant 0 : index
    %c0_52 = arith.constant 0 : index
    %99 = vector.load %arg2[%c16, %c0_51, %c0_52] : memref<21x128x128xbf16, #tpu.memory_space<vmem>>, vector<1x128x128xbf16>
    %100 = vector.shape_cast %99 : vector<1x128x128xbf16> to vector<128x128xbf16>
    %cst_53 = arith.constant dense<0.000000e+00> : vector<256x128xf32>
    %101 = tpu.matmul %98, %100, %cst_53 {dimension_numbers = #tpu.dot_dimension_numbers<[1], [0], [0], [1], [0, 0, 1, 1], [], []>} : vector<256x128xbf16>, vector<128x128xbf16>, vector<256x128xf32> -> vector<256x128xf32>
    %102 = arith.addf %96, %101 : vector<256x128xf32>
    %103 = vector.extract_strided_slice %1 {offsets = [2, 3, 0], sizes = [16, 16, 128], strides = [1, 1, 1]} : vector<18x22x128xbf16> to vector<16x16x128xbf16>
    %104 = vector.shape_cast %103 : vector<16x16x128xbf16> to vector<256x128xbf16>
    %c17 = arith.constant 17 : index
    %c0_54 = arith.constant 0 : index
    %c0_55 = arith.constant 0 : index
    %105 = vector.load %arg2[%c17, %c0_54, %c0_55] : memref<21x128x128xbf16, #tpu.memory_space<vmem>>, vector<1x128x128xbf16>
    %106 = vector.shape_cast %105 : vector<1x128x128xbf16> to vector<128x128xbf16>
    %cst_56 = arith.constant dense<0.000000e+00> : vector<256x128xf32>
    %107 = tpu.matmul %104, %106, %cst_56 {dimension_numbers = #tpu.dot_dimension_numbers<[1], [0], [0], [1], [0, 0, 1, 1], [], []>} : vector<256x128xbf16>, vector<128x128xbf16>, vector<256x128xf32> -> vector<256x128xf32>
    %108 = arith.addf %102, %107 : vector<256x128xf32>
    %109 = vector.extract_strided_slice %1 {offsets = [2, 4, 0], sizes = [16, 16, 128], strides = [1, 1, 1]} : vector<18x22x128xbf16> to vector<16x16x128xbf16>
    %110 = vector.shape_cast %109 : vector<16x16x128xbf16> to vector<256x128xbf16>
    %c18 = arith.constant 18 : index
    %c0_57 = arith.constant 0 : index
    %c0_58 = arith.constant 0 : index
    %111 = vector.load %arg2[%c18, %c0_57, %c0_58] : memref<21x128x128xbf16, #tpu.memory_space<vmem>>, vector<1x128x128xbf16>
    %112 = vector.shape_cast %111 : vector<1x128x128xbf16> to vector<128x128xbf16>
    %cst_59 = arith.constant dense<0.000000e+00> : vector<256x128xf32>
    %113 = tpu.matmul %110, %112, %cst_59 {dimension_numbers = #tpu.dot_dimension_numbers<[1], [0], [0], [1], [0, 0, 1, 1], [], []>} : vector<256x128xbf16>, vector<128x128xbf16>, vector<256x128xf32> -> vector<256x128xf32>
    %114 = arith.addf %108, %113 : vector<256x128xf32>
    %115 = vector.extract_strided_slice %1 {offsets = [2, 5, 0], sizes = [16, 16, 128], strides = [1, 1, 1]} : vector<18x22x128xbf16> to vector<16x16x128xbf16>
    %116 = vector.shape_cast %115 : vector<16x16x128xbf16> to vector<256x128xbf16>
    %c19 = arith.constant 19 : index
    %c0_60 = arith.constant 0 : index
    %c0_61 = arith.constant 0 : index
    %117 = vector.load %arg2[%c19, %c0_60, %c0_61] : memref<21x128x128xbf16, #tpu.memory_space<vmem>>, vector<1x128x128xbf16>
    %118 = vector.shape_cast %117 : vector<1x128x128xbf16> to vector<128x128xbf16>
    %cst_62 = arith.constant dense<0.000000e+00> : vector<256x128xf32>
    %119 = tpu.matmul %116, %118, %cst_62 {dimension_numbers = #tpu.dot_dimension_numbers<[1], [0], [0], [1], [0, 0, 1, 1], [], []>} : vector<256x128xbf16>, vector<128x128xbf16>, vector<256x128xf32> -> vector<256x128xf32>
    %120 = arith.addf %114, %119 : vector<256x128xf32>
    %121 = vector.extract_strided_slice %1 {offsets = [2, 6, 0], sizes = [16, 16, 128], strides = [1, 1, 1]} : vector<18x22x128xbf16> to vector<16x16x128xbf16>
    %122 = vector.shape_cast %121 : vector<16x16x128xbf16> to vector<256x128xbf16>
    %c20 = arith.constant 20 : index
    %c0_63 = arith.constant 0 : index
    %c0_64 = arith.constant 0 : index
    %123 = vector.load %arg2[%c20, %c0_63, %c0_64] : memref<21x128x128xbf16, #tpu.memory_space<vmem>>, vector<1x128x128xbf16>
    %124 = vector.shape_cast %123 : vector<1x128x128xbf16> to vector<128x128xbf16>
    %cst_65 = arith.constant dense<0.000000e+00> : vector<256x128xf32>
    %125 = tpu.matmul %122, %124, %cst_65 {dimension_numbers = #tpu.dot_dimension_numbers<[1], [0], [0], [1], [0, 0, 1, 1], [], []>} : vector<256x128xbf16>, vector<128x128xbf16>, vector<256x128xf32> -> vector<256x128xf32>
    %126 = arith.addf %120, %125 : vector<256x128xf32>
    %c0_66 = arith.constant 0 : index
    %c0_67 = arith.constant 0 : index
    %127 = vector.load %arg3[%c0_66, %c0_67] : memref<8x128xf32, #tpu.memory_space<vmem>>, vector<1x128xf32>
    %128 = vector.broadcast %127 : vector<1x128xf32> to vector<256x128xf32>
    %129 = arith.mulf %126, %128 : vector<256x128xf32>
    %c1_68 = arith.constant 1 : index
    %c0_69 = arith.constant 0 : index
    %130 = vector.load %arg3[%c1_68, %c0_69] : memref<8x128xf32, #tpu.memory_space<vmem>>, vector<1x128xf32>
    %131 = vector.broadcast %130 : vector<1x128xf32> to vector<256x128xf32>
    %132 = arith.addf %129, %131 : vector<256x128xf32>
    %c2_70 = arith.constant 2 : index
    %c0_71 = arith.constant 0 : index
    %133 = vector.load %arg3[%c2_70, %c0_71] : memref<8x128xf32, #tpu.memory_space<vmem>>, vector<1x128xf32>
    %134 = vector.broadcast %133 : vector<1x128xf32> to vector<256x128xf32>
    %135 = arith.maximumf %132, %134 : vector<256x128xf32>
    %136 = vector.shape_cast %135 : vector<256x128xf32> to vector<16x16x128xf32>
    %137 = arith.truncf %136 : vector<16x16x128xf32> to vector<16x16x128xbf16>
    %c0_72 = arith.constant 0 : index
    %c0_73 = arith.constant 0 : index
    %c0_74 = arith.constant 0 : index
    %c0_75 = arith.constant 0 : index
    %138 = vector.load %arg4[%c0_72, %c0_73, %c0_74, %c0_75] : memref<1x16x16x128xbf16, #tpu.memory_space<vmem>>, vector<1x16x16x128xbf16>
    %139 = vector.shape_cast %138 : vector<1x16x16x128xbf16> to vector<16x16x128xbf16>
    %140 = vector.shape_cast %137 : vector<16x16x128xbf16> to vector<1x16x16x128xbf16>
    tpu.vector_store %arg4[%c0_72, %c0_73, %c0_74, %c0_75], %140 {strides = array<i32>} : memref<1x16x16x128xbf16, #tpu.memory_space<vmem>>, vector<1x16x16x128xbf16>,
    return
  }
  func.func @transform_0(%arg0: i32) -> (i32, i32, i32, i32) {
    %c0_i32 = arith.constant 0 : i32
    %c0_i32_0 = arith.constant 0 : i32
    %c0_i32_1 = arith.constant 0 : i32
    %c0_i32_2 = arith.constant 0 : i32
    return %arg0, %c0_i32, %c0_i32_0, %c0_i32_1 : i32, i32, i32, i32
  }
  func.func @transform_1(%arg0: i32) -> (i32, i32, i32) {
    %c0_i32 = arith.constant 0 : i32
    %c0_i32_0 = arith.constant 0 : i32
    %c0_i32_1 = arith.constant 0 : i32
    %c0_i32_2 = arith.constant 0 : i32
    return %c0_i32, %c0_i32_0, %c0_i32_1 : i32, i32, i32
  }
  func.func @transform_2(%arg0: i32) -> (i32, i32) {
    %c0_i32 = arith.constant 0 : i32
    %c0_i32_0 = arith.constant 0 : i32
    %c0_i32_1 = arith.constant 0 : i32
    return %c0_i32, %c0_i32_0 : i32, i32
  }
  func.func @transform_3(%arg0: i32) -> (i32, i32, i32, i32) {
    %c0_i32 = arith.constant 0 : i32
    %c0_i32_0 = arith.constant 0 : i32
    %c0_i32_1 = arith.constant 0 : i32
    %c0_i32_2 = arith.constant 0 : i32
    return %arg0, %c0_i32, %c0_i32_0, %c0_i32_1 : i32, i32, i32, i32
  }
}

module attributes {stable_mosaic.version = 11 : i64} {
  func.func @_se_excite_combine_kernel(%arg0: i32, %arg1: memref<1x256x128xbf16, #tpu.memory_space<vmem>>, %arg2: memref<1x256x128xbf16, #tpu.memory_space<vmem>>, %arg3: memref<128x8xbf16, #tpu.memory_space<vmem>>, %arg4: memref<8x128xbf16, #tpu.memory_space<vmem>>, %arg5: memref<1x256x128xf32, #tpu.memory_space<vmem>>) attributes {dimension_semantics = [#tpu.dimension_semantics<parallel>], iteration_bounds = array<i64: 2>, scalar_prefetch = 0 : i64, scratch_operands = 0 : i64, tpu.core_type = #tpu.core_type<tc>, window_params = [{transform_indices = @transform_0, window_bounds = array<i64: 1, 256, 128>}, {transform_indices = @transform_1, window_bounds = array<i64: 1, 256, 128>}, {pipeline_mode = #tpu.pipeline_mode<synchronous>, transform_indices = @transform_2, window_bounds = array<i64: 128, 8>}, {pipeline_mode = #tpu.pipeline_mode<synchronous>, transform_indices = @transform_3, window_bounds = array<i64: 8, 128>}, {transform_indices = @transform_4, window_bounds = array<i64: 1, 256, 128>}]} {
    %c0 = arith.constant 0 : index
    %c0_0 = arith.constant 0 : index
    %c0_1 = arith.constant 0 : index
    %0 = vector.load %arg1[%c0, %c0_0, %c0_1] : memref<1x256x128xbf16, #tpu.memory_space<vmem>>, vector<1x256x128xbf16>
    %1 = vector.shape_cast %0 : vector<1x256x128xbf16> to vector<256x128xbf16>
    %2 = arith.extf %1 : vector<256x128xbf16> to vector<256x128xf32>
    %cst = arith.constant dense<0.000000e+00> : vector<128xf32>
    %3 = vector.multi_reduction <add>, %2, %cst [0] : vector<256x128xf32> to vector<128xf32>
    %4 = vector.shape_cast %3 : vector<128xf32> to vector<1x128xf32>
    %cst_2 = arith.constant 2.560000e+02 : f32
    %5 = vector.broadcast %cst_2 : f32 to vector<1x128xf32>
    %6 = arith.divf %4, %5 : vector<1x128xf32>
    %7 = arith.truncf %6 : vector<1x128xf32> to vector<1x128xbf16>
    %c0_3 = arith.constant 0 : index
    %c0_4 = arith.constant 0 : index
    %8 = vector.load %arg3[%c0_3, %c0_4] : memref<128x8xbf16, #tpu.memory_space<vmem>>, vector<128x8xbf16>
    %cst_5 = arith.constant dense<0.000000e+00> : vector<1x8xf32>
    %9 = tpu.matmul %7, %8, %cst_5 {dimension_numbers = #tpu.dot_dimension_numbers<[1], [0], [0], [1], [0, 0, 1, 1], [], []>} : vector<1x128xbf16>, vector<128x8xbf16>, vector<1x8xf32> -> vector<1x8xf32>
    %cst_6 = arith.constant 0.000000e+00 : f32
    %10 = vector.broadcast %cst_6 : f32 to vector<1x8xf32>
    %11 = arith.maximumf %9, %10 : vector<1x8xf32>
    %12 = arith.truncf %11 : vector<1x8xf32> to vector<1x8xbf16>
    %c0_7 = arith.constant 0 : index
    %c0_8 = arith.constant 0 : index
    %13 = vector.load %arg4[%c0_7, %c0_8] : memref<8x128xbf16, #tpu.memory_space<vmem>>, vector<8x128xbf16>
    %cst_9 = arith.constant dense<0.000000e+00> : vector<1x128xf32>
    %14 = tpu.matmul %12, %13, %cst_9 {dimension_numbers = #tpu.dot_dimension_numbers<[1], [0], [0], [1], [0, 0, 1, 1], [], []>} : vector<1x8xbf16>, vector<8x128xbf16>, vector<1x128xf32> -> vector<1x128xf32>
    %15 = arith.negf %14 : vector<1x128xf32>
    %16 = math.exp %15 : vector<1x128xf32>
    %cst_10 = arith.constant 1.000000e+00 : f32
    %17 = vector.broadcast %cst_10 : f32 to vector<1x128xf32>
    %18 = arith.addf %17, %16 : vector<1x128xf32>
    %19 = arith.divf %17, %18 : vector<1x128xf32>
    %c0_11 = arith.constant 0 : index
    %c0_12 = arith.constant 0 : index
    %c0_13 = arith.constant 0 : index
    %20 = vector.load %arg2[%c0_11, %c0_12, %c0_13] : memref<1x256x128xbf16, #tpu.memory_space<vmem>>, vector<1x256x128xbf16>
    %21 = vector.shape_cast %20 : vector<1x256x128xbf16> to vector<256x128xbf16>
    %22 = arith.extf %21 : vector<256x128xbf16> to vector<256x128xf32>
    %23 = vector.broadcast %19 : vector<1x128xf32> to vector<256x128xf32>
    %24 = arith.mulf %23, %2 : vector<256x128xf32>
    %25 = arith.addf %24, %22 : vector<256x128xf32>
    %cst_14 = arith.constant 0.000000e+00 : f32
    %26 = vector.broadcast %cst_14 : f32 to vector<256x128xf32>
    %27 = arith.maximumf %25, %26 : vector<256x128xf32>
    %c0_15 = arith.constant 0 : index
    %c0_16 = arith.constant 0 : index
    %c0_17 = arith.constant 0 : index
    %28 = vector.load %arg5[%c0_15, %c0_16, %c0_17] : memref<1x256x128xf32, #tpu.memory_space<vmem>>, vector<1x256x128xf32>
    %29 = vector.shape_cast %28 : vector<1x256x128xf32> to vector<256x128xf32>
    %30 = vector.shape_cast %27 : vector<256x128xf32> to vector<1x256x128xf32>
    tpu.vector_store %arg5[%c0_15, %c0_16, %c0_17], %30 {strides = array<i32>} : memref<1x256x128xf32, #tpu.memory_space<vmem>>, vector<1x256x128xf32>,
    return
  }
  func.func @transform_0(%arg0: i32) -> (i32, i32, i32) {
    %c0_i32 = arith.constant 0 : i32
    %c0_i32_0 = arith.constant 0 : i32
    %c0_i32_1 = arith.constant 0 : i32
    return %arg0, %c0_i32, %c0_i32_0 : i32, i32, i32
  }
  func.func @transform_1(%arg0: i32) -> (i32, i32, i32) {
    %c0_i32 = arith.constant 0 : i32
    %c0_i32_0 = arith.constant 0 : i32
    %c0_i32_1 = arith.constant 0 : i32
    return %arg0, %c0_i32, %c0_i32_0 : i32, i32, i32
  }
  func.func @transform_2(%arg0: i32) -> (i32, i32) {
    %c0_i32 = arith.constant 0 : i32
    %c0_i32_0 = arith.constant 0 : i32
    %c0_i32_1 = arith.constant 0 : i32
    return %c0_i32, %c0_i32_0 : i32, i32
  }
  func.func @transform_3(%arg0: i32) -> (i32, i32) {
    %c0_i32 = arith.constant 0 : i32
    %c0_i32_0 = arith.constant 0 : i32
    %c0_i32_1 = arith.constant 0 : i32
    return %c0_i32, %c0_i32_0 : i32, i32
  }
  func.func @transform_4(%arg0: i32) -> (i32, i32, i32) {
    %c0_i32 = arith.constant 0 : i32
    %c0_i32_0 = arith.constant 0 : i32
    %c0_i32_1 = arith.constant 0 : i32
    return %arg0, %c0_i32, %c0_i32_0 : i32, i32, i32
  }
}

</mosaic_0001>

<bundles_post_ra>
// kernel: seblock_forward.5
= control target key start
LH: loop header
LB: loop body
LE: loop exit
PB: predicated region body
PF: predicated region fallthrough
CT: control target
= control target key end

     0   :  { %9 = vsyncpa [#allocation3], 0  ;;  %s1720_s0 = inlined_call_operand.vmem [shape: bf16[2,256,128], index: 0, kind: input, shape index: {}]   ;;  %s1721_s1 = inlined_call_operand.vmem [shape: bf16[2,256,128], index: 1, kind: input, shape index: {}]   ;;  %s1722_s2 = inlined_call_operand.vmem [shape: bf16[128,8], index: 2, kind: input, shape index: {}]   ;;  %s1723_s3 = inlined_call_operand.vmem [shape: bf16[8,128], index: 3, kind: input, shape index: {}]   ;;  %s1724_s4 = inlined_call_operand.hbm [shape: f32[2,256,128], index: 4, kind: output, shape index: {}]  }
   0x1   :  { %11 = vsyncpa [#allocation3 + $0x1], 0  ;;  %s1137_s15 = smov 0   ;;  %s1139_s16 = smov 0  }
   0x2   :  { %s1141_s17 = smov 0   ;;  %s1143_s18 = smov 0  }
   0x3 LB: > { %s1158_s19 = sadd.s32 4294967295, %s1105_s18   ;;  %s766_s20 = sadd.s32 4294967294, %s1105_s18   ;;  %s1105_s18 = sphi %s1143_s18, %s1785_s18   ;;  %s1101_s17 = sphi %s1141_s17, %s1784_s17   ;;  %s1097_s16 = sphi %s1139_s16, %s1783_s16   ;;  %s1093_s15 = sphi %s1137_s15, %s1782_s15  }
   0x4   : > { %s1162_s21 = sadd.s32 1, %s1105_s18   ;;  %s118_s22 = sadd.s32 1, %s1101_s17 }
   0x5   : > { %s115_s23 = ssub.s32 %s1105_s18, %s1162_s21  ;;  %p128_p0 = scmp.ne.s32.totalorder %s1101_s17, %s1097_s16 }
   0x6   : > { %p116_p1 = scmp.eq.s32.totalorder %s115_s23, 0  ;;  %p129_p2 = scmp.eq.s32.totalorder %s1158_s19, 1 }
   0x7   : > { %p134_p3 = scmp.ne.s32.totalorder %s1097_s16, %s1093_s15  ;;  %p135_p4 = scmp.eq.s32.totalorder %s766_s20, 1 }
   0x8   : > { %s1173_s24 = scalar_select %p116_p1, %s1101_s17, %s118_s22  }
   0x9   : > { %p1175_p5 = por %p129_p2, %p128_p0  ;;  %p1179_p6 = por %p135_p4, %p134_p3 }
   0xa   : > { %p769_p7 = scmp.ge.s32.totalorder %s1105_s18, 1  ;;  %p175_p8 = scmp.lt.s32.totalorder %s1105_s18, 3 }
   0xc   : > { %p176_p9 = pnand %p769_p7, %p175_p8 }
   0xd   : > { %v1031_v0 = vld [vmem:[%s1722_s2] sm:$0xff] (!%p176_p9)   ;;  %v1107_v1 = vmov (!%p176_p9), 0.0   ;;  %v1032_v2 = vld [vmem:[%s1722_s2 + $0x8] sm:$0xff] (!%p176_p9)   ;;  %vm1108_vm0 = vmmov (!%p176_p9), 0   ;;  %p206_p10 = scmp.lt.s32.totalorder (!%p176_p9), %s1158_s19, 1  ;;  %v1033_v3 = vld [vmem:[%s1722_s2 + $0x10] sm:$0xff] (!%p176_p9)  }
   0xe   : > { %179 = sbr.rel (%p176_p9) target bundleno = 619 (0x26b), region = 36  ;;  %962 = vmatprep.subr.bf16.mxu0 (!%p176_p9), %v1107_v1  ;;  %982 = vmatprep.subr.bf16.mxu1 (!%p176_p9), %v1107_v1  ;;  %v1034_v4 = vld [vmem:[%s1722_s2 + $0x18] sm:$0xff] (!%p176_p9)   ;;  %v1035_v6 = vld [vmem:[%s1722_s2 + $0x20] sm:$0xff] (!%p176_p9)   ;;  %v1036_v10 = vld [vmem:[%s1722_s2 + $0x28] sm:$0xff] (!%p176_p9)   ;;  %vm432_vm1 = vcmask (!%p176_p9), 1043456   ;;  %vm428_vm2 = vcmask (!%p176_p9), 64512  }
   0xf   : > { %963 = vmatpush3.bf16.msra.mxu0 (!%p176_p9), %v1031_v0  ;;  %978 = vmatprep.mubr.msk.bf16.mxu0 (!%p176_p9), %vm1108_vm0, %v1107_v1  ;;  %v1037_v15 = vld [vmem:[%s1722_s2 + $0x30] sm:$0xff] (!%p176_p9)   ;;  %v1038_v21 = vld [vmem:[%s1722_s2 + $0x38] sm:$0xff] (!%p176_p9)   ;;  %s1109_s28 = smov (!%p176_p9), [#allocation2]  }
  0x10   : > { %964 = vmatprep.subr.bf16.mxu0 (!%p176_p9), %v1107_v1  ;;  %984 = vmatprep.mubr.msk.bf16.mxu1 (!%p176_p9), %vm1108_vm0, %v1107_v1  ;;  %s1047_s29 = sshll.u32 (!%p176_p9), %s1109_s28, 4  ;;  %s1048_s29 = int_to_ptr.vmem [resolvable:$false] %s1047_s29 }
  0x11   : > { %s1049_s30 = scalar_lea.vmem (!%p176_p9), %s1048_s29, 8192 }
  0x13   : > { %965 = vmatpush3.bf16.msra.mxu0 (!%p176_p9), %v1032_v2 }
  0x14   : > { %966 = vmatprep.subr.bf16.mxu0 (!%p176_p9), %v1107_v1 }
  0x15   : > { %s1196_s7 = scalar_select %p206_p10, %s1158_s19, 1 }
  0x17   : > { %s790_s8 = sshll.u32 %s1196_s7, 7  ;;  %967 = vmatpush3.bf16.msra.mxu0 %v1033_v3  ;;  %s203_s7 = sand.u32 1, %s1097_s16  }
  0x18   : > { %s1207_s13 = scalar_lea.vmem %s1720_s0, %s790_s8  ;;  %968 = vmatprep.subr.bf16.mxu0 %v1107_v1  ;;  %s1373_s11 = scalar_lea.vmem %s1721_s1, %s790_s8 }
  0x19   : > { %v1210_v5 = vld [vmem:[%s1207_s13] sm:$0xff]   ;;  %v1216_v7 = vld [vmem:[%s1207_s13 + $0x8] sm:$0xff]   ;;  %v1225_v12 = vld [vmem:[%s1207_s13 + $0x10] sm:$0xff]   ;;  %s770_s8 = sshll.u32 %s203_s7, 8  ;;  %s1679_s23 = scalar_lea.sflag [#allocation3], %s203_s7 }
  0x1a   : > { %v795_v8 = vunpack.c.l.bf16 %v1210_v5  ;;  %v796_v9 = vunpack.c.h.bf16 %v1210_v5  ;;  %v799_v11 = vunpack.c.l.bf16 %v1216_v7  ;;  %v800_v13 = vunpack.c.h.bf16 %v1216_v7  ;;  %v1239_v18 = vld [vmem:[%s1207_s13 + $0x18] sm:$0xff]   ;;  %v1251_v24 = vld [vmem:[%s1207_s13 + $0x20] sm:$0xff]   ;;  %v1260_v29 = vld [vmem:[%s1207_s13 + $0x28] sm:$0xff]   ;;  %s1618_s12 = scalar_lea.vmem [#allocation2], %s770_s8 }
  0x1b   : > { %969 = vmatpush3.bf16.msra.mxu0 %v1034_v4  ;;  %v803_v16 = vunpack.c.l.bf16 %v1225_v12  ;;  %v804_v19 = vunpack.c.h.bf16 %v1225_v12  ;;  %v807_v22 = vunpack.c.l.bf16 %v1239_v18  ;;  %v808_v25 = vunpack.c.h.bf16 %v1239_v18  ;;  %v1269_v34 = vld [vmem:[%s1207_s13 + $0x30] sm:$0xff]   ;;  %v1278_v39 = vld [vmem:[%s1207_s13 + $0x38] sm:$0xff]   ;;  %v1287_v44 = vld [vmem:[%s1207_s13 + $0x40] sm:$0xff]   ;;  %s692_s14 = sshll.u32 %s1618_s12, 4  ;;  %s1659_s14 = int_to_ptr.vmem [resolvable:$true] %s692_s14 }
  0x1c   : > { %970 = vmatprep.subr.bf16.mxu0 %v1107_v1  ;;  %v281_v14 = vadd.f32 %v796_v9, %v795_v8  ;;  %v811_v27 = vunpack.c.l.bf16 %v1251_v24  ;;  %v812_v30 = vunpack.c.h.bf16 %v1251_v24  ;;  %v815_v32 = vunpack.c.l.bf16 %v1260_v29  ;;  %v1296_v49 = vld [vmem:[%s1207_s13 + $0x48] sm:$0xff]   ;;  %v1305_v54 = vld [vmem:[%s1207_s13 + $0x50] sm:$0xff]   ;;  %v1314_v59 = vld [vmem:[%s1207_s13 + $0x58] sm:$0xff]   ;;  %s1043_s27 = scalar_lea.vmem %s1659_s14, 4096  ;;  %p1050_p0 = scmp.lt.s32.totalorder %s1659_s14, %s1048_s29 }
  0x1d   : > { %v816_v35 = vunpack.c.h.bf16 %v1260_v29  ;;  %v819_v37 = vunpack.c.l.bf16 %v1269_v34  ;;  %v820_v40 = vunpack.c.h.bf16 %v1269_v34  ;;  %v823_v42 = vunpack.c.l.bf16 %v1278_v39  ;;  %v1323_v0 = vld [vmem:[%s1207_s13 + $0x60] sm:$0xff]   ;;  %p1044_p11 = scmp.ne.s32.totalorder %s1659_s14, %s1043_s27  ;;  %p1051_p1 = scmp.lt.s32.totalorder %s1049_s30, %s1043_s27 }
  0x1e   : > { %v282_v17 = vadd.f32 %v799_v11, %v281_v14  ;;  %v824_v45 = vunpack.c.h.bf16 %v1278_v39  ;;  %v827_v47 = vunpack.c.l.bf16 %v1287_v44  ;;  %v828_v50 = vunpack.c.h.bf16 %v1287_v44 }
  0x1f   : > { %971 = vmatpush3.bf16.msra.mxu0 %v1035_v6  ;;  %v831_v52 = vunpack.c.l.bf16 %v1296_v49  ;;  %v1737_v55 = vunpack.c.h.bf16 %v1296_v49  ;;  %v1736_v57 = vunpack.c.l.bf16 %v1305_v54  ;;  %v1735_v60 = vunpack.c.h.bf16 %v1305_v54  ;;  %v1332_v6 = vld [vmem:[%s1207_s13 + $0x68] sm:$0xff]   ;;  %p1045_p12 = pnand %p1044_p11, %p1175_p5  ;;  %p1052_p2 = por %p1051_p1, %p1050_p0 }
  0x20   : > { %972 = vmatprep.subr.bf16.mxu0 %v1107_v1  ;;  %v283_v20 = vadd.f32 %v800_v13, %v282_v17  ;;  %v1734_v62 = vunpack.c.l.bf16 %v1314_v59  ;;  %v1732_v3 = vunpack.c.l.bf16 %v1323_v0  ;;  %v1741_v29 = vunpack.c.l.bf16 %v1305_v54 }
  0x21   : > { %v1744_v39 = vunpack.c.h.bf16 %v1314_v59  ;;  %p1046_p13 = pneg %p1045_p12 }
  0x22   : > { %v284_v23 = vadd.f32 %v803_v16, %v283_v20  ;;  %v1341_v20 = vld [vmem:[%s1207_s13 + $0x70] sm:$0xff]  }
  0x23   : > { %973 = vmatpush3.bf16.msra.mxu0 %v1036_v10  ;;  %v1731_v10 = vunpack.c.h.bf16 %v1323_v0  ;;  %p1053_p3 = pnand %p1052_p2, %p1046_p13 }
  0x24   : > { %974 = vmatprep.subr.bf16.mxu0 %v1107_v1  ;;  %v285_v26 = vadd.f32 %v804_v19, %v284_v23 }
  0x26   : > { %v286_v28 = vadd.f32 %v807_v22, %v285_v26  ;;  %v1728_v26 = vunpack.c.l.bf16 %v1341_v20 }
  0x27   : > { %975 = vmatpush3.bf16.msra.mxu0 %v1037_v15  ;;  %v1730_v15 = vunpack.c.l.bf16 %v1332_v6 }
  0x28   : > { %976 = vmatprep.subr.bf16.mxu0 %v1107_v1  ;;  %v287_v31 = vadd.f32 %v808_v25, %v286_v28  ;;  %v1733_v1 = vunpack.c.h.bf16 %v1314_v59 }
  0x2a   : > { %v288_v33 = vadd.f32 %v811_v27, %v287_v31  ;;  %v1350_v31 = vld [vmem:[%s1207_s13 + $0x78] sm:$0xff]   ;;  %s792_s13 = sshll.u32 %s1158_s19, 12 }
  0x2b   : > { %977 = vmatpush3.bf16.msra.mxu0 %v1038_v21  ;;  %v1729_v21 = vunpack.c.h.bf16 %v1332_v6  ;;  %s1657_s22 = scalar_lea.hbm %s1724_s4, %s792_s13 }
  0x2c   : > { %v289_v36 = vadd.f32 %v812_v30, %v288_v33  ;;  %v1727_v33 = vunpack.c.h.bf16 %v1341_v20 }
  0x2e   : > { %v290_v38 = vadd.f32 %v815_v32, %v289_v36 }
  0x30   : > { %v291_v41 = vadd.f32 %v816_v35, %v290_v38  ;;  %v1726_v38 = vunpack.c.l.bf16 %v1350_v31 }
  0x32   : > { %v292_v43 = vadd.f32 %v819_v37, %v291_v41 }
  0x34   : > { %v293_v46 = vadd.f32 %v820_v40, %v292_v43  ;;  %v1725_v43 = vunpack.c.h.bf16 %v1350_v31 }
  0x36   : > { %v294_v48 = vadd.f32 %v823_v42, %v293_v46 }
  0x38   : > { %v295_v51 = vadd.f32 %v824_v45, %v294_v48 }
  0x3a   : > { %v296_v53 = vadd.f32 %v827_v47, %v295_v51 }
  0x3c   : > { %v297_v56 = vadd.f32 %v828_v50, %v296_v53 }
  0x3e   : > { %v298_v58 = vadd.f32 %v831_v52, %v297_v56 }
  0x40   : > { %v299_v61 = vadd.f32 %v1737_v55, %v298_v58 }
  0x42   : > { %v300_v63 = vadd.f32 %v1736_v57, %v299_v61 }
  0x44   : > { %v301_v2 = vadd.f32 %v1735_v60, %v300_v63 }
  0x46   : > { %v302_v4 = vadd.f32 %v1734_v62, %v301_v2 }
  0x48   : > { %v303_v14 = vadd.f32 %v1733_v1, %v302_v4  ;;  %v1439_v1 = vld [vmem:[%s1373_s11 + $0x70] sm:$0xff]  }
  0x4a   : > { %v304_v17 = vadd.f32 %v1732_v3, %v303_v14 }
  0x4c   : > { %v305_v23 = vadd.f32 %v1731_v10, %v304_v17  ;;  %v427_v17 = vld [vmem:[%s1723_s3] sm:$0xf]  ;;  %v1432_v10 = vld [vmem:[%s1373_s11 + $0x68] sm:$0xff]  }
  0x4e   : > { %v306_v28 = vadd.f32 %v1730_v15, %v305_v23  ;;  %v434_v23 = vsel %vm432_vm1, %v427_v17, 0  ;;  %v1376_v17 = vld [vmem:[%s1373_s11] sm:$0xff]  }
  0x4f   : > { %983 = vmatpush3.bf16.msra.mxu1 %v434_v23  ;;  %v1379_v23 = vld [vmem:[%s1373_s11 + $0x8] sm:$0xff]  }
  0x50   : > { %v307_v36 = vadd.f32 %v1729_v21, %v306_v28 }
  0x52   : > { %v308_v41 = vadd.f32 %v1728_v26, %v307_v36  ;;  %v1425_v26 = vld [vmem:[%s1373_s11 + $0x60] sm:$0xff]  }
  0x54   : > { %v309_v46 = vadd.f32 %v1727_v33, %v308_v41  ;;  %v912_v33 = vunpack.c.h.bf16 %v1432_v10 }
  0x56   : > { %v310_v48 = vadd.f32 %v1726_v38, %v309_v46  ;;  %v1413_v38 = vld [vmem:[%s1373_s11 + $0x48] sm:$0xff]  }
  0x58   : > { %v311_v51 = vadd.f32 %v1725_v43, %v310_v48 }
  0x5a   : > { %v312_v53 = vrot.slane %v311_v51, 4 }
  0x5c   : > { %v313_v56 = vadd.f32 %v312_v53, %v311_v51 }
  0x5e   : > { %v314_v58 = vrot.slane %v313_v56, 2 }
  0x60   : > { %v315_v61 = vadd.f32 %v314_v58, %v313_v56 }
  0x62   : > { %v316_v63 = vrot.slane %v315_v61, 1 }
  0x64   : > { %v317_v2 = vadd.f32 %v316_v63, %v315_v61 }
  0x66   : > { %v319_v4 = vmul.f32 0.00390625, %v317_v2 }
  0x68   : > { %v320_v14 = vpack.c.bf16 %v319_v4, %v319_v4 }
  0x6a   : > { %979 = vmatmul.mubr.bf16.vlgmr.msra.gmra.mrb[0].mxu0 %v320_v14  ;;  %v546_v14 = vlaneseq }
 0x13d   : > { %v419_v28 = vpop.f32.mrb[0].mxu0 }
 0x13e   : > { %v425_v36 = vmax.f32 %v419_v28, 0.0  ;;  %v980_v41 = vpop.f32.mrb[1].mxu0  ;;  %v1382_v28 = vld [vmem:[%s1373_s11 + $0x10] sm:$0xff]  }
 0x13f   : > { %v422_v46 = vpop.f32.mrb[2].mxu0  ;;  %v1388_v41 = vld [vmem:[%s1373_s11 + $0x20] sm:$0xff]  }
 0x140   : > { %v426_v48 = vpack.c.bf16 %v425_v36, %v425_v36  ;;  %v981_v51 = vpop.f32.mrb[3].mxu0  ;;  %v1385_v36 = vld [vmem:[%s1373_s11 + $0x18] sm:$0xff]   ;;  %v547_v46 = vshrl.u32 %v546_v14, 7  ;;  %v1406_v14 = vld [vmem:[%s1373_s11 + $0x40] sm:$0xff]  }
 0x141   : > { %v1422_v51 = vld [vmem:[%s1373_s11 + $0x58] sm:$0xff]  }
 0x142   : > { %985 = vmatmul.mubr.msk.bf16.vlgmr.msra.gmra.mrb[0].mxu1 %vm428_vm2, %v426_v48  ;;  %v548_v48 = vsub.s32 0, %v547_v46  ;;  %v1442_v46 = vld [vmem:[%s1373_s11 + $0x78] sm:$0xff]   ;;  %v903_v21 = vunpack.c.l.bf16 %v1422_v51 }
 0x215   : > { %v470_v53 = vpop.f32.mrb[0].mxu1 }
 0x216   : > { %v784_v56 = vmul.f32 -1.442695, %v470_v53  ;;  %v986_v58 = vpop.f32.mrb[1].mxu1  ;;  %v1393_v53 = vld [vmem:[%s1373_s11 + $0x28] sm:$0xff]  }
 0x217   : > { %v473_v61 = vpop.f32.mrb[2].mxu1 }
 0x218   : > { %1039 = vpow2.f32 %v784_v56  ;;  %v987_v63 = vpop.f32.mrb[3].mxu1  ;;  %v1396_v56 = vld [vmem:[%s1373_s11 + $0x30] sm:$0xff]  }
 0x219   : > { %v1416_v61 = vld [vmem:[%s1373_s11 + $0x50] sm:$0xff]  }
 0x222   : > { %v1040_v2 = vpop.eup %1039 }
 0x223   : > { %v479_v4 = vadd.f32 1.0, %v1040_v2  ;;  %v908_v2 = vunpack.c.h.bf16 %v1425_v26 }
 0x225   : > { %1041 = vrcp.f32 %v479_v4  ;;  %v1403_v4 = vld [vmem:[%s1373_s11 + $0x38] sm:$0xff]  }
 0x22f   : > { %v1042_v43 = vpop.eup %1041 }
 0x230   : > { %v549_v3 = vrot.slane %v1042_v43, %v548_v48 }
 0x232   : > { %v550_v15 = vmul.f32 %v795_v8, %v549_v3  ;;  %v551_v62 = vmul.f32 %v796_v9, %v549_v3  ;;  %v552_v63 = vmul.f32 %v799_v11, %v549_v3  ;;  %v553_v43 = vmul.f32 %v800_v13, %v549_v3 }
 0x233   : > { %v554_v48 = vmul.f32 %v803_v16, %v549_v3  ;;  %v555_v55 = vmul.f32 %v804_v19, %v549_v3  ;;  %v556_v58 = vmul.f32 %v807_v22, %v549_v3  ;;  %v557_v8 = vmul.f32 %v808_v25, %v549_v3 }
 0x234   : > { %v558_v5 = vmul.f32 %v811_v27, %v549_v3  ;;  %v559_v9 = vmul.f32 %v812_v30, %v549_v3  ;;  %v560_v7 = vmul.f32 %v815_v32, %v549_v3  ;;  %v561_v11 = vmul.f32 %v816_v35, %v549_v3 }
 0x235   : > { %v562_v12 = vmul.f32 %v819_v37, %v549_v3  ;;  %v563_v13 = vmul.f32 %v820_v40, %v549_v3  ;;  %v564_v16 = vmul.f32 %v823_v42, %v549_v3  ;;  %v565_v18 = vmul.f32 %v824_v45, %v549_v3 }
 0x236   : > { %v566_v19 = vmul.f32 %v827_v47, %v549_v3  ;;  %v567_v22 = vmul.f32 %v828_v50, %v549_v3  ;;  %v568_v24 = vmul.f32 %v831_v52, %v549_v3  ;;  %v1740_v25 = vunpack.c.h.bf16 %v1296_v49 }
 0x237   : > { %v570_v30 = vmul.f32 %v1741_v29, %v549_v3  ;;  %v1742_v32 = vunpack.c.h.bf16 %v1305_v54  ;;  %v1743_v35 = vunpack.c.l.bf16 %v1314_v59  ;;  %v573_v40 = vmul.f32 %v1744_v39, %v549_v3 }
 0x238   : > { %v569_v27 = vmul.f32 %v1740_v25, %v549_v3  ;;  %v1745_v42 = vunpack.c.l.bf16 %v1323_v0  ;;  %v1746_v45 = vunpack.c.h.bf16 %v1323_v0  ;;  %v1747_v49 = vunpack.c.l.bf16 %v1332_v6 }
 0x239   : > { %v571_v34 = vmul.f32 %v1742_v32, %v549_v3  ;;  %v572_v37 = vmul.f32 %v1743_v35, %v549_v3  ;;  %v1748_v52 = vunpack.c.h.bf16 %v1332_v6  ;;  %v1749_v25 = vunpack.c.l.bf16 %v1341_v20 }
 0x23a   : > { %v574_v44 = vmul.f32 %v1745_v42, %v549_v3  ;;  %v575_v47 = vmul.f32 %v1746_v45, %v549_v3  ;;  %v576_v50 = vmul.f32 %v1747_v49, %v549_v3  ;;  %v1750_v32 = vunpack.c.h.bf16 %v1341_v20 }
 0x23b   : > { %v577_v54 = vmul.f32 %v1748_v52, %v549_v3  ;;  %v578_v29 = vmul.f32 %v1749_v25, %v549_v3  ;;  %v1751_v59 = vunpack.c.l.bf16 %v1350_v31  ;;  %v1752_v42 = vunpack.c.h.bf16 %v1350_v31 }
 0x23c   : > { %v579_v35 = vmul.f32 %v1750_v32, %v549_v3  ;;  %v1753_v0 = vunpack.c.l.bf16 %v1376_v17  ;;  %v1754_v49 = vunpack.c.h.bf16 %v1376_v17  ;;  %v1755_v6 = vunpack.c.l.bf16 %v1379_v23 }
 0x23d   : > { %v580_v39 = vmul.f32 %v1751_v59, %v549_v3  ;;  %v581_v57 = vmul.f32 %v1752_v42, %v549_v3  ;;  %v1756_v25 = vunpack.c.h.bf16 %v1379_v23  ;;  %v1757_v32 = vunpack.c.l.bf16 %v1382_v28 }
 0x23e   : > { %v582_v45 = vadd.f32 %v1753_v0, %v550_v15  ;;  %v583_v60 = vadd.f32 %v1754_v49, %v551_v62  ;;  %v584_v52 = vadd.f32 %v1755_v6, %v552_v63  ;;  %v1758_v31 = vunpack.c.h.bf16 %v1382_v28 }
 0x23f   : > { %v585_v20 = vadd.f32 %v1756_v25, %v553_v43  ;;  %v586_v59 = vadd.f32 %v1757_v32, %v554_v48  ;;  %v1759_v42 = vunpack.c.l.bf16 %v1385_v36  ;;  %v1760_v17 = vunpack.c.h.bf16 %v1385_v36 }
 0x240   : > { %v587_v3 = vadd.f32 %v1758_v31, %v555_v55  ;;  %v1761_v0 = vunpack.c.l.bf16 %v1388_v41  ;;  %v1762_v63 = vunpack.c.h.bf16 %v1388_v41  ;;  %v1763_v43 = vunpack.c.l.bf16 %v1393_v53 }
 0x241   : > { %v588_v15 = vadd.f32 %v1759_v42, %v556_v58  ;;  %v589_v62 = vadd.f32 %v1760_v17, %v557_v8  ;;  %v1764_v48 = vunpack.c.h.bf16 %v1393_v53  ;;  %v1765_v55 = vunpack.c.l.bf16 %v1396_v56 }
 0x242   : > { %v590_v49 = vadd.f32 %v1761_v0, %v558_v5  ;;  %v591_v23 = vadd.f32 %v1762_v63, %v559_v9  ;;  %v592_v6 = vadd.f32 %v1763_v43, %v560_v7  ;;  %v1766_v58 = vunpack.c.h.bf16 %v1396_v56 }
 0x243   : > { %v593_v25 = vadd.f32 %v1764_v48, %v561_v11  ;;  %v594_v28 = vadd.f32 %v1765_v55, %v562_v12  ;;  %v1767_v36 = vunpack.c.l.bf16 %v1403_v4  ;;  %v1768_v5 = vunpack.c.h.bf16 %v1403_v4 }
 0x244   : > { %v595_v32 = vadd.f32 %v1766_v58, %v563_v13  ;;  %v1769_v41 = vunpack.c.l.bf16 %v1406_v14  ;;  %v1770_v53 = vunpack.c.h.bf16 %v1406_v14  ;;  %v1771_v11 = vunpack.c.l.bf16 %v1413_v38 }
 0x245   : > { %v596_v8 = vadd.f32 %v1767_v36, %v564_v16  ;;  %v597_v31 = vadd.f32 %v1768_v5, %v565_v18  ;;  %v1772_v12 = vunpack.c.h.bf16 %v1413_v38  ;;  %v1773_v4 = vunpack.c.l.bf16 %v1416_v61 }
 0x246   : > { %v1556_v9 = vadd.f32 %v1769_v41, %v566_v19  ;;  %v1560_v7 = vadd.f32 %v1770_v53, %v567_v22  ;;  %v1564_v56 = vadd.f32 %v1771_v11, %v568_v24  ;;  %v1774_v18 = vunpack.c.h.bf16 %v1416_v61 }
 0x247   : > { %v1568_v13 = vadd.f32 %v1772_v12, %v569_v27  ;;  %v1572_v16 = vadd.f32 %v1773_v4, %v570_v30  ;;  %v1580_v14 = vadd.f32 %v903_v21, %v572_v37  ;;  %v1775_v22 = vunpack.c.h.bf16 %v1422_v51 }
 0x248   : > { %v1576_v19 = vadd.f32 %v1774_v18, %v571_v34  ;;  %v1776_v38 = vunpack.c.l.bf16 %v1425_v26  ;;  %v1592_v30 = vadd.f32 %v908_v2, %v575_v47  ;;  %v1777_v61 = vunpack.c.l.bf16 %v1432_v10 }
 0x249   : > { %v1584_v24 = vadd.f32 %v1775_v22, %v573_v40  ;;  %v1600_v21 = vadd.f32 %v912_v33, %v577_v54  ;;  %v1778_v51 = vunpack.c.l.bf16 %v1439_v1  ;;  %v1779_v40 = vunpack.c.h.bf16 %v1439_v1 }
 0x24a   : > { %v1588_v27 = vadd.f32 %v1776_v38, %v574_v44  ;;  %v1596_v34 = vadd.f32 %v1777_v61, %v576_v50  ;;  %v1780_v26 = vunpack.c.l.bf16 %v1442_v46  ;;  %v1781_v47 = vunpack.c.h.bf16 %v1442_v46 }
 0x24b   : > { %v1604_v37 = vadd.f32 %v1778_v51, %v578_v29  ;;  %v1608_v44 = vadd.f32 %v1779_v40, %v579_v35  ;;  %v614_v42 = vmax.f32 %v582_v45, 0.0  ;;  %v615_v10 = vmax.f32 %v583_v60, 0.0 }
 0x24c   : > { %v1612_v2 = vadd.f32 %v1780_v26, %v580_v39  ;;  %v1616_v50 = vadd.f32 %v1781_v47, %v581_v57  ;;  %v616_v33 = vmax.f32 %v584_v52, 0.0  ;;  %v617_v54 = vmax.f32 %v585_v20, 0.0 }
 0x24d   : > { %v618_v17 = vmax.f32 %v586_v59, 0.0  ;;  %v619_v0 = vmax.f32 %v587_v3, 0.0  ;;  %v620_v29 = vmax.f32 %v588_v15, 0.0  ;;  %v621_v63 = vmax.f32 %v589_v62, 0.0  ;;  %646 = vst [vmem:[%s1618_s12] sm:$0xff] %v614_v42  ;;  %647 = vst [vmem:[%s1618_s12 + $0x8] sm:$0xff] %v615_v10 }
 0x24e   : > { %v622_v43 = vmax.f32 %v590_v49, 0.0  ;;  %v623_v1 = vmax.f32 %v591_v23, 0.0  ;;  %v624_v35 = vmax.f32 %v592_v6, 0.0  ;;  %v625_v48 = vmax.f32 %v593_v25, 0.0  ;;  %648 = vst [vmem:[%s1618_s12 + $0x10] sm:$0xff] %v616_v33  ;;  %649 = vst [vmem:[%s1618_s12 + $0x18] sm:$0xff] %v617_v54 }
 0x24f   : > { %v626_v57 = vmax.f32 %v594_v28, 0.0  ;;  %v627_v60 = vmax.f32 %v595_v32, 0.0  ;;  %v628_v46 = vmax.f32 %v596_v8, 0.0  ;;  %v629_v39 = vmax.f32 %v597_v31, 0.0  ;;  %650 = vst [vmem:[%s1618_s12 + $0x20] sm:$0xff] %v618_v17  ;;  %651 = vst [vmem:[%s1618_s12 + $0x28] sm:$0xff] %v619_v0 }
 0x250   : > { %652 = vst [vmem:[%s1618_s12 + $0x30] sm:$0xff] %v620_v29  ;;  %653 = vst [vmem:[%s1618_s12 + $0x38] sm:$0xff] %v621_v63  ;;  %v630_v45 = vmax.f32 %v1556_v9, 0.0  ;;  %v631_v52 = vmax.f32 %v1560_v7, 0.0  ;;  %v632_v20 = vmax.f32 %v1564_v56, 0.0  ;;  %v633_v59 = vmax.f32 %v1568_v13, 0.0 }
 0x251   : > { %654 = vst [vmem:[%s1618_s12 + $0x40] sm:$0xff] %v622_v43  ;;  %655 = vst [vmem:[%s1618_s12 + $0x48] sm:$0xff] %v623_v1  ;;  %v634_v3 = vmax.f32 %v1572_v16, 0.0  ;;  %v635_v15 = vmax.f32 %v1576_v19, 0.0  ;;  %v636_v62 = vmax.f32 %v1580_v14, 0.0  ;;  %v637_v49 = vmax.f32 %v1584_v24, 0.0 }
 0x252   : > { %656 = vst [vmem:[%s1618_s12 + $0x50] sm:$0xff] %v624_v35  ;;  %657 = vst [vmem:[%s1618_s12 + $0x58] sm:$0xff] %v625_v48  ;;  %v638_v23 = vmax.f32 %v1588_v27, 0.0  ;;  %v639_v6 = vmax.f32 %v1592_v30, 0.0  ;;  %v640_v25 = vmax.f32 %v1596_v34, 0.0  ;;  %v641_v55 = vmax.f32 %v1600_v21, 0.0 }
 0x253   : > { %658 = vst [vmem:[%s1618_s12 + $0x60] sm:$0xff] %v626_v57  ;;  %659 = vst [vmem:[%s1618_s12 + $0x68] sm:$0xff] %v627_v60  ;;  %v642_v28 = vmax.f32 %v1604_v37, 0.0  ;;  %v643_v58 = vmax.f32 %v1608_v44, 0.0  ;;  %v644_v32 = vmax.f32 %v1612_v2, 0.0  ;;  %v645_v36 = vmax.f32 %v1616_v50, 0.0 }
 0x254   : > { %660 = vst [vmem:[%s1618_s12 + $0x70] sm:$0xff] %v628_v46  ;;  %661 = vst [vmem:[%s1618_s12 + $0x78] sm:$0xff] %v629_v39 }
 0x255   : > { %662 = vst [vmem:[%s1618_s12 + $0x80] sm:$0xff] %v630_v45  ;;  %663 = vst [vmem:[%s1618_s12 + $0x88] sm:$0xff] %v631_v52 }
 0x256   : > { %664 = vst [vmem:[%s1618_s12 + $0x90] sm:$0xff] %v632_v20  ;;  %665 = vst [vmem:[%s1618_s12 + $0x98] sm:$0xff] %v633_v59 }
 0x257   : > { %666 = vst [vmem:[%s1618_s12 + $0xa0] sm:$0xff] %v634_v3  ;;  %667 = vst [vmem:[%s1618_s12 + $0xa8] sm:$0xff] %v635_v15 }
 0x258   : > { %668 = vst [vmem:[%s1618_s12 + $0xb0] sm:$0xff] %v636_v62  ;;  %669 = vst [vmem:[%s1618_s12 + $0xb8] sm:$0xff] %v637_v49 }
 0x259   : > { %670 = vst [vmem:[%s1618_s12 + $0xc0] sm:$0xff] %v638_v23  ;;  %671 = vst [vmem:[%s1618_s12 + $0xc8] sm:$0xff] %v639_v6 }
 0x25a   : > { %672 = vst [vmem:[%s1618_s12 + $0xd0] sm:$0xff] %v640_v25  ;;  %673 = vst [vmem:[%s1618_s12 + $0xd8] sm:$0xff] %v641_v55 }
 0x25b   : > { %674 = vst [vmem:[%s1618_s12 + $0xe0] sm:$0xff] %v642_v28  ;;  %675 = vst [vmem:[%s1618_s12 + $0xe8] sm:$0xff] %v643_v58 }
 0x25c   : > { %676 = vst [vmem:[%s1618_s12 + $0xf0] sm:$0xff] %v644_v32  ;;  %677 = vst [vmem:[%s1618_s12 + $0xf8] sm:$0xff] %v645_v36 }
 0x25d   : > { %1056 = shalt.err (!%p1053_p3)
}
 0x25e   : > { %s1057_s5 = scalar_lea.hbm %s1657_s22, 4096  ;;  %s1061_s10 = scalar_lea.hbm %s1724_s4, 8192 }
 0x25f   : > { %p1058_p4 = scmp.ne.s32.totalorder %s1657_s22, %s1057_s5  ;;  %p1062_p9 = scmp.lt.u32.totalorder %s1657_s22, %s1724_s4 }
 0x260   : > { %p1063_p10 = scmp.lt.u32.totalorder %s1061_s10, %s1057_s5  ;;  %p1065_p12 = scmp.lt.u32.totalorder %s1057_s5, %s1657_s22 }
 0x261   : > { %p1059_p7 = pnand %p1058_p4, %p1175_p5 }
 0x262   : > { %p1064_p11 = por %p1063_p10, %p1062_p9 }
 0x263   : > { %p1060_p8 = pneg %p1059_p7 }
 0x264   : > { %p1066_p13 = por %p1065_p12, %p1064_p11 }
 0x266   : > { %p1067_p0 = pnand %p1066_p13, %p1060_p8 }
 0x268   : > { %1070 = shalt.err (!%p1067_p0)
}
 0x269   : > { %s1110_s8 = smov 128   ;;  %s1111_s12 = smov 8  }
 0x26a   : > { %988 = dma.vmem_to_hbm [thread:$0]  (%p1175_p5), %s1659_s14, 4096, %s1657_s22, %s1679_s23, %s1110_s8, %s1110_s8, %s1111_s12  }
 0x26b PF: > { %p994_p1 = scmp.ge.s32.totalorder %s1105_s18, 2  ;;  %s707_s13 = sand.u32 1, %s1093_s15  }
 0x26c   : > { %s708_s19 = scalar_lea.sflag [#allocation3], %s707_s13 }
 0x26d   : > { %p991_p2 = pnand %p994_p1, %p1179_p6 }
 0x26f   : > { %1088 = dma.done.wait (!%p991_p2), %s708_s19, 4096  }
 0x270   : > { %1090 = vsyncadd (!%p991_p2), %s708_s19, 4294963200  ;;  %p14_p3 = scmp.ge.s32.totalorder %s1162_s21, 4   ;;  %s1782_s15 = smov %s1097_s16 }
 0x271   : > { %s1783_s16 = smov %s1101_s17  ;;  %s1784_s17 = smov %s1173_s24 }
 0x272   : > { %s1785_s18 = smov %s1162_s21  ;;  %16 = sbr.rel (!%p14_p3) target bundleno = 3 (0x3), region = 74 }
 0x279   :  { %713 = vsyncpa [#allocation3], 1 }
 0x27a   :  { %715 = vsyncpa [#allocation3 + $0x1], 1 }

// kernel: seblock_forward.3
= control target key start
LH: loop header
LB: loop body
LE: loop exit
PB: predicated region body
PF: predicated region fallthrough
CT: control target
= control target key end

     0   :  { %s12200_s15 = smov 0   ;;  %s15920_s0 = inlined_call_operand.vmem [shape: bf16[2,18,22,64], index: 0, kind: input, shape index: {}]   ;;  %s15921_s1 = inlined_call_operand.vmem [shape: bf16[21,64,256], index: 1, kind: input, shape index: {}]   ;;  %s15922_s2 = inlined_call_operand.vmem [shape: f32[8,256], index: 2, kind: input, shape index: {}]   ;;  %s15923_s3 = inlined_call_operand.vmem [shape: bf16[2,16,16,128], index: 3, kind: output, shape index: {0}]   ;;  %s15924_s4 = inlined_call_operand.vmem [shape: bf16[2,16,16,128], index: 4, kind: output, shape index: {1}]  }
   0x1 LB: > { %s9344_s16 = sadd.s32 4294967295, %s12172_s15   ;;  %p9348_p0 = scmp.ge.s32.totalorder %s12172_s15, 1  ;;  %s12172_s15 = sphi %s12200_s15, %s15_s15  }
   0x2   : > { %p165_p1 = scmp.lt.s32.totalorder %s12172_s15, 3 }
   0x4   : > { %p166_p2 = pnand %p9348_p0, %p165_p1 }
   0x6   : > { %169 = sbr.rel (%p166_p2) target bundleno = 1601 (0x641), region = 32 }
   0xd   : > { %v11820_v0 = vld [vmem:[%s15921_s1 + $0x44] ss:$8 sps:$4 sm:$0xff]   ;;  %p196_p3 = scmp.lt.s32.totalorder %s9344_s16, 1  ;;  %v15928_v2 = vmov 0   ;;  %v11824_v3 = vld [vmem:[%s15921_s1 + $0x40] ss:$8 sps:$4 sm:$0xff]  }
   0xe   : > { %v11822_v1 = vld [vmem:[%s15921_s1 + $0x284] ss:$8 sps:$4 sm:$0xff]   ;;  %839 = vmatprep.mubr.bf16.mxu1 %v15928_v2  ;;  %5258 = vmatprep.mubr.bf16.mxu0 %v15928_v2  ;;  %v11825_v4 = vld [vmem:[%s15921_s1 + $0x280] ss:$8 sps:$4 sm:$0xff]   ;;  %v11826_v5 = vld [vmem:[%s15921_s1 + $0x54] ss:$8 sps:$4 sm:$0xff]  }
   0xf   : > { %807 = vmatprep.subr.bf16.mxu1 %v11820_v0  ;;  %s16724_s16 = smov (!%p196_p3, %s9344_s16), 1  ;;  %5226 = vmatprep.subr.bf16.mxu0 %v11822_v1  ;;  %v11828_v6 = vld [vmem:[%s15921_s1 + $0x294] ss:$8 sps:$4 sm:$0xff]   ;;  %v11830_v7 = vld [vmem:[%s15921_s1 + $0x50] ss:$8 sps:$4 sm:$0xff]   ;;  %v16251_v32 = vmov 0 }
  0x10   : > { %808 = vmatpush1.bf16.msra.mxu1 %v11824_v3  ;;  %5227 = vmatpush1.bf16.msra.mxu0 %v11825_v4  ;;  %s11810_s5 = smul.u32 216, %s16724_s16  ;;  %v11831_v8 = vld [vmem:[%s15921_s1 + $0x290] ss:$8 sps:$4 sm:$0xff]   ;;  %v11832_v9 = vld [vmem:[%s15921_s1 + $0x64] ss:$8 sps:$4 sm:$0xff]   ;;  %vm758_vm5 = vcmask 523264  }
  0x11   : > { %809 = vmatprep.subr.bf16.mxu1 %v11826_v5  ;;  %5228 = vmatprep.subr.bf16.mxu0 %v11828_v6  ;;  %v11834_v10 = vld [vmem:[%s15921_s1 + $0x2a4] ss:$8 sps:$4 sm:$0xff]   ;;  %v11836_v11 = vld [vmem:[%s15921_s1 + $0x60] ss:$8 sps:$4 sm:$0xff]   ;;  %v11838_v13 = vld [vmem:[%s15921_s1 + $0x74] ss:$8 sps:$4 sm:$0xff]  }
  0x12   : > { %v11837_v12 = vld [vmem:[%s15921_s1 + $0x2a0] ss:$8 sps:$4 sm:$0xff]   ;;  %s12252_s20 = scalar_lea.vmem %s15920_s0, %s11810_s5  ;;  %v11840_v14 = vld [vmem:[%s15921_s1 + $0x2b4] ss:$8 sps:$4 sm:$0xff]   ;;  %v11842_v15 = vld [vmem:[%s15921_s1 + $0x70] ss:$8 sps:$4 sm:$0xff]  }
  0x13   : > { %v11843_v16 = vld [vmem:[%s15921_s1 + $0x2b0] ss:$8 sps:$4 sm:$0xff]   ;;  %v212_v17 = vld [vmem:[%s12252_s20] sm:$0xf]  ;;  %v213_v18 = vld [vmem:[%s12252_s20 + $0x4] sm:$0xf] }
  0x14   : > { %810 = vmatpush1.bf16.msra.mxu1 %v11830_v7  ;;  %5229 = vmatpush1.bf16.msra.mxu0 %v11831_v8  ;;  %v214_v19 = vld [vmem:[%s12252_s20 + $0x8] sm:$0x7]  ;;  %v12269_v20 = vshrl.u32 %v212_v17, 16  ;;  %v12271_v21 = vshll.u32 %v212_v17, 16  ;;  %v12273_v22 = vshll.u32 %v213_v18, 16  ;;  %v12275_v23 = vshrl.u32 %v213_v18, 16 }
  0x15   : > { %811 = vmatprep.subr.bf16.mxu1 %v11832_v9  ;;  %5230 = vmatprep.subr.bf16.mxu0 %v11834_v10  ;;  %v12277_v24 = vshll.u32 %v214_v19, 16  ;;  %vm274_vm0 = vsmask.f32 3328  ;;  %vm275_vm1 = vsmask.f32 7440  ;;  %v16254_v57 = vmov 0 }
  0x16   : > { %16246 = vst [vmem:[#allocation2_spill] sm:$0xff] %v12269_v20  ;;  %16247 = vst [vmem:[#allocation3_spill] sm:$0xff] %v12271_v21  ;;  %v280_v25 = vrot.slane %v12269_v20, 4  ;;  %v283_v26 = vrot.slane %v12271_v21, 5  ;;  %v289_v27 = vrot.slane %v12273_v22, 5  ;;  %v293_v28 = vrot.slane %v12275_v23, 4 }
  0x17   : > { %16248 = vst [vmem:[#allocation4_spill] sm:$0xff] %v12273_v22  ;;  %16249 = vst [vmem:[#allocation5_spill] sm:$0xff] %v12275_v23  ;;  %v11846_v29 = vld [vmem:[%s15921_s1 + $0x4] ss:$8 sps:$4 sm:$0xff]   ;;  %vm1894_vm2 = vsmask.f32 2304 }
  0x18   : > { %812 = vmatpush1.bf16.msra.mxu1 %v11836_v11  ;;  %5231 = vmatpush1.bf16.msra.mxu0 %v11837_v12  ;;  %16250 = vst [vmem:[#allocation6_spill] sm:$0xff] %v12277_v24  ;;  %v284_v30 = vor.u32 %v283_v26, %v280_v25  ;;  %v12287_v31 = vld [vmem:[%s12252_s20 + $0xc] sm:$0xf]  ;;  %vm12289_vm3 = vmor %vm274_vm0, %vm275_vm1  ;;  %v294_v33 = vor.u32 %v293_v28, %v289_v27  ;;  %v299_v34 = vrot.slane %v12277_v24, 5  ;;  %v12295_v35 = vld [vmem:[%s12252_s20 + $0x10] sm:$0xf] }
  0x19   : > { %813 = vmatprep.subr.bf16.mxu1 %v11838_v13  ;;  %5232 = vmatprep.subr.bf16.mxu0 %v11840_v14  ;;  %v16252_v32 = vsel %vm12289_vm3, 4294967295, %v16251_v32  ;;  %vm1895_vm4 = vsmask.f32 6416  ;;  %v12298_v37 = vld [vmem:[%s12252_s20 + $0x14] sm:$0x7]  ;;  %v12301_v38 = vshrl.u32 %v12287_v31, 16 }
  0x1a   : > { %16253 = vst [vmem:[#allocation7_spill] sm:$0xff] %v16252_v32  ;;  %v285_v36 = vrot.slane %v284_v30, 4  ;;  %v12304_v39 = vshll.u32 %v12287_v31, 16  ;;  %v295_v40 = vrot.slane %v294_v33, 4  ;;  %v12307_v41 = vshll.u32 %v12295_v35, 16  ;;  %vm12333_vm6 = vmor %vm1894_vm2, %vm1895_vm4  ;;  %s10266_s6 = sshll.u32 %s16724_s16, 7 }
  0x1b   : > { %v12310_v42 = vshrl.u32 %v12295_v35, 16  ;;  %v12313_v43 = vshll.u32 %v12298_v37, 16  ;;  %v1912_v45 = vrot.slane %v12301_v38, 5  ;;  %v1921_v47 = vshrl.u32 %v12298_v37, 16  ;;  %v11849_v48 = vld [vmem:[%s15921_s1 + $0x2c4] ss:$8 sps:$4 sm:$0xff]   ;;  %s15670_s9 = scalar_lea.vmem %s15923_s3, %s10266_s6  ;;  %s15677_s11 = scalar_lea.vmem %s15924_s4, %s10266_s6 }
  0x1c   : > { %814 = vmatpush1.bf16.msra.mxu1 %v11842_v15  ;;  %5233 = vmatpush1.bf16.msra.mxu0 %v11843_v16  ;;  %v290_v44 = vsel %vm12289_vm3, %v285_v36, %v289_v27  ;;  %v1913_v46 = vrot.slane %v12304_v39, 6  ;;  %v300_v49 = vsel %vm12289_vm3, %v295_v40, %v299_v34  ;;  %v11844_v50 = vld [vmem:[%s15921_s1] ss:$8 sps:$4 sm:$0xff]   ;;  %v1917_v52 = vrot.slane %v12307_v41, 6  ;;  %v12340_v63 = vld [vmem:[%s12252_s20 + $0x18] sm:$0xf] }
  0x1d   : > { %1168 = vmatprep.subr.bf16.mxu1 %v11846_v29  ;;  %v1916_v51 = vrot.slane %v12310_v42, 5  ;;  %v1924_v53 = vrot.slane %v12313_v43, 6  ;;  %v9362_v54 = vcombine.low %v290_v44, %v300_v49  ;;  %v1923_v56 = vrot.slane %v1921_v47, 5  ;;  %5545 = vmatprep.subr.bf16.mxu0 %v11849_v48  ;;  %v12347_v5 = vld [vmem:[%s12252_s20 + $0x1c] sm:$0xf] }
  0x1e   : > { %v1914_v55 = vor.u32 %v1913_v46, %v1912_v45  ;;  %v16255_v57 = vsel %vm12333_vm6, 4294967295, %v16254_v57  ;;  %v3081_v61 = vrot.slane %v1921_v47, 6  ;;  %v3082_v62 = vrot.slane %v12313_v43, 7  ;;  %v12356_v10 = vld [vmem:[%s12252_s20 + $0x20] sm:$0x7] }
  0x1f   : > { %16256 = vst [vmem:[#allocation8_spill] sm:$0xff] %v16255_v57  ;;  %v1918_v58 = vor.u32 %v1917_v52, %v1916_v51  ;;  %9386 = vmatmul.mubr.msk.bf16.vlgmr.msra.gmra.mrb[0].mxu1 %vm758_vm5, %v9362_v54  ;;  %v1925_v60 = vor.u32 %v1924_v53, %v1923_v56  ;;  %v304_v1 = vrot.slane %v12301_v38, 4  ;;  %v307_v3 = vrot.slane %v12304_v39, 5  ;;  %16257 = vst [vmem:[#allocation9_spill] sm:$0xff] %v12356_v10  ;;  %v11847_v12 = vld [vmem:[%s15921_s1 + $0x2c0] ss:$8 sps:$4 sm:$0xff]  }
  0x20   : > { %v1915_v59 = vrot.slane %v1914_v55, 4  ;;  %1169 = vmatpush1.bf16.msra.mxu1 %v11844_v50  ;;  %849 = vmatprep.mubr.bf16.mxu1 %v15928_v2  ;;  %v313_v4 = vrot.slane %v12307_v41, 5  ;;  %v12351_v7 = vor.u32 %v3082_v62, %v3081_v61  ;;  %v317_v8 = vrot.slane %v12310_v42, 4  ;;  %v11852_v25 = vld [vmem:[%s15921_s1 + $0x2d4] ss:$8 sps:$4 sm:$0xff]  }
  0x21   : > { %v1920_v0 = vrot.slane %v1918_v58, 4  ;;  %v323_v9 = vrot.slane %v12313_v43, 5  ;;  %v308_v13 = vor.u32 %v307_v3, %v304_v1  ;;  %v12364_v14 = vshrl.u32 %v12340_v63, 16  ;;  %v11853_v26 = vld [vmem:[%s15921_s1 + $0x10] ss:$8 sps:$4 sm:$0xff]  }
  0x22   : > { %v1919_v6 = vsel %vm12333_vm6, %v1915_v59, %v1918_v58  ;;  %v12367_v15 = vshll.u32 %v12340_v63, 16  ;;  %v318_v17 = vor.u32 %v317_v8, %v313_v4  ;;  %v12372_v18 = vshll.u32 %v12347_v5, 16  ;;  %v11855_v33 = vld [vmem:[%s15921_s1 + $0x14] ss:$8 sps:$4 sm:$0xff]   ;;  %v12402_v48 = vld [vmem:[%s12252_s20 + $0x24] sm:$0xf] }
  0x23   : > { %v1926_v11 = vsel %vm12333_vm6, %v1920_v0, %v1925_v60  ;;  %v12375_v19 = vshrl.u32 %v12347_v5, 16  ;;  %v309_v27 = vrot.slane %v308_v13, 4  ;;  %v12384_v28 = vshll.u32 %v12356_v10, 16  ;;  %v11850_v49 = vld [vmem:[%s15921_s1 + $0x2d0] ss:$8 sps:$4 sm:$0xff]   ;;  %1170 = vmatprep.subr.bf16.mxu1 %v11855_v33 }
  0x24   : > { %v12369_v16 = vcombine.low %v1919_v6, %v1926_v11  ;;  %v1927_v29 = vrot.slane %v12364_v14, 5  ;;  %v1928_v30 = vrot.slane %v12367_v15, 6  ;;  %v319_v34 = vrot.slane %v318_v17, 4  ;;  %v12413_v54 = vld [vmem:[%s12252_s20 + $0x28] sm:$0xf]  ;;  %1171 = vmatpush1.bf16.msra.mxu1 %v11853_v26 }
  0x25   : > { %16259 = vst [vmem:[#allocation11_spill] sm:$0xff] %v12384_v28  ;;  %v1931_v36 = vrot.slane %v12375_v19, 5  ;;  %v1932_v40 = vrot.slane %v12372_v18, 6  ;;  %v15927_v43 = vshrl.u32 %v12356_v10, 16  ;;  %v314_v44 = vsel %vm12289_vm3, %v309_v27, %v313_v4  ;;  %v11858_v60 = vld [vmem:[%s15921_s1 + $0x2e4] ss:$8 sps:$4 sm:$0xff]  }
  0x26   : > { %16258 = vst [vmem:[#allocation10_spill] sm:$0xff] %v12369_v16  ;;  %9847 = vmatmul.mubr.msk.bf16.vlgmr.msra.gmra.mrb[0].mxu0 %vm758_vm5, %v12369_v16  ;;  %v1929_v45 = vor.u32 %v1928_v30, %v1927_v29  ;;  %v1939_v46 = vrot.slane %v12384_v28, 6  ;;  %v328_v47 = vrot.slane %v12364_v14, 4  ;;  %v324_v50 = vsel %vm12289_vm3, %v319_v34, %v323_v9  ;;  %v12424_v3 = vld [vmem:[%s12252_s20 + $0x2c] sm:$0x7] }
  0x27   : > { %5546 = vmatpush1.bf16.msra.mxu0 %v11847_v12  ;;  %5268 = vmatprep.mubr.bf16.mxu0 %v15928_v2  ;;  %v1933_v51 = vor.u32 %v1932_v40, %v1931_v36  ;;  %v1938_v52 = vrot.slane %v15927_v43, 5  ;;  %v331_v53 = vrot.slane %v12367_v15, 5  ;;  %v12415_v55 = vcombine.low %v314_v44, %v324_v50  ;;  %16261 = vst [vmem:[#allocation13_spill] sm:$0xff] %v12424_v3  ;;  %v12460_v44 = vld [vmem:[%s12252_s20 + $0x30] sm:$0xf] }
  0x28   : > { %5547 = vmatprep.subr.bf16.mxu0 %v11852_v25  ;;  %v1930_v56 = vrot.slane %v1929_v45, 4  ;;  %v337_v58 = vrot.slane %v12372_v18, 5  ;;  %v341_v59 = vrot.slane %v12375_v19, 4  ;;  %v347_v1 = vrot.slane %v12384_v28, 5  ;;  %v11856_v25 = vld [vmem:[%s15921_s1 + $0x2e0] ss:$8 sps:$4 sm:$0xff]  }
  0x29   : > { %16260 = vst [vmem:[#allocation12_spill] sm:$0xff] %v12415_v55  ;;  %v1935_v61 = vrot.slane %v1933_v51, 4  ;;  %v1940_v62 = vor.u32 %v1939_v46, %v1938_v52  ;;  %v332_v0 = vor.u32 %v331_v53, %v328_v47  ;;  %9387 = vmatmul.mubr.msk.bf16.gmra.mrb[4].mxu1 %vm758_vm5, %v12415_v55  ;;  %v12431_v8 = vshrl.u32 %v12402_v48, 16  ;;  %v11861_v50 = vld [vmem:[%s15921_s1 + $0x2f4] ss:$8 sps:$4 sm:$0xff]  }
  0x2a   : > { %v1934_v4 = vsel %vm12333_vm6, %v1930_v56, %v1933_v51  ;;  %v342_v6 = vor.u32 %v341_v59, %v337_v58  ;;  %v12434_v9 = vshll.u32 %v12402_v48, 16  ;;  %859 = vmatprep.mubr.bf16.mxu1 %v15928_v2  ;;  %v12440_v13 = vshll.u32 %v12413_v54, 16  ;;  %v11859_v59 = vld [vmem:[%s15921_s1 + $0x2f0] ss:$8 sps:$4 sm:$0xff]   ;;  %v12604_v21 = vld [vmem:[%s12252_s20 + $0x4c] sm:$0xf] }
  0x2b   : > { %16262 = vst [vmem:[#allocation14_spill] sm:$0xff] %v12431_v8  ;;  %5548 = vmatpush1.bf16.msra.mxu0 %v11850_v49  ;;  %v1941_v11 = vsel %vm12333_vm6, %v1935_v61, %v1940_v62  ;;  %v333_v12 = vrot.slane %v332_v0, 4  ;;  %v12443_v17 = vshrl.u32 %v12413_v54, 16  ;;  %v12451_v29 = vshll.u32 %v12424_v3, 16 }
  0x2c   : > { %16263 = vst [vmem:[#allocation15_spill] sm:$0xff] %v12434_v9  ;;  %16264 = vst [vmem:[#allocation16_spill] sm:$0xff] %v12440_v13  ;;  %5549 = vmatprep.subr.bf16.mxu0 %v11858_v60  ;;  %v12448_v26 = vcombine.low %v1934_v4, %v1941_v11  ;;  %v343_v27 = vrot.slane %v342_v6, 4  ;;  %v1942_v30 = vrot.slane %v12431_v8, 5  ;;  %v1943_v34 = vrot.slane %v12434_v9, 6 }
  0x2d   : > { %16265 = vst [vmem:[#allocation17_spill] sm:$0xff] %v12443_v17  ;;  %16267 = vst [vmem:[#allocation19_spill] sm:$0xff] %v12451_v29  ;;  %v338_v33 = vsel %vm12289_vm3, %v333_v12, %v337_v58  ;;  %v1946_v36 = vrot.slane %v12443_v17, 5  ;;  %v1947_v40 = vrot.slane %v12440_v13, 6  ;;  %v15925_v46 = vshrl.u32 %v12424_v3, 16 }
  0x2e   : > { %16266 = vst [vmem:[#allocation18_spill] sm:$0xff] %v12448_v26  ;;  %9848 = vmatmul.mubr.msk.bf16.gmra.mrb[4].mxu0 %vm758_vm5, %v12448_v26  ;;  %v348_v45 = vsel %vm12289_vm3, %v343_v27, %v347_v1  ;;  %v1954_v47 = vrot.slane %v12451_v29, 6  ;;  %v352_v49 = vrot.slane %v12431_v8, 4  ;;  %v1944_v52 = vor.u32 %v1943_v34, %v1942_v30  ;;  %v12477_v58 = vld [vmem:[%s12252_s20 + $0x34] sm:$0xf] }
  0x2f   : > { %5278 = vmatprep.mubr.bf16.mxu0 %v15928_v2  ;;  %v12473_v51 = vcombine.low %v338_v33, %v348_v45  ;;  %v1948_v53 = vor.u32 %v1947_v40, %v1946_v36  ;;  %v355_v56 = vrot.slane %v12434_v9, 5  ;;  %5550 = vmatpush1.bf16.msra.mxu0 %v11856_v25  ;;  %v1953_v60 = vrot.slane %v15925_v46, 5  ;;  %v12488_v1 = vld [vmem:[%s12252_s20 + $0x38] sm:$0x7]  ;;  %v11862_v25 = vld [vmem:[%s15921_s1 + $0x20] ss:$8 sps:$4 sm:$0xff]  }
  0x30   : > { %v361_v61 = vrot.slane %v12440_v13, 5  ;;  %v365_v62 = vrot.slane %v12443_v17, 4  ;;  %v371_v0 = vrot.slane %v12451_v29, 5  ;;  %5551 = vmatprep.subr.bf16.mxu0 %v11861_v50  ;;  %v1945_v4 = vrot.slane %v1944_v52, 4  ;;  %v11864_v36 = vld [vmem:[%s15921_s1 + $0x24] ss:$8 sps:$4 sm:$0xff]  }
  0x31   : > { %16268 = vst [vmem:[#allocation20_spill] sm:$0xff] %v12473_v51  ;;  %v1950_v6 = vrot.slane %v1948_v53, 4  ;;  %v356_v11 = vor.u32 %v355_v56, %v352_v49  ;;  %v12491_v12 = vshrl.u32 %v12460_v44, 16  ;;  %9388 = vmatmul.mubr.msk.bf16.gmra.mrb[8].mxu1 %vm758_vm5, %v12473_v51  ;;  %v1955_v27 = vor.u32 %v1954_v47, %v1953_v60  ;;  %v11867_v50 = vld [vmem:[%s15921_s1 + $0x304] ss:$8 sps:$4 sm:$0xff]   ;;  %1172 = vmatprep.subr.bf16.mxu1 %v11864_v36 }
  0x32   : > { %v366_v30 = vor.u32 %v365_v62, %v361_v61  ;;  %v12499_v33 = vshll.u32 %v12460_v44, 16  ;;  %v12502_v34 = vshll.u32 %v12477_v58, 16  ;;  %v1949_v40 = vsel %vm12333_vm6, %v1945_v4, %v1948_v53  ;;  %869 = vmatprep.mubr.bf16.mxu1 %v15928_v2  ;;  %1173 = vmatpush1.bf16.msra.mxu1 %v11862_v25  ;;  %v12551_v46 = vld [vmem:[%s12252_s20 + $0x44] sm:$0x7]  ;;  %v12888_v8 = vld [vmem:[%s12252_s20 + $0x8c] sm:$0x7] }
  0x33   : > { %16269 = vst [vmem:[#allocation21_spill] sm:$0xff] %v12491_v12  ;;  %v357_v45 = vrot.slane %v356_v11, 4  ;;  %v12511_v49 = vshrl.u32 %v12477_v58, 16  ;;  %v12514_v47 = vshll.u32 %v12488_v1, 16  ;;  %5552 = vmatpush1.bf16.msra.mxu0 %v11859_v59  ;;  %v1956_v52 = vsel %vm12333_vm6, %v1950_v6, %v1955_v27 }
  0x34   : > { %16270 = vst [vmem:[#allocation22_spill] sm:$0xff] %v12499_v33  ;;  %16271 = vst [vmem:[#allocation23_spill] sm:$0xff] %v12502_v34  ;;  %v367_v56 = vrot.slane %v366_v30, 4  ;;  %v1957_v53 = vrot.slane %v12491_v12, 5  ;;  %v1958_v60 = vrot.slane %v12499_v33, 6  ;;  %v12523_v62 = vcombine.low %v1949_v40, %v1956_v52  ;;  %5870 = vmatprep.subr.bf16.mxu0 %v11867_v50 }
  0x35   : > { %16272 = vst [vmem:[#allocation24_spill] sm:$0xff] %v12511_v49  ;;  %16273 = vst [vmem:[#allocation25_spill] sm:$0xff] %v12514_v47  ;;  %v362_v59 = vsel %vm12289_vm3, %v357_v45, %v361_v61  ;;  %v1961_v4 = vrot.slane %v12511_v49, 5  ;;  %v1962_v11 = vrot.slane %v12502_v34, 6  ;;  %v15926_v30 = vshrl.u32 %v12488_v1, 16 }
  0x36   : > { %16274 = vst [vmem:[#allocation26_spill] sm:$0xff] %v12523_v62  ;;  %v372_v6 = vsel %vm12289_vm3, %v367_v56, %v371_v0  ;;  %v1959_v27 = vor.u32 %v1958_v60, %v1957_v53  ;;  %v1969_v36 = vrot.slane %v12514_v47, 6  ;;  %v12534_v40 = vld [vmem:[%s12252_s20 + $0x3c] sm:$0xf]  ;;  %9849 = vmatmul.mubr.msk.bf16.gmra.mrb[8].mxu0 %vm758_vm5, %v12523_v62  ;;  %v376_v50 = vrot.slane %v12491_v12, 4 }
  0x37   : > { %v12538_v61 = vcombine.low %v362_v59, %v372_v6  ;;  %v1963_v45 = vor.u32 %v1962_v11, %v1961_v4  ;;  %v379_v25 = vrot.slane %v12499_v33, 5  ;;  %v12543_v52 = vld [vmem:[%s12252_s20 + $0x40] sm:$0xf]  ;;  %5288 = vmatprep.mubr.bf16.mxu0 %v15928_v2  ;;  %v1968_v56 = vrot.slane %v15926_v30, 5  ;;  %v12714_v33 = vld [vmem:[%s12252_s20 + $0x68] sm:$0x7] }
  0x38   : > { %v1960_v0 = vrot.slane %v1959_v27, 4  ;;  %v385_v53 = vrot.slane %v12502_v34, 5  ;;  %v389_v60 = vrot.slane %v12511_v49, 4  ;;  %v395_v11 = vrot.slane %v12514_v47, 5  ;;  %v12662_v47 = vld [vmem:[%s12252_s20 + $0x58] sm:$0xf] }
  0x39   : > { %16275 = vst [vmem:[#allocation27_spill] sm:$0xff] %v12538_v61  ;;  %v1965_v59 = vrot.slane %v1963_v45, 4  ;;  %v380_v4 = vor.u32 %v379_v25, %v376_v50  ;;  %v12555_v6 = vshrl.u32 %v12534_v40, 16  ;;  %9389 = vmatmul.mubr.msk.bf16.gmra.mrb[12].mxu1 %vm758_vm5, %v12538_v61  ;;  %v1970_v30 = vor.u32 %v1969_v36, %v1968_v56  ;;  %v12711_v49 = vld [vmem:[%s12252_s20 + $0x64] sm:$0xf] }
  0x3a   : > { %v1964_v27 = vsel %vm12333_vm6, %v1960_v0, %v1963_v45  ;;  %v390_v43 = vor.u32 %v389_v60, %v385_v53  ;;  %v12562_v2 = vshll.u32 %v12534_v40, 16  ;;  %v16278_v55 = vmov 0   ;;  %v11868_v60 = vld [vmem:[%s15921_s1 + $0x30] ss:$8 sps:$4 sm:$0xff]  }
  0x3b   : > { %16276 = vst [vmem:[#allocation28_spill] sm:$0xff] %v12555_v6  ;;  %879 = vmatprep.mubr.bf16.mxu1 %v16278_v55  ;;  %v381_v51 = vrot.slane %v380_v4, 4  ;;  %v12566_v50 = vshll.u32 %v12543_v52, 16  ;;  %v12569_v25 = vshrl.u32 %v12543_v52, 16  ;;  %v12572_v61 = vshll.u32 %v12551_v46, 16 }
  0x3c   : > { %16277 = vst [vmem:[#allocation29_spill] sm:$0xff] %v12562_v2  ;;  %v1971_v36 = vsel %vm12333_vm6, %v1965_v59, %v1970_v30  ;;  %v391_v45 = vrot.slane %v390_v43, 4  ;;  %v1972_v0 = vrot.slane %v12555_v6, 5  ;;  %v1973_v56 = vrot.slane %v12562_v2, 6  ;;  %v11870_v43 = vld [vmem:[%s15921_s1 + $0x34] ss:$8 sps:$4 sm:$0xff]  }
  0x3d   : > { %16279 = vst [vmem:[#allocation30_spill] sm:$0xff] %v12566_v50  ;;  %16280 = vst [vmem:[#allocation31_spill] sm:$0xff] %v12569_v25  ;;  %v12581_v4 = vcombine.low %v1964_v27, %v1971_v36  ;;  %v386_v62 = vsel %vm12289_vm3, %v381_v51, %v385_v53  ;;  %v1976_v26 = vrot.slane %v12569_v25, 5  ;;  %v1977_v16 = vrot.slane %v12566_v50, 6  ;;  %v12595_v36 = vld [vmem:[%s12252_s20 + $0x48] sm:$0xf]  ;;  %1174 = vmatprep.subr.bf16.mxu1 %v11870_v43 }
  0x3e   : > { %16281 = vst [vmem:[#allocation32_spill] sm:$0xff] %v12572_v61  ;;  %v396_v30 = vsel %vm12289_vm3, %v391_v45, %v395_v11  ;;  %v1974_v59 = vor.u32 %v1973_v56, %v1972_v0  ;;  %v15950_v24 = vshrl.u32 %v12551_v46, 16  ;;  %v1984_v27 = vrot.slane %v12572_v61, 6  ;;  %1175 = vmatpush1.bf16.msra.mxu1 %v11868_v60 }
  0x3f   : > { %16282 = vst [vmem:[#allocation33_spill] sm:$0xff] %v12581_v4  ;;  %9850 = vmatmul.mubr.msk.bf16.gmra.mrb[12].mxu0 %vm758_vm5, %v12581_v4  ;;  %v12599_v51 = vcombine.low %v386_v62, %v396_v30  ;;  %v1978_v53 = vor.u32 %v1977_v16, %v1976_v26  ;;  %v400_v22 = vrot.slane %v12555_v6, 4  ;;  %v403_v23 = vrot.slane %v12562_v2, 5  ;;  %v12612_v62 = vld [vmem:[%s12252_s20 + $0x50] sm:$0x7] }
  0x40   : > { %5298 = vmatprep.mubr.bf16.mxu0 %v16278_v55  ;;  %v1975_v11 = vrot.slane %v1974_v59, 4  ;;  %v1983_v45 = vrot.slane %v15950_v24, 5  ;;  %v409_v0 = vrot.slane %v12566_v50, 5  ;;  %v413_v56 = vrot.slane %v12569_v25, 4  ;;  %16284 = vst [vmem:[#allocation35_spill] sm:$0xff] %v12612_v62 }
  0x41   : > { %16283 = vst [vmem:[#allocation34_spill] sm:$0xff] %v12599_v51  ;;  %v1980_v16 = vrot.slane %v1978_v53, 4  ;;  %v404_v26 = vor.u32 %v403_v23, %v400_v22  ;;  %v419_v30 = vrot.slane %v12572_v61, 5  ;;  %v12616_v4 = vshrl.u32 %v12595_v36, 16  ;;  %9390 = vmatmul.mubr.msk.bf16.gmra.mrb[16].mxu1 %vm758_vm5, %v12599_v51  ;;  %v11877_v25 = vld [vmem:[%s15921_s1 + $0x84] ss:$8 sps:$4 sm:$0xff]  }
  0x42   : > { %v1979_v43 = vsel %vm12333_vm6, %v1975_v11, %v1978_v53  ;;  %v1985_v59 = vor.u32 %v1984_v27, %v1983_v45  ;;  %v414_v24 = vor.u32 %v413_v56, %v409_v0  ;;  %v12623_v20 = vshll.u32 %v12595_v36, 16  ;;  %889 = vmatprep.mubr.bf16.mxu1 %v16278_v55  ;;  %1637 = vmatprep.subr.bf16.mxu1 %v11877_v25 }
  0x43   : > { %16285 = vst [vmem:[#allocation36_spill] sm:$0xff] %v12616_v4  ;;  %v405_v60 = vrot.slane %v404_v26, 4  ;;  %v12627_v22 = vshll.u32 %v12604_v21, 16  ;;  %v12630_v23 = vshrl.u32 %v12604_v21, 16  ;;  %v12633_v51 = vshll.u32 %v12612_v62, 16 }
  0x44   : > { %16286 = vst [vmem:[#allocation37_spill] sm:$0xff] %v12623_v20  ;;  %v1986_v27 = vsel %vm12333_vm6, %v1980_v16, %v1985_v59  ;;  %v415_v53 = vrot.slane %v414_v24, 4  ;;  %v1987_v11 = vrot.slane %v12616_v4, 5  ;;  %v1988_v45 = vrot.slane %v12623_v20, 6 }
  0x45   : > { %16287 = vst [vmem:[#allocation38_spill] sm:$0xff] %v12627_v22  ;;  %16288 = vst [vmem:[#allocation39_spill] sm:$0xff] %v12630_v23  ;;  %v12639_v56 = vcombine.low %v1979_v43, %v1986_v27  ;;  %v410_v26 = vsel %vm12289_vm3, %v405_v60, %v409_v0  ;;  %v1991_v61 = vrot.slane %v12630_v23, 5  ;;  %v1992_v50 = vrot.slane %v12627_v22, 6  ;;  %v12653_v27 = vld [vmem:[%s12252_s20 + $0x54] sm:$0xf] }
  0x46   : > { %16289 = vst [vmem:[#allocation40_spill] sm:$0xff] %v12633_v51  ;;  %v420_v24 = vsel %vm12289_vm3, %v415_v53, %v419_v30  ;;  %v1989_v16 = vor.u32 %v1988_v45, %v1987_v11  ;;  %v15963_v59 = vshrl.u32 %v12612_v62, 16  ;;  %v1999_v43 = vrot.slane %v12633_v51, 6 }
  0x47   : > { %16290 = vst [vmem:[#allocation41_spill] sm:$0xff] %v12639_v56  ;;  %9851 = vmatmul.mubr.msk.bf16.gmra.mrb[16].mxu0 %vm758_vm5, %v12639_v56  ;;  %v12657_v0 = vcombine.low %v410_v26, %v420_v24  ;;  %v1993_v60 = vor.u32 %v1992_v50, %v1991_v61  ;;  %v424_v2 = vrot.slane %v12616_v4, 4  ;;  %v427_v6 = vrot.slane %v12623_v20, 5  ;;  %v12670_v26 = vld [vmem:[%s12252_s20 + $0x5c] sm:$0x7] }
  0x48   : > { %5308 = vmatprep.mubr.bf16.mxu0 %v16278_v55  ;;  %v1990_v30 = vrot.slane %v1989_v16, 4  ;;  %v1998_v53 = vrot.slane %v15963_v59, 5  ;;  %v433_v11 = vrot.slane %v12627_v22, 5  ;;  %v437_v45 = vrot.slane %v12630_v23, 4 }
  0x49   : > { %16291 = vst [vmem:[#allocation42_spill] sm:$0xff] %v12657_v0  ;;  %v1995_v61 = vrot.slane %v1993_v60, 4  ;;  %v428_v50 = vor.u32 %v427_v6, %v424_v2  ;;  %v443_v24 = vrot.slane %v12633_v51, 5  ;;  %v12674_v56 = vshrl.u32 %v12653_v27, 16  ;;  %9391 = vmatmul.mubr.msk.bf16.gmra.mrb[20].mxu1 %vm758_vm5, %v12657_v0 }
  0x4a   : > { %v1994_v25 = vsel %vm12333_vm6, %v1990_v30, %v1993_v60  ;;  %v2000_v16 = vor.u32 %v1999_v43, %v1998_v53  ;;  %v438_v59 = vor.u32 %v437_v45, %v433_v11  ;;  %v12681_v22 = vshll.u32 %v12653_v27, 16  ;;  %899 = vmatprep.mubr.bf16.mxu1 %v16278_v55  ;;  %v12698_v45 = vld [vmem:[%s12252_s20 + $0x60] sm:$0xf] }
  0x4b   : > { %16292 = vst [vmem:[#allocation43_spill] sm:$0xff] %v12674_v56  ;;  %v429_v2 = vrot.slane %v428_v50, 4  ;;  %v12685_v6 = vshll.u32 %v12662_v47, 16  ;;  %v12688_v51 = vshrl.u32 %v12662_v47, 16  ;;  %v12691_v0 = vshll.u32 %v12670_v26, 16 }
  0x4c   : > { %16293 = vst [vmem:[#allocation44_spill] sm:$0xff] %v12681_v22  ;;  %v2001_v43 = vsel %vm12333_vm6, %v1995_v61, %v2000_v16  ;;  %v439_v60 = vrot.slane %v438_v59, 4  ;;  %v2002_v30 = vrot.slane %v12674_v56, 5  ;;  %v2003_v53 = vrot.slane %v12681_v22, 6 }
  0x4d   : > { %16294 = vst [vmem:[#allocation45_spill] sm:$0xff] %v12685_v6  ;;  %16295 = vst [vmem:[#allocation46_spill] sm:$0xff] %v12688_v51  ;;  %v12700_v50 = vcombine.low %v1994_v25, %v2001_v43  ;;  %v434_v23 = vsel %vm12289_vm3, %v429_v2, %v433_v11  ;;  %v2006_v20 = vrot.slane %v12688_v51, 5  ;;  %v2007_v4 = vrot.slane %v12685_v6, 6 }
  0x4e   : > { %16296 = vst [vmem:[#allocation47_spill] sm:$0xff] %v12691_v0  ;;  %v444_v34 = vsel %vm12289_vm3, %v439_v60, %v443_v24  ;;  %v2004_v61 = vor.u32 %v2003_v53, %v2002_v30  ;;  %v15976_v59 = vshrl.u32 %v12670_v26, 16  ;;  %v2014_v16 = vrot.slane %v12691_v0, 6 }
  0x4f   : > { %16297 = vst [vmem:[#allocation48_spill] sm:$0xff] %v12700_v50  ;;  %9852 = vmatmul.mubr.msk.bf16.gmra.mrb[20].mxu0 %vm758_vm5, %v12700_v50  ;;  %v12718_v11 = vcombine.low %v434_v23, %v444_v34  ;;  %v2008_v25 = vor.u32 %v2007_v4, %v2006_v20  ;;  %v448_v2 = vrot.slane %v12674_v56, 4  ;;  %v451_v43 = vrot.slane %v12681_v22, 5 }
  0x50   : > { %5318 = vmatprep.mubr.bf16.mxu0 %v16278_v55  ;;  %v2005_v24 = vrot.slane %v2004_v61, 4  ;;  %v2013_v60 = vrot.slane %v15976_v59, 5  ;;  %v457_v30 = vrot.slane %v12685_v6, 5  ;;  %v461_v53 = vrot.slane %v12688_v51, 4 }
  0x51   : > { %16298 = vst [vmem:[#allocation49_spill] sm:$0xff] %v12718_v11  ;;  %vm2539_vm7 = vcmask 1041408   ;;  %vm2540_vm8 = vcmask 1045508   ;;  %v2010_v50 = vrot.slane %v2008_v25, 4  ;;  %v452_v34 = vor.u32 %v451_v43, %v448_v2  ;;  %9392 = vmatmul.mubr.msk.bf16.gmra.mrb[24].mxu1 %vm758_vm5, %v12718_v11 }
  0x52   : > { %v467_v20 = vrot.slane %v12691_v0, 5  ;;  %v12729_v4 = vshrl.u32 %v12698_v45, 16  ;;  %v2009_v23 = vsel %vm12333_vm6, %v2005_v24, %v2008_v25  ;;  %v2015_v61 = vor.u32 %v2014_v16, %v2013_v60  ;;  %909 = vmatprep.mubr.bf16.mxu1 %v16278_v55  ;;  %vm12791_vm9 = vmor %vm2539_vm7, %vm2540_vm8 }
  0x53   : > { %v462_v59 = vor.u32 %v461_v53, %v457_v30  ;;  %v12736_v6 = vshll.u32 %v12698_v45, 16  ;;  %v453_v51 = vrot.slane %v452_v34, 4  ;;  %v12740_v2 = vshll.u32 %v12711_v49, 16 }
  0x54   : > { %16299 = vst [vmem:[#allocation50_spill] sm:$0xff] %v12729_v4  ;;  %v12743_v43 = vshrl.u32 %v12711_v49, 16  ;;  %v12746_v0 = vshll.u32 %v12714_v33, 16  ;;  %v2016_v25 = vsel %vm12333_vm6, %v2010_v50, %v2015_v61  ;;  %v2017_v24 = vrot.slane %v12729_v4, 5 }
  0x55   : > { %16300 = vst [vmem:[#allocation51_spill] sm:$0xff] %v12736_v6  ;;  %16301 = vst [vmem:[#allocation52_spill] sm:$0xff] %v12740_v2  ;;  %v463_v16 = vrot.slane %v462_v59, 4  ;;  %v2018_v60 = vrot.slane %v12736_v6, 6  ;;  %v12752_v53 = vcombine.low %v2009_v23, %v2016_v25  ;;  %v458_v34 = vsel %vm12289_vm3, %v453_v51, %v457_v30  ;;  %v12769_v25 = vld [vmem:[%s12252_s20 + $0x6c] sm:$0xf] }
  0x56   : > { %16302 = vst [vmem:[#allocation53_spill] sm:$0xff] %v12743_v43  ;;  %16303 = vst [vmem:[#allocation54_spill] sm:$0xff] %v12746_v0  ;;  %v2021_v11 = vrot.slane %v12743_v43, 5  ;;  %v2022_v22 = vrot.slane %v12740_v2, 6  ;;  %v15988_v50 = vshrl.u32 %v12714_v33, 16  ;;  %v2029_v59 = vrot.slane %v12746_v0, 6 }
  0x57   : > { %16304 = vst [vmem:[#allocation55_spill] sm:$0xff] %v12752_v53  ;;  %v468_v56 = vsel %vm12289_vm3, %v463_v16, %v467_v20  ;;  %v2019_v12 = vor.u32 %v2018_v60, %v2017_v24  ;;  %9853 = vmatmul.mubr.msk.bf16.gmra.mrb[24].mxu0 %vm758_vm5, %v12752_v53  ;;  %v472_v51 = vrot.slane %v12729_v4, 4  ;;  %v475_v30 = vrot.slane %v12736_v6, 5 }
  0x58   : > { %v12764_v23 = vcombine.low %v458_v34, %v468_v56  ;;  %v2023_v61 = vor.u32 %v2022_v22, %v2021_v11  ;;  %5328 = vmatprep.mubr.bf16.mxu0 %v16278_v55  ;;  %v2028_v16 = vrot.slane %v15988_v50, 5  ;;  %v481_v24 = vrot.slane %v12740_v2, 5  ;;  %v12778_v11 = vld [vmem:[%s12252_s20 + $0x70] sm:$0xf]  ;;  %v12786_v2 = vld [vmem:[%s12252_s20 + $0x74] sm:$0x7] }
  0x59   : > { %v2020_v20 = vrot.slane %v2019_v12, 4  ;;  %v485_v60 = vrot.slane %v12743_v43, 4  ;;  %v476_v34 = vor.u32 %v475_v30, %v472_v51  ;;  %v491_v22 = vrot.slane %v12746_v0, 5 }
  0x5a   : > { %16305 = vst [vmem:[#allocation56_spill] sm:$0xff] %v12764_v23  ;;  %v2025_v56 = vrot.slane %v2023_v61, 4  ;;  %9393 = vmatmul.mubr.msk.bf16.gmra.mrb[28].mxu1 %vm758_vm5, %v12764_v23  ;;  %v2030_v53 = vor.u32 %v2029_v59, %v2028_v16  ;;  %v2551_v50 = vrot.slane %v12295_v35, 6  ;;  %v16306_v30 = vmov 0 }
  0x5b   : > { %v2024_v12 = vsel %vm12333_vm6, %v2020_v20, %v2023_v61  ;;  %v486_v6 = vor.u32 %v485_v60, %v481_v24  ;;  %919 = vmatprep.mubr.bf16.mxu1 %v16278_v55  ;;  %v477_v51 = vrot.slane %v476_v34, 4  ;;  %v16307_v30 = vsel %vm12791_vm9, 4294967295, %v16306_v30  ;;  %v12806_v34 = vld [vmem:[%s12252_s20 + $0x78] sm:$0xf] }
  0x5c   : > { %16308 = vst [vmem:[#allocation57_spill] sm:$0xff] %v16307_v30  ;;  %v9555_v23 = vrot.slane %v12287_v31, 10  ;;  %v12797_v61 = vshrl.u32 %v12769_v25, 16  ;;  %v12800_v59 = vshll.u32 %v12769_v25, 16  ;;  %v2031_v35 = vsel %vm12333_vm6, %v2025_v56, %v2030_v53  ;;  %v16383_v30 = vld [vmem:[#allocation14_spill] sm:$0xff] }
  0x5d   : > { %v487_v20 = vrot.slane %v486_v6, 4  ;;  %v2553_v16 = vrot.slane %v2551_v50, 4  ;;  %v2554_v60 = vrot.slane %v12298_v37, 6  ;;  %v12808_v0 = vcombine.low %v2024_v12, %v2031_v35  ;;  %v12823_v37 = vld [vmem:[%s12252_s20 + $0x7c] sm:$0xf] }
  0x5e   : > { %16309 = vst [vmem:[#allocation58_spill] sm:$0xff] %v12797_v61  ;;  %16310 = vst [vmem:[#allocation59_spill] sm:$0xff] %v12800_v59  ;;  %v482_v31 = vsel %vm12289_vm3, %v477_v51, %v481_v24  ;;  %v496_v43 = vrot.slane %v12797_v61, 4  ;;  %v499_v4 = vrot.slane %v12800_v59, 5  ;;  %v12817_v6 = vshll.u32 %v12778_v11, 16 }
  0x5f   : > { %16311 = vst [vmem:[#allocation60_spill] sm:$0xff] %v12808_v0  ;;  %v492_v57 = vsel %vm12289_vm3, %v487_v20, %v491_v22  ;;  %v12820_v53 = vshrl.u32 %v12778_v11, 16  ;;  %9854 = vmatmul.mubr.msk.bf16.gmra.mrb[28].mxu0 %vm758_vm5, %v12808_v0  ;;  %v2552_v24 = vsel %vm12791_vm9, %v9555_v23, %v2551_v50  ;;  %v12832_v51 = vshll.u32 %v12786_v2, 16  ;;  %v12835_v22 = vld [vmem:[%s12252_s20 + $0x80] sm:$0x7] }
  0x60   : > { %16312 = vst [vmem:[#allocation61_spill] sm:$0xff] %v12817_v6  ;;  %v12827_v56 = vcombine.low %v482_v31, %v492_v57  ;;  %v500_v12 = vor.u32 %v499_v4, %v496_v43  ;;  %5577 = vmatprep.mubr.bf16.mxu0 %v16278_v55  ;;  %v2555_v35 = vsel %vm12791_vm9, %v2553_v16, %v2554_v60  ;;  %v505_v20 = vrot.slane %v12817_v6, 5  ;;  %v11865_v23 = vld [vmem:[%s15921_s1 + $0x300] ss:$8 sps:$4 sm:$0xff]  }
  0x61   : > { %16313 = vst [vmem:[#allocation62_spill] sm:$0xff] %v12820_v53  ;;  %16315 = vst [vmem:[#allocation64_spill] sm:$0xff] %v12832_v51  ;;  %v509_v57 = vrot.slane %v12820_v53, 4  ;;  %v2558_v31 = vrot.slane %v12347_v5, 6  ;;  %v515_v4 = vrot.slane %v12832_v51, 5  ;;  %v9556_v43 = vrot.slane %v12340_v63, 10 }
  0x62   : > { %16314 = vst [vmem:[#allocation63_spill] sm:$0xff] %v12827_v56  ;;  %v501_v0 = vrot.slane %v500_v12, 4  ;;  %v12846_v50 = vshrl.u32 %v12806_v34, 16  ;;  %9394 = vmatmul.mubr.msk.bf16.gmra.mrb[32].mxu1 %vm758_vm5, %v12827_v56  ;;  %v2561_v5 = vrot.slane %v12356_v10, 6  ;;  %v12855_v12 = vshll.u32 %v12806_v34, 16 }
  0x63   : > { %v510_v16 = vor.u32 %v509_v57, %v505_v20  ;;  %v2560_v60 = vrot.slane %v2558_v31, 4  ;;  %v12858_v51 = vld [vmem:[%s12252_s20 + $0x84] sm:$0xf]  ;;  %v12860_v63 = vcombine.low %v2552_v24, %v2555_v35  ;;  %929 = vmatprep.mubr.bf16.mxu1 %v16278_v55  ;;  %v12865_v6 = vshll.u32 %v12823_v37, 16  ;;  %v11873_v53 = vld [vmem:[%s15921_s1 + $0x314] ss:$8 sps:$4 sm:$0xff]  }
  0x64   : > { %16316 = vst [vmem:[#allocation65_spill] sm:$0xff] %v12846_v50  ;;  %16317 = vst [vmem:[#allocation66_spill] sm:$0xff] %v12855_v12  ;;  %v520_v56 = vrot.slane %v12846_v50, 4  ;;  %v12868_v57 = vshrl.u32 %v12823_v37, 16  ;;  %v506_v59 = vsel %vm12289_vm3, %v501_v0, %v505_v20  ;;  %v523_v24 = vrot.slane %v12855_v12, 5 }
  0x65   : > { %16318 = vst [vmem:[#allocation67_spill] sm:$0xff] %v12860_v63  ;;  %16319 = vst [vmem:[#allocation68_spill] sm:$0xff] %v12865_v6  ;;  %v511_v61 = vrot.slane %v510_v16, 4  ;;  %v12877_v35 = vshll.u32 %v12835_v22, 16  ;;  %v12880_v50 = vld [vmem:[%s12252_s20 + $0x88] sm:$0xf]  ;;  %v2559_v29 = vsel %vm12791_vm9, %v9556_v43, %v2558_v31 }
  0x66   : > { %16320 = vst [vmem:[#allocation69_spill] sm:$0xff] %v12868_v57  ;;  %v529_v13 = vrot.slane %v12865_v6, 5  ;;  %v533_v17 = vrot.slane %v12868_v57, 4  ;;  %v9557_v9 = vrot.slane %v12402_v48, 10  ;;  %v524_v20 = vor.u32 %v523_v24, %v520_v56  ;;  %v12915_v24 = vld [vmem:[%s12252_s20 + $0x90] sm:$0xf] }
  0x67   : > { %16321 = vst [vmem:[#allocation70_spill] sm:$0xff] %v12877_v35  ;;  %v516_v0 = vsel %vm12289_vm3, %v511_v61, %v515_v4  ;;  %v539_v16 = vrot.slane %v12877_v35, 5  ;;  %v2565_v12 = vrot.slane %v12413_v54, 6  ;;  %9881 = vmatmul.mubr.msk.bf16.vlgmr.msra.gmra.mrb[0].mxu0 %vm758_vm5, %v12860_v63  ;;  %v2568_v48 = vrot.slane %v12424_v3, 6  ;;  %v11871_v61 = vld [vmem:[%s15921_s1 + $0x310] ss:$8 sps:$4 sm:$0xff]  }
  0x68   : > { %v12896_v31 = vcombine.low %v506_v59, %v516_v0  ;;  %v534_v43 = vor.u32 %v533_v17, %v529_v13  ;;  %v12900_v6 = vshrl.u32 %v12858_v51, 16  ;;  %v11880_v54 = vld [vmem:[%s15921_s1 + $0x324] ss:$8 sps:$4 sm:$0xff]   ;;  %5871 = vmatpush1.bf16.msra.mxu0 %v11865_v23  ;;  %5587 = vmatprep.mubr.bf16.mxu0 %v16278_v55  ;;  %v2562_v17 = vsel %vm12791_vm9, %v2560_v60, %v2561_v5  ;;  %v12925_v57 = vld [vmem:[%s12252_s20 + $0x94] sm:$0xf] }
  0x69   : > { %v525_v59 = vrot.slane %v524_v20, 4  ;;  %v2567_v56 = vrot.slane %v2565_v12, 4  ;;  %v12912_v4 = vshll.u32 %v12858_v51, 16  ;;  %v12919_v35 = vshll.u32 %v12880_v50, 16  ;;  %5872 = vmatprep.subr.bf16.mxu0 %v11873_v53  ;;  %v12953_v3 = vld [vmem:[%s12252_s20 + $0x98] sm:$0x7] }
  0x6a   : > { %16322 = vst [vmem:[#allocation71_spill] sm:$0xff] %v12896_v31  ;;  %16323 = vst [vmem:[#allocation72_spill] sm:$0xff] %v12900_v6  ;;  %v535_v0 = vrot.slane %v534_v43, 4  ;;  %v544_v63 = vrot.slane %v12900_v6, 4  ;;  %v12922_v23 = vshrl.u32 %v12880_v50, 16  ;;  %9395 = vmatmul.mubr.msk.bf16.gmra.mrb[36].mxu1 %vm758_vm5, %v12896_v31  ;;  %v12933_v20 = vshll.u32 %v12888_v8, 16 }
  0x6b   : > { %16324 = vst [vmem:[#allocation73_spill] sm:$0xff] %v12912_v4  ;;  %16325 = vst [vmem:[#allocation74_spill] sm:$0xff] %v12919_v35  ;;  %v530_v60 = vsel %vm12289_vm3, %v525_v59, %v529_v13  ;;  %v547_v5 = vrot.slane %v12912_v4, 5  ;;  %v11878_v43 = vld [vmem:[%s15921_s1 + $0x320] ss:$8 sps:$4 sm:$0xff]   ;;  %v12938_v6 = vcombine.low %v2559_v29, %v2562_v17  ;;  %939 = vmatprep.mubr.bf16.mxu1 %v16278_v55  ;;  %v553_v31 = vrot.slane %v12919_v35, 5 }
  0x6c   : > { %16326 = vst [vmem:[#allocation75_spill] sm:$0xff] %v12922_v23  ;;  %16327 = vst [vmem:[#allocation76_spill] sm:$0xff] %v12933_v20  ;;  %v540_v53 = vsel %vm12289_vm3, %v535_v0, %v539_v16  ;;  %v557_v13 = vrot.slane %v12922_v23, 4  ;;  %v11890_v59 = vld [vmem:[%s15921_s1 + $0x334] ss:$8 sps:$4 sm:$0xff]   ;;  %v2566_v4 = vsel %vm12791_vm9, %v9557_v9, %v2565_v12  ;;  %v2569_v29 = vsel %vm12791_vm9, %v2567_v56, %v2568_v48 }
  0x6d   : > { %16328 = vst [vmem:[#allocation77_spill] sm:$0xff] %v12938_v6  ;;  %v548_v17 = vor.u32 %v547_v5, %v544_v63  ;;  %5873 = vmatpush1.bf16.msra.mxu0 %v11871_v61  ;;  %v12955_v16 = vcombine.low %v530_v60, %v540_v53  ;;  %v563_v35 = vrot.slane %v12933_v20, 5  ;;  %v12959_v23 = vshrl.u32 %v12915_v24, 16  ;;  %v12972_v48 = vld [vmem:[%s12252_s20 + $0x9c] sm:$0xf] }
  0x6e   : > { %v558_v0 = vor.u32 %v557_v13, %v553_v31  ;;  %5874 = vmatprep.subr.bf16.mxu0 %v11880_v54  ;;  %v2572_v28 = vrot.slane %v12477_v58, 6  ;;  %v12963_v9 = vshll.u32 %v12915_v24, 16  ;;  %v12966_v12 = vshll.u32 %v12925_v57, 16  ;;  %v11888_v61 = vld [vmem:[%s15921_s1 + $0x330] ss:$8 sps:$4 sm:$0xff]  }
  0x6f   : > { %16329 = vst [vmem:[#allocation78_spill] sm:$0xff] %v12955_v16  ;;  %16330 = vst [vmem:[#allocation79_spill] sm:$0xff] %v12959_v23  ;;  %v12969_v63 = vshrl.u32 %v12925_v57, 16  ;;  %9882 = vmatmul.mubr.msk.bf16.gmra.mrb[4].mxu0 %vm758_vm5, %v12938_v6  ;;  %v549_v54 = vrot.slane %v548_v17, 4  ;;  %v568_v56 = vrot.slane %v12959_v23, 4  ;;  %v12990_v6 = vcombine.low %v2566_v4, %v2569_v29 }
  0x70   : > { %16331 = vst [vmem:[#allocation80_spill] sm:$0xff] %v12963_v9  ;;  %16332 = vst [vmem:[#allocation81_spill] sm:$0xff] %v12966_v12  ;;  %v559_v58 = vrot.slane %v558_v0, 4  ;;  %v12981_v60 = vld [vmem:[%s12252_s20 + $0xa0] sm:$0xf]  ;;  %5597 = vmatprep.mubr.bf16.mxu0 %v16278_v55  ;;  %v571_v53 = vrot.slane %v12963_v9, 5 }
  0x71   : > { %16333 = vst [vmem:[#allocation82_spill] sm:$0xff] %v12969_v63  ;;  %v11900_v5 = vld [vmem:[%s15921_s1 + $0x344] ss:$8 sps:$4 sm:$0xff]   ;;  %v577_v13 = vrot.slane %v12966_v12, 5  ;;  %v581_v20 = vrot.slane %v12969_v63, 4  ;;  %5875 = vmatpush1.bf16.msra.mxu0 %v11878_v43  ;;  %16334 = vst [vmem:[#allocation83_spill] sm:$0xff] %v12990_v6  ;;  %v554_v4 = vsel %vm12289_vm3, %v549_v54, %v553_v31 }
  0x72   : > { %v9558_v17 = vrot.slane %v12460_v44, 10  ;;  %v12994_v0 = vshll.u32 %v12953_v3, 16  ;;  %5876 = vmatprep.subr.bf16.mxu0 %v11890_v59  ;;  %9396 = vmatmul.mubr.msk.bf16.gmra.mrb[40].mxu1 %vm758_vm5, %v12955_v16  ;;  %v2574_v23 = vrot.slane %v2572_v28, 4  ;;  %v2575_v9 = vrot.slane %v12488_v1, 6  ;;  %v13030_v63 = vld [vmem:[%s12252_s20 + $0xac] sm:$0xf] }
  0x73   : > { %v572_v10 = vor.u32 %v571_v53, %v568_v56  ;;  %v582_v12 = vor.u32 %v581_v20, %v577_v13  ;;  %949 = vmatprep.mubr.bf16.mxu1 %v16278_v55  ;;  %v564_v44 = vsel %vm12289_vm3, %v559_v58, %v563_v35  ;;  %v13006_v59 = vshrl.u32 %v12972_v48, 16  ;;  %v13010_v56 = vld [vmem:[%s12252_s20 + $0xa4] sm:$0x7]  ;;  %v13023_v58 = vld [vmem:[%s12252_s20 + $0xa8] sm:$0xf] }
  0x74   : > { %16335 = vst [vmem:[#allocation84_spill] sm:$0xff] %v12994_v0  ;;  %v587_v43 = vrot.slane %v12994_v0, 5  ;;  %v2579_v16 = vrot.slane %v12543_v52, 6  ;;  %v13013_v20 = vshll.u32 %v12972_v48, 16  ;;  %v13016_v53 = vshll.u32 %v12981_v60, 16 }
  0x75   : > { %16336 = vst [vmem:[#allocation85_spill] sm:$0xff] %v13006_v59  ;;  %v573_v29 = vrot.slane %v572_v10, 4  ;;  %5877 = vmatpush1.bf16.msra.mxu0 %v11888_v61  ;;  %v583_v31 = vrot.slane %v582_v12, 4  ;;  %v592_v35 = vrot.slane %v13006_v59, 4  ;;  %v13020_v54 = vshrl.u32 %v12981_v60, 16 }
  0x76   : > { %16337 = vst [vmem:[#allocation86_spill] sm:$0xff] %v13013_v20  ;;  %16338 = vst [vmem:[#allocation87_spill] sm:$0xff] %v13016_v53  ;;  %6189 = vmatprep.subr.bf16.mxu0 %v11900_v5  ;;  %v13025_v10 = vcombine.low %v554_v4, %v564_v44  ;;  %v595_v52 = vrot.slane %v13013_v20, 5  ;;  %v601_v0 = vrot.slane %v13016_v53, 5  ;;  %v2573_v12 = vsel %vm12791_vm9, %v9558_v17, %v2572_v28 }
  0x77   : > { %16339 = vst [vmem:[#allocation88_spill] sm:$0xff] %v13020_v54  ;;  %9883 = vmatmul.mubr.msk.bf16.gmra.mrb[8].mxu0 %vm758_vm5, %v12990_v6  ;;  %v2576_v61 = vsel %vm12791_vm9, %v2574_v23, %v2575_v9  ;;  %v605_v59 = vrot.slane %v13020_v54, 4  ;;  %v578_v5 = vsel %vm12289_vm3, %v573_v29, %v577_v13  ;;  %v9559_v4 = vrot.slane %v12534_v40, 10 }
  0x78   : > { %16340 = vst [vmem:[#allocation89_spill] sm:$0xff] %v13025_v10  ;;  %5607 = vmatprep.mubr.bf16.mxu0 %v16278_v55  ;;  %v2581_v44 = vrot.slane %v2579_v16, 4  ;;  %v2582_v53 = vrot.slane %v12551_v46, 6  ;;  %v588_v6 = vsel %vm12289_vm3, %v583_v31, %v587_v43  ;;  %v596_v20 = vor.u32 %v595_v52, %v592_v35 }
  0x79   : > { %v606_v28 = vor.u32 %v605_v59, %v601_v0  ;;  %v13047_v17 = vshll.u32 %v13010_v56, 16  ;;  %v13052_v23 = vshrl.u32 %v13023_v58, 16  ;;  %v13055_v9 = vshll.u32 %v13023_v58, 16 }
  0x7a   : > { %9397 = vmatmul.mubr.msk.bf16.gmra.mrb[44].mxu1 %vm758_vm5, %v13025_v10  ;;  %v13057_v40 = vcombine.low %v2573_v12, %v2576_v61  ;;  %v13061_v13 = vshll.u32 %v13030_v63, 16  ;;  %v13064_v43 = vshrl.u32 %v13030_v63, 16  ;;  %v13066_v59 = vcombine.low %v578_v5, %v588_v6 }
  0x7b   : > { %16341 = vst [vmem:[#allocation90_spill] sm:$0xff] %v13047_v17  ;;  %16342 = vst [vmem:[#allocation91_spill] sm:$0xff] %v13052_v23  ;;  %959 = vmatprep.mubr.bf16.mxu1 %v16278_v55  ;;  %v2580_v29 = vsel %vm12791_vm9, %v9559_v4, %v2579_v16  ;;  %v2583_v31 = vsel %vm12791_vm9, %v2581_v44, %v2582_v53  ;;  %v597_v35 = vrot.slane %v596_v20, 4  ;;  %v607_v52 = vrot.slane %v606_v28, 4  ;;  %v13081_v16 = vld [vmem:[%s12252_s20 + $0xb0] sm:$0x7] }
  0x7c   : > { %16343 = vst [vmem:[#allocation92_spill] sm:$0xff] %v13055_v9  ;;  %16344 = vst [vmem:[#allocation93_spill] sm:$0xff] %v13057_v40  ;;  %v611_v12 = vrot.slane %v13047_v17, 5  ;;  %v2586_v61 = vrot.slane %v12604_v21, 6  ;;  %v616_v10 = vrot.slane %v13052_v23, 4  ;;  %v619_v54 = vrot.slane %v13055_v9, 5 }
  0x7d   : > { %16345 = vst [vmem:[#allocation94_spill] sm:$0xff] %v13061_v13  ;;  %16346 = vst [vmem:[#allocation95_spill] sm:$0xff] %v13064_v43  ;;  %v625_v6 = vrot.slane %v13061_v13, 5  ;;  %v629_v5 = vrot.slane %v13064_v43, 4  ;;  %v13084_v20 = vcombine.low %v2580_v29, %v2583_v31  ;;  %v13087_v53 = vld [vmem:[%s12252_s20 + $0xb4] sm:$0xf]  ;;  %v602_v4 = vsel %vm12289_vm3, %v597_v35, %v601_v0 }
  0x7e   : > { %16347 = vst [vmem:[#allocation96_spill] sm:$0xff] %v13066_v59  ;;  %v13090_v21 = vld [vmem:[%s12252_s20 + $0xb8] sm:$0xf]  ;;  %v9560_v44 = vrot.slane %v12595_v36, 10  ;;  %v2588_v28 = vrot.slane %v2586_v61, 4  ;;  %v2589_v13 = vrot.slane %v12612_v62, 6  ;;  %v620_v29 = vor.u32 %v619_v54, %v616_v10 }
  0x7f   : > { %9884 = vmatmul.mubr.msk.bf16.gmra.mrb[12].mxu0 %vm758_vm5, %v13057_v40  ;;  %16348 = vst [vmem:[#allocation97_spill] sm:$0xff] %v13084_v20  ;;  %v612_v40 = vsel %vm12289_vm3, %v607_v52, %v611_v12  ;;  %v630_v31 = vor.u32 %v629_v5, %v625_v6  ;;  %v13101_v43 = vshll.u32 %v13081_v16, 16  ;;  %v13105_v0 = vshrl.u32 %v13087_v53, 16 }
  0x80   : > { %5617 = vmatprep.mubr.bf16.mxu0 %v16278_v55  ;;  %v13108_v36 = vshll.u32 %v13087_v53, 16  ;;  %v13111_v35 = vshll.u32 %v13090_v21, 16  ;;  %v2587_v54 = vsel %vm12791_vm9, %v9560_v44, %v2586_v61  ;;  %v2590_v10 = vsel %vm12791_vm9, %v2588_v28, %v2589_v13  ;;  %v13132_v13 = vld [vmem:[%s12252_s20 + $0xbc] sm:$0x7] }
  0x81   : > { %v13120_v52 = vcombine.low %v602_v4, %v612_v40  ;;  %v621_v12 = vrot.slane %v620_v29, 4  ;;  %v631_v5 = vrot.slane %v630_v31, 4  ;;  %v635_v9 = vrot.slane %v13101_v43, 5 }
  0x82   : > { %9398 = vmatmul.mubr.msk.bf16.gmra.mrb[48].mxu1 %vm758_vm5, %v13066_v59  ;;  %16349 = vst [vmem:[#allocation98_spill] sm:$0xff] %v13111_v35  ;;  %v13114_v59 = vshrl.u32 %v13090_v21, 16  ;;  %v640_v23 = vrot.slane %v13105_v0, 4  ;;  %v643_v17 = vrot.slane %v13108_v36, 5  ;;  %v649_v62 = vrot.slane %v13111_v35, 5 }
  0x83   : > { %969 = vmatprep.mubr.bf16.mxu1 %v16278_v55  ;;  %16350 = vst [vmem:[#allocation99_spill] sm:$0xff] %v13120_v52  ;;  %v2593_v40 = vrot.slane %v12662_v47, 6  ;;  %v13136_v4 = vcombine.low %v2587_v54, %v2590_v10  ;;  %v626_v44 = vsel %vm12289_vm3, %v621_v12, %v625_v6  ;;  %v636_v28 = vsel %vm12289_vm3, %v631_v5, %v635_v9 }
  0x84   : > { %v653_v61 = vrot.slane %v13114_v59, 4  ;;  %v644_v29 = vor.u32 %v643_v17, %v640_v23  ;;  %v9561_v47 = vrot.slane %v12653_v27, 10  ;;  %v13148_v54 = vcombine.low %v626_v44, %v636_v28 }
  0x85   : > { %16351 = vst [vmem:[#allocation100_spill] sm:$0xff] %v13136_v4  ;;  %v2595_v35 = vrot.slane %v2593_v40, 4  ;;  %v2600_v23 = vrot.slane %v12711_v49, 6  ;;  %v3072_v9 = vrot.slane %v12301_v38, 6  ;;  %v3073_v5 = vrot.slane %v12304_v39, 7 }
  0x86   : > { %v654_v31 = vor.u32 %v653_v61, %v649_v62  ;;  %16352 = vst [vmem:[#allocation101_spill] sm:$0xff] %v13148_v54  ;;  %v645_v6 = vrot.slane %v644_v29, 4  ;;  %v2594_v17 = vsel %vm12791_vm9, %v9561_v47, %v2593_v40  ;;  %v3076_v61 = vrot.slane %v12310_v42, 6 }
  0x87   : > { %9885 = vmatmul.mubr.msk.bf16.gmra.mrb[16].mxu0 %vm758_vm5, %v13084_v20  ;;  %v13144_v20 = vshll.u32 %v13132_v13, 16  ;;  %v3077_v44 = vrot.slane %v12307_v41, 7  ;;  %v9562_v38 = vrot.slane %v12698_v45, 10  ;;  %v2602_v39 = vrot.slane %v2600_v23, 4 }
  0x88   : > { %5627 = vmatprep.mubr.bf16.mxu0 %v16278_v55  ;;  %v655_v10 = vrot.slane %v654_v31, 4  ;;  %v2603_v42 = vrot.slane %v12714_v33, 6  ;;  %vm3056_vm10 = vsmask.f32 1280  ;;  %vm3057_vm11 = vsmask.f32 5392 }
  0x89   : > { %v659_v12 = vrot.slane %v13144_v20, 5  ;;  %v3074_v41 = vor.u32 %v3073_v5, %v3072_v9  ;;  %v3078_v40 = vor.u32 %v3077_v44, %v3076_v61  ;;  %v2607_v29 = vrot.slane %v12778_v11, 6  ;;  %vm13184_vm12 = vmor %vm3056_vm10, %vm3057_vm11  ;;  %v13203_v61 = vld [vmem:[%s12252_s20] sm:$0xf]  ;;  %v13206_v44 = vld [vmem:[%s12252_s20 + $0x4] sm:$0xf] }
  0x8a   : > { %9399 = vmatmul.mubr.msk.bf16.gmra.mrb[52].mxu1 %vm758_vm5, %v13120_v52  ;;  %v2596_v52 = vrot.slane %v12670_v26, 6  ;;  %v2604_v45 = vsel %vm12791_vm9, %v2602_v39, %v2603_v42  ;;  %v16355_v31 = vmov 0  ;;  %v2610_v9 = vrot.slane %v12786_v2, 6  ;;  %v11887_v39 = vld [vmem:[%s15921_s1 + $0x94] ss:$8 sps:$4 sm:$0xff]  }
  0x8b   : > { %979 = vmatprep.mubr.bf16.mxu1 %v16278_v55  ;;  %v660_v49 = vsel %vm12289_vm3, %v655_v10, %v659_v12  ;;  %v16356_v31 = vsel %vm13184_vm12, 4294967295, %v16355_v31  ;;  %v3075_v47 = vrot.slane %v3074_v41, 4  ;;  %v11885_v41 = vld [vmem:[%s15921_s1 + $0x90] ss:$8 sps:$4 sm:$0xff]   ;;  %v9568_v32 = vrot.slane %v13023_v58, 10 }
  0x8c   : > { %v2597_v27 = vsel %vm12791_vm9, %v2595_v35, %v2596_v52  ;;  %v650_v35 = vsel %vm12289_vm3, %v645_v6, %v649_v62  ;;  %v2601_v62 = vsel %vm12791_vm9, %v9562_v38, %v2600_v23  ;;  %16357 = vst [vmem:[#allocation104_spill] sm:$0xff] %v16356_v31  ;;  %v3080_v6 = vrot.slane %v3078_v40, 4  ;;  %v11993_v31 = vld [vmem:[%s15921_s1 + $0x424] ss:$8 sps:$4 sm:$0xff]  }
  0x8d   : > { %v13165_v28 = vcombine.low %v2594_v17, %v2597_v27  ;;  %v13174_v52 = vcombine.low %v650_v35, %v660_v49  ;;  %v13190_v10 = vcombine.low %v2601_v62, %v2604_v45  ;;  %v3079_v12 = vsel %vm13184_vm12, %v3075_v47, %v3078_v40  ;;  %v13237_v47 = vld [vmem:[%s12252_s20 + $0xc] sm:$0xf] }
  0x8e   : > { %v3084_v17 = vsel %vm13184_vm12, %v3080_v6, %v12351_v7  ;;  %v9563_v27 = vrot.slane %v12769_v25, 10  ;;  %v2609_v23 = vrot.slane %v2607_v29, 4  ;;  %v9402_v35 = vcombine.low %v13203_v61, %v13206_v44  ;;  %v11875_v7 = vld [vmem:[%s15921_s1 + $0x80] ss:$8 sps:$4 sm:$0xff]   ;;  %v13240_v6 = vld [vmem:[%s12252_s20 + $0x10] sm:$0xf] }
  0x8f   : > { %9886 = vmatmul.mubr.msk.bf16.gmra.mrb[20].mxu0 %vm758_vm5, %v13136_v4  ;;  %16353 = vst [vmem:[#allocation102_spill] sm:$0xff] %v13165_v28  ;;  %16354 = vst [vmem:[#allocation103_spill] sm:$0xff] %v13174_v52  ;;  %v13200_v5 = vcombine.low %v3079_v12, %v3084_v17  ;;  %v2614_v38 = vrot.slane %v12823_v37, 6  ;;  %v9564_v40 = vrot.slane %v12806_v34, 10  ;;  %v2617_v45 = vrot.slane %v12835_v22, 6 }
  0x90   : > { %5637 = vmatprep.mubr.bf16.mxu0 %v16278_v55  ;;  %16358 = vst [vmem:[#allocation105_spill] sm:$0xff] %v13190_v10  ;;  %v2608_v2 = vsel %vm12791_vm9, %v9563_v27, %v2607_v29  ;;  %v2611_v49 = vsel %vm12791_vm9, %v2609_v23, %v2610_v9  ;;  %v11897_v29 = vld [vmem:[%s15921_s1 + $0xa4] ss:$8 sps:$4 sm:$0xff]   ;;  %v13244_v12 = vcombine.low %v13237_v47, %v13240_v6  ;;  %v11895_v22 = vld [vmem:[%s15921_s1 + $0xa0] ss:$8 sps:$4 sm:$0xff]   ;;  %v2621_v23 = vrot.slane %v12880_v50, 6 }
  0x91   : > { %16359 = vst [vmem:[#allocation106_spill] sm:$0xff] %v13200_v5  ;;  %v13225_v42 = vcombine.low %v2608_v2, %v2611_v49  ;;  %v2616_v62 = vrot.slane %v2614_v38, 4  ;;  %v2615_v17 = vsel %vm12791_vm9, %v9564_v40, %v2614_v38  ;;  %v11907_v9 = vld [vmem:[%s15921_s1 + $0xb4] ss:$8 sps:$4 sm:$0xff]   ;;  %v9565_v2 = vrot.slane %v12858_v51, 10 }
  0x92   : > { %9400 = vmatmul.mubr.msk.bf16.gmra.mrb[56].mxu1 %vm758_vm5, %v13148_v54  ;;  %16361 = vst [vmem:[#allocation108_spill] sm:$0xff] %v13244_v12  ;;  %v2623_v49 = vrot.slane %v2621_v23, 4  ;;  %v2624_v38 = vrot.slane %v12888_v8, 6  ;;  %v13277_v40 = vld [vmem:[%s12252_s20 + $0x1c] sm:$0xf]  ;;  %v2645_v54 = vrot.slane %v13081_v16, 6 }
  0x93   : > { %989 = vmatprep.mubr.bf16.mxu1 %v16278_v55  ;;  %16360 = vst [vmem:[#allocation107_spill] sm:$0xff] %v13225_v42  ;;  %v2618_v27 = vsel %vm12791_vm9, %v2616_v62, %v2617_v45  ;;  %v2622_v8 = vsel %vm12791_vm9, %v9565_v2, %v2621_v23  ;;  %v13299_v23 = vld [vmem:[%s12252_s20 + $0x24] sm:$0xf]  ;;  %vm1377_vm13 = vcmask 1042432   ;;  %vm1378_vm14 = vcmask 1046532  }
  0x94   : > { %v2625_v45 = vsel %vm12791_vm9, %v2623_v49, %v2624_v38  ;;  %v2635_v38 = vrot.slane %v12981_v60, 6  ;;  %vm13636_vm15 = vmor %vm1377_vm13, %vm1378_vm14  ;;  %vm3669_vm0 = vcmask 1040384   ;;  %vm3670_vm1 = vcmask 1044484  }
  0x95   : > { %vm13976_vm2 = vmor %vm3669_vm0, %vm3670_vm1 }
  0x97   : > { %9887 = vmatmul.mubr.msk.bf16.gmra.mrb[24].mxu0 %vm758_vm5, %v13165_v28  ;;  %v13398_v28 = vld [vmem:[%s12252_s20 + $0xc8] sm:$0x7] }
  0x98   : > { %5647 = vmatprep.mubr.bf16.mxu0 %v16278_v55  ;;  %16372 = vst [vmem:[#allocation119_spill] sm:$0xff] %v13398_v28 }
  0x9a   : > { %9401 = vmatmul.mubr.msk.bf16.gmra.mrb[60].mxu1 %vm758_vm5, %v13174_v52 }
  0x9b   : > { %1200 = vmatprep.mubr.bf16.mxu1 %v16278_v55 }
  0x9f   : > { %9888 = vmatmul.mubr.msk.bf16.gmra.mrb[28].mxu0 %vm758_vm5, %v13190_v10  ;;  %v13395_v10 = vld [vmem:[%s12252_s20 + $0xc0] sm:$0xf] }
  0xa0   : > { %5657 = vmatprep.mubr.bf16.mxu0 %v16278_v55 }
  0xa2   : > { %9426 = vmatmul.mubr.msk.bf16.vlgmr.msra.gmra.mrb[0].mxu1 %vm758_vm5, %v9402_v35  ;;  %v13262_v35 = vcombine.low %v2615_v17, %v2618_v27  ;;  %v9566_v17 = vrot.slane %v12915_v24, 10 }
  0xa3   : > { %1638 = vmatpush1.bf16.msra.mxu1 %v11875_v7  ;;  %1210 = vmatprep.mubr.bf16.mxu1 %v16278_v55  ;;  %v11905_v7 = vld [vmem:[%s15921_s1 + $0xb0] ss:$8 sps:$4 sm:$0xff]  }
  0xa4   : > { %1639 = vmatprep.subr.bf16.mxu1 %v11887_v39  ;;  %16362 = vst [vmem:[#allocation109_spill] sm:$0xff] %v13262_v35  ;;  %v11916_v39 = vld [vmem:[%s15921_s1 + $0xc4] ss:$8 sps:$4 sm:$0xff]  }
  0xa7   : > { %9889 = vmatmul.mubr.msk.bf16.gmra.mrb[32].mxu0 %vm758_vm5, %v13225_v42  ;;  %1640 = vmatpush1.bf16.msra.mxu1 %v11885_v41  ;;  %v13274_v41 = vld [vmem:[%s12252_s20 + $0x18] sm:$0xf] }
  0xa8   : > { %5667 = vmatprep.mubr.bf16.mxu0 %v16278_v55  ;;  %1641 = vmatprep.subr.bf16.mxu1 %v11897_v29  ;;  %v13281_v62 = vcombine.low %v13274_v41, %v13277_v40  ;;  %v2628_v29 = vrot.slane %v12925_v57, 6 }
  0xaa   : > { %9427 = vmatmul.mubr.msk.bf16.gmra.mrb[4].mxu1 %vm758_vm5, %v13244_v12  ;;  %16363 = vst [vmem:[#allocation110_spill] sm:$0xff] %v13281_v62  ;;  %v2630_v27 = vrot.slane %v2628_v29, 4  ;;  %v2629_v49 = vsel %vm12791_vm9, %v9566_v17, %v2628_v29  ;;  %v2638_v12 = vrot.slane %v13010_v56, 6  ;;  %v13324_v29 = vld [vmem:[%s12252_s20 + $0x30] sm:$0xf] }
  0xab   : > { %1220 = vmatprep.mubr.bf16.mxu1 %v16278_v55  ;;  %1642 = vmatpush1.bf16.msra.mxu1 %v11895_v22  ;;  %v13293_v22 = vcombine.low %v2622_v8, %v2625_v45  ;;  %v9567_v8 = vrot.slane %v12972_v48, 10  ;;  %v2637_v45 = vrot.slane %v2635_v38, 4  ;;  %v13327_v17 = vld [vmem:[%s12252_s20 + $0x34] sm:$0xf] }
  0xac   : > { %1643 = vmatprep.subr.bf16.mxu1 %v11907_v9  ;;  %v2631_v9 = vrot.slane %v12953_v3, 6 }
  0xad   : > { %16364 = vst [vmem:[#allocation111_spill] sm:$0xff] %v13293_v22  ;;  %v2639_v56 = vsel %vm12791_vm9, %v2637_v45, %v2638_v12  ;;  %v13352_v12 = vld [vmem:[%s12252_s20 + $0x40] sm:$0xf] }
  0xae   : > { %v2632_v3 = vsel %vm12791_vm9, %v2630_v27, %v2631_v9  ;;  %v13331_v27 = vcombine.low %v13324_v29, %v13327_v17  ;;  %v2636_v9 = vsel %vm12791_vm9, %v9567_v8, %v2635_v38  ;;  %v13349_v38 = vld [vmem:[%s12252_s20 + $0x3c] sm:$0xf] }
  0xaf   : > { %9890 = vmatmul.mubr.msk.bf16.gmra.mrb[36].mxu0 %vm758_vm5, %v13262_v35  ;;  %1644 = vmatpush1.bf16.msra.mxu1 %v11905_v7  ;;  %v13302_v7 = vld [vmem:[%s12252_s20 + $0x28] sm:$0xf]  ;;  %v13356_v8 = vcombine.low %v13349_v38, %v13352_v12  ;;  %v2652_v35 = vrot.slane %v13132_v13, 6 }
  0xb0   : > { %5677 = vmatprep.mubr.bf16.mxu0 %v16278_v55  ;;  %2282 = vmatprep.subr.bf16.mxu1 %v11916_v39  ;;  %v13306_v2 = vcombine.low %v13299_v23, %v13302_v7  ;;  %v13318_v39 = vcombine.low %v2629_v49, %v2632_v3  ;;  %16367 = vst [vmem:[#allocation114_spill] sm:$0xff] %v13331_v27  ;;  %v2642_v49 = vrot.slane %v13030_v63, 6 }
  0xb1   : > { %v13343_v3 = vcombine.low %v2636_v9, %v2639_v56  ;;  %16369 = vst [vmem:[#allocation116_spill] sm:$0xff] %v13356_v8  ;;  %v2649_v56 = vrot.slane %v13090_v21, 6 }
  0xb2   : > { %9428 = vmatmul.mubr.msk.bf16.gmra.mrb[8].mxu1 %vm758_vm5, %v13281_v62  ;;  %16365 = vst [vmem:[#allocation112_spill] sm:$0xff] %v13306_v2  ;;  %16366 = vst [vmem:[#allocation113_spill] sm:$0xff] %v13318_v39  ;;  %v2644_v52 = vrot.slane %v2642_v49, 4  ;;  %v2643_v45 = vsel %vm12791_vm9, %v9568_v32, %v2642_v49  ;;  %v13374_v32 = vld [vmem:[%s12252_s20 + $0xc4] sm:$0xf]  ;;  %v3090_v62 = vrot.slane %v12372_v18, 7 }
  0xb3   : > { %1230 = vmatprep.mubr.bf16.mxu1 %v16278_v55  ;;  %16368 = vst [vmem:[#allocation115_spill] sm:$0xff] %v13343_v3  ;;  %v13377_v49 = vld [vmem:[%s12252_s20 + $0x48] sm:$0xf]  ;;  %v5485_v42 = vrot.slane %v13374_v32, 6 }
  0xb4   : > { %v2646_v9 = vsel %vm12791_vm9, %v2644_v52, %v2645_v54  ;;  %v13380_v54 = vld [vmem:[%s12252_s20 + $0x4c] sm:$0xf] }
  0xb5   : > { %v13384_v52 = vcombine.low %v13377_v49, %v13380_v54 }
  0xb7   : > { %9891 = vmatmul.mubr.msk.bf16.gmra.mrb[40].mxu0 %vm758_vm5, %v13293_v22  ;;  %v2651_v22 = vrot.slane %v2649_v56, 4  ;;  %16371 = vst [vmem:[#allocation118_spill] sm:$0xff] %v13384_v52 }
  0xb8   : > { %5687 = vmatprep.mubr.bf16.mxu0 %v16278_v55 }
  0xba   : > { %9429 = vmatmul.mubr.msk.bf16.gmra.mrb[12].mxu1 %vm758_vm5, %v13306_v2  ;;  %v3086_v2 = vrot.slane %v12367_v15, 7  ;;  %v16380_v15 = vld [vmem:[#allocation9_spill] sm:$0xff] }
  0xbb   : > { %1240 = vmatprep.mubr.bf16.mxu1 %v16278_v55 }
  0xbf   : > { %9892 = vmatmul.mubr.msk.bf16.gmra.mrb[44].mxu0 %vm758_vm5, %v13318_v39  ;;  %v13368_v39 = vcombine.low %v2643_v45, %v2646_v9  ;;  %v2653_v9 = vsel %vm12791_vm9, %v2651_v22, %v2652_v35  ;;  %v13408_v35 = vld [vmem:[%s12252_s20 + $0x54] sm:$0xf]  ;;  %v13411_v22 = vld [vmem:[%s12252_s20 + $0x58] sm:$0xf] }
  0xc0   : > { %5697 = vmatprep.mubr.bf16.mxu0 %v16278_v55  ;;  %16374 = vst [vmem:[#allocation121_spill] sm:$0xff] %v13408_v35 }
  0xc1   : > { %16370 = vst [vmem:[#allocation117_spill] sm:$0xff] %v13368_v39 }
  0xc2   : > { %9430 = vmatmul.mubr.msk.bf16.gmra.mrb[16].mxu1 %vm758_vm5, %v13331_v27  ;;  %v3085_v27 = vrot.slane %v12364_v14, 6 }
  0xc3   : > { %1250 = vmatprep.mubr.bf16.mxu1 %v16278_v55 }
  0xc7   : > { %9893 = vmatmul.mubr.msk.bf16.gmra.mrb[48].mxu0 %vm758_vm5, %v13343_v3  ;;  %v9569_v3 = vrot.slane %v13087_v53, 10 }
  0xc8   : > { %5707 = vmatprep.mubr.bf16.mxu0 %v16278_v55 }
  0xc9   : > { %v2650_v45 = vsel %vm12791_vm9, %v9569_v3, %v2649_v56  ;;  %v5488_v3 = vrot.slane %v13398_v28, 6  ;;  %v13415_v56 = vcombine.low %v13408_v35, %v13411_v22  ;;  %v13434_v35 = vld [vmem:[%s12252_s20 + $0x60] sm:$0xf] }
  0xca   : > { %9431 = vmatmul.mubr.msk.bf16.gmra.mrb[20].mxu1 %vm758_vm5, %v13356_v8  ;;  %v13402_v4 = vcombine.low %v2650_v45, %v2653_v9  ;;  %v5487_v8 = vrot.slane %v5485_v42, 4  ;;  %16377 = vst [vmem:[#allocation124_spill] sm:$0xff] %v13434_v35 }
  0xcb   : > { %1260 = vmatprep.mubr.bf16.mxu1 %v16278_v55  ;;  %16375 = vst [vmem:[#allocation122_spill] sm:$0xff] %v13415_v56 }
  0xcc   : > { %16373 = vst [vmem:[#allocation120_spill] sm:$0xff] %v13402_v4  ;;  %v5489_v9 = vsel %vm12791_vm9, %v5487_v8, %v5488_v3  ;;  %v3087_v8 = vor.u32 %v3086_v2, %v3085_v27  ;;  %v16381_v3 = vshrl.u32 %v16380_v15, 16  ;;  %v11898_v2 = vld [vmem:[%s15921_s1 + $0x340] ss:$8 sps:$4 sm:$0xff]   ;;  %v16385_v27 = vld [vmem:[#allocation17_spill] sm:$0xff] }
  0xcd   : > { %v3102_v15 = vrot.slane %v16385_v27, 6 }
  0xcf   : > { %9894 = vmatmul.mubr.msk.bf16.gmra.mrb[52].mxu0 %vm758_vm5, %v13368_v39  ;;  %v9863_v39 = vrot.slane %v13395_v10, 10 }
  0xd0   : > { %5717 = vmatprep.mubr.bf16.mxu0 %v16278_v55 }
  0xd1   : > { %v5486_v45 = vsel %vm12791_vm9, %v9863_v39, %v5485_v42  ;;  %v13437_v42 = vld [vmem:[%s12252_s20 + $0x64] sm:$0xf] }
  0xd2   : > { %9432 = vmatmul.mubr.msk.bf16.gmra.mrb[24].mxu1 %vm758_vm5, %v13384_v52  ;;  %v13426_v52 = vcombine.low %v5486_v45, %v5489_v9  ;;  %16378 = vst [vmem:[#allocation125_spill] sm:$0xff] %v13437_v42  ;;  %v13441_v39 = vcombine.low %v13434_v35, %v13437_v42  ;;  %v16382_v45 = vld [vmem:[#allocation11_spill] sm:$0xff]  ;;  %v3088_v9 = vrot.slane %v3087_v8, 4  ;;  %v13464_v8 = vcombine.low %v12769_v25, %v12778_v11  ;;  %v11908_v11 = vld [vmem:[%s15921_s1 + $0x350] ss:$8 sps:$4 sm:$0xff]  }
  0xd3   : > { %1270 = vmatprep.mubr.bf16.mxu1 %v16278_v55  ;;  %v3095_v18 = vrot.slane %v16382_v45, 7  ;;  %v16384_v35 = vld [vmem:[#allocation15_spill] sm:$0xff] }
  0xd4   : > { %16376 = vst [vmem:[#allocation123_spill] sm:$0xff] %v13426_v52  ;;  %16379 = vst [vmem:[#allocation126_spill] sm:$0xff] %v13441_v39  ;;  %v3099_v42 = vrot.slane %v16384_v35, 7  ;;  %v16388_v35 = vld [vmem:[#allocation13_spill] sm:$0xff] }
  0xd5   : > { %16387 = vst [vmem:[#allocation9_spill] sm:$0xff] %v13464_v8 }
  0xd7   : > { %9895 = vmatmul.mubr.msk.bf16.gmra.mrb[56].mxu0 %vm758_vm5, %v13402_v4  ;;  %v3089_v4 = vrot.slane %v12375_v19, 6  ;;  %v3094_v19 = vrot.slane %v16381_v3, 6  ;;  %v16386_v3 = vld [vmem:[#allocation16_spill] sm:$0xff] }
  0xd8   : > { %5727 = vmatprep.mubr.bf16.mxu0 %v16278_v55  ;;  %v3103_v45 = vrot.slane %v16386_v3, 7  ;;  %v16390_v3 = vld [vmem:[#allocation19_spill] sm:$0xff] }
  0xd9   : > { %v3091_v14 = vor.u32 %v3090_v62, %v3089_v4  ;;  %v3096_v62 = vor.u32 %v3095_v18, %v3094_v19  ;;  %v3108_v25 = vrot.slane %v16390_v3, 7 }
  0xda   : > { %9433 = vmatmul.mubr.msk.bf16.gmra.mrb[28].mxu1 %vm758_vm5, %v13415_v56  ;;  %v3098_v56 = vrot.slane %v16383_v30, 6  ;;  %v3104_v27 = vor.u32 %v3103_v45, %v3102_v15  ;;  %v16394_v45 = vld [vmem:[#allocation24_spill] sm:$0xff] }
  0xdb   : > { %1280 = vmatprep.mubr.bf16.mxu1 %v16278_v55  ;;  %v3093_v4 = vrot.slane %v3091_v14, 4  ;;  %v3092_v19 = vsel %vm13184_vm12, %v3088_v9, %v3091_v14  ;;  %v16392_v14 = vld [vmem:[#allocation21_spill] sm:$0xff] }
  0xdc   : > { %v3100_v30 = vor.u32 %v3099_v42, %v3098_v56  ;;  %v11919_v56 = vld [vmem:[%s15921_s1 + $0x364] ss:$8 sps:$4 sm:$0xff]   ;;  %v3111_v9 = vrot.slane %v16392_v14, 6 }
  0xdd   : > { %v3097_v18 = vsel %vm13184_vm12, %v3093_v4, %v3096_v62  ;;  %v3106_v62 = vrot.slane %v3104_v27, 4 }
  0xde   : > { %v13484_v42 = vcombine.low %v3092_v19, %v3097_v18  ;;  %v13499_v19 = vcombine.low %v12806_v34, %v12823_v37  ;;  %v16397_v18 = vshrl.u32 %v12488_v1, 16  ;;  %v11923_v34 = vld [vmem:[%s15921_s1 + $0x370] ss:$8 sps:$4 sm:$0xff]   ;;  %v11931_v1 = vld [vmem:[%s15921_s1 + $0x384] ss:$8 sps:$4 sm:$0xff]  }
  0xdf   : > { %9896 = vmatmul.mubr.msk.bf16.gmra.mrb[60].mxu0 %vm758_vm5, %v13426_v52  ;;  %v11910_v52 = vld [vmem:[%s15921_s1 + $0x354] ss:$8 sps:$4 sm:$0xff]  }
  0xe0   : > { %5902 = vmatprep.mubr.bf16.mxu0 %v16278_v55  ;;  %16391 = vst [vmem:[#allocation11_spill] sm:$0xff] %v13484_v42  ;;  %16396 = vst [vmem:[#allocation14_spill] sm:$0xff] %v13499_v19 }
  0xe2   : > { %9434 = vmatmul.mubr.msk.bf16.gmra.mrb[32].mxu1 %vm758_vm5, %v13441_v39  ;;  %v16389_v39 = vshrl.u32 %v16388_v35, 16  ;;  %v16395_v35 = vld [vmem:[#allocation23_spill] sm:$0xff] }
  0xe3   : > { %1290 = vmatprep.mubr.bf16.mxu1 %v16278_v55  ;;  %v3116_v3 = vrot.slane %v16395_v35, 7 }
  0xe4   : > { %v3107_v28 = vrot.slane %v16389_v39, 6  ;;  %v3101_v39 = vrot.slane %v3100_v30, 4  ;;  %v11925_v30 = vld [vmem:[%s15921_s1 + $0x374] ss:$8 sps:$4 sm:$0xff]  }
  0xe6   : > { %v3109_v15 = vor.u32 %v3108_v25, %v3107_v28  ;;  %v3120_v25 = vrot.slane %v16397_v18, 6  ;;  %v13528_v18 = vcombine.low %v12858_v51, %v12880_v50 }
  0xe7   : > { %9914 = vmatmul.mubr.msk.bf16.vlgmr.msra.gmra.mrb[0].mxu0 %vm758_vm5, %v13200_v5  ;;  %v11917_v5 = vld [vmem:[%s15921_s1 + $0x360] ss:$8 sps:$4 sm:$0xff]  }
  0xe8   : > { %6190 = vmatpush1.bf16.msra.mxu0 %v11898_v2  ;;  %5912 = vmatprep.mubr.bf16.mxu0 %v16278_v55  ;;  %v16393_v2 = vld [vmem:[#allocation22_spill] sm:$0xff]  ;;  %16404 = vst [vmem:[#allocation17_spill] sm:$0xff] %v13528_v18 }
  0xe9   : > { %6191 = vmatprep.subr.bf16.mxu0 %v11910_v52  ;;  %v3112_v4 = vrot.slane %v16393_v2, 7  ;;  %v3115_v52 = vrot.slane %v16394_v45, 6  ;;  %v16398_v2 = vld [vmem:[#allocation25_spill] sm:$0xff] }
  0xea   : > { %9435 = vmatmul.mubr.msk.bf16.gmra.mrb[36].mxu1 %vm758_vm5, %v13464_v8  ;;  %v3121_v45 = vrot.slane %v16398_v2, 7  ;;  %v16405_v2 = vshrl.u32 %v12551_v46, 16  ;;  %v16411_v46 = vld [vmem:[#allocation38_spill] sm:$0xff] }
  0xeb   : > { %1300 = vmatprep.mubr.bf16.mxu1 %v16278_v55  ;;  %v3113_v28 = vor.u32 %v3112_v4, %v3111_v9  ;;  %v3117_v14 = vor.u32 %v3116_v3, %v3115_v52  ;;  %v16402_v52 = vld [vmem:[#allocation31_spill] sm:$0xff]  ;;  %v16403_v3 = vld [vmem:[#allocation30_spill] sm:$0xff] }
  0xec   : > { %6192 = vmatpush1.bf16.msra.mxu0 %v11908_v11  ;;  %v3105_v11 = vsel %vm13184_vm12, %v3101_v39, %v3104_v27  ;;  %v16400_v39 = vld [vmem:[#allocation28_spill] sm:$0xff]  ;;  %v3128_v35 = vrot.slane %v16402_v52, 6  ;;  %v3142_v52 = vrot.slane %v16411_v46, 7  ;;  %v13574_v46 = vcombine.low %v12972_v48, %v12981_v60  ;;  %v16424_v48 = vld [vmem:[#allocation50_spill] sm:$0xff] }
  0xed   : > { %6193 = vmatprep.subr.bf16.mxu0 %v11919_v56  ;;  %v3110_v56 = vsel %vm13184_vm12, %v3106_v62, %v3109_v15  ;;  %v3114_v27 = vrot.slane %v3113_v28, 4  ;;  %v3124_v9 = vrot.slane %v16400_v39, 6  ;;  %v3119_v62 = vrot.slane %v3117_v14, 4  ;;  %v16409_v39 = vld [vmem:[#allocation37_spill] sm:$0xff] }
  0xee   : > { %v13519_v37 = vcombine.low %v3105_v11, %v3110_v56  ;;  %v3122_v15 = vor.u32 %v3121_v45, %v3120_v25  ;;  %v3133_v45 = vrot.slane %v16405_v2, 6  ;;  %16421 = vst [vmem:[#allocation21_spill] sm:$0xff] %v13574_v46  ;;  %v3163_v60 = vrot.slane %v16424_v48, 6 }
  0xef   : > { %9915 = vmatmul.mubr.msk.bf16.gmra.mrb[4].mxu0 %vm758_vm5, %v13484_v42  ;;  %v3118_v28 = vsel %vm13184_vm12, %v3114_v27, %v3117_v14  ;;  %v16408_v14 = vld [vmem:[#allocation36_spill] sm:$0xff]  ;;  %v13600_v48 = vcombine.low %v13023_v58, %v13030_v63  ;;  %v16432_v58 = vld [vmem:[#allocation58_spill] sm:$0xff] }
  0xf0   : > { %5922 = vmatprep.mubr.bf16.mxu0 %v16278_v55  ;;  %6194 = vmatpush1.bf16.msra.mxu0 %v11917_v5  ;;  %16399 = vst [vmem:[#allocation15_spill] sm:$0xff] %v13519_v37  ;;  %v16401_v5 = vld [vmem:[#allocation29_spill] sm:$0xff]  ;;  %v3123_v25 = vsel %vm13184_vm12, %v3119_v62, %v3122_v15  ;;  %v3137_v27 = vrot.slane %v16408_v14, 6  ;;  %v16410_v62 = vld [vmem:[#allocation39_spill] sm:$0xff]  ;;  %v16418_v14 = vld [vmem:[#allocation44_spill] sm:$0xff] }
  0xf1   : > { %6195 = vmatprep.subr.bf16.mxu0 %v11925_v30  ;;  %v3125_v4 = vrot.slane %v16401_v5, 7  ;;  %v3129_v30 = vrot.slane %v16403_v3, 7  ;;  %v13542_v51 = vcombine.low %v3118_v28, %v3123_v25  ;;  %v3141_v15 = vrot.slane %v16410_v62, 6  ;;  %v16413_v25 = vld [vmem:[#allocation35_spill] sm:$0xff]  ;;  %v16420_v62 = vld [vmem:[#allocation45_spill] sm:$0xff]  ;;  %16431 = vst [vmem:[#allocation24_spill] sm:$0xff] %v13600_v48 }
  0xf2   : > { %9436 = vmatmul.mubr.msk.bf16.gmra.mrb[40].mxu1 %vm758_vm5, %v13499_v19  ;;  %v16414_v2 = vshrl.u32 %v16413_v25, 16  ;;  %v16423_v25 = vld [vmem:[#allocation47_spill] sm:$0xff] }
  0xf3   : > { %1310 = vmatprep.mubr.bf16.mxu1 %v16278_v55  ;;  %v3126_v11 = vor.u32 %v3125_v4, %v3124_v9  ;;  %v3130_v56 = vor.u32 %v3129_v30, %v3128_v35  ;;  %16407 = vst [vmem:[#allocation16_spill] sm:$0xff] %v13542_v51  ;;  %v3138_v9 = vrot.slane %v16409_v39, 7  ;;  %v13551_v35 = vcombine.low %v12915_v24, %v12925_v57 }
  0xf4   : > { %6196 = vmatpush1.bf16.msra.mxu0 %v11923_v34  ;;  %v16406_v34 = vld [vmem:[#allocation32_spill] sm:$0xff] }
  0xf5   : > { %6503 = vmatprep.subr.bf16.mxu0 %v11931_v1  ;;  %v3134_v1 = vrot.slane %v16406_v34, 7  ;;  %v3127_v50 = vrot.slane %v3126_v11, 4  ;;  %v3132_v5 = vrot.slane %v3130_v56, 4  ;;  %16412 = vst [vmem:[#allocation13_spill] sm:$0xff] %v13551_v35  ;;  %v3139_v30 = vor.u32 %v3138_v9, %v3137_v27  ;;  %v16415_v34 = vld [vmem:[#allocation40_spill] sm:$0xff] }
  0xf6   : > { %v3143_v11 = vor.u32 %v3142_v52, %v3141_v15  ;;  %v3151_v27 = vrot.slane %v16418_v14, 7  ;;  %v3155_v15 = vrot.slane %v16420_v62, 7  ;;  %v16426_v14 = vld [vmem:[#allocation53_spill] sm:$0xff]  ;;  %v16427_v62 = vld [vmem:[#allocation52_spill] sm:$0xff] }
  0xf7   : > { %9916 = vmatmul.mubr.msk.bf16.gmra.mrb[8].mxu0 %vm758_vm5, %v13519_v37  ;;  %v3135_v4 = vor.u32 %v3134_v1, %v3133_v45  ;;  %v3131_v3 = vsel %vm13184_vm12, %v3127_v50, %v3130_v56  ;;  %v3146_v45 = vrot.slane %v16414_v2, 6  ;;  %v3147_v1 = vrot.slane %v16415_v34, 7  ;;  %v16417_v56 = vld [vmem:[#allocation43_spill] sm:$0xff] }
  0xf8   : > { %5932 = vmatprep.mubr.bf16.mxu0 %v16278_v55  ;;  %v3140_v24 = vrot.slane %v3139_v30, 4  ;;  %v3150_v50 = vrot.slane %v16417_v56, 6  ;;  %v3145_v39 = vrot.slane %v3143_v11, 4  ;;  %v16422_v30 = vshrl.u32 %v12670_v26, 16  ;;  %v16448_v37 = vld [vmem:[#allocation3_spill] sm:$0xff] }
  0xf9   : > { %v3136_v28 = vsel %vm13184_vm12, %v3132_v5, %v3135_v4  ;;  %v3148_v9 = vor.u32 %v3147_v1, %v3146_v45  ;;  %v16419_v5 = vld [vmem:[#allocation46_spill] sm:$0xff]  ;;  %v3160_v2 = vrot.slane %v16423_v25, 7  ;;  %v16425_v1 = vld [vmem:[#allocation51_spill] sm:$0xff]  ;;  %v1898_v42 = vrot.slane %v16448_v37, 6 }
  0xfa   : > { %9437 = vmatmul.mubr.msk.bf16.gmra.mrb[44].mxu1 %vm758_vm5, %v13528_v18  ;;  %v13565_v57 = vcombine.low %v3131_v3, %v3136_v28  ;;  %v3154_v4 = vrot.slane %v16419_v5, 6  ;;  %v3144_v52 = vsel %vm13184_vm12, %v3140_v24, %v3143_v11  ;;  %v3152_v3 = vor.u32 %v3151_v27, %v3150_v50  ;;  %v13671_v18 = vld [vmem:[%s12252_s20 + $0x14] sm:$0x7] }
  0xfb   : > { %1320 = vmatprep.mubr.bf16.mxu1 %v16278_v55  ;;  %v3159_v28 = vrot.slane %v16422_v30, 6  ;;  %v3149_v45 = vsel %vm13184_vm12, %v3145_v39, %v3148_v9  ;;  %v3164_v56 = vrot.slane %v16425_v1, 7  ;;  %v3167_v5 = vrot.slane %v16426_v14, 6  ;;  %v16430_v30 = vld [vmem:[#allocation54_spill] sm:$0xff] }
  0xfc   : > { %16416 = vst [vmem:[#allocation19_spill] sm:$0xff] %v13565_v57  ;;  %v3156_v34 = vor.u32 %v3155_v15, %v3154_v4  ;;  %v3168_v11 = vrot.slane %v16427_v62, 7  ;;  %v13592_v26 = vcombine.low %v3144_v52, %v3149_v45  ;;  %v3153_v24 = vrot.slane %v3152_v3, 4  ;;  %v16434_v14 = vld [vmem:[#allocation62_spill] sm:$0xff]  ;;  %v16435_v62 = vld [vmem:[#allocation61_spill] sm:$0xff] }
  0xfd   : > { %v3161_v27 = vor.u32 %v3160_v2, %v3159_v28  ;;  %v3165_v39 = vor.u32 %v3164_v56, %v3163_v60  ;;  %v16429_v4 = vshrl.u32 %v12714_v33, 16  ;;  %v3173_v25 = vrot.slane %v16430_v30, 7  ;;  %v13611_v60 = vld [vmem:[%s12252_s20 + $0x74] sm:$0x7]  ;;  %v16433_v56 = vld [vmem:[#allocation59_spill] sm:$0xff] }
  0xfe   : > { %16428 = vst [vmem:[#allocation22_spill] sm:$0xff] %v13592_v26  ;;  %v3158_v50 = vrot.slane %v3156_v34, 4  ;;  %v3169_v9 = vor.u32 %v3168_v11, %v3167_v5  ;;  %v3157_v52 = vsel %vm13184_vm12, %v3153_v24, %v3156_v34  ;;  %v1382_v45 = vrot.slane %v13206_v44, 5 }
  0xff   : > { %9917 = vmatmul.mubr.msk.bf16.gmra.mrb[12].mxu0 %vm758_vm5, %v13542_v51  ;;  %v3172_v15 = vrot.slane %v16429_v4, 6  ;;  %v3166_v28 = vrot.slane %v3165_v39, 4  ;;  %v16139_v63 = vshrl.u32 %v13611_v60, 16  ;;  %v3176_v1 = vrot.slane %v16432_v58, 6 }
 0x100   : > { %5942 = vmatprep.mubr.bf16.mxu0 %v16278_v55  ;;  %v3162_v3 = vsel %vm13184_vm12, %v3158_v50, %v3161_v27  ;;  %v3171_v33 = vrot.slane %v3169_v9, 4  ;;  %v3177_v34 = vrot.slane %v16433_v56, 7  ;;  %v3180_v5 = vrot.slane %v16434_v14, 6 }
 0x101   : > { %v3174_v2 = vor.u32 %v3173_v25, %v3172_v15  ;;  %v3181_v11 = vrot.slane %v16435_v62, 7  ;;  %v13620_v24 = vcombine.low %v3157_v52, %v3162_v3  ;;  %v13625_v44 = vcombine.low %v13087_v53, %v13090_v21  ;;  %v13633_v15 = vld [vmem:[%s12252_s20 + $0x8] sm:$0x7]  ;;  %v16441_v52 = vld [vmem:[#allocation64_spill] sm:$0xff]  ;;  %v16442_v3 = vld [vmem:[#allocation2_spill] sm:$0xff] }
 0x102   : > { %9438 = vmatmul.mubr.msk.bf16.gmra.mrb[48].mxu1 %vm758_vm5, %v13551_v35  ;;  %v9442_v50 = vrot.slane %v13203_v61, 9  ;;  %v3170_v27 = vsel %vm13184_vm12, %v3166_v28, %v3169_v9  ;;  %v1384_v4 = vrot.slane %v1382_v45, 4  ;;  %16438 = vst [vmem:[#allocation28_spill] sm:$0xff] %v13633_v15  ;;  %v1385_v30 = vrot.slane %v13633_v15, 5  ;;  %v16474_v62 = vld [vmem:[#allocation87_spill] sm:$0xff] }
 0x103   : > { %1330 = vmatprep.mubr.bf16.mxu1 %v16278_v55  ;;  %16436 = vst [vmem:[#allocation23_spill] sm:$0xff] %v13620_v24  ;;  %16437 = vst [vmem:[#allocation25_spill] sm:$0xff] %v13625_v44  ;;  %v3175_v39 = vsel %vm13184_vm12, %v3171_v33, %v3174_v2  ;;  %v3178_v53 = vor.u32 %v3177_v34, %v3176_v1  ;;  %v3182_v21 = vor.u32 %v3181_v11, %v3180_v5  ;;  %v12027_v25 = vld [vmem:[%s15921_s1 + $0x480] ss:$8 sps:$4 sm:$0xff]  }
 0x104   : > { %v3185_v61 = vrot.slane %v16139_v63, 6  ;;  %v3186_v9 = vrot.slane %v16441_v52, 7  ;;  %v1897_v28 = vrot.slane %v16442_v3, 5  ;;  %v13647_v33 = vcombine.low %v3170_v27, %v3175_v39  ;;  %v16444_v39 = vld [vmem:[#allocation65_spill] sm:$0xff] }
 0x105   : > { %v1383_v2 = vsel %vm13636_vm15, %v9442_v50, %v1382_v45  ;;  %v1386_v1 = vsel %vm13636_vm15, %v1384_v4, %v1385_v30  ;;  %v1389_v34 = vrot.slane %v13240_v6, 5  ;;  %v3179_v5 = vrot.slane %v3178_v53, 4  ;;  %v16445_v50 = vld [vmem:[#allocation66_spill] sm:$0xff]  ;;  %v16446_v4 = vld [vmem:[#allocation69_spill] sm:$0xff] }
 0x106   : > { %16443 = vst [vmem:[#allocation29_spill] sm:$0xff] %v13647_v33  ;;  %v3184_v11 = vrot.slane %v3182_v21, 4  ;;  %v3187_v63 = vor.u32 %v3186_v9, %v3185_v61  ;;  %v3189_v45 = vrot.slane %v16444_v39, 6  ;;  %v3193_v30 = vrot.slane %v16446_v4, 6  ;;  %v16449_v53 = vld [vmem:[#allocation5_spill] sm:$0xff] }
 0x107   : > { %9918 = vmatmul.mubr.msk.bf16.gmra.mrb[16].mxu0 %vm758_vm5, %v13565_v57  ;;  %v16447_v57 = vld [vmem:[#allocation68_spill] sm:$0xff]  ;;  %v9443_v9 = vrot.slane %v13237_v47, 9  ;;  %v1391_v35 = vrot.slane %v1389_v34, 4  ;;  %v1392_v19 = vrot.slane %v13671_v18, 5  ;;  %v9466_v8 = vcombine.low %v1383_v2, %v1386_v1  ;;  %v16453_v1 = vld [vmem:[#allocation70_spill] sm:$0xff] }
 0x108   : > { %5952 = vmatprep.mubr.bf16.mxu0 %v16278_v55  ;;  %v3194_v51 = vrot.slane %v16447_v57, 7  ;;  %v3183_v3 = vsel %vm13184_vm12, %v3179_v5, %v3182_v21  ;;  %v3188_v37 = vsel %vm13184_vm12, %v3184_v11, %v3187_v63  ;;  %v11922_v21 = vld [vmem:[%s15921_s1 + $0xd4] ss:$8 sps:$4 sm:$0xff]   ;;  %v1899_v5 = vor.u32 %v1898_v42, %v1897_v28  ;;  %v13795_v39 = vld [vmem:[%s12252_s20 + $0xa4] sm:$0x7] }
 0x109   : > { %v1390_v63 = vsel %vm13636_vm15, %v9443_v9, %v1389_v34  ;;  %v16456_v34 = vld [vmem:[#allocation73_spill] sm:$0xff] }
 0x10a   : > { %9439 = vmatmul.mubr.msk.bf16.gmra.mrb[52].mxu1 %vm758_vm5, %v13574_v46  ;;  %v16451_v46 = vld [vmem:[#allocation6_spill] sm:$0xff]  ;;  %v3195_v57 = vor.u32 %v3194_v51, %v3193_v30  ;;  %v16455_v30 = vld [vmem:[#allocation72_spill] sm:$0xff]  ;;  %v3203_v9 = vrot.slane %v16456_v34, 7 }
 0x10b   : > { %1340 = vmatprep.mubr.bf16.mxu1 %v16278_v55  ;;  %v1909_v27 = vrot.slane %v16451_v46, 6  ;;  %v11914_v46 = vld [vmem:[%s15921_s1 + $0xc0] ss:$8 sps:$4 sm:$0xff]  }
 0x10f   : > { %9919 = vmatmul.mubr.msk.bf16.gmra.mrb[20].mxu0 %vm758_vm5, %v13592_v26  ;;  %v3190_v26 = vrot.slane %v16445_v50, 7  ;;  %v3199_v50 = vrot.slane %v16453_v1, 7  ;;  %v1900_v1 = vrot.slane %v1899_v5, 4  ;;  %v16458_v5 = vld [vmem:[#allocation74_spill] sm:$0xff] }
 0x110   : > { %5962 = vmatprep.mubr.bf16.mxu0 %v16278_v55 }
 0x112   : > { %9440 = vmatmul.mubr.msk.bf16.gmra.mrb[56].mxu1 %vm758_vm5, %v13600_v48  ;;  %v16450_v48 = vld [vmem:[#allocation4_spill] sm:$0xff] }
 0x113   : > { %1350 = vmatprep.mubr.bf16.mxu1 %v16278_v55  ;;  %v1902_v61 = vrot.slane %v16450_v48, 6  ;;  %v3191_v48 = vor.u32 %v3190_v26, %v3189_v45  ;;  %v13695_v26 = vcombine.low %v3183_v3, %v3188_v37  ;;  %v1393_v45 = vsel %vm13636_vm15, %v1391_v35, %v1392_v19  ;;  %v16457_v35 = vld [vmem:[#allocation75_spill] sm:$0xff] }
 0x114   : > { %v3197_v37 = vrot.slane %v3195_v57, 4  ;;  %v9444_v19 = vrot.slane %v13274_v41, 9 }
 0x115   : > { %16454 = vst [vmem:[#allocation31_spill] sm:$0xff] %v13695_v26  ;;  %v3192_v28 = vrot.slane %v3191_v48, 4 }
 0x117   : > { %9920 = vmatmul.mubr.msk.bf16.gmra.mrb[24].mxu0 %vm758_vm5, %v13620_v24  ;;  %v13657_v24 = vld [vmem:[%s12252_s20 + $0x80] sm:$0x7] }
 0x118   : > { %5972 = vmatprep.mubr.bf16.mxu0 %v16278_v55  ;;  %v16452_v4 = vshrl.u32 %v13657_v24, 16 }
 0x11a   : > { %9441 = vmatmul.mubr.msk.bf16.gmra.mrb[60].mxu1 %vm758_vm5, %v13625_v44  ;;  %v1901_v44 = vrot.slane %v16449_v53, 5  ;;  %v16168_v53 = vshrl.u32 %v13633_v15, 16  ;;  %v3198_v2 = vrot.slane %v16452_v4, 6  ;;  %v1396_v4 = vrot.slane %v13277_v40, 5 }
 0x11b   : > { %1669 = vmatprep.mubr.bf16.mxu1 %v16278_v55  ;;  %v3207_v15 = vrot.slane %v16458_v5, 7  ;;  %v13730_v5 = vld [vmem:[%s12252_s20 + $0x20] sm:$0x7] }
 0x11c   : > { %v1903_v11 = vor.u32 %v1902_v61, %v1901_v44  ;;  %v1908_v51 = vrot.slane %v16168_v53, 5  ;;  %v3200_v3 = vor.u32 %v3199_v50, %v3198_v2  ;;  %v13705_v61 = vld [vmem:[%s12252_s20 + $0x8c] sm:$0x7]  ;;  %v3206_v53 = vrot.slane %v16457_v35, 6 }
 0x11d   : > { %v13724_v2 = vcombine.low %v1390_v63, %v1393_v45  ;;  %v1399_v35 = vrot.slane %v13730_v5, 5 }
 0x11e   : > { %v1905_v42 = vrot.slane %v1903_v11, 4  ;;  %v1910_v44 = vor.u32 %v1909_v27, %v1908_v51  ;;  %v13718_v27 = vsel %vm12333_vm6, %v1900_v1, %v1903_v11  ;;  %v3196_v1 = vsel %vm13184_vm12, %v3192_v28, %v3195_v57  ;;  %v11934_v57 = vld [vmem:[%s15921_s1 + $0xf4] ss:$8 sps:$4 sm:$0xff]   ;;  %v16464_v51 = vld [vmem:[#allocation79_spill] sm:$0xff] }
 0x11f   : > { %9921 = vmatmul.mubr.msk.bf16.gmra.mrb[28].mxu0 %vm758_vm5, %v13647_v33  ;;  %v3202_v33 = vrot.slane %v16455_v30, 6  ;;  %16460 = vst [vmem:[#allocation30_spill] sm:$0xff] %v13724_v2  ;;  %v3201_v63 = vsel %vm13184_vm12, %v3197_v37, %v3200_v3  ;;  %v16461_v11 = vshrl.u32 %v13705_v61, 16  ;;  %v1397_v37 = vsel %vm13636_vm15, %v9444_v19, %v1396_v4  ;;  %v16472_v30 = vld [vmem:[#allocation86_spill] sm:$0xff] }
 0x120   : > { %5982 = vmatprep.mubr.bf16.mxu0 %v16278_v55  ;;  %v13722_v50 = vsel %vm12333_vm6, %v1905_v42, %v1910_v44  ;;  %v16462_v42 = vld [vmem:[#allocation76_spill] sm:$0xff]  ;;  %v13751_v28 = vcombine.low %v3196_v1, %v3201_v63  ;;  %v3215_v1 = vrot.slane %v16464_v51, 6  ;;  %v3229_v48 = vrot.slane %v16472_v30, 7 }
 0x121   : > { %v3204_v34 = vor.u32 %v3203_v9, %v3202_v33  ;;  %v3211_v45 = vrot.slane %v16461_v11, 6  ;;  %v3212_v44 = vrot.slane %v16462_v42, 7  ;;  %v11926_v33 = vld [vmem:[%s15921_s1 + $0xe0] ss:$8 sps:$4 sm:$0xff]   ;;  %v3208_v9 = vor.u32 %v3207_v15, %v3206_v53 }
 0x122   : > { %9490 = vmatmul.mubr.msk.bf16.vlgmr.msra.gmra.mrb[0].mxu1 %vm758_vm5, %v9466_v8  ;;  %v11920_v8 = vld [vmem:[%s15921_s1 + $0xd0] ss:$8 sps:$4 sm:$0xff]   ;;  %16463 = vst [vmem:[#allocation32_spill] sm:$0xff] %v13751_v28  ;;  %v1403_v53 = vrot.slane %v13302_v7, 5 }
 0x123   : > { %2283 = vmatpush1.bf16.msra.mxu1 %v11914_v46  ;;  %1679 = vmatprep.mubr.bf16.mxu1 %v16278_v55  ;;  %v11928_v46 = vld [vmem:[%s15921_s1 + $0xe4] ss:$8 sps:$4 sm:$0xff]   ;;  %v3213_v15 = vor.u32 %v3212_v44, %v3211_v45  ;;  %v3210_v19 = vrot.slane %v3208_v9, 4  ;;  %v16467_v45 = vld [vmem:[#allocation81_spill] sm:$0xff] }
 0x124   : > { %2284 = vmatprep.subr.bf16.mxu1 %v11922_v21  ;;  %v1398_v21 = vrot.slane %v1396_v4, 4  ;;  %v11932_v4 = vld [vmem:[%s15921_s1 + $0xf0] ss:$8 sps:$4 sm:$0xff]   ;;  %v3220_v44 = vrot.slane %v16467_v45, 7 }
 0x126   : > { %v1400_v3 = vsel %vm13636_vm15, %v1398_v21, %v1399_v35  ;;  %v16465_v35 = vld [vmem:[#allocation80_spill] sm:$0xff]  ;;  %v16466_v21 = vld [vmem:[#allocation82_spill] sm:$0xff] }
 0x127   : > { %9922 = vmatmul.mubr.msk.bf16.gmra.mrb[32].mxu0 %vm758_vm5, %v13695_v26  ;;  %2285 = vmatpush1.bf16.msra.mxu1 %v11920_v8  ;;  %v3205_v8 = vrot.slane %v3204_v34, 4  ;;  %v3216_v34 = vrot.slane %v16465_v35, 7  ;;  %v3219_v63 = vrot.slane %v16466_v21, 6  ;;  %v13773_v11 = vcombine.low %v1397_v37, %v1400_v3  ;;  %v13781_v21 = vld [vmem:[%s12252_s20 + $0x2c] sm:$0x7] }
 0x128   : > { %5992 = vmatprep.mubr.bf16.mxu0 %v16278_v55  ;;  %2286 = vmatprep.subr.bf16.mxu1 %v11928_v46  ;;  %v13760_v46 = vld [vmem:[%s12252_s20 + $0x98] sm:$0x7]  ;;  %v1405_v35 = vrot.slane %v1403_v53, 4 }
 0x129   : > { %16468 = vst [vmem:[#allocation36_spill] sm:$0xff] %v13773_v11  ;;  %v3209_v26 = vsel %vm13184_vm12, %v3205_v8, %v3208_v9  ;;  %v16469_v45 = vshrl.u32 %v13760_v46, 16  ;;  %v3217_v37 = vor.u32 %v3216_v34, %v3215_v1  ;;  %v3221_v3 = vor.u32 %v3220_v44, %v3219_v63  ;;  %v16471_v9 = vld [vmem:[#allocation85_spill] sm:$0xff] }
 0x12a   : > { %9491 = vmatmul.mubr.msk.bf16.gmra.mrb[4].mxu1 %vm758_vm5, %v13724_v2  ;;  %v11940_v2 = vld [vmem:[%s15921_s1 + $0x104] ss:$8 sps:$4 sm:$0xff]   ;;  %v3228_v8 = vrot.slane %v16471_v9, 6  ;;  %v1410_v34 = vrot.slane %v13327_v17, 5 }
 0x12b   : > { %1689 = vmatprep.mubr.bf16.mxu1 %v16278_v55  ;;  %2287 = vmatpush1.bf16.msra.mxu1 %v11926_v33  ;;  %v9445_v33 = vrot.slane %v13299_v23, 9  ;;  %v3224_v51 = vrot.slane %v16469_v45, 6  ;;  %v3214_v23 = vsel %vm13184_vm12, %v3210_v19, %v3213_v15  ;;  %v16473_v45 = vld [vmem:[#allocation88_spill] sm:$0xff]  ;;  %v3233_v15 = vrot.slane %v16474_v62, 7  ;;  %v16478_v9 = vld [vmem:[#allocation90_spill] sm:$0xff] }
 0x12c   : > { %2288 = vmatprep.subr.bf16.mxu1 %v11934_v57  ;;  %v1406_v57 = vrot.slane %v13781_v21, 5  ;;  %v3232_v52 = vrot.slane %v16473_v45, 6  ;;  %v13800_v1 = vcombine.low %v3209_v26, %v3214_v23  ;;  %v3218_v63 = vrot.slane %v3217_v37, 4 }
 0x12d   : > { %v3223_v44 = vrot.slane %v3221_v3, 4  ;;  %v3230_v45 = vor.u32 %v3229_v48, %v3228_v8  ;;  %v16477_v23 = vshrl.u32 %v13795_v39, 16  ;;  %v16479_v8 = vld [vmem:[#allocation91_spill] sm:$0xff] }
 0x12e   : > { %16475 = vst [vmem:[#allocation37_spill] sm:$0xff] %v13800_v1  ;;  %v1407_v19 = vsel %vm13636_vm15, %v1405_v35, %v1406_v57  ;;  %v3234_v26 = vor.u32 %v3233_v15, %v3232_v52  ;;  %v13817_v35 = vld [vmem:[%s12252_s20 + $0x38] sm:$0x7]  ;;  %v3241_v15 = vrot.slane %v16479_v8, 6 }
 0x12f   : > { %9923 = vmatmul.mubr.msk.bf16.gmra.mrb[36].mxu0 %vm758_vm5, %v13751_v28  ;;  %2289 = vmatpush1.bf16.msra.mxu1 %v11932_v4  ;;  %v16470_v28 = vld [vmem:[#allocation84_spill] sm:$0xff]  ;;  %v3237_v30 = vrot.slane %v16477_v23, 6  ;;  %v1413_v17 = vrot.slane %v13817_v35, 5  ;;  %v13842_v23 = vld [vmem:[%s12252_s20 + $0x44] sm:$0x7] }
 0x130   : > { %6002 = vmatprep.mubr.bf16.mxu0 %v16278_v55  ;;  %v3225_v42 = vrot.slane %v16470_v28, 7  ;;  %2799 = vmatprep.subr.bf16.mxu1 %v11940_v2  ;;  %v1404_v2 = vsel %vm13636_vm15, %v9445_v33, %v1403_v53  ;;  %v3238_v28 = vrot.slane %v16478_v9, 7  ;;  %v1412_v53 = vrot.slane %v1410_v34, 4 }
 0x131   : > { %v13809_v62 = vcombine.low %v1404_v2, %v1407_v19  ;;  %v16182_v33 = vshrl.u32 %v13081_v16, 16  ;;  %v3236_v57 = vrot.slane %v3234_v26, 4 }
 0x132   : > { %9492 = vmatmul.mubr.msk.bf16.gmra.mrb[8].mxu1 %vm758_vm5, %v13773_v11  ;;  %v3226_v4 = vor.u32 %v3225_v42, %v3224_v51  ;;  %v9446_v11 = vrot.slane %v13324_v29, 9  ;;  %v3222_v29 = vsel %vm13184_vm12, %v3218_v63, %v3221_v3  ;;  %v3231_v51 = vrot.slane %v3230_v45, 4  ;;  %v16480_v3 = vld [vmem:[#allocation92_spill] sm:$0xff]  ;;  %v16483_v45 = vld [vmem:[#allocation94_spill] sm:$0xff] }
 0x133   : > { %1699 = vmatprep.mubr.bf16.mxu1 %v16278_v55  ;;  %16476 = vst [vmem:[#allocation39_spill] sm:$0xff] %v13809_v62  ;;  %v1417_v42 = vrot.slane %v13352_v12, 5  ;;  %v3239_v37 = vor.u32 %v3238_v28, %v3237_v30  ;;  %v3242_v2 = vrot.slane %v16480_v3, 7  ;;  %v9447_v63 = vrot.slane %v13349_v38, 9 }
 0x134   : > { %v3227_v52 = vsel %vm13184_vm12, %v3223_v44, %v3226_v4  ;;  %v1411_v48 = vsel %vm13636_vm15, %v9446_v11, %v1410_v34  ;;  %v1414_v11 = vsel %vm13636_vm15, %v1412_v53, %v1413_v17  ;;  %v16482_v4 = vld [vmem:[#allocation95_spill] sm:$0xff]  ;;  %v3246_v34 = vrot.slane %v16483_v45, 7 }
 0x135   : > { %v13833_v19 = vcombine.low %v3222_v29, %v3227_v52  ;;  %v3245_v12 = vrot.slane %v16482_v4, 6  ;;  %v1419_v44 = vrot.slane %v1417_v42, 4  ;;  %v1420_v30 = vrot.slane %v13842_v23, 5 }
 0x136   : > { %v3250_v28 = vrot.slane %v16182_v33, 6  ;;  %v3251_v29 = vrot.slane %v13101_v43, 7  ;;  %v13848_v52 = vcombine.low %v1411_v48, %v1414_v11  ;;  %v3235_v53 = vsel %vm13184_vm12, %v3231_v51, %v3234_v26 }
 0x137   : > { %9924 = vmatmul.mubr.msk.bf16.gmra.mrb[40].mxu0 %vm758_vm5, %v13800_v1  ;;  %16481 = vst [vmem:[#allocation38_spill] sm:$0xff] %v13833_v19  ;;  %v3240_v17 = vsel %vm13184_vm12, %v3236_v57, %v3239_v37  ;;  %v3243_v1 = vor.u32 %v3242_v2, %v3241_v15  ;;  %v3247_v38 = vor.u32 %v3246_v34, %v3245_v12  ;;  %v1424_v57 = vrot.slane %v13380_v54, 5  ;;  %v16486_v12 = vld [vmem:[#allocation98_spill] sm:$0xff] }
 0x138   : > { %6012 = vmatprep.mubr.bf16.mxu0 %v16278_v55  ;;  %16484 = vst [vmem:[#allocation35_spill] sm:$0xff] %v13848_v52  ;;  %v1418_v33 = vsel %vm13636_vm15, %v9447_v63, %v1417_v42  ;;  %v1421_v48 = vsel %vm13636_vm15, %v1419_v44, %v1420_v30  ;;  %v3252_v26 = vor.u32 %v3251_v29, %v3250_v28  ;;  %v3254_v37 = vrot.slane %v13105_v0, 6  ;;  %v13878_v30 = vld [vmem:[%s12252_s20 + $0x50] sm:$0x7] }
 0x139   : > { %v3244_v51 = vrot.slane %v3243_v1, 4  ;;  %v3255_v15 = vrot.slane %v13108_v36, 7  ;;  %v3249_v2 = vrot.slane %v3247_v38, 4  ;;  %v16183_v42 = vshrl.u32 %v13132_v13, 16 }
 0x13a   : > { %9493 = vmatmul.mubr.msk.bf16.gmra.mrb[12].mxu1 %vm758_vm5, %v13809_v62  ;;  %v13857_v62 = vcombine.low %v3235_v53, %v3240_v17  ;;  %v3258_v11 = vrot.slane %v13114_v59, 6  ;;  %v3259_v34 = vrot.slane %v16486_v12, 7  ;;  %v13872_v63 = vcombine.low %v1418_v33, %v1421_v48 }
 0x13b   : > { %1709 = vmatprep.mubr.bf16.mxu1 %v16278_v55  ;;  %v9448_v44 = vrot.slane %v13377_v49, 9  ;;  %v3248_v54 = vsel %vm13184_vm12, %v3244_v51, %v3247_v38  ;;  %v1426_v1 = vrot.slane %v1424_v57, 4  ;;  %v1427_v28 = vrot.slane %v13878_v30, 5 }
 0x13c   : > { %16485 = vst [vmem:[#allocation40_spill] sm:$0xff] %v13857_v62  ;;  %16487 = vst [vmem:[#allocation43_spill] sm:$0xff] %v13872_v63  ;;  %v3256_v29 = vor.u32 %v3255_v15, %v3254_v37  ;;  %v3253_v53 = vsel %vm13184_vm12, %v3249_v2, %v3252_v26  ;;  %v3260_v17 = vor.u32 %v3259_v34, %v3258_v11  ;;  %v3263_v33 = vrot.slane %v16183_v42, 6  ;;  %v16490_v42 = vld [vmem:[#allocation119_spill] sm:$0xff] }
 0x13d   : > { %v3264_v49 = vrot.slane %v13144_v20, 7  ;;  %v13890_v38 = vshrl.u32 %v13395_v10, 16  ;;  %v13893_v48 = vshll.u32 %v13395_v10, 16  ;;  %v13896_v51 = vshll.u32 %v13374_v32, 16 }
 0x13e   : > { %v13899_v37 = vshrl.u32 %v13374_v32, 16  ;;  %v1425_v26 = vsel %vm13636_vm15, %v9448_v44, %v1424_v57  ;;  %v13905_v15 = vcombine.low %v3248_v54, %v3253_v53  ;;  %v1428_v2 = vsel %vm13636_vm15, %v1426_v1, %v1427_v28 }
 0x13f   : > { %9925 = vmatmul.mubr.msk.bf16.gmra.mrb[44].mxu0 %vm758_vm5, %v13833_v19  ;;  %v3257_v11 = vrot.slane %v3256_v29, 4  ;;  %v1431_v10 = vrot.slane %v13411_v22, 5  ;;  %v3262_v34 = vrot.slane %v3260_v17, 4  ;;  %v3265_v32 = vor.u32 %v3264_v49, %v3263_v33  ;;  %v16493_v22 = vld [vmem:[#allocation121_spill] sm:$0xff] }
 0x140   : > { %6022 = vmatprep.mubr.bf16.mxu0 %v16278_v55  ;;  %16488 = vst [vmem:[#allocation44_spill] sm:$0xff] %v13899_v37  ;;  %16489 = vst [vmem:[#allocation46_spill] sm:$0xff] %v13905_v15  ;;  %v5802_v44 = vrot.slane %v13890_v38, 6  ;;  %v5803_v54 = vrot.slane %v13893_v48, 7  ;;  %v5806_v53 = vrot.slane %v13899_v37, 6  ;;  %v5807_v1 = vrot.slane %v13896_v51, 7 }
 0x141   : > { %v13919_v28 = vcombine.low %v1425_v26, %v1428_v2  ;;  %v9449_v29 = vrot.slane %v16493_v22, 9  ;;  %v3261_v33 = vsel %vm13184_vm12, %v3257_v11, %v3260_v17  ;;  %v3266_v49 = vsel %vm13184_vm12, %v3262_v34, %v3265_v32  ;;  %v13929_v19 = vld [vmem:[%s12252_s20 + $0x5c] sm:$0x7]  ;;  %v12148_v37 = vld [vmem:[%s12252_s20 + $0x60] sm:$0xf] }
 0x142   : > { %9494 = vmatmul.mubr.msk.bf16.gmra.mrb[16].mxu1 %vm758_vm5, %v13848_v52  ;;  %v1433_v57 = vrot.slane %v1431_v10, 4  ;;  %v5804_v26 = vor.u32 %v5803_v54, %v5802_v44  ;;  %v5808_v2 = vor.u32 %v5807_v1, %v5806_v53  ;;  %v16494_v22 = vshrl.u32 %v16490_v42, 16  ;;  %v16496_v32 = vld [vmem:[#allocation125_spill] sm:$0xff] }
 0x143   : > { %1719 = vmatprep.mubr.bf16.mxu1 %v16278_v55  ;;  %16492 = vst [vmem:[#allocation47_spill] sm:$0xff] %v13919_v28  ;;  %v13938_v17 = vcombine.low %v3261_v33, %v3266_v49  ;;  %v1432_v11 = vsel %vm13636_vm15, %v9449_v29, %v1431_v10  ;;  %v1438_v44 = vrot.slane %v16496_v32, 5  ;;  %v16498_v33 = vld [vmem:[#allocation124_spill] sm:$0xff]  ;;  %v3684_v32 = vrot.slane %v13671_v18, 7 }
 0x144   : > { %v5811_v52 = vrot.slane %v16494_v22, 6  ;;  %v5805_v54 = vrot.slane %v5804_v26, 4  ;;  %v5810_v53 = vrot.slane %v5808_v2, 4  ;;  %v9450_v49 = vrot.slane %v16498_v33, 9 }
 0x145   : > { %16495 = vst [vmem:[#allocation50_spill] sm:$0xff] %v13938_v17 }
 0x146   : > { %v1439_v29 = vsel %vm13636_vm15, %v9450_v49, %v1438_v44  ;;  %v3688_v49 = vrot.slane %v13277_v40, 7  ;;  %v11929_v40 = vld [vmem:[%s15921_s1 + $0x380] ss:$8 sps:$4 sm:$0xff]  }
 0x147   : > { %9926 = vmatmul.mubr.msk.bf16.gmra.mrb[48].mxu0 %vm758_vm5, %v13857_v62  ;;  %v13912_v62 = vshll.u32 %v16490_v42, 16  ;;  %v1440_v42 = vrot.slane %v1438_v44, 4 }
 0x148   : > { %6032 = vmatprep.mubr.bf16.mxu0 %v16278_v55 }
 0x149   : > { %16491 = vst [vmem:[#allocation45_spill] sm:$0xff] %v13912_v62 }
 0x14a   : > { %9495 = vmatmul.mubr.msk.bf16.gmra.mrb[20].mxu1 %vm758_vm5, %v13872_v63  ;;  %v1434_v63 = vrot.slane %v13929_v19, 5 }
 0x14b   : > { %1729 = vmatprep.mubr.bf16.mxu1 %v16278_v55 }
 0x14c   : > { %v1435_v34 = vsel %vm13636_vm15, %v1433_v57, %v1434_v63  ;;  %v5809_v63 = vsel %vm13184_vm12, %v5805_v54, %v5808_v2  ;;  %v13971_v2 = vld [vmem:[%s12252_s20 + $0x70] sm:$0xf]  ;;  %v16500_v54 = vmov 0 }
 0x14d   : > { %v13946_v22 = vcombine.low %v1432_v11, %v1435_v34  ;;  %v9667_v11 = vrot.slane %v13237_v47, 11  ;;  %v16501_v54 = vsel %vm13976_vm2, 4294967295, %v16500_v54  ;;  %v1448_v47 = vrot.slane %v13611_v60, 5 }
 0x14e   : > { %16502 = vst [vmem:[#allocation52_spill] sm:$0xff] %v16501_v54 }
 0x14f   : > { %9927 = vmatmul.mubr.msk.bf16.gmra.mrb[52].mxu0 %vm758_vm5, %v13905_v15  ;;  %v5812_v15 = vrot.slane %v13912_v62, 7  ;;  %16497 = vst [vmem:[#allocation51_spill] sm:$0xff] %v13946_v22 }
 0x150   : > { %6042 = vmatprep.mubr.bf16.mxu0 %v16278_v55 }
 0x151   : > { %v5813_v1 = vor.u32 %v5812_v15, %v5811_v52  ;;  %v3681_v15 = vrot.slane %v13240_v6, 7  ;;  %v1445_v6 = vrot.slane %v13971_v2, 5 }
 0x152   : > { %9496 = vmatmul.mubr.msk.bf16.gmra.mrb[24].mxu1 %vm758_vm5, %v13919_v28  ;;  %v13952_v28 = vld [vmem:[%s12252_s20 + $0x68] sm:$0x7] }
 0x153   : > { %1739 = vmatprep.mubr.bf16.mxu1 %v16278_v55  ;;  %v1441_v10 = vrot.slane %v13952_v28, 5  ;;  %v5814_v52 = vsel %vm13184_vm12, %v5810_v53, %v5813_v1  ;;  %v3683_v34 = vrot.slane %v3681_v15, 4  ;;  %v1447_v1 = vrot.slane %v1445_v6, 4 }
 0x154   : > { %v13963_v57 = vcombine.low %v5809_v63, %v5814_v52  ;;  %v3682_v18 = vsel %vm13976_vm2, %v9667_v11, %v3681_v15  ;;  %v14005_v15 = vld [vmem:[%s12252_s20 + $0x7c] sm:$0xf]  ;;  %v3690_v11 = vrot.slane %v3688_v49, 4 }
 0x155   : > { %v1442_v26 = vsel %vm13636_vm15, %v1440_v42, %v1441_v10  ;;  %v13985_v42 = vld [vmem:[%s12252_s20 + $0x6c] sm:$0xf]  ;;  %v3685_v33 = vsel %vm13976_vm2, %v3683_v34, %v3684_v32  ;;  %v1449_v52 = vsel %vm13636_vm15, %v1447_v1, %v1448_v47  ;;  %v3691_v34 = vrot.slane %v13730_v5, 7 }
 0x156   : > { %16499 = vst [vmem:[#allocation53_spill] sm:$0xff] %v13963_v57  ;;  %v13980_v53 = vcombine.low %v1439_v29, %v1442_v26  ;;  %v9451_v44 = vrot.slane %v13985_v42, 9  ;;  %v13997_v10 = vcombine.low %v3682_v18, %v3685_v33  ;;  %v1452_v29 = vrot.slane %v14005_v15, 5 }
 0x157   : > { %9928 = vmatmul.mubr.msk.bf16.gmra.mrb[56].mxu0 %vm758_vm5, %v13938_v17  ;;  %v9668_v26 = vrot.slane %v13274_v41, 11  ;;  %v1455_v41 = vrot.slane %v13657_v24, 5  ;;  %v3692_v18 = vsel %vm13976_vm2, %v3690_v11, %v3691_v34  ;;  %v3695_v33 = vrot.slane %v13302_v7, 7  ;;  %v12127_v34 = vld [vmem:[%s12252_s20 + $0x24] sm:$0xf] }
 0x158   : > { %6052 = vmatprep.mubr.bf16.mxu0 %v16278_v55  ;;  %16503 = vst [vmem:[#allocation54_spill] sm:$0xff] %v13980_v53  ;;  %16504 = vst [vmem:[#allocation58_spill] sm:$0xff] %v13997_v10  ;;  %v1446_v63 = vsel %vm13636_vm15, %v9451_v44, %v1445_v6  ;;  %v11937_v6 = vld [vmem:[%s15921_s1 + $0x394] ss:$8 sps:$4 sm:$0xff]   ;;  %v14021_v44 = vld [vmem:[%s12252_s20 + $0x78] sm:$0xf] }
 0x159   : > { %v14016_v32 = vcombine.low %v1446_v63, %v1449_v52  ;;  %v9452_v1 = vrot.slane %v14021_v44, 9  ;;  %v1454_v47 = vrot.slane %v1452_v29, 4  ;;  %v3689_v5 = vsel %vm13976_vm2, %v9668_v26, %v3688_v49  ;;  %v11935_v63 = vld [vmem:[%s15921_s1 + $0x390] ss:$8 sps:$4 sm:$0xff]   ;;  %v11943_v52 = vld [vmem:[%s15921_s1 + $0x3a4] ss:$8 sps:$4 sm:$0xff]  }
 0x15a   : > { %9497 = vmatmul.mubr.msk.bf16.gmra.mrb[28].mxu1 %vm758_vm5, %v13946_v22  ;;  %v14047_v26 = vld [vmem:[%s12252_s20 + $0x88] sm:$0xf] }
 0x15b   : > { %1749 = vmatprep.mubr.bf16.mxu1 %v16278_v55  ;;  %16505 = vst [vmem:[#allocation59_spill] sm:$0xff] %v14016_v32  ;;  %v1453_v7 = vsel %vm13636_vm15, %v9452_v1, %v1452_v29  ;;  %v1456_v49 = vsel %vm13636_vm15, %v1454_v47, %v1455_v41  ;;  %v1459_v11 = vrot.slane %v14047_v26, 5  ;;  %v11949_v29 = vld [vmem:[%s15921_s1 + $0x3b4] ss:$8 sps:$4 sm:$0xff]   ;;  %v14063_v47 = vld [vmem:[%s12252_s20 + $0x84] sm:$0xf] }
 0x15c   : > { %v14058_v1 = vcombine.low %v1453_v7, %v1456_v49  ;;  %v9453_v41 = vrot.slane %v14063_v47, 9  ;;  %v12129_v49 = vld [vmem:[%s12252_s20 + $0x34] sm:$0xf] }
 0x15e   : > { %16507 = vst [vmem:[#allocation90_spill] sm:$0xff] %v14058_v1 }
 0x15f   : > { %9929 = vmatmul.mubr.msk.bf16.gmra.mrb[60].mxu0 %vm758_vm5, %v13963_v57  ;;  %v3697_v57 = vrot.slane %v3695_v33, 4 }
 0x160   : > { %6221 = vmatprep.mubr.bf16.mxu0 %v16278_v55 }
 0x162   : > { %9498 = vmatmul.mubr.msk.bf16.gmra.mrb[32].mxu1 %vm758_vm5, %v13980_v53 }
 0x163   : > { %1759 = vmatprep.mubr.bf16.mxu1 %v16278_v55 }
 0x167   : > { %9948 = vmatmul.mubr.msk.bf16.vlgmr.msra.gmra.mrb[0].mxu0 %vm758_vm5, %v13997_v10  ;;  %v11955_v10 = vld [vmem:[%s15921_s1 + $0x3c4] ss:$8 sps:$4 sm:$0xff]  }
 0x168   : > { %6504 = vmatpush1.bf16.msra.mxu0 %v11929_v40  ;;  %6231 = vmatprep.mubr.bf16.mxu0 %v16278_v55  ;;  %v14039_v40 = vcombine.low %v3689_v5, %v3692_v18  ;;  %v3698_v5 = vrot.slane %v13781_v21, 7  ;;  %v11941_v18 = vld [vmem:[%s15921_s1 + $0x3a0] ss:$8 sps:$4 sm:$0xff]   ;;  %v1461_v21 = vrot.slane %v1459_v11, 4 }
 0x169   : > { %6505 = vmatprep.subr.bf16.mxu0 %v11937_v6  ;;  %v9669_v6 = vrot.slane %v12127_v34, 11  ;;  %v3702_v34 = vrot.slane %v12129_v49, 7 }
 0x16a   : > { %9499 = vmatmul.mubr.msk.bf16.gmra.mrb[36].mxu1 %vm758_vm5, %v14016_v32  ;;  %16506 = vst [vmem:[#allocation62_spill] sm:$0xff] %v14039_v40  ;;  %v3699_v7 = vsel %vm13976_vm2, %v3697_v57, %v3698_v5  ;;  %v1460_v57 = vsel %vm13636_vm15, %v9453_v41, %v1459_v11  ;;  %v14089_v5 = vld [vmem:[%s12252_s20 + $0x94] sm:$0xf]  ;;  %v14099_v11 = vld [vmem:[%s12252_s20 + $0x90] sm:$0xf] }
 0x16b   : > { %1769 = vmatprep.mubr.bf16.mxu1 %v16278_v55  ;;  %v3704_v32 = vrot.slane %v3702_v34, 4  ;;  %v9454_v41 = vrot.slane %v14099_v11, 9 }
 0x16c   : > { %6506 = vmatpush1.bf16.msra.mxu0 %v11935_v63  ;;  %v1462_v63 = vrot.slane %v13705_v61, 5 }
 0x16d   : > { %6507 = vmatprep.subr.bf16.mxu0 %v11943_v52  ;;  %v3696_v52 = vsel %vm13976_vm2, %v9669_v6, %v3695_v33 }
 0x16e   : > { %v14081_v33 = vcombine.low %v3696_v52, %v3699_v7  ;;  %v1463_v6 = vsel %vm13636_vm15, %v1461_v21, %v1462_v63  ;;  %v1469_v63 = vrot.slane %v13760_v46, 5 }
 0x16f   : > { %9949 = vmatmul.mubr.msk.bf16.gmra.mrb[4].mxu0 %vm758_vm5, %v14039_v40  ;;  %v11947_v40 = vld [vmem:[%s15921_s1 + $0x3b0] ss:$8 sps:$4 sm:$0xff]   ;;  %v14094_v52 = vcombine.low %v1460_v57, %v1463_v6 }
 0x170   : > { %6241 = vmatprep.mubr.bf16.mxu0 %v16278_v55  ;;  %6508 = vmatpush1.bf16.msra.mxu0 %v11941_v18  ;;  %16508 = vst [vmem:[#allocation91_spill] sm:$0xff] %v14081_v33  ;;  %v1466_v18 = vrot.slane %v14089_v5, 5 }
 0x171   : > { %6509 = vmatprep.subr.bf16.mxu0 %v11949_v29  ;;  %v12131_v29 = vld [vmem:[%s12252_s20 + $0x30] sm:$0xf]  ;;  %16509 = vst [vmem:[#allocation92_spill] sm:$0xff] %v14094_v52 }
 0x172   : > { %9500 = vmatmul.mubr.msk.bf16.gmra.mrb[40].mxu1 %vm758_vm5, %v14058_v1  ;;  %v9670_v49 = vrot.slane %v12131_v29, 11  ;;  %v3705_v1 = vrot.slane %v13817_v35, 7  ;;  %v1468_v21 = vrot.slane %v1466_v18, 4  ;;  %v1467_v6 = vsel %vm13636_vm15, %v9454_v41, %v1466_v18  ;;  %v14129_v18 = vld [vmem:[%s12252_s20 + $0x9c] sm:$0xf] }
 0x173   : > { %1779 = vmatprep.mubr.bf16.mxu1 %v16278_v55  ;;  %v9455_v41 = vrot.slane %v14129_v18, 9 }
 0x174   : > { %6510 = vmatpush1.bf16.msra.mxu0 %v11947_v40  ;;  %v3703_v35 = vsel %vm13976_vm2, %v9670_v49, %v3702_v34  ;;  %v12133_v40 = vld [vmem:[%s12252_s20 + $0x40] sm:$0xf]  ;;  %v1470_v29 = vsel %vm13636_vm15, %v1468_v21, %v1469_v63  ;;  %v1476_v63 = vrot.slane %v13795_v39, 5 }
 0x175   : > { %6839 = vmatprep.subr.bf16.mxu0 %v11955_v10  ;;  %v3706_v10 = vsel %vm13976_vm2, %v3704_v32, %v3705_v1  ;;  %v3709_v7 = vrot.slane %v12133_v40, 7  ;;  %v14119_v34 = vld [vmem:[%s12252_s20 + $0xa0] sm:$0xf]  ;;  %v12135_v1 = vld [vmem:[%s12252_s20 + $0x3c] sm:$0xf] }
 0x176   : > { %v14111_v57 = vcombine.low %v3703_v35, %v3706_v10  ;;  %v1473_v32 = vrot.slane %v14119_v34, 5  ;;  %v9671_v49 = vrot.slane %v12135_v1, 11  ;;  %v14124_v35 = vcombine.low %v1467_v6, %v1470_v29  ;;  %v12137_v6 = vld [vmem:[%s12252_s20 + $0x4c] sm:$0xf] }
 0x177   : > { %9950 = vmatmul.mubr.msk.bf16.gmra.mrb[8].mxu0 %vm758_vm5, %v14081_v33  ;;  %v3711_v40 = vrot.slane %v3709_v7, 4  ;;  %v3712_v33 = vrot.slane %v13842_v23, 7  ;;  %v3716_v29 = vrot.slane %v12137_v6, 7 }
 0x178   : > { %6251 = vmatprep.mubr.bf16.mxu0 %v16278_v55  ;;  %16510 = vst [vmem:[#allocation95_spill] sm:$0xff] %v14111_v57  ;;  %16511 = vst [vmem:[#allocation94_spill] sm:$0xff] %v14124_v35  ;;  %v1475_v21 = vrot.slane %v1473_v32, 4  ;;  %v3710_v10 = vsel %vm13976_vm2, %v9671_v49, %v3709_v7  ;;  %v14149_v49 = vld [vmem:[%s12252_s20 + $0xac] sm:$0xf] }
 0x179   : > { %v3713_v23 = vsel %vm13976_vm2, %v3711_v40, %v3712_v33  ;;  %v1480_v33 = vrot.slane %v14149_v49, 5  ;;  %v12139_v40 = vld [vmem:[%s12252_s20 + $0x48] sm:$0xf] }
 0x17a   : > { %9501 = vmatmul.mubr.msk.bf16.gmra.mrb[44].mxu1 %vm758_vm5, %v14094_v52  ;;  %v14141_v1 = vcombine.low %v3710_v10, %v3713_v23  ;;  %v1477_v7 = vsel %vm13636_vm15, %v1475_v21, %v1476_v63  ;;  %v9672_v6 = vrot.slane %v12139_v40, 11  ;;  %v3718_v52 = vrot.slane %v3716_v29, 4  ;;  %v14163_v63 = vld [vmem:[%s12252_s20 + $0xb0] sm:$0x7] }
 0x17b   : > { %1789 = vmatprep.mubr.bf16.mxu1 %v16278_v55  ;;  %v1482_v21 = vrot.slane %v1480_v33, 4  ;;  %v1483_v23 = vrot.slane %v14163_v63, 5 }
 0x17c   : > { %16512 = vst [vmem:[#allocation98_spill] sm:$0xff] %v14141_v1 }
 0x17f   : > { %9951 = vmatmul.mubr.msk.bf16.gmra.mrb[12].mxu0 %vm758_vm5, %v14111_v57  ;;  %v1474_v57 = vsel %vm13636_vm15, %v9455_v41, %v1473_v32  ;;  %v14159_v32 = vld [vmem:[%s12252_s20 + $0xa8] sm:$0xf] }
 0x180   : > { %6261 = vmatprep.mubr.bf16.mxu0 %v16278_v55  ;;  %v14154_v10 = vcombine.low %v1474_v57, %v1477_v7  ;;  %v9456_v41 = vrot.slane %v14159_v32, 9  ;;  %v12142_v7 = vld [vmem:[%s12252_s20 + $0x58] sm:$0xf] }
 0x181   : > { %v3723_v40 = vrot.slane %v12142_v7, 7 }
 0x182   : > { %9502 = vmatmul.mubr.msk.bf16.gmra.mrb[48].mxu1 %vm758_vm5, %v14124_v35  ;;  %v3719_v35 = vrot.slane %v13878_v30, 7  ;;  %16513 = vst [vmem:[#allocation121_spill] sm:$0xff] %v14154_v10  ;;  %v3717_v30 = vsel %vm13976_vm2, %v9672_v6, %v3716_v29  ;;  %v1481_v17 = vsel %vm13636_vm15, %v9456_v41, %v1480_v33  ;;  %v1484_v29 = vsel %vm13636_vm15, %v1482_v21, %v1483_v23  ;;  %v14182_v6 = vld [vmem:[%s12252_s20 + $0xb8] sm:$0xf]  ;;  %v14192_v33 = vld [vmem:[%s12252_s20 + $0xb4] sm:$0xf] }
 0x183   : > { %1799 = vmatprep.mubr.bf16.mxu1 %v16278_v55  ;;  %v3725_v53 = vrot.slane %v3723_v40, 4  ;;  %v9457_v41 = vrot.slane %v14192_v33, 9  ;;  %v14196_v23 = vld [vmem:[%s12252_s20 + $0xbc] sm:$0x7] }
 0x184   : > { %v3720_v57 = vsel %vm13976_vm2, %v3718_v52, %v3719_v35  ;;  %v1487_v52 = vrot.slane %v14182_v6, 5  ;;  %v12144_v35 = vld [vmem:[%s12252_s20 + $0x54] sm:$0xf] }
 0x185   : > { %v9673_v7 = vrot.slane %v12144_v35, 11 }
 0x186   : > { %v1489_v21 = vrot.slane %v1487_v52, 4  ;;  %v1488_v22 = vsel %vm13636_vm15, %v9457_v41, %v1487_v52  ;;  %v3737_v41 = vrot.slane %v13971_v2, 7 }
 0x187   : > { %9952 = vmatmul.mubr.msk.bf16.gmra.mrb[16].mxu0 %vm758_vm5, %v14141_v1  ;;  %v14174_v1 = vcombine.low %v3717_v30, %v3720_v57  ;;  %v14187_v30 = vcombine.low %v1481_v17, %v1484_v29  ;;  %v1490_v57 = vrot.slane %v14196_v23, 5  ;;  %v12147_v29 = vld [vmem:[%s12252_s20 + $0x64] sm:$0xf] }
 0x188   : > { %6271 = vmatprep.mubr.bf16.mxu0 %v16278_v55  ;;  %v3730_v35 = vrot.slane %v12147_v29, 7  ;;  %v16517_v29 = vcombine.low %v13718_v27, %v13722_v50  ;;  %v11952_v27 = vld [vmem:[%s15921_s1 + $0x124] ss:$8 sps:$4 sm:$0xff]   ;;  %v11950_v50 = vld [vmem:[%s15921_s1 + $0x120] ss:$8 sps:$4 sm:$0xff]  }
 0x189   : > { %16514 = vst [vmem:[#allocation125_spill] sm:$0xff] %v14174_v1  ;;  %16515 = vst [vmem:[#allocation124_spill] sm:$0xff] %v14187_v30  ;;  %v1491_v62 = vsel %vm13636_vm15, %v1489_v21, %v1490_v57  ;;  %v11938_v21 = vld [vmem:[%s15921_s1 + $0x100] ss:$8 sps:$4 sm:$0xff]  }
 0x18a   : > { %9503 = vmatmul.mubr.msk.bf16.gmra.mrb[52].mxu1 %vm758_vm5, %v14154_v10  ;;  %v3726_v10 = vrot.slane %v13929_v19, 7  ;;  %v3724_v19 = vsel %vm13976_vm2, %v9673_v7, %v3723_v40  ;;  %v9674_v40 = vrot.slane %v12148_v37, 11  ;;  %v3732_v7 = vrot.slane %v3730_v35, 4 }
 0x18b   : > { %1809 = vmatprep.mubr.bf16.mxu1 %v16278_v55 }
 0x18c   : > { %v3727_v17 = vsel %vm13976_vm2, %v3725_v53, %v3726_v10  ;;  %v3733_v53 = vrot.slane %v13952_v28, 7  ;;  %v14216_v10 = vcombine.low %v1488_v22, %v1491_v62  ;;  %v9675_v62 = vrot.slane %v13985_v42, 11 }
 0x18d   : > { %v3739_v28 = vrot.slane %v3737_v41, 4  ;;  %v3740_v22 = vrot.slane %v13611_v60, 7  ;;  %v3744_v42 = vrot.slane %v14005_v15, 7  ;;  %v9676_v15 = vrot.slane %v14021_v44, 11 }
 0x18e   : > { %16516 = vst [vmem:[#allocation127_spill] sm:$0xff] %v14216_v10  ;;  %v3734_v52 = vsel %vm13976_vm2, %v3732_v7, %v3733_v53  ;;  %v3738_v2 = vsel %vm13976_vm2, %v9675_v62, %v3737_v41  ;;  %v3747_v53 = vrot.slane %v13657_v24, 7  ;;  %v11958_v41 = vld [vmem:[%s15921_s1 + $0x134] ss:$8 sps:$4 sm:$0xff]   ;;  %v16518_v62 = vld [vmem:[#allocation10_spill] sm:$0xff] }
 0x18f   : > { %9953 = vmatmul.mubr.msk.bf16.gmra.mrb[20].mxu0 %vm758_vm5, %v14174_v1  ;;  %v14207_v1 = vcombine.low %v3724_v19, %v3727_v17  ;;  %v3731_v19 = vsel %vm13976_vm2, %v9674_v40, %v3730_v35  ;;  %v3741_v57 = vsel %vm13976_vm2, %v3739_v28, %v3740_v22  ;;  %v11946_v17 = vld [vmem:[%s15921_s1 + $0x114] ss:$8 sps:$4 sm:$0xff]   ;;  %v11944_v40 = vld [vmem:[%s15921_s1 + $0x110] ss:$8 sps:$4 sm:$0xff]   ;;  %v3746_v7 = vrot.slane %v3744_v42, 4 }
 0x190   : > { %6281 = vmatprep.mubr.bf16.mxu0 %v16278_v55  ;;  %v14228_v37 = vcombine.low %v3731_v19, %v3734_v52  ;;  %v14251_v35 = vcombine.low %v3738_v2, %v3741_v57  ;;  %v3745_v44 = vsel %vm13976_vm2, %v9676_v15, %v3744_v42  ;;  %v3751_v52 = vrot.slane %v14047_v26, 7  ;;  %v11956_v22 = vld [vmem:[%s15921_s1 + $0x130] ss:$8 sps:$4 sm:$0xff]   ;;  %v11964_v57 = vld [vmem:[%s15921_s1 + $0x144] ss:$8 sps:$4 sm:$0xff]  }
 0x191   : > { %v3748_v19 = vsel %vm13976_vm2, %v3746_v7, %v3747_v53  ;;  %v3754_v2 = vrot.slane %v13705_v61, 7  ;;  %v9678_v15 = vrot.slane %v14099_v11, 11  ;;  %v3761_v53 = vrot.slane %v13760_v46, 7 }
 0x192   : > { %9504 = vmatmul.mubr.msk.bf16.gmra.mrb[56].mxu1 %vm758_vm5, %v14187_v30  ;;  %v14278_v28 = vcombine.low %v3745_v44, %v3748_v19  ;;  %v3753_v26 = vrot.slane %v3751_v52, 4  ;;  %v16520_v44 = vld [vmem:[#allocation26_spill] sm:$0xff]  ;;  %v9679_v19 = vrot.slane %v14129_v18, 11 }
 0x193   : > { %1819 = vmatprep.mubr.bf16.mxu1 %v16278_v55 }
 0x197   : > { %9954 = vmatmul.mubr.msk.bf16.gmra.mrb[24].mxu0 %vm758_vm5, %v14207_v1 }
 0x198   : > { %6291 = vmatprep.mubr.bf16.mxu0 %v16278_v55 }
 0x19a   : > { %9505 = vmatmul.mubr.msk.bf16.gmra.mrb[60].mxu1 %vm758_vm5, %v14216_v10 }
 0x19b   : > { %2314 = vmatprep.mubr.bf16.mxu1 %v16278_v55 }
 0x19f   : > { %9955 = vmatmul.mubr.msk.bf16.gmra.mrb[28].mxu0 %vm758_vm5, %v14228_v37 }
 0x1a0   : > { %6301 = vmatprep.mubr.bf16.mxu0 %v16278_v55 }
 0x1a2   : > { %9538 = vmatmul.mubr.msk.bf16.vlgmr.msra.gmra.mrb[0].mxu1 %vm758_vm5, %v16517_v29  ;;  %v16519_v29 = vld [vmem:[#allocation18_spill] sm:$0xff] }
 0x1a3   : > { %2800 = vmatpush1.bf16.msra.mxu1 %v11938_v21  ;;  %2324 = vmatprep.mubr.bf16.mxu1 %v16278_v55  ;;  %v9677_v21 = vrot.slane %v14063_v47, 11  ;;  %v3755_v47 = vsel %vm13976_vm2, %v3753_v26, %v3754_v2  ;;  %v9680_v26 = vrot.slane %v14159_v32, 11 }
 0x1a4   : > { %2801 = vmatprep.subr.bf16.mxu1 %v11946_v17  ;;  %v3758_v17 = vrot.slane %v14089_v5, 7 }
 0x1a5   : > { %v3752_v42 = vsel %vm13976_vm2, %v9677_v21, %v3751_v52  ;;  %v16521_v21 = vld [vmem:[#allocation33_spill] sm:$0xff] }
 0x1a6   : > { %v3760_v7 = vrot.slane %v3758_v17, 4  ;;  %v3759_v5 = vsel %vm13976_vm2, %v9678_v15, %v3758_v17  ;;  %v16522_v17 = vld [vmem:[#allocation41_spill] sm:$0xff] }
 0x1a7   : > { %9956 = vmatmul.mubr.msk.bf16.gmra.mrb[32].mxu0 %vm758_vm5, %v14251_v35  ;;  %2802 = vmatpush1.bf16.msra.mxu1 %v11944_v40  ;;  %v14299_v40 = vcombine.low %v3752_v42, %v3755_v47  ;;  %v3779_v47 = vrot.slane %v14182_v6, 7 }
 0x1a8   : > { %6311 = vmatprep.mubr.bf16.mxu0 %v16278_v55  ;;  %2803 = vmatprep.subr.bf16.mxu1 %v11952_v27  ;;  %v3762_v27 = vsel %vm13976_vm2, %v3760_v7, %v3761_v53  ;;  %v3782_v7 = vrot.slane %v14196_v23, 7  ;;  %v14350_v53 = vld [vmem:[%s12252_s20 + $0xc4] sm:$0xf] }
 0x1a9   : > { %v14314_v11 = vcombine.low %v3759_v5, %v3762_v27  ;;  %v3781_v15 = vrot.slane %v3779_v47, 4  ;;  %v6129_v5 = vrot.slane %v14350_v53, 7 }
 0x1aa   : > { %9539 = vmatmul.mubr.msk.bf16.gmra.mrb[4].mxu1 %vm758_vm5, %v16518_v62 }
 0x1ab   : > { %2334 = vmatprep.mubr.bf16.mxu1 %v16278_v55  ;;  %2804 = vmatpush1.bf16.msra.mxu1 %v11950_v50  ;;  %v3765_v50 = vrot.slane %v14119_v34, 7  ;;  %v3783_v27 = vsel %vm13976_vm2, %v3781_v15, %v3782_v7 }
 0x1ac   : > { %2805 = vmatprep.subr.bf16.mxu1 %v11958_v41  ;;  %v3768_v41 = vrot.slane %v13795_v39, 7 }
 0x1ad   : > { %v3767_v52 = vrot.slane %v3765_v50, 4  ;;  %v3766_v34 = vsel %vm13976_vm2, %v9679_v19, %v3765_v50  ;;  %v16524_v50 = vld [vmem:[#allocation48_spill] sm:$0xff]  ;;  %v6131_v19 = vrot.slane %v6129_v5, 4 }
 0x1af   : > { %9957 = vmatmul.mubr.msk.bf16.gmra.mrb[36].mxu0 %vm758_vm5, %v14278_v28  ;;  %2806 = vmatpush1.bf16.msra.mxu1 %v11956_v22  ;;  %v3769_v62 = vsel %vm13976_vm2, %v3767_v52, %v3768_v41  ;;  %v3772_v22 = vrot.slane %v14149_v49, 7  ;;  %v14367_v52 = vld [vmem:[%s12252_s20 + $0xc8] sm:$0x7] }
 0x1b0   : > { %6321 = vmatprep.mubr.bf16.mxu0 %v16278_v55  ;;  %3412 = vmatprep.subr.bf16.mxu1 %v11964_v57  ;;  %v14329_v18 = vcombine.low %v3766_v34, %v3769_v62  ;;  %v3775_v57 = vrot.slane %v14163_v63, 7  ;;  %v9681_v63 = vrot.slane %v14192_v33, 11  ;;  %v14363_v33 = vld [vmem:[%s12252_s20 + $0xc0] sm:$0xf]  ;;  %v6132_v41 = vrot.slane %v14367_v52, 7 }
 0x1b1   : > { %v3774_v2 = vrot.slane %v3772_v22, 4  ;;  %v3773_v49 = vsel %vm13976_vm2, %v9680_v26, %v3772_v22  ;;  %v9930_v23 = vrot.slane %v14363_v33, 11  ;;  %v2032_v26 = vrot.slane %v16432_v58, 5 }
 0x1b2   : > { %9540 = vmatmul.mubr.msk.bf16.gmra.mrb[8].mxu1 %vm758_vm5, %v16519_v29  ;;  %v3780_v6 = vsel %vm13976_vm2, %v9681_v63, %v3779_v47  ;;  %v6133_v22 = vsel %vm13976_vm2, %v6131_v19, %v6132_v41  ;;  %v16527_v47 = vld [vmem:[#allocation55_spill] sm:$0xff]  ;;  %v16533_v41 = vld [vmem:[#allocation69_spill] sm:$0xff]  ;;  %v9796_v54 = vrot.slane %v14363_v33, 9 }
 0x1b3   : > { %2344 = vmatprep.mubr.bf16.mxu1 %v16278_v55  ;;  %v3776_v42 = vsel %vm13976_vm2, %v3774_v2, %v3775_v57  ;;  %v14370_v34 = vcombine.low %v3780_v6, %v3783_v27  ;;  %v6130_v62 = vsel %vm13976_vm2, %v9930_v23, %v6129_v5  ;;  %v2033_v2 = vrot.slane %v16433_v56, 6  ;;  %v16530_v6 = vld [vmem:[#allocation64_spill] sm:$0xff]  ;;  %v16531_v27 = vld [vmem:[#allocation65_spill] sm:$0xff]  ;;  %v16532_v23 = vld [vmem:[#allocation66_spill] sm:$0xff] }
 0x1b4   : > { %v14344_v32 = vcombine.low %v3773_v49, %v3776_v42  ;;  %v2036_v57 = vrot.slane %v16434_v14, 5  ;;  %v16526_v49 = vld [vmem:[#allocation61_spill] sm:$0xff]  ;;  %v14386_v63 = vcombine.low %v6130_v62, %v6133_v22  ;;  %v16529_v5 = vshrl.u32 %v13611_v60, 16  ;;  %v16535_v60 = vld [vmem:[#allocation60_spill] sm:$0xff] }
 0x1b5   : > { %16525 = vst [vmem:[#allocation18_spill] sm:$0xff] %v14370_v34  ;;  %v2037_v42 = vrot.slane %v16526_v49, 6  ;;  %v2034_v15 = vor.u32 %v2033_v2, %v2032_v26  ;;  %v2044_v56 = vrot.slane %v16530_v6, 6  ;;  %v2047_v14 = vrot.slane %v16531_v27, 5  ;;  %v16537_v6 = vld [vmem:[#allocation70_spill] sm:$0xff] }
 0x1b6   : > { %16523 = vst [vmem:[#allocation10_spill] sm:$0xff] %v14344_v32  ;;  %16528 = vst [vmem:[#allocation26_spill] sm:$0xff] %v14386_v63  ;;  %v2043_v58 = vrot.slane %v16529_v5, 5  ;;  %v2048_v19 = vrot.slane %v16532_v23, 6  ;;  %v2051_v49 = vrot.slane %v16533_v41, 5  ;;  %v2059_v27 = vrot.slane %v16537_v6, 6 }
 0x1b7   : > { %9958 = vmatmul.mubr.msk.bf16.gmra.mrb[40].mxu0 %vm758_vm5, %v14299_v40  ;;  %v2038_v7 = vor.u32 %v2037_v42, %v2036_v57  ;;  %v2035_v62 = vrot.slane %v2034_v15, 4  ;;  %v16536_v42 = vshrl.u32 %v13657_v24, 16  ;;  %v16540_v41 = vld [vmem:[#allocation110_spill] sm:$0xff] }
 0x1b8   : > { %6331 = vmatprep.mubr.bf16.mxu0 %v16278_v55  ;;  %v2045_v26 = vor.u32 %v2044_v56, %v2043_v58  ;;  %v2049_v2 = vor.u32 %v2048_v19, %v2047_v14  ;;  %v11953_v58 = vld [vmem:[%s15921_s1 + $0x3c0] ss:$8 sps:$4 sm:$0xff]  }
 0x1b9   : > { %v2040_v22 = vrot.slane %v2038_v7, 4  ;;  %v2058_v5 = vrot.slane %v16536_v42, 5  ;;  %v2039_v23 = vsel %vm12333_vm6, %v2035_v62, %v2038_v7  ;;  %v16541_v7 = vld [vmem:[#allocation72_spill] sm:$0xff]  ;;  %v16542_v62 = vld [vmem:[#allocation73_spill] sm:$0xff]  ;;  %v16544_v6 = vld [vmem:[#allocation74_spill] sm:$0xff] }
 0x1ba   : > { %9541 = vmatmul.mubr.msk.bf16.gmra.mrb[12].mxu1 %vm758_vm5, %v16520_v44  ;;  %v2050_v56 = vrot.slane %v2049_v2, 4  ;;  %v11959_v2 = vld [vmem:[%s15921_s1 + $0x3d0] ss:$8 sps:$4 sm:$0xff]  }
 0x1bb   : > { %2354 = vmatprep.mubr.bf16.mxu1 %v16278_v55  ;;  %v2046_v15 = vsel %vm12333_vm6, %v2040_v22, %v2045_v26  ;;  %v2060_v19 = vor.u32 %v2059_v27, %v2058_v5  ;;  %v2063_v22 = vrot.slane %v16542_v62, 6  ;;  %v16543_v26 = vld [vmem:[#allocation75_spill] sm:$0xff]  ;;  %v16546_v62 = vld [vmem:[#allocation76_spill] sm:$0xff] }
 0x1bc   : > { %v14415_v24 = vcombine.low %v2039_v23, %v2046_v15  ;;  %v2066_v42 = vrot.slane %v16543_v26, 5  ;;  %v11967_v5 = vld [vmem:[%s15921_s1 + $0x3e4] ss:$8 sps:$4 sm:$0xff]   ;;  %v2074_v26 = vrot.slane %v16546_v62, 6 }
 0x1be   : > { %16539 = vst [vmem:[#allocation33_spill] sm:$0xff] %v14415_v24 }
 0x1bf   : > { %9959 = vmatmul.mubr.msk.bf16.gmra.mrb[44].mxu0 %vm758_vm5, %v14314_v11 }
 0x1c0   : > { %6341 = vmatprep.mubr.bf16.mxu0 %v16278_v55 }
 0x1c2   : > { %9542 = vmatmul.mubr.msk.bf16.gmra.mrb[16].mxu1 %vm758_vm5, %v16521_v21 }
 0x1c3   : > { %2364 = vmatprep.mubr.bf16.mxu1 %v16278_v55 }
 0x1c7   : > { %9960 = vmatmul.mubr.msk.bf16.gmra.mrb[48].mxu0 %vm758_vm5, %v14329_v18 }
 0x1c8   : > { %6351 = vmatprep.mubr.bf16.mxu0 %v16278_v55 }
 0x1ca   : > { %9543 = vmatmul.mubr.msk.bf16.gmra.mrb[20].mxu1 %vm758_vm5, %v16522_v17 }
 0x1cb   : > { %2374 = vmatprep.mubr.bf16.mxu1 %v16278_v55 }
 0x1cf   : > { %9961 = vmatmul.mubr.msk.bf16.gmra.mrb[52].mxu0 %vm758_vm5, %v14344_v32 }
 0x1d0   : > { %6361 = vmatprep.mubr.bf16.mxu0 %v16278_v55 }
 0x1d2   : > { %9544 = vmatmul.mubr.msk.bf16.gmra.mrb[24].mxu1 %vm758_vm5, %v16524_v50 }
 0x1d3   : > { %2384 = vmatprep.mubr.bf16.mxu1 %v16278_v55 }
 0x1d7   : > { %9962 = vmatmul.mubr.msk.bf16.gmra.mrb[56].mxu0 %vm758_vm5, %v14370_v34  ;;  %v16534_v34 = vld [vmem:[#allocation68_spill] sm:$0xff] }
 0x1d8   : > { %6371 = vmatprep.mubr.bf16.mxu0 %v16278_v55  ;;  %v2052_v32 = vrot.slane %v16534_v34, 6  ;;  %v12051_v34 = vld [vmem:[%s15921_s1 + $0x4c0] ss:$8 sps:$4 sm:$0xff]  }
 0x1da   : > { %9545 = vmatmul.mubr.msk.bf16.gmra.mrb[28].mxu1 %vm758_vm5, %v16527_v47  ;;  %v2053_v57 = vor.u32 %v2052_v32, %v2051_v49  ;;  %v11961_v32 = vld [vmem:[%s15921_s1 + $0x3d4] ss:$8 sps:$4 sm:$0xff]   ;;  %v2062_v49 = vrot.slane %v16541_v7, 5  ;;  %v16545_v7 = vshrl.u32 %v13705_v61, 16  ;;  %v16550_v61 = vld [vmem:[#allocation82_spill] sm:$0xff] }
 0x1db   : > { %2394 = vmatprep.mubr.bf16.mxu1 %v16278_v55 }
 0x1dc   : > { %v2055_v14 = vrot.slane %v2053_v57, 4  ;;  %v2054_v27 = vsel %vm12333_vm6, %v2050_v56, %v2053_v57  ;;  %v2064_v15 = vor.u32 %v2063_v22, %v2062_v49  ;;  %v11973_v57 = vld [vmem:[%s15921_s1 + $0x3f4] ss:$8 sps:$4 sm:$0xff]   ;;  %v16548_v56 = vld [vmem:[#allocation79_spill] sm:$0xff]  ;;  %v2081_v49 = vrot.slane %v16550_v61, 5 }
 0x1dd   : > { %v16551_v22 = vld [vmem:[#allocation81_spill] sm:$0xff] }
 0x1de   : > { %v2061_v23 = vsel %vm12333_vm6, %v2055_v14, %v2060_v19  ;;  %v2077_v14 = vrot.slane %v16548_v56, 5 }
 0x1df   : > { %9963 = vmatmul.mubr.msk.bf16.gmra.mrb[60].mxu0 %vm758_vm5, %v14386_v63  ;;  %v2067_v63 = vrot.slane %v16544_v6, 6  ;;  %v11965_v6 = vld [vmem:[%s15921_s1 + $0x3e0] ss:$8 sps:$4 sm:$0xff]  }
 0x1e0   : > { %6535 = vmatprep.mubr.bf16.mxu0 %v16278_v55 }
 0x1e2   : > { %9546 = vmatmul.mubr.msk.bf16.gmra.mrb[32].mxu1 %vm758_vm5, %v16535_v60 }
 0x1e3   : > { %2404 = vmatprep.mubr.bf16.mxu1 %v16278_v55 }
 0x1e7   : > { %9981 = vmatmul.mubr.msk.bf16.vlgmr.msra.gmra.mrb[0].mxu0 %vm758_vm5, %v16540_v41  ;;  %v14443_v41 = vcombine.low %v2054_v27, %v2061_v23  ;;  %v11981_v23 = vld [vmem:[%s15921_s1 + $0x404] ss:$8 sps:$4 sm:$0xff]  }
 0x1e8   : > { %6840 = vmatpush1.bf16.msra.mxu0 %v11953_v58  ;;  %6545 = vmatprep.mubr.bf16.mxu0 %v16278_v55  ;;  %v2068_v58 = vor.u32 %v2067_v63, %v2066_v42  ;;  %v16549_v63 = vld [vmem:[#allocation80_spill] sm:$0xff]  ;;  %v2082_v42 = vrot.slane %v16551_v22, 6 }
 0x1e9   : > { %6841 = vmatprep.subr.bf16.mxu0 %v11961_v32  ;;  %v2073_v32 = vrot.slane %v16545_v7, 5  ;;  %16547 = vst [vmem:[#allocation41_spill] sm:$0xff] %v14443_v41  ;;  %v2078_v19 = vrot.slane %v16549_v63, 6  ;;  %v2065_v7 = vrot.slane %v2064_v15, 4  ;;  %v16553_v15 = vshrl.u32 %v13760_v46, 16  ;;  %v16556_v46 = vld [vmem:[#allocation85_spill] sm:$0xff] }
 0x1ea   : > { %9547 = vmatmul.mubr.msk.bf16.gmra.mrb[36].mxu1 %vm758_vm5, %v14415_v24  ;;  %v2070_v62 = vrot.slane %v2068_v58, 4  ;;  %v2083_v63 = vor.u32 %v2082_v42, %v2081_v49  ;;  %v16555_v49 = vld [vmem:[#allocation114_spill] sm:$0xff]  ;;  %v2092_v42 = vrot.slane %v16556_v46, 5 }
 0x1eb   : > { %2414 = vmatprep.mubr.bf16.mxu1 %v16278_v55  ;;  %v2075_v27 = vor.u32 %v2074_v26, %v2073_v32  ;;  %v2079_v56 = vor.u32 %v2078_v19, %v2077_v14  ;;  %v2088_v32 = vrot.slane %v16553_v15, 5  ;;  %v16554_v26 = vld [vmem:[#allocation84_spill] sm:$0xff]  ;;  %v16557_v15 = vld [vmem:[#allocation86_spill] sm:$0xff] }
 0x1ec   : > { %6842 = vmatpush1.bf16.msra.mxu0 %v11959_v2  ;;  %v16552_v2 = vld [vmem:[#allocation112_spill] sm:$0xff]  ;;  %v2089_v61 = vrot.slane %v16554_v26, 6  ;;  %v2085_v14 = vrot.slane %v2083_v63, 4  ;;  %v2093_v26 = vrot.slane %v16557_v15, 6 }
 0x1ed   : > { %6843 = vmatprep.subr.bf16.mxu0 %v11967_v5  ;;  %v11971_v5 = vld [vmem:[%s15921_s1 + $0x3f0] ss:$8 sps:$4 sm:$0xff]  }
 0x1ee   : > { %v2090_v19 = vor.u32 %v2089_v61, %v2088_v32  ;;  %v2104_v32 = vrot.slane %v16478_v9, 6 }
 0x1ef   : > { %9982 = vmatmul.mubr.msk.bf16.gmra.mrb[4].mxu0 %vm758_vm5, %v16552_v2  ;;  %v2080_v2 = vrot.slane %v2079_v56, 4  ;;  %v16560_v56 = vshrl.u32 %v13795_v39, 16 }
 0x1f0   : > { %6555 = vmatprep.mubr.bf16.mxu0 %v16278_v55  ;;  %6844 = vmatpush1.bf16.msra.mxu0 %v11965_v6  ;;  %v2069_v6 = vsel %vm12333_vm6, %v2065_v7, %v2068_v58  ;;  %v16559_v58 = vld [vmem:[#allocation87_spill] sm:$0xff] }
 0x1f1   : > { %6845 = vmatprep.subr.bf16.mxu0 %v11973_v57  ;;  %v2076_v57 = vsel %vm12333_vm6, %v2070_v62, %v2075_v27  ;;  %v2097_v7 = vrot.slane %v16559_v58, 6  ;;  %v2084_v62 = vsel %vm12333_vm6, %v2080_v2, %v2083_v63  ;;  %v2091_v27 = vsel %vm12333_vm6, %v2085_v14, %v2090_v19  ;;  %v16561_v14 = vld [vmem:[#allocation116_spill] sm:$0xff] }
 0x1f2   : > { %9548 = vmatmul.mubr.msk.bf16.gmra.mrb[40].mxu1 %vm758_vm5, %v14443_v41  ;;  %v14471_v22 = vcombine.low %v2069_v6, %v2076_v57  ;;  %v16558_v41 = vld [vmem:[#allocation88_spill] sm:$0xff]  ;;  %v14490_v61 = vcombine.low %v2084_v62, %v2091_v27  ;;  %v2107_v6 = vrot.slane %v16479_v8, 5  ;;  %v2108_v57 = vrot.slane %v16480_v3, 6  ;;  %v16563_v62 = vld [vmem:[#allocation118_spill] sm:$0xff] }
 0x1f3   : > { %2424 = vmatprep.mubr.bf16.mxu1 %v16278_v55  ;;  %v2096_v24 = vrot.slane %v16558_v41, 5  ;;  %v2103_v41 = vrot.slane %v16560_v56, 5  ;;  %v2111_v2 = vrot.slane %v16482_v4, 5  ;;  %v2112_v63 = vrot.slane %v16483_v45, 6 }
 0x1f4   : > { %6846 = vmatpush1.bf16.msra.mxu0 %v11971_v5  ;;  %v2094_v5 = vor.u32 %v2093_v26, %v2092_v42  ;;  %v2109_v39 = vor.u32 %v2108_v57, %v2107_v6  ;;  %v16562_v8 = vshrl.u32 %v13081_v16, 16  ;;  %v2119_v4 = vrot.slane %v13101_v43, 6  ;;  %v16565_v6 = vld [vmem:[#allocation122_spill] sm:$0xff] }
 0x1f5   : > { %7159 = vmatprep.subr.bf16.mxu0 %v11981_v23  ;;  %v2098_v23 = vor.u32 %v2097_v7, %v2096_v24  ;;  %v2105_v46 = vor.u32 %v2104_v32, %v2103_v41  ;;  %v2113_v9 = vor.u32 %v2112_v63, %v2111_v2  ;;  %v2122_v16 = vrot.slane %v13105_v0, 5 }
 0x1f6   : > { %v2095_v19 = vrot.slane %v2094_v5, 4  ;;  %v2118_v3 = vrot.slane %v16562_v8, 5  ;;  %v2110_v26 = vrot.slane %v2109_v39, 4  ;;  %v2123_v43 = vrot.slane %v13108_v36, 6  ;;  %v16566_v39 = vld [vmem:[#allocation126_spill] sm:$0xff] }
 0x1f7   : > { %9983 = vmatmul.mubr.msk.bf16.gmra.mrb[8].mxu0 %vm758_vm5, %v16555_v49  ;;  %v2100_v24 = vrot.slane %v2098_v23, 4  ;;  %v2115_v58 = vrot.slane %v2113_v9, 4  ;;  %v2126_v27 = vrot.slane %v13114_v59, 5  ;;  %v2127_v5 = vrot.slane %v16486_v12, 6 }
 0x1f8   : > { %6565 = vmatprep.mubr.bf16.mxu0 %v16278_v55  ;;  %v2099_v45 = vsel %vm12333_vm6, %v2095_v19, %v2098_v23  ;;  %v2120_v7 = vor.u32 %v2119_v4, %v2118_v3  ;;  %v2114_v23 = vsel %vm12333_vm6, %v2110_v26, %v2113_v9  ;;  %v2124_v0 = vor.u32 %v2123_v43, %v2122_v16  ;;  %v14541_v19 = vld [vmem:[%s12252_s20 + $0x4] sm:$0xf]  ;;  %v14549_v9 = vld [vmem:[%s12252_s20] sm:$0xf]  ;;  %v14553_v4 = vld [vmem:[%s12252_s20 + $0x8] sm:$0x7] }
 0x1f9   : > { %v2106_v42 = vsel %vm12333_vm6, %v2100_v24, %v2105_v46  ;;  %v2128_v36 = vor.u32 %v2127_v5, %v2126_v27  ;;  %v16564_v59 = vshrl.u32 %v13132_v13, 16  ;;  %v2134_v12 = vrot.slane %v13144_v20, 6  ;;  %v16569_v43 = vld [vmem:[#allocation3_spill] sm:$0xff]  ;;  %v16570_v5 = vld [vmem:[#allocation5_spill] sm:$0xff] }
 0x1fa   : > { %9549 = vmatmul.mubr.msk.bf16.gmra.mrb[44].mxu1 %vm758_vm5, %v14471_v22  ;;  %v14509_v15 = vcombine.low %v2099_v45, %v2106_v42  ;;  %v2121_v56 = vsel %vm12333_vm6, %v2115_v58, %v2120_v7  ;;  %v2125_v57 = vrot.slane %v2124_v0, 4  ;;  %v2544_v24 = vrot.slane %v14541_v19, 6  ;;  %v16568_v7 = vld [vmem:[#allocation2_spill] sm:$0xff]  ;;  %v16592_v42 = vld [vmem:[#allocation107_spill] sm:$0xff] }
 0x1fb   : > { %2434 = vmatprep.mubr.bf16.mxu1 %v16278_v55  ;;  %v2133_v41 = vrot.slane %v16564_v59, 5  ;;  %v14528_v32 = vcombine.low %v2114_v23, %v2121_v56  ;;  %v2130_v2 = vrot.slane %v2128_v36, 4  ;;  %v9554_v8 = vrot.slane %v14549_v9, 10  ;;  %v16571_v56 = vld [vmem:[#allocation4_spill] sm:$0xff] }
 0x1fc   : > { %v2129_v13 = vsel %vm12333_vm6, %v2125_v57, %v2128_v36  ;;  %v2546_v3 = vrot.slane %v2544_v24, 4  ;;  %v2547_v45 = vrot.slane %v14553_v4, 6  ;;  %v3059_v16 = vrot.slane %v16568_v7, 6  ;;  %v16572_v36 = vld [vmem:[#allocation6_spill] sm:$0xff] }
 0x1fd   : > { %v2135_v63 = vor.u32 %v2134_v12, %v2133_v41  ;;  %v2545_v26 = vsel %vm12791_vm9, %v9554_v8, %v2544_v24  ;;  %v3060_v27 = vrot.slane %v16569_v43, 7  ;;  %v3063_v23 = vrot.slane %v16570_v5, 6  ;;  %v16573_v12 = vld [vmem:[#allocation9_spill] sm:$0xff]  ;;  %v11962_v57 = vld [vmem:[%s15921_s1 + $0x140] ss:$8 sps:$4 sm:$0xff]  }
 0x1fe   : > { %v2548_v58 = vsel %vm12791_vm9, %v2546_v3, %v2547_v45  ;;  %v3064_v0 = vrot.slane %v16571_v56, 7  ;;  %v3069_v59 = vrot.slane %v16572_v36, 7  ;;  %v11978_v7 = vld [vmem:[%s15921_s1 + $0x164] ss:$8 sps:$4 sm:$0xff]   ;;  %v11984_v56 = vld [vmem:[%s15921_s1 + $0x174] ss:$8 sps:$4 sm:$0xff]  }
 0x1ff   : > { %9984 = vmatmul.mubr.msk.bf16.gmra.mrb[12].mxu0 %vm758_vm5, %v16561_v14  ;;  %v2136_v20 = vsel %vm12333_vm6, %v2130_v2, %v2135_v63  ;;  %v9578_v41 = vcombine.low %v2545_v26, %v2548_v58  ;;  %v11970_v2 = vld [vmem:[%s15921_s1 + $0x154] ss:$8 sps:$4 sm:$0xff]   ;;  %v3061_v63 = vor.u32 %v3060_v27, %v3059_v16  ;;  %v11968_v58 = vld [vmem:[%s15921_s1 + $0x150] ss:$8 sps:$4 sm:$0xff]   ;;  %v16576_v5 = vld [vmem:[#allocation14_spill] sm:$0xff] }
 0x200   : > { %6575 = vmatprep.mubr.bf16.mxu0 %v16278_v55  ;;  %v14544_v46 = vcombine.low %v2129_v13, %v2136_v20  ;;  %v3065_v13 = vor.u32 %v3064_v0, %v3063_v23  ;;  %v16574_v20 = vld [vmem:[#allocation28_spill] sm:$0xff]  ;;  %v11976_v23 = vld [vmem:[%s15921_s1 + $0x160] ss:$8 sps:$4 sm:$0xff]  }
 0x201   : > { %v16575_v24 = vshrl.u32 %v16574_v20, 16  ;;  %v3062_v3 = vrot.slane %v3061_v63, 4  ;;  %v16577_v0 = vld [vmem:[#allocation67_spill] sm:$0xff]  ;;  %v11982_v36 = vld [vmem:[%s15921_s1 + $0x170] ss:$8 sps:$4 sm:$0xff]  }
 0x202   : > { %9550 = vmatmul.mubr.msk.bf16.gmra.mrb[48].mxu1 %vm758_vm5, %v14490_v61  ;;  %v3067_v45 = vrot.slane %v3065_v13, 4  ;;  %v16581_v63 = vld [vmem:[#allocation83_spill] sm:$0xff]  ;;  %v16583_v20 = vld [vmem:[#allocation93_spill] sm:$0xff]  ;;  %v16591_v27 = vld [vmem:[#allocation20_spill] sm:$0xff] }
 0x203   : > { %2444 = vmatprep.mubr.bf16.mxu1 %v16278_v55  ;;  %v3068_v8 = vrot.slane %v16575_v24, 6  ;;  %v14590_v16 = vsel %vm13184_vm12, %v3062_v3, %v3065_v13  ;;  %v16582_v13 = vld [vmem:[#allocation21_spill] sm:$0xff]  ;;  %v16584_v24 = vld [vmem:[#allocation24_spill] sm:$0xff] }
 0x204   : > { %v16586_v3 = vld [vmem:[#allocation25_spill] sm:$0xff] }
 0x205   : > { %v3070_v26 = vor.u32 %v3069_v59, %v3068_v8  ;;  %v11990_v59 = vld [vmem:[%s15921_s1 + $0x184] ss:$8 sps:$4 sm:$0xff]   ;;  %v16585_v8 = vld [vmem:[#allocation97_spill] sm:$0xff] }
 0x207   : > { %9985 = vmatmul.mubr.msk.bf16.gmra.mrb[16].mxu0 %vm758_vm5, %v16563_v62  ;;  %v14594_v43 = vsel %vm13184_vm12, %v3067_v45, %v3070_v26  ;;  %v16587_v45 = vld [vmem:[#allocation100_spill] sm:$0xff]  ;;  %v14647_v26 = vcombine.low %v14363_v33, %v14350_v53 }
 0x208   : > { %6585 = vmatprep.mubr.bf16.mxu0 %v16278_v55 }
 0x209   : > { %16588 = vst [vmem:[#allocation48_spill] sm:$0xff] %v14647_v26 }
 0x20a   : > { %9551 = vmatmul.mubr.msk.bf16.gmra.mrb[52].mxu1 %vm758_vm5, %v14509_v15 }
 0x20b   : > { %2454 = vmatprep.mubr.bf16.mxu1 %v16278_v55 }
 0x20f   : > { %9986 = vmatmul.mubr.msk.bf16.gmra.mrb[20].mxu0 %vm758_vm5, %v16565_v6 }
 0x210   : > { %6595 = vmatprep.mubr.bf16.mxu0 %v16278_v55 }
 0x212   : > { %9552 = vmatmul.mubr.msk.bf16.gmra.mrb[56].mxu1 %vm758_vm5, %v14528_v32 }
 0x213   : > { %2464 = vmatprep.mubr.bf16.mxu1 %v16278_v55 }
 0x217   : > { %9987 = vmatmul.mubr.msk.bf16.gmra.mrb[24].mxu0 %vm758_vm5, %v16566_v39 }
 0x218   : > { %6605 = vmatprep.mubr.bf16.mxu0 %v16278_v55 }
 0x21a   : > { %9553 = vmatmul.mubr.msk.bf16.gmra.mrb[60].mxu1 %vm758_vm5, %v14544_v46 }
 0x21b   : > { %2831 = vmatprep.mubr.bf16.mxu1 %v16278_v55 }
 0x21f   : > { %9988 = vmatmul.mubr.msk.bf16.gmra.mrb[28].mxu0 %vm758_vm5, %v16573_v12  ;;  %v16621_v12 = vld [vmem:[#allocation22_spill] sm:$0xff] }
 0x220   : > { %6615 = vmatprep.mubr.bf16.mxu0 %v16278_v55 }
 0x222   : > { %9602 = vmatmul.mubr.msk.bf16.vlgmr.msra.gmra.mrb[0].mxu1 %vm758_vm5, %v9578_v41  ;;  %v16578_v41 = vld [vmem:[#allocation17_spill] sm:$0xff] }
 0x223   : > { %3413 = vmatpush1.bf16.msra.mxu1 %v11962_v57  ;;  %2841 = vmatprep.mubr.bf16.mxu1 %v16278_v55  ;;  %v16579_v57 = vld [vmem:[#allocation77_spill] sm:$0xff] }
 0x224   : > { %3414 = vmatprep.subr.bf16.mxu1 %v11970_v2  ;;  %v16580_v2 = vld [vmem:[#allocation13_spill] sm:$0xff] }
 0x227   : > { %9989 = vmatmul.mubr.msk.bf16.gmra.mrb[32].mxu0 %vm758_vm5, %v16576_v5  ;;  %3415 = vmatpush1.bf16.msra.mxu1 %v11968_v58  ;;  %v14654_v58 = vld [vmem:[%s12252_s20 + $0xcc] sm:$0xf] }
 0x228   : > { %6625 = vmatprep.mubr.bf16.mxu0 %v16278_v55  ;;  %3416 = vmatprep.subr.bf16.mxu1 %v11978_v7  ;;  %v14657_v7 = vld [vmem:[%s12252_s20 + $0xd0] sm:$0xf] }
 0x22a   : > { %9603 = vmatmul.mubr.msk.bf16.gmra.mrb[4].mxu1 %vm758_vm5, %v16577_v0  ;;  %v16590_v0 = vld [vmem:[#allocation105_spill] sm:$0xff] }
 0x22b   : > { %2851 = vmatprep.mubr.bf16.mxu1 %v16278_v55  ;;  %3417 = vmatpush1.bf16.msra.mxu1 %v11976_v23  ;;  %v16589_v23 = vld [vmem:[#allocation102_spill] sm:$0xff] }
 0x22c   : > { %3418 = vmatprep.subr.bf16.mxu1 %v11984_v56  ;;  %v9972_v56 = vcombine.low %v14654_v58, %v14657_v7 }
 0x22f   : > { %9990 = vmatmul.mubr.msk.bf16.gmra.mrb[36].mxu0 %vm758_vm5, %v16578_v41  ;;  %3419 = vmatpush1.bf16.msra.mxu1 %v11982_v36  ;;  %v11979_v36 = vld [vmem:[%s15921_s1 + $0x400] ss:$8 sps:$4 sm:$0xff]  }
 0x230   : > { %6635 = vmatprep.mubr.bf16.mxu0 %v16278_v55  ;;  %3929 = vmatprep.subr.bf16.mxu1 %v11990_v59  ;;  %v11987_v59 = vld [vmem:[%s15921_s1 + $0x414] ss:$8 sps:$4 sm:$0xff]   ;;  %v16619_v41 = vld [vmem:[#allocation103_spill] sm:$0xff] }
 0x232   : > { %9604 = vmatmul.mubr.msk.bf16.gmra.mrb[8].mxu1 %vm758_vm5, %v16579_v57 }
 0x233   : > { %2861 = vmatprep.mubr.bf16.mxu1 %v16278_v55 }
 0x237   : > { %9991 = vmatmul.mubr.msk.bf16.gmra.mrb[40].mxu0 %vm758_vm5, %v16580_v2 }
 0x238   : > { %6645 = vmatprep.mubr.bf16.mxu0 %v16278_v55 }
 0x23a   : > { %9605 = vmatmul.mubr.msk.bf16.gmra.mrb[12].mxu1 %vm758_vm5, %v16581_v63 }
 0x23b   : > { %2871 = vmatprep.mubr.bf16.mxu1 %v16278_v55 }
 0x23f   : > { %9992 = vmatmul.mubr.msk.bf16.gmra.mrb[44].mxu0 %vm758_vm5, %v16582_v13 }
 0x240   : > { %6655 = vmatprep.mubr.bf16.mxu0 %v16278_v55 }
 0x242   : > { %9606 = vmatmul.mubr.msk.bf16.gmra.mrb[16].mxu1 %vm758_vm5, %v16583_v20  ;;  %v14819_v20 = vld [vmem:[%s12252_s20 + $0xd4] sm:$0x7] }
 0x243   : > { %2881 = vmatprep.mubr.bf16.mxu1 %v16278_v55  ;;  %v14829_v57 = vshll.u32 %v14819_v20, 16 }
 0x247   : > { %9993 = vmatmul.mubr.msk.bf16.gmra.mrb[48].mxu0 %vm758_vm5, %v16584_v24  ;;  %v16617_v24 = vld [vmem:[#allocation19_spill] sm:$0xff] }
 0x248   : > { %6665 = vmatprep.mubr.bf16.mxu0 %v16278_v55 }
 0x24a   : > { %9607 = vmatmul.mubr.msk.bf16.gmra.mrb[20].mxu1 %vm758_vm5, %v16585_v8 }
 0x24b   : > { %2891 = vmatprep.mubr.bf16.mxu1 %v16278_v55 }
 0x24f   : > { %9994 = vmatmul.mubr.msk.bf16.gmra.mrb[52].mxu0 %vm758_vm5, %v16586_v3  ;;  %v14805_v3 = vshll.u32 %v14657_v7, 16 }
 0x250   : > { %6675 = vmatprep.mubr.bf16.mxu0 %v16278_v55 }
 0x251   : > { %v6772_v8 = vrot.slane %v14805_v3, 5 }
 0x252   : > { %9608 = vmatmul.mubr.msk.bf16.gmra.mrb[24].mxu1 %vm758_vm5, %v16587_v45 }
 0x253   : > { %2901 = vmatprep.mubr.bf16.mxu1 %v16278_v55 }
 0x257   : > { %9995 = vmatmul.mubr.msk.bf16.gmra.mrb[56].mxu0 %vm758_vm5, %v14647_v26 }
 0x258   : > { %6685 = vmatprep.mubr.bf16.mxu0 %v16278_v55 }
 0x25a   : > { %9609 = vmatmul.mubr.msk.bf16.gmra.mrb[28].mxu1 %vm758_vm5, %v16589_v23  ;;  %v14808_v23 = vshrl.u32 %v14657_v7, 16 }
 0x25b   : > { %2911 = vmatprep.mubr.bf16.mxu1 %v16278_v55 }
 0x25c   : > { %v6776_v2 = vrot.slane %v14808_v23, 4 }
 0x25e   : > { %v6777_v5 = vor.u32 %v6776_v2, %v6772_v8 }
 0x25f   : > { %9996 = vmatmul.mubr.msk.bf16.gmra.mrb[60].mxu0 %vm758_vm5, %v9972_v56  ;;  %v11985_v56 = vld [vmem:[%s15921_s1 + $0x410] ss:$8 sps:$4 sm:$0xff]  }
 0x260   : > { %6871 = vmatprep.mubr.bf16.mxu0 %v16278_v55  ;;  %v6778_v6 = vrot.slane %v6777_v5, 4  ;;  %v16623_v5 = vld [vmem:[#allocation29_spill] sm:$0xff] }
 0x262   : > { %9610 = vmatmul.mubr.msk.bf16.gmra.mrb[32].mxu1 %vm758_vm5, %v16590_v0  ;;  %v14802_v0 = vshll.u32 %v14654_v58, 16 }
 0x263   : > { %2921 = vmatprep.mubr.bf16.mxu1 %v16278_v55 }
 0x264   : > { %v6766_v13 = vrot.slane %v14802_v0, 5 }
 0x267   : > { %10014 = vmatmul.mubr.msk.bf16.vlgmr.msra.gmra.mrb[0].mxu0 %vm758_vm5, %v16591_v27  ;;  %v11999_v27 = vld [vmem:[%s15921_s1 + $0x434] ss:$8 sps:$4 sm:$0xff]  }
 0x268   : > { %7160 = vmatpush1.bf16.msra.mxu0 %v11979_v36  ;;  %6881 = vmatprep.mubr.bf16.mxu0 %v16278_v55  ;;  %v11991_v36 = vld [vmem:[%s15921_s1 + $0x420] ss:$8 sps:$4 sm:$0xff]  }
 0x269   : > { %7161 = vmatprep.subr.bf16.mxu0 %v11987_v59  ;;  %v16593_v59 = vld [vmem:[#allocation27_spill] sm:$0xff] }
 0x26a   : > { %9611 = vmatmul.mubr.msk.bf16.gmra.mrb[36].mxu1 %vm758_vm5, %v16592_v42  ;;  %v11997_v42 = vld [vmem:[%s15921_s1 + $0x430] ss:$8 sps:$4 sm:$0xff]  }
 0x26b   : > { %2931 = vmatprep.mubr.bf16.mxu1 %v16278_v55 }
 0x26c   : > { %7162 = vmatpush1.bf16.msra.mxu0 %v11985_v56  ;;  %v12005_v56 = vld [vmem:[%s15921_s1 + $0x444] ss:$8 sps:$4 sm:$0xff]  }
 0x26d   : > { %7163 = vmatprep.subr.bf16.mxu0 %v11993_v31  ;;  %v16594_v31 = vld [vmem:[#allocation109_spill] sm:$0xff] }
 0x26f   : > { %10015 = vmatmul.mubr.msk.bf16.gmra.mrb[4].mxu0 %vm758_vm5, %v16593_v59  ;;  %v16595_v59 = vld [vmem:[#allocation34_spill] sm:$0xff] }
 0x270   : > { %6891 = vmatprep.mubr.bf16.mxu0 %v16278_v55  ;;  %7164 = vmatpush1.bf16.msra.mxu0 %v11991_v36  ;;  %v16596_v36 = vld [vmem:[#allocation111_spill] sm:$0xff] }
 0x271   : > { %7165 = vmatprep.subr.bf16.mxu0 %v11999_v27  ;;  %v16597_v27 = vld [vmem:[#allocation42_spill] sm:$0xff] }
 0x272   : > { %9612 = vmatmul.mubr.msk.bf16.gmra.mrb[40].mxu1 %vm758_vm5, %v16594_v31  ;;  %v16598_v31 = vld [vmem:[#allocation113_spill] sm:$0xff] }
 0x273   : > { %2941 = vmatprep.mubr.bf16.mxu1 %v16278_v55 }
 0x274   : > { %7166 = vmatpush1.bf16.msra.mxu0 %v11997_v42  ;;  %v16599_v42 = vld [vmem:[#allocation49_spill] sm:$0xff] }
 0x275   : > { %7486 = vmatprep.subr.bf16.mxu0 %v12005_v56  ;;  %v16600_v56 = vld [vmem:[#allocation115_spill] sm:$0xff] }
 0x277   : > { %10016 = vmatmul.mubr.msk.bf16.gmra.mrb[8].mxu0 %vm758_vm5, %v16595_v59  ;;  %v16601_v59 = vld [vmem:[#allocation56_spill] sm:$0xff] }
 0x278   : > { %6901 = vmatprep.mubr.bf16.mxu0 %v16278_v55 }
 0x27a   : > { %9613 = vmatmul.mubr.msk.bf16.gmra.mrb[44].mxu1 %vm758_vm5, %v16596_v36  ;;  %v16607_v36 = vld [vmem:[#allocation78_spill] sm:$0xff] }
 0x27b   : > { %2951 = vmatprep.mubr.bf16.mxu1 %v16278_v55 }
 0x27f   : > { %10017 = vmatmul.mubr.msk.bf16.gmra.mrb[12].mxu0 %vm758_vm5, %v16597_v27  ;;  %v16602_v27 = vld [vmem:[#allocation117_spill] sm:$0xff] }
 0x280   : > { %6911 = vmatprep.mubr.bf16.mxu0 %v16278_v55 }
 0x282   : > { %9614 = vmatmul.mubr.msk.bf16.gmra.mrb[48].mxu1 %vm758_vm5, %v16598_v31  ;;  %v16603_v31 = vld [vmem:[#allocation63_spill] sm:$0xff] }
 0x283   : > { %2961 = vmatprep.mubr.bf16.mxu1 %v16278_v55 }
 0x287   : > { %10018 = vmatmul.mubr.msk.bf16.gmra.mrb[16].mxu0 %vm758_vm5, %v16599_v42  ;;  %v16604_v42 = vld [vmem:[#allocation120_spill] sm:$0xff] }
 0x288   : > { %6921 = vmatprep.mubr.bf16.mxu0 %v16278_v55 }
 0x28a   : > { %9615 = vmatmul.mubr.msk.bf16.gmra.mrb[52].mxu1 %vm758_vm5, %v16600_v56  ;;  %v16605_v56 = vld [vmem:[#allocation71_spill] sm:$0xff] }
 0x28b   : > { %2971 = vmatprep.mubr.bf16.mxu1 %v16278_v55 }
 0x28f   : > { %10019 = vmatmul.mubr.msk.bf16.gmra.mrb[20].mxu0 %vm758_vm5, %v16601_v59  ;;  %v11988_v59 = vld [vmem:[%s15921_s1 + $0x180] ss:$8 sps:$4 sm:$0xff]  }
 0x290   : > { %6931 = vmatprep.mubr.bf16.mxu0 %v16278_v55 }
 0x292   : > { %9616 = vmatmul.mubr.msk.bf16.gmra.mrb[56].mxu1 %vm758_vm5, %v16602_v27  ;;  %v16606_v27 = vcombine.low %v14590_v16, %v14594_v43  ;;  %v12000_v16 = vld [vmem:[%s15921_s1 + $0x1a0] ss:$8 sps:$4 sm:$0xff]   ;;  %v12008_v43 = vld [vmem:[%s15921_s1 + $0x1b4] ss:$8 sps:$4 sm:$0xff]  }
 0x293   : > { %2981 = vmatprep.mubr.bf16.mxu1 %v16278_v55 }
 0x297   : > { %10020 = vmatmul.mubr.msk.bf16.gmra.mrb[24].mxu0 %vm758_vm5, %v16603_v31  ;;  %v11996_v31 = vld [vmem:[%s15921_s1 + $0x194] ss:$8 sps:$4 sm:$0xff]  }
 0x298   : > { %6941 = vmatprep.mubr.bf16.mxu0 %v16278_v55 }
 0x29a   : > { %9617 = vmatmul.mubr.msk.bf16.gmra.mrb[60].mxu1 %vm758_vm5, %v16604_v42  ;;  %v12002_v42 = vld [vmem:[%s15921_s1 + $0x1a4] ss:$8 sps:$4 sm:$0xff]  }
 0x29b   : > { %3444 = vmatprep.mubr.bf16.mxu1 %v16278_v55 }
 0x29f   : > { %10021 = vmatmul.mubr.msk.bf16.gmra.mrb[28].mxu0 %vm758_vm5, %v16605_v56  ;;  %v11994_v56 = vld [vmem:[%s15921_s1 + $0x190] ss:$8 sps:$4 sm:$0xff]  }
 0x2a0   : > { %6951 = vmatprep.mubr.bf16.mxu0 %v16278_v55 }
 0x2a2   : > { %9650 = vmatmul.mubr.msk.bf16.vlgmr.msra.gmra.mrb[0].mxu1 %vm758_vm5, %v16606_v27  ;;  %v12014_v27 = vld [vmem:[%s15921_s1 + $0x1c4] ss:$8 sps:$4 sm:$0xff]  }
 0x2a3   : > { %3930 = vmatpush1.bf16.msra.mxu1 %v11988_v59  ;;  %3454 = vmatprep.mubr.bf16.mxu1 %v16278_v55  ;;  %v16608_v59 = vld [vmem:[#allocation106_spill] sm:$0xff] }
 0x2a4   : > { %3931 = vmatprep.subr.bf16.mxu1 %v11996_v31  ;;  %v12006_v31 = vld [vmem:[%s15921_s1 + $0x1b0] ss:$8 sps:$4 sm:$0xff]  }
 0x2a7   : > { %10022 = vmatmul.mubr.msk.bf16.gmra.mrb[32].mxu0 %vm758_vm5, %v16607_v36  ;;  %3932 = vmatpush1.bf16.msra.mxu1 %v11994_v56  ;;  %v16610_v56 = vld [vmem:[#allocation11_spill] sm:$0xff]  ;;  %v16615_v36 = vld [vmem:[#allocation44_spill] sm:$0xff] }
 0x2a8   : > { %6961 = vmatprep.mubr.bf16.mxu0 %v16278_v55  ;;  %3933 = vmatprep.subr.bf16.mxu1 %v12002_v42  ;;  %v16609_v42 = vld [vmem:[#allocation89_spill] sm:$0xff] }
 0x2aa   : > { %9651 = vmatmul.mubr.msk.bf16.gmra.mrb[4].mxu1 %vm758_vm5, %v16608_v59  ;;  %v16613_v59 = vld [vmem:[#allocation99_spill] sm:$0xff] }
 0x2ab   : > { %3464 = vmatprep.mubr.bf16.mxu1 %v16278_v55  ;;  %3934 = vmatpush1.bf16.msra.mxu1 %v12000_v16  ;;  %v16611_v16 = vld [vmem:[#allocation96_spill] sm:$0xff] }
 0x2ac   : > { %3935 = vmatprep.subr.bf16.mxu1 %v12008_v43  ;;  %v16612_v43 = vld [vmem:[#allocation15_spill] sm:$0xff] }
 0x2af   : > { %10023 = vmatmul.mubr.msk.bf16.gmra.mrb[36].mxu0 %vm758_vm5, %v16609_v42  ;;  %3936 = vmatpush1.bf16.msra.mxu1 %v12006_v31  ;;  %v16614_v31 = vld [vmem:[#allocation16_spill] sm:$0xff]  ;;  %v4512_v42 = vrot.slane %v13896_v51, 5 }
 0x2b0   : > { %6971 = vmatprep.mubr.bf16.mxu0 %v16278_v55  ;;  %4243 = vmatprep.subr.bf16.mxu1 %v12014_v27  ;;  %v4503_v27 = vrot.slane %v13890_v38, 4 }
 0x2b2   : > { %9652 = vmatmul.mubr.msk.bf16.gmra.mrb[8].mxu1 %vm758_vm5, %v16610_v56  ;;  %v16616_v56 = vld [vmem:[#allocation101_spill] sm:$0xff] }
 0x2b3   : > { %3474 = vmatprep.mubr.bf16.mxu1 %v16278_v55 }
 0x2b7   : > { %10024 = vmatmul.mubr.msk.bf16.gmra.mrb[40].mxu0 %vm758_vm5, %v16611_v16  ;;  %v4506_v16 = vrot.slane %v13893_v48, 5 }
 0x2b8   : > { %6981 = vmatprep.mubr.bf16.mxu0 %v16278_v55 }
 0x2b9   : > { %v4507_v26 = vor.u32 %v4506_v16, %v4503_v27  ;;  %v16618_v27 = vld [vmem:[#allocation45_spill] sm:$0xff] }
 0x2ba   : > { %9653 = vmatmul.mubr.msk.bf16.gmra.mrb[12].mxu1 %vm758_vm5, %v16612_v43  ;;  %v4516_v43 = vrot.slane %v16615_v36, 4 }
 0x2bb   : > { %3484 = vmatprep.mubr.bf16.mxu1 %v16278_v55  ;;  %v4508_v16 = vrot.slane %v4507_v26, 4 }
 0x2bd   : > { %v4513_v63 = vsel %vm12289_vm3, %v4508_v16, %v4512_v42  ;;  %v16625_v16 = vld [vmem:[#allocation31_spill] sm:$0xff] }
 0x2bf   : > { %10025 = vmatmul.mubr.msk.bf16.gmra.mrb[44].mxu0 %vm758_vm5, %v16613_v59  ;;  %v4517_v59 = vor.u32 %v4516_v43, %v4512_v42  ;;  %v6782_v42 = vrot.slane %v14829_v57, 5 }
 0x2c0   : > { %6991 = vmatprep.mubr.bf16.mxu0 %v16278_v55 }
 0x2c1   : > { %v4518_v43 = vrot.slane %v4517_v59, 4 }
 0x2c2   : > { %9654 = vmatmul.mubr.msk.bf16.gmra.mrb[16].mxu1 %vm758_vm5, %v16614_v31  ;;  %v14799_v31 = vshrl.u32 %v14654_v58, 16 }
 0x2c3   : > { %3494 = vmatprep.mubr.bf16.mxu1 %v16278_v55 }
 0x2c4   : > { %v6763_v45 = vrot.slane %v14799_v31, 4 }
 0x2c6   : > { %v6767_v59 = vor.u32 %v6766_v13, %v6763_v45  ;;  %v6783_v13 = vsel %vm12289_vm3, %v6778_v6, %v6782_v42  ;;  %v16622_v45 = vld [vmem:[#allocation23_spill] sm:$0xff]  ;;  %v12011_v6 = vld [vmem:[%s15921_s1 + $0x454] ss:$8 sps:$4 sm:$0xff]   ;;  %v12021_v42 = vld [vmem:[%s15921_s1 + $0x470] ss:$8 sps:$4 sm:$0xff]  }
 0x2c7   : > { %10026 = vmatmul.mubr.msk.bf16.gmra.mrb[48].mxu0 %vm758_vm5, %v16616_v56  ;;  %v4522_v56 = vrot.slane %v16618_v27, 5 }
 0x2c8   : > { %7001 = vmatprep.mubr.bf16.mxu0 %v16278_v55 }
 0x2c9   : > { %v4523_v26 = vsel %vm12289_vm3, %v4518_v43, %v4522_v56  ;;  %v12017_v56 = vld [vmem:[%s15921_s1 + $0x464] ss:$8 sps:$4 sm:$0xff]   ;;  %v12015_v43 = vld [vmem:[%s15921_s1 + $0x460] ss:$8 sps:$4 sm:$0xff]  }
 0x2ca   : > { %9655 = vmatmul.mubr.msk.bf16.gmra.mrb[20].mxu1 %vm758_vm5, %v16617_v24  ;;  %v14833_v39 = vcombine.low %v4513_v63, %v4523_v26  ;;  %v16624_v24 = vld [vmem:[#allocation36_spill] sm:$0xff] }
 0x2cb   : > { %3504 = vmatprep.mubr.bf16.mxu1 %v16278_v55  ;;  %v12023_v26 = vld [vmem:[%s15921_s1 + $0x474] ss:$8 sps:$4 sm:$0xff]  }
 0x2cf   : > { %10027 = vmatmul.mubr.msk.bf16.gmra.mrb[52].mxu0 %vm758_vm5, %v16619_v41  ;;  %v6768_v41 = vrot.slane %v6767_v59, 4  ;;  %v16626_v59 = vld [vmem:[#allocation39_spill] sm:$0xff] }
 0x2d0   : > { %7011 = vmatprep.mubr.bf16.mxu0 %v16278_v55 }
 0x2d1   : > { %v6773_v2 = vsel %vm12289_vm3, %v6768_v41, %v6772_v8  ;;  %v12003_v41 = vld [vmem:[%s15921_s1 + $0x440] ss:$8 sps:$4 sm:$0xff]   ;;  %v12009_v8 = vld [vmem:[%s15921_s1 + $0x450] ss:$8 sps:$4 sm:$0xff]  }
 0x2d2   : > { %9656 = vmatmul.mubr.msk.bf16.gmra.mrb[24].mxu1 %vm758_vm5, %v16621_v12  ;;  %v10005_v63 = vcombine.low %v6773_v2, %v6783_v13  ;;  %v12029_v2 = vld [vmem:[%s15921_s1 + $0x484] ss:$8 sps:$4 sm:$0xff]   ;;  %v16627_v13 = vld [vmem:[#allocation32_spill] sm:$0xff] }
 0x2d3   : > { %3514 = vmatprep.mubr.bf16.mxu1 %v16278_v55 }
 0x2d7   : > { %10028 = vmatmul.mubr.msk.bf16.gmra.mrb[56].mxu0 %vm758_vm5, %v14833_v39 }
 0x2d8   : > { %7021 = vmatprep.mubr.bf16.mxu0 %v16278_v55 }
 0x2da   : > { %9657 = vmatmul.mubr.msk.bf16.gmra.mrb[28].mxu1 %vm758_vm5, %v16622_v45 }
 0x2db   : > { %3524 = vmatprep.mubr.bf16.mxu1 %v16278_v55 }
 0x2df   : > { %10029 = vmatmul.mubr.msk.bf16.gmra.mrb[60].mxu0 %vm758_vm5, %v10005_v63  ;;  %v16628_v63 = vld [vmem:[#allocation35_spill] sm:$0xff] }
 0x2e0   : > { %7191 = vmatprep.mubr.bf16.mxu0 %v16278_v55 }
 0x2e2   : > { %9658 = vmatmul.mubr.msk.bf16.gmra.mrb[32].mxu1 %vm758_vm5, %v16623_v5 }
 0x2e3   : > { %3534 = vmatprep.mubr.bf16.mxu1 %v16278_v55 }
 0x2e7   : > { %10048 = vmatmul.mubr.msk.bf16.vlgmr.msra.gmra.mrb[0].mxu0 %vm758_vm5, %v16624_v24 }
 0x2e8   : > { %7487 = vmatpush1.bf16.msra.mxu0 %v12003_v41  ;;  %7201 = vmatprep.mubr.bf16.mxu0 %v16278_v55  ;;  %v16629_v41 = vld [vmem:[#allocation37_spill] sm:$0xff] }
 0x2e9   : > { %7488 = vmatprep.subr.bf16.mxu0 %v12011_v6  ;;  %v16630_v6 = vld [vmem:[#allocation43_spill] sm:$0xff] }
 0x2ea   : > { %9659 = vmatmul.mubr.msk.bf16.gmra.mrb[36].mxu1 %vm758_vm5, %v16625_v16 }
 0x2eb   : > { %3544 = vmatprep.mubr.bf16.mxu1 %v16278_v55 }
 0x2ec   : > { %7489 = vmatpush1.bf16.msra.mxu0 %v12009_v8  ;;  %v16631_v8 = vld [vmem:[#allocation38_spill] sm:$0xff] }
 0x2ed   : > { %7490 = vmatprep.subr.bf16.mxu0 %v12017_v56  ;;  %v16632_v56 = vld [vmem:[#allocation47_spill] sm:$0xff] }
 0x2ef   : > { %10049 = vmatmul.mubr.msk.bf16.gmra.mrb[4].mxu0 %vm758_vm5, %v16626_v59 }
 0x2f0   : > { %7211 = vmatprep.mubr.bf16.mxu0 %v16278_v55  ;;  %7491 = vmatpush1.bf16.msra.mxu0 %v12015_v43  ;;  %v16633_v43 = vld [vmem:[#allocation40_spill] sm:$0xff] }
 0x2f1   : > { %7492 = vmatprep.subr.bf16.mxu0 %v12023_v26  ;;  %v16634_v26 = vld [vmem:[#allocation51_spill] sm:$0xff] }
 0x2f2   : > { %9660 = vmatmul.mubr.msk.bf16.gmra.mrb[40].mxu1 %vm758_vm5, %v16627_v13 }
 0x2f3   : > { %3554 = vmatprep.mubr.bf16.mxu1 %v16278_v55 }
 0x2f4   : > { %7493 = vmatpush1.bf16.msra.mxu0 %v12021_v42  ;;  %v16635_v42 = vld [vmem:[#allocation46_spill] sm:$0xff] }
 0x2f5   : > { %7805 = vmatprep.subr.bf16.mxu0 %v12029_v2  ;;  %v3674_v2 = vrot.slane %v14541_v19, 7 }
 0x2f7   : > { %10050 = vmatmul.mubr.msk.bf16.gmra.mrb[8].mxu0 %vm758_vm5, %v16628_v63  ;;  %v3677_v63 = vrot.slane %v14553_v4, 7  ;;  %v12020_v4 = vld [vmem:[%s15921_s1 + $0x1d4] ss:$8 sps:$4 sm:$0xff]  }
 0x2f8   : > { %7221 = vmatprep.mubr.bf16.mxu0 %v16278_v55 }
 0x2fa   : > { %9661 = vmatmul.mubr.msk.bf16.gmra.mrb[44].mxu1 %vm758_vm5, %v16629_v41 }
 0x2fb   : > { %3564 = vmatprep.mubr.bf16.mxu1 %v16278_v55 }
 0x2ff   : > { %10051 = vmatmul.mubr.msk.bf16.gmra.mrb[12].mxu0 %vm758_vm5, %v16630_v6  ;;  %v9666_v6 = vrot.slane %v14549_v9, 11  ;;  %v12012_v9 = vld [vmem:[%s15921_s1 + $0x1c0] ss:$8 sps:$4 sm:$0xff]  }
 0x300   : > { %7231 = vmatprep.mubr.bf16.mxu0 %v16278_v55 }
 0x302   : > { %9662 = vmatmul.mubr.msk.bf16.gmra.mrb[48].mxu1 %vm758_vm5, %v16631_v8 }
 0x303   : > { %3574 = vmatprep.mubr.bf16.mxu1 %v16278_v55 }
 0x307   : > { %10052 = vmatmul.mubr.msk.bf16.gmra.mrb[16].mxu0 %vm758_vm5, %v16632_v56  ;;  %v16636_v56 = vld [vmem:[#allocation54_spill] sm:$0xff] }
 0x308   : > { %7241 = vmatprep.mubr.bf16.mxu0 %v16278_v55 }
 0x30a   : > { %9663 = vmatmul.mubr.msk.bf16.gmra.mrb[52].mxu1 %vm758_vm5, %v16633_v43  ;;  %v3676_v43 = vrot.slane %v3674_v2, 4 }
 0x30b   : > { %3584 = vmatprep.mubr.bf16.mxu1 %v16278_v55 }
 0x30c   : > { %v3678_v19 = vsel %vm13976_vm2, %v3676_v43, %v3677_v63  ;;  %v12018_v63 = vld [vmem:[%s15921_s1 + $0x1d0] ss:$8 sps:$4 sm:$0xff]   ;;  %v16639_v43 = vld [vmem:[#allocation90_spill] sm:$0xff] }
 0x30f   : > { %10053 = vmatmul.mubr.msk.bf16.gmra.mrb[20].mxu0 %vm758_vm5, %v16634_v26  ;;  %v16637_v26 = vld [vmem:[#allocation50_spill] sm:$0xff] }
 0x310   : > { %7251 = vmatprep.mubr.bf16.mxu0 %v16278_v55 }
 0x312   : > { %9664 = vmatmul.mubr.msk.bf16.gmra.mrb[56].mxu1 %vm758_vm5, %v16635_v42  ;;  %v3675_v42 = vsel %vm13976_vm2, %v9666_v6, %v3674_v2  ;;  %v12026_v6 = vld [vmem:[%s15921_s1 + $0x1e4] ss:$8 sps:$4 sm:$0xff]  }
 0x313   : > { %3594 = vmatprep.mubr.bf16.mxu1 %v16278_v55  ;;  %v9690_v8 = vcombine.low %v3675_v42, %v3678_v19  ;;  %v12032_v42 = vld [vmem:[%s15921_s1 + $0x1f4] ss:$8 sps:$4 sm:$0xff]   ;;  %v16640_v2 = vld [vmem:[#allocation58_spill] sm:$0xff]  ;;  %v12030_v19 = vld [vmem:[%s15921_s1 + $0x1f0] ss:$8 sps:$4 sm:$0xff]  }
 0x317   : > { %10054 = vmatmul.mubr.msk.bf16.gmra.mrb[24].mxu0 %vm758_vm5, %v16636_v56  ;;  %v16638_v56 = vld [vmem:[#allocation59_spill] sm:$0xff] }
 0x318   : > { %7261 = vmatprep.mubr.bf16.mxu0 %v16278_v55 }
 0x31a   : > { %9665 = vmatmul.mubr.msk.bf16.gmra.mrb[60].mxu1 %vm758_vm5, %v16637_v26 }
 0x31b   : > { %3961 = vmatprep.mubr.bf16.mxu1 %v16278_v55 }
 0x31f   : > { %10055 = vmatmul.mubr.msk.bf16.gmra.mrb[28].mxu0 %vm758_vm5, %v16638_v56 }
 0x320   : > { %7271 = vmatprep.mubr.bf16.mxu0 %v16278_v55 }
 0x322   : > { %9714 = vmatmul.mubr.msk.bf16.vlgmr.msra.gmra.mrb[0].mxu1 %vm758_vm5, %v9690_v8  ;;  %v12024_v8 = vld [vmem:[%s15921_s1 + $0x1e0] ss:$8 sps:$4 sm:$0xff]  }
 0x323   : > { %4244 = vmatpush1.bf16.msra.mxu1 %v12012_v9  ;;  %3971 = vmatprep.mubr.bf16.mxu1 %v16278_v55  ;;  %v12038_v9 = vld [vmem:[%s15921_s1 + $0x204] ss:$8 sps:$4 sm:$0xff]  }
 0x324   : > { %4245 = vmatprep.subr.bf16.mxu1 %v12020_v4  ;;  %v16641_v4 = vld [vmem:[#allocation92_spill] sm:$0xff] }
 0x327   : > { %10056 = vmatmul.mubr.msk.bf16.gmra.mrb[32].mxu0 %vm758_vm5, %v16639_v43  ;;  %4246 = vmatpush1.bf16.msra.mxu1 %v12018_v63  ;;  %v16642_v63 = vld [vmem:[#allocation62_spill] sm:$0xff] }
 0x328   : > { %7281 = vmatprep.mubr.bf16.mxu0 %v16278_v55  ;;  %4247 = vmatprep.subr.bf16.mxu1 %v12026_v6  ;;  %v16643_v6 = vld [vmem:[#allocation94_spill] sm:$0xff] }
 0x32a   : > { %9715 = vmatmul.mubr.msk.bf16.gmra.mrb[4].mxu1 %vm758_vm5, %v16640_v2  ;;  %v16646_v2 = vld [vmem:[#allocation95_spill] sm:$0xff] }
 0x32b   : > { %3981 = vmatprep.mubr.bf16.mxu1 %v16278_v55  ;;  %4248 = vmatpush1.bf16.msra.mxu1 %v12024_v8  ;;  %v16644_v8 = vld [vmem:[#allocation91_spill] sm:$0xff] }
 0x32c   : > { %4249 = vmatprep.subr.bf16.mxu1 %v12032_v42  ;;  %v16645_v42 = vld [vmem:[#allocation121_spill] sm:$0xff] }
 0x32f   : > { %10057 = vmatmul.mubr.msk.bf16.gmra.mrb[36].mxu0 %vm758_vm5, %v16641_v4  ;;  %4250 = vmatpush1.bf16.msra.mxu1 %v12030_v19  ;;  %v4839_v19 = vrot.slane %v14350_v53, 5  ;;  %v7102_v4 = vrot.slane %v14819_v20, 5 }
 0x330   : > { %7291 = vmatprep.mubr.bf16.mxu0 %v16278_v55  ;;  %4579 = vmatprep.subr.bf16.mxu1 %v12038_v9  ;;  %v16647_v9 = vld [vmem:[#allocation98_spill] sm:$0xff] }
 0x332   : > { %9716 = vmatmul.mubr.msk.bf16.gmra.mrb[8].mxu1 %vm758_vm5, %v16642_v63 }
 0x333   : > { %3991 = vmatprep.mubr.bf16.mxu1 %v16278_v55 }
 0x337   : > { %10058 = vmatmul.mubr.msk.bf16.gmra.mrb[40].mxu0 %vm758_vm5, %v16643_v6  ;;  %v4842_v6 = vrot.slane %v14367_v52, 5  ;;  %v10030_v52 = vrot.slane %v14654_v58, 9 }
 0x338   : > { %7301 = vmatprep.mubr.bf16.mxu0 %v16278_v55 }
 0x33a   : > { %9717 = vmatmul.mubr.msk.bf16.gmra.mrb[12].mxu1 %vm758_vm5, %v16644_v8 }
 0x33b   : > { %4001 = vmatprep.mubr.bf16.mxu1 %v16278_v55 }
 0x33f   : > { %10059 = vmatmul.mubr.msk.bf16.gmra.mrb[44].mxu0 %vm758_vm5, %v16645_v42  ;;  %v4841_v42 = vrot.slane %v4839_v19, 4 }
 0x340   : > { %7311 = vmatprep.mubr.bf16.mxu0 %v16278_v55 }
 0x341   : > { %v4843_v53 = vsel %vm13636_vm15, %v4841_v42, %v4842_v6  ;;  %v12041_v42 = vld [vmem:[%s15921_s1 + $0x4a4] ss:$8 sps:$4 sm:$0xff]  }
 0x342   : > { %9718 = vmatmul.mubr.msk.bf16.gmra.mrb[16].mxu1 %vm758_vm5, %v16646_v2  ;;  %v16648_v2 = vld [vmem:[#allocation125_spill] sm:$0xff] }
 0x343   : > { %4011 = vmatprep.mubr.bf16.mxu1 %v16278_v55 }
 0x347   : > { %10060 = vmatmul.mubr.msk.bf16.gmra.mrb[48].mxu0 %vm758_vm5, %v14187_v30  ;;  %v4840_v30 = vsel %vm13636_vm15, %v9796_v54, %v4839_v19  ;;  %v12047_v19 = vld [vmem:[%s15921_s1 + $0x4b4] ss:$8 sps:$4 sm:$0xff]  }
 0x348   : > { %7321 = vmatprep.mubr.bf16.mxu0 %v16278_v55  ;;  %v14997_v33 = vcombine.low %v4840_v30, %v4843_v53  ;;  %v12053_v53 = vld [vmem:[%s15921_s1 + $0x4c4] ss:$8 sps:$4 sm:$0xff]  }
 0x34a   : > { %9719 = vmatmul.mubr.msk.bf16.gmra.mrb[20].mxu1 %vm758_vm5, %v16647_v9  ;;  %v7099_v9 = vrot.slane %v14657_v7, 5 }
 0x34b   : > { %4021 = vmatprep.mubr.bf16.mxu1 %v16278_v55 }
 0x34c   : > { %v7100_v54 = vsel %vm13636_vm15, %v10030_v52, %v7099_v9  ;;  %v12042_v52 = vld [vmem:[%s15921_s1 + $0x210] ss:$8 sps:$4 sm:$0xff]  }
 0x34f   : > { %10061 = vmatmul.mubr.msk.bf16.gmra.mrb[52].mxu0 %vm758_vm5, %v14216_v10  ;;  %v7101_v10 = vrot.slane %v7099_v9, 4  ;;  %v12045_v9 = vld [vmem:[%s15921_s1 + $0x4b0] ss:$8 sps:$4 sm:$0xff]  }
 0x350   : > { %7331 = vmatprep.mubr.bf16.mxu0 %v16278_v55 }
 0x351   : > { %v7103_v6 = vsel %vm13636_vm15, %v7101_v10, %v7102_v4  ;;  %v12035_v10 = vld [vmem:[%s15921_s1 + $0x494] ss:$8 sps:$4 sm:$0xff]   ;;  %v12033_v4 = vld [vmem:[%s15921_s1 + $0x490] ss:$8 sps:$4 sm:$0xff]  }
 0x352   : > { %9720 = vmatmul.mubr.msk.bf16.gmra.mrb[24].mxu1 %vm758_vm5, %v16648_v2  ;;  %v10039_v30 = vcombine.low %v7100_v54, %v7103_v6  ;;  %v12050_v54 = vld [vmem:[%s15921_s1 + $0x224] ss:$8 sps:$4 sm:$0xff]   ;;  %v16653_v6 = vld [vmem:[#allocation41_spill] sm:$0xff] }
 0x353   : > { %4031 = vmatprep.mubr.bf16.mxu1 %v16278_v55 }
 0x357   : > { %10062 = vmatmul.mubr.msk.bf16.gmra.mrb[56].mxu0 %vm758_vm5, %v14997_v33 }
 0x358   : > { %7341 = vmatprep.mubr.bf16.mxu0 %v16278_v55 }
 0x35a   : > { %9721 = vmatmul.mubr.msk.bf16.gmra.mrb[28].mxu1 %vm758_vm5, %v14207_v1 }
 0x35b   : > { %4041 = vmatprep.mubr.bf16.mxu1 %v16278_v55 }
 0x35f   : > { %10063 = vmatmul.mubr.msk.bf16.gmra.mrb[60].mxu0 %vm758_vm5, %v10039_v30  ;;  %v12048_v30 = vld [vmem:[%s15921_s1 + $0x220] ss:$8 sps:$4 sm:$0xff]  }
 0x360   : > { %7518 = vmatprep.mubr.bf16.mxu0 %v16278_v55 }
 0x362   : > { %9722 = vmatmul.mubr.msk.bf16.gmra.mrb[32].mxu1 %vm758_vm5, %v14228_v37 }
 0x363   : > { %4051 = vmatprep.mubr.bf16.mxu1 %v16278_v55 }
 0x367   : > { %10081 = vmatmul.mubr.msk.bf16.vlgmr.msra.gmra.mrb[0].mxu0 %vm758_vm5, %v16519_v29  ;;  %v12039_v29 = vld [vmem:[%s15921_s1 + $0x4a0] ss:$8 sps:$4 sm:$0xff]  }
 0x368   : > { %7806 = vmatpush1.bf16.msra.mxu0 %v12027_v25  ;;  %7528 = vmatprep.mubr.bf16.mxu0 %v16278_v55  ;;  %v12056_v25 = vld [vmem:[%s15921_s1 + $0x234] ss:$8 sps:$4 sm:$0xff]  }
 0x369   : > { %7807 = vmatprep.subr.bf16.mxu0 %v12035_v10  ;;  %v16654_v10 = vld [vmem:[#allocation110_spill] sm:$0xff] }
 0x36a   : > { %9723 = vmatmul.mubr.msk.bf16.gmra.mrb[36].mxu1 %vm758_vm5, %v14251_v35 }
 0x36b   : > { %4061 = vmatprep.mubr.bf16.mxu1 %v16278_v55 }
 0x36c   : > { %7808 = vmatpush1.bf16.msra.mxu0 %v12033_v4  ;;  %v12054_v4 = vld [vmem:[%s15921_s1 + $0x230] ss:$8 sps:$4 sm:$0xff]  }
 0x36d   : > { %7809 = vmatprep.subr.bf16.mxu0 %v12041_v42  ;;  %v12062_v42 = vld [vmem:[%s15921_s1 + $0x244] ss:$8 sps:$4 sm:$0xff]  }
 0x36f   : > { %10082 = vmatmul.mubr.msk.bf16.gmra.mrb[4].mxu0 %vm758_vm5, %v16520_v44  ;;  %v16649_v44 = vld [vmem:[#allocation10_spill] sm:$0xff] }
 0x370   : > { %7538 = vmatprep.mubr.bf16.mxu0 %v16278_v55  ;;  %7810 = vmatpush1.bf16.msra.mxu0 %v12039_v29  ;;  %v16655_v29 = vld [vmem:[#allocation112_spill] sm:$0xff] }
 0x371   : > { %7811 = vmatprep.subr.bf16.mxu0 %v12047_v19  ;;  %v5156_v19 = vrot.slane %v13890_v38, 5 }
 0x372   : > { %9724 = vmatmul.mubr.msk.bf16.gmra.mrb[40].mxu1 %vm758_vm5, %v14278_v28 }
 0x373   : > { %4071 = vmatprep.mubr.bf16.mxu1 %v16278_v55 }
 0x374   : > { %7812 = vmatpush1.bf16.msra.mxu0 %v12045_v9  ;;  %v5157_v9 = vrot.slane %v13893_v48, 6 }
 0x375   : > { %8130 = vmatprep.subr.bf16.mxu0 %v12053_v53  ;;  %v5160_v53 = vrot.slane %v16615_v36, 5  ;;  %v7416_v36 = vrot.slane %v14799_v31, 5 }
 0x377   : > { %10083 = vmatmul.mubr.msk.bf16.gmra.mrb[8].mxu0 %vm758_vm5, %v16521_v21  ;;  %v16650_v21 = vld [vmem:[#allocation18_spill] sm:$0xff] }
 0x378   : > { %7548 = vmatprep.mubr.bf16.mxu0 %v16278_v55 }
 0x37a   : > { %9725 = vmatmul.mubr.msk.bf16.gmra.mrb[44].mxu1 %vm758_vm5, %v14299_v40 }
 0x37b   : > { %4081 = vmatprep.mubr.bf16.mxu1 %v16278_v55 }
 0x37f   : > { %10084 = vmatmul.mubr.msk.bf16.gmra.mrb[12].mxu0 %vm758_vm5, %v16522_v17  ;;  %v16651_v17 = vld [vmem:[#allocation33_spill] sm:$0xff] }
 0x380   : > { %7558 = vmatprep.mubr.bf16.mxu0 %v16278_v55 }
 0x382   : > { %9726 = vmatmul.mubr.msk.bf16.gmra.mrb[48].mxu1 %vm758_vm5, %v14314_v11 }
 0x383   : > { %4091 = vmatprep.mubr.bf16.mxu1 %v16278_v55 }
 0x387   : > { %10085 = vmatmul.mubr.msk.bf16.gmra.mrb[16].mxu0 %vm758_vm5, %v16524_v50  ;;  %v12036_v50 = vld [vmem:[%s15921_s1 + $0x200] ss:$8 sps:$4 sm:$0xff]  }
 0x388   : > { %7568 = vmatprep.mubr.bf16.mxu0 %v16278_v55 }
 0x38a   : > { %9727 = vmatmul.mubr.msk.bf16.gmra.mrb[52].mxu1 %vm758_vm5, %v14329_v18 }
 0x38b   : > { %4101 = vmatprep.mubr.bf16.mxu1 %v16278_v55 }
 0x38f   : > { %10086 = vmatmul.mubr.msk.bf16.gmra.mrb[20].mxu0 %vm758_vm5, %v16527_v47  ;;  %v12044_v47 = vld [vmem:[%s15921_s1 + $0x214] ss:$8 sps:$4 sm:$0xff]  }
 0x390   : > { %7578 = vmatprep.mubr.bf16.mxu0 %v16278_v55 }
 0x392   : > { %9728 = vmatmul.mubr.msk.bf16.gmra.mrb[56].mxu1 %vm758_vm5, %v16649_v44 }
 0x393   : > { %4111 = vmatprep.mubr.bf16.mxu1 %v16278_v55 }
 0x397   : > { %10087 = vmatmul.mubr.msk.bf16.gmra.mrb[24].mxu0 %vm758_vm5, %v16535_v60  ;;  %v16652_v60 = vld [vmem:[#allocation108_spill] sm:$0xff] }
 0x398   : > { %7588 = vmatprep.mubr.bf16.mxu0 %v16278_v55 }
 0x39a   : > { %9729 = vmatmul.mubr.msk.bf16.gmra.mrb[60].mxu1 %vm758_vm5, %v16650_v21 }
 0x39b   : > { %4275 = vmatprep.mubr.bf16.mxu1 %v16278_v55 }
 0x39f   : > { %10088 = vmatmul.mubr.msk.bf16.gmra.mrb[28].mxu0 %vm758_vm5, %v16651_v17 }
 0x3a0   : > { %7598 = vmatprep.mubr.bf16.mxu0 %v16278_v55 }
 0x3a2   : > { %9747 = vmatmul.mubr.msk.bf16.vlgmr.msra.gmra.mrb[0].mxu1 %vm758_vm5, %v16652_v60  ;;  %v16656_v60 = vld [vmem:[#allocation119_spill] sm:$0xff] }
 0x3a3   : > { %4580 = vmatpush1.bf16.msra.mxu1 %v12036_v50  ;;  %4285 = vmatprep.mubr.bf16.mxu1 %v16278_v55  ;;  %v5158_v50 = vor.u32 %v5157_v9, %v5156_v19  ;;  %v7428_v9 = vrot.slane %v14829_v57, 6 }
 0x3a4   : > { %4581 = vmatprep.subr.bf16.mxu1 %v12044_v47 }
 0x3a5   : > { %v5159_v38 = vrot.slane %v5158_v50, 4 }
 0x3a7   : > { %10089 = vmatmul.mubr.msk.bf16.gmra.mrb[32].mxu0 %vm758_vm5, %v16653_v6  ;;  %4582 = vmatpush1.bf16.msra.mxu1 %v12042_v52  ;;  %v16657_v52 = vshrl.u32 %v16656_v60, 16 }
 0x3a8   : > { %7608 = vmatprep.mubr.bf16.mxu0 %v16278_v55  ;;  %4583 = vmatprep.subr.bf16.mxu1 %v12050_v54 }
 0x3a9   : > { %v5167_v54 = vrot.slane %v16657_v52, 5 }
 0x3aa   : > { %9748 = vmatmul.mubr.msk.bf16.gmra.mrb[4].mxu1 %vm758_vm5, %v16654_v10  ;;  %v7421_v10 = vrot.slane %v14805_v3, 6 }
 0x3ab   : > { %4295 = vmatprep.mubr.bf16.mxu1 %v16278_v55  ;;  %4584 = vmatpush1.bf16.msra.mxu1 %v12048_v30  ;;  %v7417_v30 = vrot.slane %v14802_v0, 6 }
 0x3ac   : > { %4585 = vmatprep.subr.bf16.mxu1 %v12056_v25  ;;  %v7420_v25 = vrot.slane %v14808_v23, 5 }
 0x3af   : > { %10090 = vmatmul.mubr.msk.bf16.gmra.mrb[36].mxu0 %vm758_vm5, %v14471_v22  ;;  %4586 = vmatpush1.bf16.msra.mxu1 %v12054_v4 }
 0x3b0   : > { %7618 = vmatprep.mubr.bf16.mxu0 %v16278_v55  ;;  %4899 = vmatprep.subr.bf16.mxu1 %v12062_v42  ;;  %v7418_v42 = vor.u32 %v7417_v30, %v7416_v36  ;;  %v16661_v36 = vld [vmem:[#allocation77_spill] sm:$0xff] }
 0x3b1   : > { %v12057_v30 = vld [vmem:[%s15921_s1 + $0x4d0] ss:$8 sps:$4 sm:$0xff]  }
 0x3b2   : > { %9749 = vmatmul.mubr.msk.bf16.gmra.mrb[8].mxu1 %vm758_vm5, %v16655_v29  ;;  %v7422_v29 = vor.u32 %v7421_v10, %v7420_v25  ;;  %v7419_v50 = vrot.slane %v7418_v42, 4  ;;  %v12065_v25 = vld [vmem:[%s15921_s1 + $0x4e4] ss:$8 sps:$4 sm:$0xff]  }
 0x3b3   : > { %4305 = vmatprep.mubr.bf16.mxu1 %v16278_v55  ;;  %v16662_v10 = vld [vmem:[#allocation14_spill] sm:$0xff]  ;;  %v16663_v42 = vld [vmem:[#allocation83_spill] sm:$0xff] }
 0x3b4   : > { %v7423_v52 = vsel %vm12333_vm6, %v7419_v50, %v7422_v29  ;;  %v16666_v50 = vld [vmem:[#allocation13_spill] sm:$0xff] }
 0x3b7   : > { %10091 = vmatmul.mubr.msk.bf16.gmra.mrb[40].mxu0 %vm758_vm5, %v14490_v61 }
 0x3b8   : > { %7628 = vmatprep.mubr.bf16.mxu0 %v16278_v55 }
 0x3ba   : > { %9750 = vmatmul.mubr.msk.bf16.gmra.mrb[12].mxu1 %vm758_vm5, %v16555_v49  ;;  %v5161_v49 = vrot.slane %v13896_v51, 6 }
 0x3bb   : > { %4315 = vmatprep.mubr.bf16.mxu1 %v16278_v55 }
 0x3bc   : > { %v5162_v47 = vor.u32 %v5161_v49, %v5160_v53  ;;  %v16658_v53 = vld [vmem:[#allocation122_spill] sm:$0xff] }
 0x3be   : > { %v5164_v48 = vrot.slane %v5162_v47, 4 }
 0x3bf   : > { %10092 = vmatmul.mubr.msk.bf16.gmra.mrb[44].mxu0 %vm758_vm5, %v14509_v15 }
 0x3c0   : > { %7638 = vmatprep.mubr.bf16.mxu0 %v16278_v55 }
 0x3c2   : > { %9751 = vmatmul.mubr.msk.bf16.gmra.mrb[16].mxu1 %vm758_vm5, %v16561_v14  ;;  %v5168_v14 = vrot.slane %v16618_v27, 6  ;;  %v7425_v27 = vshrl.u32 %v14819_v20, 16 }
 0x3c3   : > { %4325 = vmatprep.mubr.bf16.mxu1 %v16278_v55 }
 0x3c4   : > { %v5169_v51 = vor.u32 %v5168_v14, %v5167_v54  ;;  %v7427_v19 = vrot.slane %v7425_v27, 5  ;;  %v16659_v14 = vld [vmem:[#allocation126_spill] sm:$0xff] }
 0x3c6   : > { %v5170_v4 = vsel %vm12333_vm6, %v5164_v48, %v5169_v51  ;;  %v7429_v60 = vor.u32 %v7428_v9, %v7427_v19  ;;  %v16660_v48 = vld [vmem:[#allocation9_spill] sm:$0xff]  ;;  %v12077_v19 = vld [vmem:[%s15921_s1 + $0x504] ss:$8 sps:$4 sm:$0xff]  }
 0x3c7   : > { %10093 = vmatmul.mubr.msk.bf16.gmra.mrb[48].mxu0 %vm758_vm5, %v14528_v32  ;;  %v12059_v51 = vld [vmem:[%s15921_s1 + $0x4d4] ss:$8 sps:$4 sm:$0xff]  }
 0x3c8   : > { %7648 = vmatprep.mubr.bf16.mxu0 %v16278_v55  ;;  %v16664_v9 = vld [vmem:[#allocation17_spill] sm:$0xff] }
 0x3ca   : > { %9752 = vmatmul.mubr.msk.bf16.gmra.mrb[20].mxu1 %vm758_vm5, %v16563_v62  ;;  %v5163_v62 = vsel %vm12333_vm6, %v5159_v38, %v5162_v47  ;;  %v7424_v47 = vrot.slane %v7422_v29, 4  ;;  %v12069_v29 = vld [vmem:[%s15921_s1 + $0x4f0] ss:$8 sps:$4 sm:$0xff]  }
 0x3cb   : > { %4335 = vmatprep.mubr.bf16.mxu1 %v16278_v55  ;;  %v15167_v49 = vcombine.low %v5163_v62, %v5170_v4  ;;  %v12063_v62 = vld [vmem:[%s15921_s1 + $0x4e0] ss:$8 sps:$4 sm:$0xff]   ;;  %v12071_v4 = vld [vmem:[%s15921_s1 + $0x4f4] ss:$8 sps:$4 sm:$0xff]  }
 0x3cc   : > { %v7430_v54 = vsel %vm12333_vm6, %v7424_v47, %v7429_v60  ;;  %v16667_v47 = vld [vmem:[#allocation97_spill] sm:$0xff] }
 0x3cd   : > { %v10072_v38 = vcombine.low %v7423_v52, %v7430_v54  ;;  %v16668_v60 = vld [vmem:[#allocation21_spill] sm:$0xff]  ;;  %v16669_v52 = vld [vmem:[#allocation100_spill] sm:$0xff] }
 0x3ce   : > { %v16670_v54 = vld [vmem:[#allocation24_spill] sm:$0xff] }
 0x3cf   : > { %10094 = vmatmul.mubr.msk.bf16.gmra.mrb[52].mxu0 %vm758_vm5, %v14544_v46 }
 0x3d0   : > { %7658 = vmatprep.mubr.bf16.mxu0 %v16278_v55 }
 0x3d2   : > { %9753 = vmatmul.mubr.msk.bf16.gmra.mrb[24].mxu1 %vm758_vm5, %v16658_v53  ;;  %v16665_v53 = vld [vmem:[#allocation93_spill] sm:$0xff] }
 0x3d3   : > { %4345 = vmatprep.mubr.bf16.mxu1 %v16278_v55 }
 0x3d7   : > { %10095 = vmatmul.mubr.msk.bf16.gmra.mrb[56].mxu0 %vm758_vm5, %v15167_v49 }
 0x3d8   : > { %7668 = vmatprep.mubr.bf16.mxu0 %v16278_v55 }
 0x3da   : > { %9754 = vmatmul.mubr.msk.bf16.gmra.mrb[28].mxu1 %vm758_vm5, %v16659_v14  ;;  %v16671_v14 = vld [vmem:[#allocation102_spill] sm:$0xff] }
 0x3db   : > { %4355 = vmatprep.mubr.bf16.mxu1 %v16278_v55 }
 0x3df   : > { %10096 = vmatmul.mubr.msk.bf16.gmra.mrb[60].mxu0 %vm758_vm5, %v10072_v38  ;;  %v16672_v38 = vld [vmem:[#allocation25_spill] sm:$0xff] }
 0x3e0   : > { %7837 = vmatprep.mubr.bf16.mxu0 %v16278_v55 }
 0x3e2   : > { %9755 = vmatmul.mubr.msk.bf16.gmra.mrb[32].mxu1 %vm758_vm5, %v16660_v48  ;;  %v16673_v48 = vld [vmem:[#allocation105_spill] sm:$0xff] }
 0x3e3   : > { %4365 = vmatprep.mubr.bf16.mxu1 %v16278_v55 }
 0x3e7   : > { %10115 = vmatmul.mubr.msk.bf16.vlgmr.msra.gmra.mrb[0].mxu0 %vm758_vm5, %v16661_v36  ;;  %v12060_v36 = vld [vmem:[%s15921_s1 + $0x240] ss:$8 sps:$4 sm:$0xff]  }
 0x3e8   : > { %8131 = vmatpush1.bf16.msra.mxu0 %v12051_v34  ;;  %7847 = vmatprep.mubr.bf16.mxu0 %v16278_v55  ;;  %v16674_v34 = vld [vmem:[#allocation48_spill] sm:$0xff] }
 0x3e9   : > { %8132 = vmatprep.subr.bf16.mxu0 %v12059_v51  ;;  %v16675_v51 = vld [vmem:[#allocation107_spill] sm:$0xff] }
 0x3ea   : > { %9756 = vmatmul.mubr.msk.bf16.gmra.mrb[36].mxu1 %vm758_vm5, %v16662_v10  ;;  %v12066_v10 = vld [vmem:[%s15921_s1 + $0x250] ss:$8 sps:$4 sm:$0xff]  }
 0x3eb   : > { %4375 = vmatprep.mubr.bf16.mxu1 %v16278_v55 }
 0x3ec   : > { %8133 = vmatpush1.bf16.msra.mxu0 %v12057_v30  ;;  %v12068_v30 = vld [vmem:[%s15921_s1 + $0x254] ss:$8 sps:$4 sm:$0xff]  }
 0x3ed   : > { %8134 = vmatprep.subr.bf16.mxu0 %v12065_v25  ;;  %v16676_v25 = vld [vmem:[#allocation12_spill] sm:$0xff] }
 0x3ef   : > { %10116 = vmatmul.mubr.msk.bf16.gmra.mrb[4].mxu0 %vm758_vm5, %v16663_v42  ;;  %v12072_v42 = vld [vmem:[%s15921_s1 + $0x260] ss:$8 sps:$4 sm:$0xff]  }
 0x3f0   : > { %7857 = vmatprep.mubr.bf16.mxu0 %v16278_v55  ;;  %8135 = vmatpush1.bf16.msra.mxu0 %v12063_v62  ;;  %v12074_v62 = vld [vmem:[%s15921_s1 + $0x264] ss:$8 sps:$4 sm:$0xff]  }
 0x3f1   : > { %8136 = vmatprep.subr.bf16.mxu0 %v12071_v4  ;;  %v16677_v4 = vld [vmem:[#allocation109_spill] sm:$0xff] }
 0x3f2   : > { %9757 = vmatmul.mubr.msk.bf16.gmra.mrb[40].mxu1 %vm758_vm5, %v16664_v9  ;;  %v12078_v9 = vld [vmem:[%s15921_s1 + $0x270] ss:$8 sps:$4 sm:$0xff]  }
 0x3f3   : > { %4385 = vmatprep.mubr.bf16.mxu1 %v16278_v55 }
 0x3f4   : > { %8137 = vmatpush1.bf16.msra.mxu0 %v12069_v29  ;;  %v12080_v29 = vld [vmem:[%s15921_s1 + $0x274] ss:$8 sps:$4 sm:$0xff]  }
 0x3f5   : > { %8449 = vmatprep.subr.bf16.mxu0 %v12077_v19  ;;  %v16678_v19 = vld [vmem:[#allocation20_spill] sm:$0xff] }
 0x3f7   : > { %10117 = vmatmul.mubr.msk.bf16.gmra.mrb[8].mxu0 %vm758_vm5, %v16665_v53  ;;  %v16679_v53 = vld [vmem:[#allocation111_spill] sm:$0xff] }
 0x3f8   : > { %7867 = vmatprep.mubr.bf16.mxu0 %v16278_v55 }
 0x3fa   : > { %9758 = vmatmul.mubr.msk.bf16.gmra.mrb[44].mxu1 %vm758_vm5, %v16666_v50  ;;  %v12155_v50 = vld [vmem:[%s15921_s1 + $0x284] ss:$8 sps:$4 sm:$0xff]  }
 0x3fb   : > { %4395 = vmatprep.mubr.bf16.mxu1 %v16278_v55 }
 0x3ff   : > { %10118 = vmatmul.mubr.msk.bf16.gmra.mrb[12].mxu0 %vm758_vm5, %v16667_v47  ;;  %v16680_v47 = vld [vmem:[#allocation27_spill] sm:$0xff] }
 0x400   : > { %7877 = vmatprep.mubr.bf16.mxu0 %v16278_v55 }
 0x402   : > { %9759 = vmatmul.mubr.msk.bf16.gmra.mrb[48].mxu1 %vm758_vm5, %v16668_v60  ;;  %v16681_v60 = vld [vmem:[#allocation113_spill] sm:$0xff] }
 0x403   : > { %4405 = vmatprep.mubr.bf16.mxu1 %v16278_v55 }
 0x407   : > { %10119 = vmatmul.mubr.msk.bf16.gmra.mrb[16].mxu0 %vm758_vm5, %v16669_v52  ;;  %v16682_v52 = vld [vmem:[#allocation34_spill] sm:$0xff] }
 0x408   : > { %7887 = vmatprep.mubr.bf16.mxu0 %v16278_v55 }
 0x40a   : > { %9760 = vmatmul.mubr.msk.bf16.gmra.mrb[52].mxu1 %vm758_vm5, %v16670_v54  ;;  %v16683_v54 = vld [vmem:[#allocation115_spill] sm:$0xff] }
 0x40b   : > { %4415 = vmatprep.mubr.bf16.mxu1 %v16278_v55 }
 0x40f   : > { %10120 = vmatmul.mubr.msk.bf16.gmra.mrb[20].mxu0 %vm758_vm5, %v16671_v14  ;;  %v16684_v14 = vld [vmem:[#allocation42_spill] sm:$0xff] }
 0x410   : > { %7897 = vmatprep.mubr.bf16.mxu0 %v16278_v55 }
 0x412   : > { %9761 = vmatmul.mubr.msk.bf16.gmra.mrb[56].mxu1 %vm758_vm5, %v16672_v38  ;;  %v16685_v38 = vld [vmem:[#allocation117_spill] sm:$0xff] }
 0x413   : > { %4425 = vmatprep.mubr.bf16.mxu1 %v16278_v55 }
 0x417   : > { %10121 = vmatmul.mubr.msk.bf16.gmra.mrb[24].mxu0 %vm758_vm5, %v16673_v48  ;;  %v16686_v48 = vld [vmem:[#allocation49_spill] sm:$0xff] }
 0x418   : > { %7907 = vmatprep.mubr.bf16.mxu0 %v16278_v55 }
 0x41a   : > { %9762 = vmatmul.mubr.msk.bf16.gmra.mrb[60].mxu1 %vm758_vm5, %v16674_v34  ;;  %v16687_v34 = vld [vmem:[#allocation120_spill] sm:$0xff] }
 0x41b   : > { %4611 = vmatprep.mubr.bf16.mxu1 %v16278_v55 }
 0x41f   : > { %10122 = vmatmul.mubr.msk.bf16.gmra.mrb[28].mxu0 %vm758_vm5, %v16675_v51  ;;  %v7745_v51 = vrot.slane %v14657_v7, 6 }
 0x420   : > { %7917 = vmatprep.mubr.bf16.mxu0 %v16278_v55 }
 0x422   : > { %9780 = vmatmul.mubr.msk.bf16.vlgmr.msra.gmra.mrb[0].mxu1 %vm758_vm5, %v16676_v25  ;;  %v7747_v25 = vrot.slane %v7745_v51, 4 }
 0x423   : > { %4900 = vmatpush1.bf16.msra.mxu1 %v12060_v36  ;;  %4621 = vmatprep.mubr.bf16.mxu1 %v16278_v55  ;;  %v16688_v36 = vld [vmem:[#allocation56_spill] sm:$0xff] }
 0x424   : > { %4901 = vmatprep.subr.bf16.mxu1 %v12068_v30  ;;  %v10097_v30 = vrot.slane %v14654_v58, 10  ;;  %v16692_v58 = vld [vmem:[#allocation71_spill] sm:$0xff] }
 0x427   : > { %10123 = vmatmul.mubr.msk.bf16.gmra.mrb[32].mxu0 %vm758_vm5, %v16677_v4  ;;  %4902 = vmatpush1.bf16.msra.mxu1 %v12066_v10  ;;  %v7748_v10 = vrot.slane %v14819_v20, 6  ;;  %v12161_v4 = vld [vmem:[%s15921_s1 + $0x2b4] ss:$8 sps:$4 sm:$0xff]  }
 0x428   : > { %7927 = vmatprep.mubr.bf16.mxu0 %v16278_v55  ;;  %4903 = vmatprep.subr.bf16.mxu1 %v12074_v62  ;;  %v16689_v62 = vld [vmem:[#allocation123_spill] sm:$0xff] }
 0x429   : > { %v7749_v7 = vsel %vm12791_vm9, %v7747_v25, %v7748_v10  ;;  %v16700_v25 = vld [vmem:[#allocation99_spill] sm:$0xff]  ;;  %v16701_v10 = vld [vmem:[#allocation101_spill] sm:$0xff] }
 0x42a   : > { %9781 = vmatmul.mubr.msk.bf16.gmra.mrb[4].mxu1 %vm758_vm5, %v16678_v19 }
 0x42b   : > { %4631 = vmatprep.mubr.bf16.mxu1 %v16278_v55  ;;  %4904 = vmatpush1.bf16.msra.mxu1 %v12072_v42  ;;  %v7746_v42 = vsel %vm12791_vm9, %v10097_v30, %v7745_v51  ;;  %v16697_v51 = vld [vmem:[#allocation16_spill] sm:$0xff]  ;;  %v16699_v30 = vld [vmem:[#allocation19_spill] sm:$0xff] }
 0x42c   : > { %4905 = vmatprep.subr.bf16.mxu1 %v12080_v29  ;;  %v16691_v29 = vld [vmem:[#allocation63_spill] sm:$0xff]  ;;  %v10106_v19 = vcombine.low %v7746_v42, %v7749_v7  ;;  %v12162_v42 = vld [vmem:[%s15921_s1 + $0x2b0] ss:$8 sps:$4 sm:$0xff]  }
 0x42d   : > { %v16705_v7 = vld [vmem:[#allocation35_spill] sm:$0xff] }
 0x42f   : > { %10124 = vmatmul.mubr.msk.bf16.gmra.mrb[36].mxu0 %vm758_vm5, %v16679_v53  ;;  %4906 = vmatpush1.bf16.msra.mxu1 %v12078_v9  ;;  %v12075_v9 = vld [vmem:[%s15921_s1 + $0x500] ss:$8 sps:$4 sm:$0xff]   ;;  %v12083_v53 = vld [vmem:[%s15921_s1 + $0x514] ss:$8 sps:$4 sm:$0xff]  }
 0x430   : > { %7937 = vmatprep.mubr.bf16.mxu0 %v16278_v55  ;;  %10522 = vmatprep.subr.bf16.mxu1 %v12155_v50  ;;  %v16693_v50 = vld [vmem:[#allocation11_spill] sm:$0xff] }
 0x432   : > { %9782 = vmatmul.mubr.msk.bf16.gmra.mrb[8].mxu1 %vm758_vm5, %v16680_v47  ;;  %v12081_v47 = vld [vmem:[%s15921_s1 + $0x510] ss:$8 sps:$4 sm:$0xff]  }
 0x433   : > { %4641 = vmatprep.mubr.bf16.mxu1 %v16278_v55 }
 0x437   : > { %10125 = vmatmul.mubr.msk.bf16.gmra.mrb[40].mxu0 %vm758_vm5, %v16681_v60  ;;  %v12086_v60 = vld [vmem:[%s15921_s1 + $0x524] ss:$8 sps:$4 sm:$0xff]  }
 0x438   : > { %7947 = vmatprep.mubr.bf16.mxu0 %v16278_v55 }
 0x43a   : > { %9783 = vmatmul.mubr.msk.bf16.gmra.mrb[12].mxu1 %vm758_vm5, %v16682_v52  ;;  %v16694_v52 = vld [vmem:[#allocation78_spill] sm:$0xff] }
 0x43b   : > { %4651 = vmatprep.mubr.bf16.mxu1 %v16278_v55 }
 0x43f   : > { %10126 = vmatmul.mubr.msk.bf16.gmra.mrb[44].mxu0 %vm758_vm5, %v16683_v54  ;;  %v12084_v54 = vld [vmem:[%s15921_s1 + $0x520] ss:$8 sps:$4 sm:$0xff]  }
 0x440   : > { %7957 = vmatprep.mubr.bf16.mxu0 %v16278_v55 }
 0x442   : > { %9784 = vmatmul.mubr.msk.bf16.gmra.mrb[16].mxu1 %vm758_vm5, %v16684_v14  ;;  %v12089_v14 = vld [vmem:[%s15921_s1 + $0x534] ss:$8 sps:$4 sm:$0xff]  }
 0x443   : > { %4661 = vmatprep.mubr.bf16.mxu1 %v16278_v55 }
 0x447   : > { %10127 = vmatmul.mubr.msk.bf16.gmra.mrb[48].mxu0 %vm758_vm5, %v16685_v38  ;;  %v16695_v38 = vld [vmem:[#allocation15_spill] sm:$0xff] }
 0x448   : > { %7967 = vmatprep.mubr.bf16.mxu0 %v16278_v55 }
 0x44a   : > { %9785 = vmatmul.mubr.msk.bf16.gmra.mrb[20].mxu1 %vm758_vm5, %v16686_v48  ;;  %v12087_v48 = vld [vmem:[%s15921_s1 + $0x530] ss:$8 sps:$4 sm:$0xff]  }
 0x44b   : > { %4671 = vmatprep.mubr.bf16.mxu1 %v16278_v55 }
 0x44f   : > { %10128 = vmatmul.mubr.msk.bf16.gmra.mrb[52].mxu0 %vm758_vm5, %v16687_v34  ;;  %v16696_v34 = vld [vmem:[#allocation89_spill] sm:$0xff] }
 0x450   : > { %7977 = vmatprep.mubr.bf16.mxu0 %v16278_v55 }
 0x452   : > { %9786 = vmatmul.mubr.msk.bf16.gmra.mrb[24].mxu1 %vm758_vm5, %v16688_v36  ;;  %v16698_v36 = vld [vmem:[#allocation96_spill] sm:$0xff] }
 0x453   : > { %4681 = vmatprep.mubr.bf16.mxu1 %v16278_v55 }
 0x457   : > { %10129 = vmatmul.mubr.msk.bf16.gmra.mrb[56].mxu0 %vm758_vm5, %v16689_v62  ;;  %v16702_v62 = vld [vmem:[#allocation103_spill] sm:$0xff] }
 0x458   : > { %7987 = vmatprep.mubr.bf16.mxu0 %v16278_v55 }
 0x45a   : > { %9787 = vmatmul.mubr.msk.bf16.gmra.mrb[28].mxu1 %vm758_vm5, %v16691_v29  ;;  %v16707_v29 = vld [vmem:[#allocation43_spill] sm:$0xff] }
 0x45b   : > { %4691 = vmatprep.mubr.bf16.mxu1 %v16278_v55 }
 0x45f   : > { %10130 = vmatmul.mubr.msk.bf16.gmra.mrb[60].mxu0 %vm758_vm5, %v10106_v19  ;;  %v16709_v19 = vld [vmem:[#allocation47_spill] sm:$0xff] }
 0x460   : > { %8162 = vmatprep.mubr.bf16.mxu0 %v16278_v55 }
 0x462   : > { %9788 = vmatmul.mubr.msk.bf16.gmra.mrb[32].mxu1 %vm758_vm5, %v16692_v58  ;;  %v8062_v58 = vrot.slane %v14799_v31, 6  ;;  %v16711_v31 = vld [vmem:[#allocation53_spill] sm:$0xff] }
 0x463   : > { %4701 = vmatprep.mubr.bf16.mxu1 %v16278_v55 }
 0x467   : > { %10148 = vmatmul.mubr.msk.bf16.vlgmr.msra.gmra.mrb[0].mxu0 %vm758_vm5, %v16693_v50  ;;  %v8067_v50 = vrot.slane %v14805_v3, 7 }
 0x468   : > { %8450 = vmatpush1.bf16.msra.mxu0 %v12075_v9  ;;  %8172 = vmatprep.mubr.bf16.mxu0 %v16278_v55  ;;  %v8063_v9 = vrot.slane %v14802_v0, 7 }
 0x469   : > { %8451 = vmatprep.subr.bf16.mxu0 %v12083_v53  ;;  %v8066_v53 = vrot.slane %v14808_v23, 6 }
 0x46a   : > { %9789 = vmatmul.mubr.msk.bf16.gmra.mrb[36].mxu1 %vm758_vm5, %v16694_v52  ;;  %v8071_v52 = vrot.slane %v7425_v27, 6 }
 0x46b   : > { %4711 = vmatprep.mubr.bf16.mxu1 %v16278_v55 }
 0x46c   : > { %8452 = vmatpush1.bf16.msra.mxu0 %v12081_v47  ;;  %v8064_v47 = vor.u32 %v8063_v9, %v8062_v58 }
 0x46d   : > { %8453 = vmatprep.subr.bf16.mxu0 %v12086_v60  ;;  %v8068_v60 = vor.u32 %v8067_v50, %v8066_v53  ;;  %v8708_v53 = vlaneseq }
 0x46e   : > { %v8065_v23 = vrot.slane %v8064_v47, 4 }
 0x46f   : > { %10149 = vmatmul.mubr.msk.bf16.gmra.mrb[4].mxu0 %vm758_vm5, %v16695_v38  ;;  %v8070_v0 = vrot.slane %v8068_v60, 4 }
 0x470   : > { %8182 = vmatprep.mubr.bf16.mxu0 %v16278_v55  ;;  %8454 = vmatpush1.bf16.msra.mxu0 %v12084_v54  ;;  %v8072_v54 = vrot.slane %v14829_v57, 7  ;;  %v8069_v38 = vsel %vm13184_vm12, %v8065_v23, %v8068_v60  ;;  %v16713_v57 = vld [vmem:[#allocation54_spill] sm:$0xff] }
 0x471   : > { %8455 = vmatprep.subr.bf16.mxu0 %v12089_v14  ;;  %v16710_v14 = vld [vmem:[#allocation51_spill] sm:$0xff] }
 0x472   : > { %9790 = vmatmul.mubr.msk.bf16.gmra.mrb[40].mxu1 %vm758_vm5, %v16696_v34  ;;  %v8073_v3 = vor.u32 %v8072_v54, %v8071_v52  ;;  %v16719_v34 = vld [vmem:[#allocation124_spill] sm:$0xff]  ;;  %v8709_v52 = vshrl.u32 %v8708_v53, 7 }
 0x473   : > { %4721 = vmatprep.mubr.bf16.mxu1 %v16278_v55 }
 0x474   : > { %8456 = vmatpush1.bf16.msra.mxu0 %v12087_v48  ;;  %v8074_v20 = vsel %vm13184_vm12, %v8070_v0, %v8073_v3  ;;  %v16714_v48 = vld [vmem:[#allocation92_spill] sm:$0xff]  ;;  %v8710_v54 = vsub.s32 0, %v8709_v52  ;;  %v8714_v23 = vsub.s32 1, %v8709_v52  ;;  %v10198_v0 = vld [vmem:[%s15922_s2 + $0x1] ss:$8 sm:$0x3] }
 0x475   : > { %v10139_v27 = vcombine.low %v8069_v38, %v8074_v20 }
 0x476   : > { %v15644_v20 = vrot.slane %v10198_v0, %v8710_v54 }
 0x477   : > { %10150 = vmatmul.mubr.msk.bf16.gmra.mrb[8].mxu0 %vm758_vm5, %v16697_v51  ;;  %v16720_v51 = vld [vmem:[#allocation127_spill] sm:$0xff] }
 0x478   : > { %8192 = vmatprep.mubr.bf16.mxu0 %v16278_v55 }
 0x47a   : > { %9791 = vmatmul.mubr.msk.bf16.gmra.mrb[44].mxu1 %vm758_vm5, %v16698_v36 }
 0x47b   : > { %4731 = vmatprep.mubr.bf16.mxu1 %v16278_v55 }
 0x47f   : > { %10151 = vmatmul.mubr.msk.bf16.gmra.mrb[12].mxu0 %vm758_vm5, %v16699_v30 }
 0x480   : > { %8202 = vmatprep.mubr.bf16.mxu0 %v16278_v55 }
 0x482   : > { %9792 = vmatmul.mubr.msk.bf16.gmra.mrb[48].mxu1 %vm758_vm5, %v16700_v25 }
 0x483   : > { %4741 = vmatprep.mubr.bf16.mxu1 %v16278_v55 }
 0x487   : > { %10152 = vmatmul.mubr.msk.bf16.gmra.mrb[16].mxu0 %vm758_vm5, %v16621_v12  ;;  %v16703_v12 = vld [vmem:[#allocation30_spill] sm:$0xff] }
 0x488   : > { %8212 = vmatprep.mubr.bf16.mxu0 %v16278_v55 }
 0x48a   : > { %9793 = vmatmul.mubr.msk.bf16.gmra.mrb[52].mxu1 %vm758_vm5, %v16701_v10 }
 0x48b   : > { %4751 = vmatprep.mubr.bf16.mxu1 %v16278_v55 }
 0x48f   : > { %10153 = vmatmul.mubr.msk.bf16.gmra.mrb[20].mxu0 %vm758_vm5, %v16622_v45  ;;  %v12156_v45 = vld [vmem:[%s15921_s1 + $0x280] ss:$8 sps:$4 sm:$0xff]  }
 0x490   : > { %8222 = vmatprep.mubr.bf16.mxu0 %v16278_v55 }
 0x492   : > { %9794 = vmatmul.mubr.msk.bf16.gmra.mrb[56].mxu1 %vm758_vm5, %v16702_v62 }
 0x493   : > { %4761 = vmatprep.mubr.bf16.mxu1 %v16278_v55 }
 0x497   : > { %10154 = vmatmul.mubr.msk.bf16.gmra.mrb[24].mxu0 %vm758_vm5, %v16623_v5  ;;  %v12158_v5 = vld [vmem:[%s15921_s1 + $0x290] ss:$8 sps:$4 sm:$0xff]  }
 0x498   : > { %8232 = vmatprep.mubr.bf16.mxu0 %v16278_v55 }
 0x49a   : > { %9795 = vmatmul.mubr.msk.bf16.gmra.mrb[60].mxu1 %vm758_vm5, %v14833_v39  ;;  %v12157_v39 = vld [vmem:[%s15921_s1 + $0x294] ss:$8 sps:$4 sm:$0xff]  }
 0x49b   : > { %4931 = vmatprep.mubr.bf16.mxu1 %v16278_v55 }
 0x49f   : > { %10155 = vmatmul.mubr.msk.bf16.gmra.mrb[28].mxu0 %vm758_vm5, %v16625_v16  ;;  %v12159_v16 = vld [vmem:[%s15921_s1 + $0x2a4] ss:$8 sps:$4 sm:$0xff]  }
 0x4a0   : > { %8242 = vmatprep.mubr.bf16.mxu0 %v16278_v55 }
 0x4a2   : > { %9814 = vmatmul.mubr.msk.bf16.vlgmr.msra.gmra.mrb[0].mxu1 %vm758_vm5, %v16703_v12 }
 0x4a3   : > { %10526 = vmatpush1.bf16.msra.mxu1 %v12156_v45  ;;  %4941 = vmatprep.mubr.bf16.mxu1 %v16278_v55 }
 0x4a4   : > { %10523 = vmatprep.subr.bf16.mxu1 %v12157_v39 }
 0x4a7   : > { %10156 = vmatmul.mubr.msk.bf16.gmra.mrb[32].mxu0 %vm758_vm5, %v16627_v13  ;;  %10527 = vmatpush1.bf16.msra.mxu1 %v12158_v5  ;;  %v12160_v13 = vld [vmem:[%s15921_s1 + $0x2a0] ss:$8 sps:$4 sm:$0xff]  }
 0x4a8   : > { %8252 = vmatprep.mubr.bf16.mxu0 %v16278_v55  ;;  %10524 = vmatprep.subr.bf16.mxu1 %v12159_v16 }
 0x4aa   : > { %9815 = vmatmul.mubr.msk.bf16.gmra.mrb[4].mxu1 %vm758_vm5, %v16624_v24  ;;  %v16704_v24 = vld [vmem:[#allocation38_spill] sm:$0xff] }
 0x4ab   : > { %4951 = vmatprep.mubr.bf16.mxu1 %v16278_v55  ;;  %10528 = vmatpush1.bf16.msra.mxu1 %v12160_v13 }
 0x4ac   : > { %10525 = vmatprep.subr.bf16.mxu1 %v12161_v4 }
 0x4af   : > { %10157 = vmatmul.mubr.msk.bf16.gmra.mrb[36].mxu0 %vm758_vm5, %v16629_v41  ;;  %10529 = vmatpush1.bf16.msra.mxu1 %v12162_v42  ;;  %v16706_v41 = vld [vmem:[#allocation40_spill] sm:$0xff] }
 0x4b0   : > { %8262 = vmatprep.mubr.bf16.mxu0 %v16278_v55 }
 0x4b2   : > { %9816 = vmatmul.mubr.msk.bf16.gmra.mrb[8].mxu1 %vm758_vm5, %v16626_v59  ;;  %v16708_v59 = vld [vmem:[#allocation46_spill] sm:$0xff] }
 0x4b3   : > { %4961 = vmatprep.mubr.bf16.mxu1 %v16278_v55 }
 0x4b7   : > { %10158 = vmatmul.mubr.msk.bf16.gmra.mrb[40].mxu0 %vm758_vm5, %v16704_v24 }
 0x4b8   : > { %8272 = vmatprep.mubr.bf16.mxu0 %v16278_v55 }
 0x4ba   : > { %9817 = vmatmul.mubr.msk.bf16.gmra.mrb[12].mxu1 %vm758_vm5, %v16705_v7 }
 0x4bb   : > { %4971 = vmatprep.mubr.bf16.mxu1 %v16278_v55 }
 0x4bf   : > { %10159 = vmatmul.mubr.msk.bf16.gmra.mrb[44].mxu0 %vm758_vm5, %v16706_v41 }
 0x4c0   : > { %8282 = vmatprep.mubr.bf16.mxu0 %v16278_v55 }
 0x4c2   : > { %9818 = vmatmul.mubr.msk.bf16.gmra.mrb[16].mxu1 %vm758_vm5, %v16707_v29 }
 0x4c3   : > { %4981 = vmatprep.mubr.bf16.mxu1 %v16278_v55 }
 0x4c7   : > { %10160 = vmatmul.mubr.msk.bf16.gmra.mrb[48].mxu0 %vm758_vm5, %v16708_v59 }
 0x4c8   : > { %8292 = vmatprep.mubr.bf16.mxu0 %v16278_v55 }
 0x4ca   : > { %9819 = vmatmul.mubr.msk.bf16.gmra.mrb[20].mxu1 %vm758_vm5, %v16709_v19 }
 0x4cb   : > { %4991 = vmatprep.mubr.bf16.mxu1 %v16278_v55 }
 0x4cf   : > { %10161 = vmatmul.mubr.msk.bf16.gmra.mrb[52].mxu0 %vm758_vm5, %v16637_v26 }
 0x4d0   : > { %8302 = vmatprep.mubr.bf16.mxu0 %v16278_v55 }
 0x4d2   : > { %9820 = vmatmul.mubr.msk.bf16.gmra.mrb[24].mxu1 %vm758_vm5, %v16710_v14  ;;  %v8706_v14 = vld [vmem:[%s15922_s2] ss:$8 sm:$0x3] }
 0x4d3   : > { %5001 = vmatprep.mubr.bf16.mxu1 %v16278_v55  ;;  %v15640_v3 = vrot.slane %v8706_v14, %v8710_v54  ;;  %v15642_v26 = vrot.slane %v8706_v14, %v8714_v23 }
 0x4d7   : > { %10162 = vmatmul.mubr.msk.bf16.gmra.mrb[56].mxu0 %vm758_vm5, %v16711_v31 }
 0x4d8   : > { %8312 = vmatprep.mubr.bf16.mxu0 %v16278_v55 }
 0x4da   : > { %9821 = vmatmul.mubr.msk.bf16.gmra.mrb[28].mxu1 %vm758_vm5, %v16713_v57 }
 0x4db   : > { %5011 = vmatprep.mubr.bf16.mxu1 %v16278_v55 }
 0x4df   : > { %10163 = vmatmul.mubr.msk.bf16.gmra.mrb[60].mxu0 %vm758_vm5, %v10139_v27  ;;  %v10199_v27 = vld [vmem:[%s15922_s2 + $0x2] ss:$8 sm:$0x3] }
 0x4e0   : > { %8481 = vmatprep.mubr.bf16.mxu0 %v16278_v55 }
 0x4e2   : > { %9822 = vmatmul.mubr.msk.bf16.gmra.mrb[32].mxu1 %vm758_vm5, %v16638_v56  ;;  %v16715_v56 = vld [vmem:[#allocation95_spill] sm:$0xff] }
 0x4e3   : > { %5021 = vmatprep.mubr.bf16.mxu1 %v16278_v55 }
 0x4e7   : > { %10182 = vmatmul.mubr.msk.bf16.vlgmr.msra.gmra.mrb[0].mxu0 %vm758_vm5, %v16642_v63  ;;  %v16716_v63 = vld [vmem:[#allocation94_spill] sm:$0xff] }
 0x4e8   : > { %8491 = vmatprep.mubr.bf16.mxu0 %v16278_v55 }
 0x4ea   : > { %9823 = vmatmul.mubr.msk.bf16.gmra.mrb[36].mxu1 %vm758_vm5, %v16639_v43  ;;  %v16717_v43 = vld [vmem:[#allocation98_spill] sm:$0xff] }
 0x4eb   : > { %5031 = vmatprep.mubr.bf16.mxu1 %v16278_v55 }
 0x4ef   : > { %10183 = vmatmul.mubr.msk.bf16.gmra.mrb[4].mxu0 %vm758_vm5, %v16644_v8  ;;  %v16718_v8 = vld [vmem:[#allocation121_spill] sm:$0xff] }
 0x4f0   : > { %8501 = vmatprep.mubr.bf16.mxu0 %v16278_v55 }
 0x4f2   : > { %9824 = vmatmul.mubr.msk.bf16.gmra.mrb[40].mxu1 %vm758_vm5, %v16714_v48 }
 0x4f3   : > { %5041 = vmatprep.mubr.bf16.mxu1 %v16278_v55 }
 0x4f7   : > { %10184 = vmatmul.mubr.msk.bf16.gmra.mrb[8].mxu0 %vm758_vm5, %v16715_v56  ;;  %v15649_v56 = vrot.slane %v10198_v0, %v8714_v23 }
 0x4f8   : > { %8511 = vmatprep.mubr.bf16.mxu0 %v16278_v55 }
 0x4fa   : > { %9825 = vmatmul.mubr.msk.bf16.gmra.mrb[44].mxu1 %vm758_vm5, %v16716_v63 }
 0x4fb   : > { %5051 = vmatprep.mubr.bf16.mxu1 %v16278_v55 }
 0x4ff   : > { %10185 = vmatmul.mubr.msk.bf16.gmra.mrb[12].mxu0 %vm758_vm5, %v16717_v43 }
 0x500   : > { %8521 = vmatprep.mubr.bf16.mxu0 %v16278_v55 }
 0x502   : > { %9826 = vmatmul.mubr.msk.bf16.gmra.mrb[48].mxu1 %vm758_vm5, %v16718_v8 }
 0x503   : > { %5061 = vmatprep.mubr.bf16.mxu1 %v16278_v55 }
 0x507   : > { %10186 = vmatmul.mubr.msk.bf16.gmra.mrb[16].mxu0 %vm758_vm5, %v16648_v2 }
 0x508   : > { %8531 = vmatprep.mubr.bf16.mxu0 %v16278_v55 }
 0x50a   : > { %9827 = vmatmul.mubr.msk.bf16.gmra.mrb[52].mxu1 %vm758_vm5, %v16719_v34 }
 0x50b   : > { %5071 = vmatprep.mubr.bf16.mxu1 %v16278_v55 }
 0x50f   : > { %10187 = vmatmul.mubr.msk.bf16.gmra.mrb[20].mxu0 %vm758_vm5, %v14207_v1  ;;  %v12163_v1 = vld [vmem:[%s12252_s20 + $0xd0] sm:$0xf] }
 0x510   : > { %8541 = vmatprep.mubr.bf16.mxu0 %v16278_v55 }
 0x512   : > { %9828 = vmatmul.mubr.msk.bf16.gmra.mrb[56].mxu1 %vm758_vm5, %v16720_v51 }
 0x513   : > { %5081 = vmatprep.mubr.bf16.mxu1 %v16278_v55 }
 0x517   : > { %10188 = vmatmul.mubr.msk.bf16.gmra.mrb[24].mxu0 %vm758_vm5, %v14228_v37  ;;  %v8389_v37 = vrot.slane %v12163_v1, 7 }
 0x518   : > { %8551 = vmatprep.mubr.bf16.mxu0 %v16278_v55 }
 0x51a   : > { %9829 = vmatmul.mubr.msk.bf16.gmra.mrb[60].mxu1 %vm758_vm5, %v14997_v33 }
 0x51b   : > { %5338 = vmatprep.mubr.bf16.mxu1 %v16278_v55 }
 0x51f   : > { %10189 = vmatmul.mubr.msk.bf16.gmra.mrb[28].mxu0 %vm758_vm5, %v14251_v35  ;;  %v12164_v35 = vld [vmem:[%s12252_s20 + $0xcc] sm:$0xf] }
 0x520   : > { %8561 = vmatprep.mubr.bf16.mxu0 %v16278_v55 }
 0x522   : > { %9855 = vmatmul.mubr.msk.bf16.vlgmr.msra.gmra.mrb[32].mxu1 %vm758_vm5, %v16651_v17 }
 0x523   : > { %5348 = vmatprep.mubr.bf16.mxu1 %v16278_v55 }
 0x527   : > { %10190 = vmatmul.mubr.msk.bf16.gmra.mrb[32].mxu0 %vm758_vm5, %v14278_v28  ;;  %v10164_v28 = vrot.slane %v12164_v35, 11  ;;  %v15654_v35 = vrot.slane %v10199_v27, %v8710_v54 }
 0x528   : > { %8571 = vmatprep.mubr.bf16.mxu0 %v16278_v55 }
 0x52a   : > { %9856 = vmatmul.mubr.msk.bf16.gmra.mrb[36].mxu1 %vm758_vm5, %v16653_v6 }
 0x52b   : > { %5358 = vmatprep.mubr.bf16.mxu1 %v16278_v55 }
 0x52f   : > { %10191 = vmatmul.mubr.msk.bf16.gmra.mrb[36].mxu0 %vm758_vm5, %v14299_v40  ;;  %v8391_v40 = vrot.slane %v8389_v37, 4 }
 0x530   : > { %8581 = vmatprep.mubr.bf16.mxu0 %v16278_v55 }
 0x532   : > { %9857 = vmatmul.mubr.msk.bf16.gmra.mrb[40].mxu1 %vm758_vm5, %v14471_v22  ;;  %v16721_v22 = vld [vmem:[#allocation26_spill] sm:$0xff] }
 0x533   : > { %5368 = vmatprep.mubr.bf16.mxu1 %v16278_v55 }
 0x537   : > { %10192 = vmatmul.mubr.msk.bf16.gmra.mrb[40].mxu0 %vm758_vm5, %v14314_v11  ;;  %v12165_v11 = vld [vmem:[%s12252_s20 + $0xd4] sm:$0x7] }
 0x538   : > { %8591 = vmatprep.mubr.bf16.mxu0 %v16278_v55 }
 0x53a   : > { %9858 = vmatmul.mubr.msk.bf16.gmra.mrb[44].mxu1 %vm758_vm5, %v14490_v61 }
 0x53b   : > { %5378 = vmatprep.mubr.bf16.mxu1 %v16278_v55 }
 0x53f   : > { %10193 = vmatmul.mubr.msk.bf16.gmra.mrb[44].mxu0 %vm758_vm5, %v14329_v18  ;;  %v8392_v18 = vrot.slane %v12165_v11, 7  ;;  %v15658_v11 = vrot.slane %v10199_v27, %v8714_v23 }
 0x540   : > { %8601 = vmatprep.mubr.bf16.mxu0 %v16278_v55 }
 0x542   : > { %9859 = vmatmul.mubr.msk.bf16.gmra.mrb[48].mxu1 %vm758_vm5, %v14509_v15  ;;  %v8390_v15 = vsel %vm13976_vm2, %v10164_v28, %v8389_v37 }
 0x543   : > { %5388 = vmatprep.mubr.bf16.mxu1 %v16278_v55 }
 0x547   : > { %10194 = vmatmul.mubr.msk.bf16.gmra.mrb[48].mxu0 %vm758_vm5, %v16649_v44 }
 0x548   : > { %8611 = vmatprep.mubr.bf16.mxu0 %v16278_v55 }
 0x54a   : > { %9860 = vmatmul.mubr.msk.bf16.gmra.mrb[52].mxu1 %vm758_vm5, %v14528_v32  ;;  %v8393_v32 = vsel %vm13976_vm2, %v8391_v40, %v8392_v18 }
 0x54b   : > { %5398 = vmatprep.mubr.bf16.mxu1 %v16278_v55 }
 0x54f   : > { %10195 = vmatmul.mubr.msk.bf16.gmra.mrb[52].mxu0 %vm758_vm5, %v16650_v21 }
 0x550   : > { %8621 = vmatprep.mubr.bf16.mxu0 %v16278_v55 }
 0x552   : > { %9861 = vmatmul.mubr.msk.bf16.gmra.mrb[56].mxu1 %vm758_vm5, %v14544_v46  ;;  %v10173_v46 = vcombine.low %v8390_v15, %v8393_v32 }
 0x553   : > { %5408 = vmatprep.mubr.bf16.mxu1 %v16278_v55 }
 0x557   : > { %10196 = vmatmul.mubr.msk.bf16.gmra.mrb[56].mxu0 %vm758_vm5, %v16721_v22 }
 0x558   : > { %8631 = vmatprep.mubr.bf16.mxu0 %v16278_v55 }
 0x55a   : > { %9862 = vmatmul.mubr.msk.bf16.gmra.mrb[60].mxu1 %vm758_vm5, %v15167_v49 }
 0x55f   : > { %10197 = vmatmul.mubr.msk.bf16.gmra.mrb[60].mxu0 %vm758_vm5, %v10173_v46 }
 0x575   : > { %v4933_v2 = vpop.f32.mrb[0].mxu1 }
 0x576   : > { %v4935_v33 = vpop.f32.mrb[1].mxu1 }
 0x577   : > { %v4937_v44 = vpop.f32.mrb[2].mxu1 }
 0x578   : > { %v4939_v21 = vpop.f32.mrb[3].mxu1 }
 0x57d   : > { %v4943_v17 = vpop.f32.mrb[4].mxu1 }
 0x57e   : > { %v15580_v6 = vpop.f32.mrb[5].mxu1 }
 0x57f   : > { %v15582_v55 = vpop.f32.mrb[6].mxu1 }
 0x580   : > { %v15584_v36 = vpop.f32.mrb[7].mxu1 }
 0x585   : > { %v15586_v30 = vpop.f32.mrb[8].mxu1 }
 0x586   : > { %v15588_v25 = vpop.f32.mrb[9].mxu1 }
 0x587   : > { %v15590_v10 = vpop.f32.mrb[10].mxu1 }
 0x588   : > { %v15592_v49 = vpop.f32.mrb[11].mxu1 }
 0x58d   : > { %v15594_v62 = vpop.f32.mrb[12].mxu1 }
 0x58e   : > { %v15596_v12 = vpop.f32.mrb[13].mxu1 }
 0x58f   : > { %v15598_v45 = vpop.f32.mrb[14].mxu1 }
 0x590   : > { %v15600_v39 = vpop.f32.mrb[15].mxu1 }
 0x595   : > { %v15602_v5 = vpop.f32.mrb[16].mxu1 }
 0x596   : > { %v15604_v16 = vpop.f32.mrb[17].mxu1 }
 0x597   : > { %v15606_v13 = vpop.f32.mrb[18].mxu1 }
 0x598   : > { %v15608_v4 = vpop.f32.mrb[19].mxu1 }
 0x59d   : > { %v15610_v42 = vpop.f32.mrb[20].mxu1 }
 0x59e   : > { %v15612_v24 = vpop.f32.mrb[21].mxu1 }
 0x59f   : > { %v15614_v7 = vpop.f32.mrb[22].mxu1 }
 0x5a0   : > { %v15616_v41 = vpop.f32.mrb[23].mxu1 }
 0x5a5   : > { %v15618_v29 = vpop.f32.mrb[24].mxu1 }
 0x5a6   : > { %v15620_v59 = vpop.f32.mrb[25].mxu1 }
 0x5a7   : > { %v15622_v19 = vpop.f32.mrb[26].mxu1 }
 0x5a8   : > { %v15624_v58 = vpop.f32.mrb[27].mxu1 }
 0x5ad   : > { %v15626_v9 = vpop.f32.mrb[28].mxu1 }
 0x5ae   : > { %v15628_v50 = vpop.f32.mrb[29].mxu1 }
 0x5af   : > { %v15630_v47 = vpop.f32.mrb[30].mxu1 }
 0x5b0   : > { %v15632_v60 = vpop.f32.mrb[31].mxu1 }
 0x5ba   : > { %v8483_v31 = vpop.f32.mrb[0].mxu0 }
 0x5bb   : > { %v10530_v38 = vadd.f32 %v8483_v31, %v4933_v2  ;;  %v8485_v57 = vpop.f32.mrb[1].mxu0 }
 0x5bc   : > { %v10531_v48 = vadd.f32 %v8485_v57, %v4935_v33  ;;  %v8487_v63 = vpop.f32.mrb[2].mxu0 }
 0x5bd   : > { %v8718_v43 = vmul.f32 %v10530_v38, %v15640_v3  ;;  %v10532_v8 = vadd.f32 %v8487_v63, %v4937_v44  ;;  %v8489_v34 = vpop.f32.mrb[3].mxu0 }
 0x5be   : > { %v8719_v51 = vmul.f32 %v10531_v48, %v15642_v26  ;;  %v10533_v1 = vadd.f32 %v8489_v34, %v4939_v21 }
 0x5bf   : > { %v8795_v37 = vadd.f32 %v15644_v20, %v8718_v43  ;;  %v8720_v28 = vmul.f32 %v10532_v8, %v15640_v3 }
 0x5c0   : > { %v8796_v40 = vadd.f32 %v15649_v56, %v8719_v51  ;;  %v8721_v18 = vmul.f32 %v10533_v1, %v15642_v26 }
 0x5c1   : > { %v8797_v22 = vadd.f32 %v15644_v20, %v8720_v28  ;;  %v8872_v32 = vmax.f32 %v8795_v37, %v15654_v35 }
 0x5c2   : > { %v8798_v61 = vadd.f32 %v15649_v56, %v8721_v18  ;;  %v8493_v15 = vpop.f32.mrb[4].mxu0  ;;  %v8873_v44 = vmax.f32 %v8796_v40, %v15658_v11 }
 0x5c3   : > { %v8874_v46 = vmax.f32 %v8797_v22, %v15654_v35  ;;  %v10534_v2 = vadd.f32 %v8493_v15, %v4943_v17  ;;  %v8495_v33 = vpop.f32.mrb[5].mxu0 }
 0x5c4   : > { %v8875_v21 = vmax.f32 %v8798_v61, %v15658_v11  ;;  %v10535_v53 = vadd.f32 %v8495_v33, %v15580_v6  ;;  %v8497_v52 = vpop.f32.mrb[6].mxu0 }
 0x5c5   : > { %v10335_v54 = vpack.c.bf16 %v8874_v46, %v8872_v32  ;;  %v8722_v17 = vmul.f32 %v10534_v2, %v15640_v3  ;;  %v10536_v14 = vadd.f32 %v8497_v52, %v15582_v55  ;;  %v8499_v23 = vpop.f32.mrb[7].mxu0 }
 0x5c6   : > { %v10415_v0 = vpack.c.bf16 %v8875_v21, %v8873_v44  ;;  %v8723_v31 = vmul.f32 %v10535_v53, %v15642_v26  ;;  %v10537_v38 = vadd.f32 %v8499_v23, %v15584_v36 }
 0x5c7   : > { %10336 = vst [vmem:[%s15670_s9] sm:$0xff] %v10335_v54   ;;  %v8799_v6 = vadd.f32 %v15644_v20, %v8722_v17  ;;  %v8724_v57 = vmul.f32 %v10536_v14, %v15640_v3 }
 0x5c8   : > { %10416 = vst [vmem:[%s15677_s11] sm:$0xff] %v10415_v0   ;;  %v8800_v27 = vadd.f32 %v15649_v56, %v8723_v31  ;;  %v8725_v48 = vmul.f32 %v10537_v38, %v15642_v26 }
 0x5c9   : > { %v8801_v63 = vadd.f32 %v15644_v20, %v8724_v57  ;;  %v8876_v8 = vmax.f32 %v8799_v6, %v15654_v35 }
 0x5ca   : > { %v8802_v55 = vadd.f32 %v15649_v56, %v8725_v48  ;;  %v8503_v43 = vpop.f32.mrb[8].mxu0  ;;  %v8877_v1 = vmax.f32 %v8800_v27, %v15658_v11 }
 0x5cb   : > { %v8878_v36 = vmax.f32 %v8801_v63, %v15654_v35  ;;  %v10538_v34 = vadd.f32 %v8503_v43, %v15586_v30  ;;  %v8505_v51 = vpop.f32.mrb[9].mxu0 }
 0x5cc   : > { %v8879_v37 = vmax.f32 %v8802_v55, %v15658_v11  ;;  %v10539_v28 = vadd.f32 %v8505_v51, %v15588_v25  ;;  %v8507_v40 = vpop.f32.mrb[10].mxu0 }
 0x5cd   : > { %v10340_v18 = vpack.c.bf16 %v8878_v36, %v8876_v8  ;;  %v8726_v22 = vmul.f32 %v10538_v34, %v15640_v3  ;;  %v10540_v61 = vadd.f32 %v8507_v40, %v15590_v10  ;;  %v8509_v15 = vpop.f32.mrb[11].mxu0 }
 0x5ce   : > { %v10420_v32 = vpack.c.bf16 %v8879_v37, %v8877_v1  ;;  %v8727_v46 = vmul.f32 %v10539_v28, %v15642_v26  ;;  %v10541_v30 = vadd.f32 %v8509_v15, %v15592_v49 }
 0x5cf   : > { %10492 = vst [vmem:[%s15670_s9 + $0x8] sm:$0xff] %v10340_v18   ;;  %v8803_v2 = vadd.f32 %v15644_v20, %v8726_v22  ;;  %v8728_v33 = vmul.f32 %v10540_v61, %v15640_v3 }
 0x5d0   : > { %10507 = vst [vmem:[%s15677_s11 + $0x8] sm:$0xff] %v10420_v32   ;;  %v8804_v25 = vadd.f32 %v15649_v56, %v8727_v46  ;;  %v8729_v44 = vmul.f32 %v10541_v30, %v15642_v26 }
 0x5d1   : > { %v8805_v21 = vadd.f32 %v15644_v20, %v8728_v33  ;;  %v8880_v52 = vmax.f32 %v8803_v2, %v15654_v35 }
 0x5d2   : > { %v8806_v10 = vadd.f32 %v15649_v56, %v8729_v44  ;;  %v8513_v53 = vpop.f32.mrb[12].mxu0  ;;  %v8881_v14 = vmax.f32 %v8804_v25, %v15658_v11 }
 0x5d3   : > { %v8882_v49 = vmax.f32 %v8805_v21, %v15654_v35  ;;  %v10542_v54 = vadd.f32 %v8513_v53, %v15594_v62  ;;  %v8515_v17 = vpop.f32.mrb[13].mxu0 }
 0x5d4   : > { %v8883_v23 = vmax.f32 %v8806_v10, %v15658_v11  ;;  %v10543_v0 = vadd.f32 %v8515_v17, %v15596_v12  ;;  %v8517_v31 = vpop.f32.mrb[14].mxu0 }
 0x5d5   : > { %v10345_v38 = vpack.c.bf16 %v8882_v49, %v8880_v52  ;;  %v8730_v6 = vmul.f32 %v10542_v54, %v15640_v3  ;;  %v10544_v57 = vadd.f32 %v8517_v31, %v15598_v45  ;;  %v8519_v27 = vpop.f32.mrb[15].mxu0 }
 0x5d6   : > { %v10425_v48 = vpack.c.bf16 %v8883_v23, %v8881_v14  ;;  %v8731_v63 = vmul.f32 %v10543_v0, %v15642_v26  ;;  %v10545_v62 = vadd.f32 %v8519_v27, %v15600_v39 }
 0x5d7   : > { %10493 = vst [vmem:[%s15670_s9 + $0x10] sm:$0xff] %v10345_v38   ;;  %v8807_v55 = vadd.f32 %v15644_v20, %v8730_v6  ;;  %v8732_v43 = vmul.f32 %v10544_v57, %v15640_v3 }
 0x5d8   : > { %10508 = vst [vmem:[%s15677_s11 + $0x10] sm:$0xff] %v10425_v48   ;;  %v8808_v12 = vadd.f32 %v15649_v56, %v8731_v63  ;;  %v8733_v8 = vmul.f32 %v10545_v62, %v15642_v26 }
 0x5d9   : > { %v8809_v36 = vadd.f32 %v15644_v20, %v8732_v43  ;;  %v8884_v51 = vmax.f32 %v8807_v55, %v15654_v35 }
 0x5da   : > { %v8810_v45 = vadd.f32 %v15649_v56, %v8733_v8  ;;  %v8523_v34 = vpop.f32.mrb[16].mxu0  ;;  %v8885_v28 = vmax.f32 %v8808_v12, %v15658_v11 }
 0x5db   : > { %v8886_v39 = vmax.f32 %v8809_v36, %v15654_v35  ;;  %v10546_v1 = vadd.f32 %v8523_v34, %v15602_v5  ;;  %v8525_v37 = vpop.f32.mrb[17].mxu0 }
 0x5dc   : > { %v8887_v40 = vmax.f32 %v8810_v45, %v15658_v11  ;;  %v10547_v18 = vadd.f32 %v8525_v37, %v15604_v16  ;;  %v8527_v22 = vpop.f32.mrb[18].mxu0 }
 0x5dd   : > { %v10350_v61 = vpack.c.bf16 %v8886_v39, %v8884_v51  ;;  %v8734_v15 = vmul.f32 %v10546_v1, %v15640_v3  ;;  %v10548_v32 = vadd.f32 %v8527_v22, %v15606_v13  ;;  %v8529_v46 = vpop.f32.mrb[19].mxu0 }
 0x5de   : > { %v10430_v30 = vpack.c.bf16 %v8887_v40, %v8885_v28  ;;  %v8735_v2 = vmul.f32 %v10547_v18, %v15642_v26  ;;  %v10549_v5 = vadd.f32 %v8529_v46, %v15608_v4 }
 0x5df   : > { %10494 = vst [vmem:[%s15670_s9 + $0x18] sm:$0xff] %v10350_v61   ;;  %v8811_v33 = vadd.f32 %v15644_v20, %v8734_v15  ;;  %v8736_v25 = vmul.f32 %v10548_v32, %v15640_v3 }
 0x5e0   : > { %10509 = vst [vmem:[%s15677_s11 + $0x18] sm:$0xff] %v10430_v30   ;;  %v8812_v16 = vadd.f32 %v15649_v56, %v8735_v2  ;;  %v8737_v44 = vmul.f32 %v10549_v5, %v15642_v26 }
 0x5e1   : > { %v8813_v21 = vadd.f32 %v15644_v20, %v8736_v25  ;;  %v8888_v53 = vmax.f32 %v8811_v33, %v15654_v35 }
 0x5e2   : > { %v8814_v13 = vadd.f32 %v15649_v56, %v8737_v44  ;;  %v8533_v10 = vpop.f32.mrb[20].mxu0  ;;  %v8889_v54 = vmax.f32 %v8812_v16, %v15658_v11 }
 0x5e3   : > { %v8890_v4 = vmax.f32 %v8813_v21, %v15654_v35  ;;  %v10550_v52 = vadd.f32 %v8533_v10, %v15610_v42  ;;  %v8535_v49 = vpop.f32.mrb[21].mxu0 }
 0x5e4   : > { %v8891_v17 = vmax.f32 %v8814_v13, %v15658_v11  ;;  %v10551_v14 = vadd.f32 %v8535_v49, %v15612_v24  ;;  %v8537_v23 = vpop.f32.mrb[22].mxu0 }
 0x5e5   : > { %v10355_v0 = vpack.c.bf16 %v8890_v4, %v8888_v53  ;;  %v8738_v31 = vmul.f32 %v10550_v52, %v15640_v3  ;;  %v10552_v38 = vadd.f32 %v8537_v23, %v15614_v7  ;;  %v8539_v6 = vpop.f32.mrb[23].mxu0 }
 0x5e6   : > { %v10435_v57 = vpack.c.bf16 %v8891_v17, %v8889_v54  ;;  %v8739_v27 = vmul.f32 %v10551_v14, %v15642_v26  ;;  %v10553_v42 = vadd.f32 %v8539_v6, %v15616_v41 }
 0x5e7   : > { %10495 = vst [vmem:[%s15670_s9 + $0x20] sm:$0xff] %v10355_v0   ;;  %v8815_v48 = vadd.f32 %v15644_v20, %v8738_v31  ;;  %v8740_v63 = vmul.f32 %v10552_v38, %v15640_v3 }
 0x5e8   : > { %10510 = vst [vmem:[%s15677_s11 + $0x20] sm:$0xff] %v10435_v57   ;;  %v8816_v24 = vadd.f32 %v15649_v56, %v8739_v27  ;;  %v8741_v62 = vmul.f32 %v10553_v42, %v15642_v26 }
 0x5e9   : > { %v8817_v55 = vadd.f32 %v15644_v20, %v8740_v63  ;;  %v8892_v12 = vmax.f32 %v8815_v48, %v15654_v35 }
 0x5ea   : > { %v8818_v7 = vadd.f32 %v15649_v56, %v8741_v62  ;;  %v8543_v43 = vpop.f32.mrb[24].mxu0  ;;  %v8893_v45 = vmax.f32 %v8816_v24, %v15658_v11 }
 0x5eb   : > { %v8894_v41 = vmax.f32 %v8817_v55, %v15654_v35  ;;  %v10554_v8 = vadd.f32 %v8543_v43, %v15618_v29  ;;  %v8545_v36 = vpop.f32.mrb[25].mxu0 }
 0x5ec   : > { %v8895_v34 = vmax.f32 %v8818_v7, %v15658_v11  ;;  %v10555_v51 = vadd.f32 %v8545_v36, %v15620_v59  ;;  %v8547_v39 = vpop.f32.mrb[26].mxu0 }
 0x5ed   : > { %v10360_v1 = vpack.c.bf16 %v8894_v41, %v8892_v12  ;;  %v8742_v37 = vmul.f32 %v10554_v8, %v15640_v3  ;;  %v10556_v28 = vadd.f32 %v8547_v39, %v15622_v19  ;;  %v8549_v40 = vpop.f32.mrb[27].mxu0 }
 0x5ee   : > { %v10440_v18 = vpack.c.bf16 %v8895_v34, %v8893_v45  ;;  %v8743_v22 = vmul.f32 %v10555_v51, %v15642_v26  ;;  %v10557_v29 = vadd.f32 %v8549_v40, %v15624_v58 }
 0x5ef   : > { %10496 = vst [vmem:[%s15670_s9 + $0x28] sm:$0xff] %v10360_v1   ;;  %v8819_v61 = vadd.f32 %v15644_v20, %v8742_v37  ;;  %v8744_v15 = vmul.f32 %v10556_v28, %v15640_v3 }
 0x5f0   : > { %10511 = vst [vmem:[%s15677_s11 + $0x28] sm:$0xff] %v10440_v18   ;;  %v8820_v59 = vadd.f32 %v15649_v56, %v8743_v22  ;;  %v8745_v32 = vmul.f32 %v10557_v29, %v15642_v26 }
 0x5f1   : > { %v8821_v46 = vadd.f32 %v15644_v20, %v8744_v15  ;;  %v8896_v2 = vmax.f32 %v8819_v61, %v15654_v35 }
 0x5f2   : > { %v8822_v19 = vadd.f32 %v15649_v56, %v8745_v32  ;;  %v8553_v30 = vpop.f32.mrb[28].mxu0  ;;  %v8897_v25 = vmax.f32 %v8820_v59, %v15658_v11 }
 0x5f3   : > { %v8898_v5 = vmax.f32 %v8821_v46, %v15654_v35  ;;  %v10558_v58 = vadd.f32 %v8553_v30, %v15626_v9  ;;  %v8555_v33 = vpop.f32.mrb[29].mxu0 }
 0x5f4   : > { %v8899_v16 = vmax.f32 %v8822_v19, %v15658_v11  ;;  %v10559_v44 = vadd.f32 %v8555_v33, %v15628_v50  ;;  %v8557_v21 = vpop.f32.mrb[30].mxu0 }
 0x5f5   : > { %v10365_v13 = vpack.c.bf16 %v8898_v5, %v8896_v2  ;;  %v8746_v10 = vmul.f32 %v10558_v58, %v15640_v3  ;;  %v10560_v53 = vadd.f32 %v8557_v21, %v15630_v47  ;;  %v8559_v4 = vpop.f32.mrb[31].mxu0  ;;  %v5340_v52 = vpop.f32.mrb[32].mxu1 }
 0x5f6   : > { %v10445_v49 = vpack.c.bf16 %v8899_v16, %v8897_v25  ;;  %v8747_v54 = vmul.f32 %v10559_v44, %v15642_v26  ;;  %v10561_v9 = vadd.f32 %v8559_v4, %v15632_v60  ;;  %v5342_v17 = vpop.f32.mrb[33].mxu1 }
 0x5f7   : > { %10497 = vst [vmem:[%s15670_s9 + $0x30] sm:$0xff] %v10365_v13   ;;  %v8823_v14 = vadd.f32 %v15644_v20, %v8746_v10  ;;  %v8748_v23 = vmul.f32 %v10560_v53, %v15640_v3  ;;  %v5344_v50 = vpop.f32.mrb[34].mxu1 }
 0x5f8   : > { %10512 = vst [vmem:[%s15677_s11 + $0x30] sm:$0xff] %v10445_v49   ;;  %v8824_v0 = vadd.f32 %v15649_v56, %v8747_v54  ;;  %v8749_v31 = vmul.f32 %v10561_v9, %v15642_v26  ;;  %v5346_v47 = vpop.f32.mrb[35].mxu1 }
 0x5f9   : > { %v8825_v38 = vadd.f32 %v15644_v20, %v8748_v23  ;;  %v8900_v60 = vmax.f32 %v8823_v14, %v15654_v35 }
 0x5fa   : > { %v8826_v6 = vadd.f32 %v15649_v56, %v8749_v31  ;;  %v8563_v57 = vpop.f32.mrb[32].mxu0  ;;  %v8901_v63 = vmax.f32 %v8824_v0, %v15658_v11 }
 0x5fb   : > { %v8902_v27 = vmax.f32 %v8825_v38, %v15654_v35  ;;  %v10562_v42 = vadd.f32 %v8563_v57, %v5340_v52  ;;  %v8565_v48 = vpop.f32.mrb[33].mxu0 }
 0x5fc   : > { %v8903_v24 = vmax.f32 %v8826_v6, %v15658_v11  ;;  %v10563_v62 = vadd.f32 %v8565_v48, %v5342_v17  ;;  %v8567_v55 = vpop.f32.mrb[34].mxu0 }
 0x5fd   : > { %v10370_v7 = vpack.c.bf16 %v8902_v27, %v8900_v60  ;;  %v8750_v43 = vmul.f32 %v10562_v42, %v15640_v3  ;;  %v10564_v12 = vadd.f32 %v8567_v55, %v5344_v50  ;;  %v8569_v41 = vpop.f32.mrb[35].mxu0  ;;  %v5350_v8 = vpop.f32.mrb[36].mxu1 }
 0x5fe   : > { %v10450_v36 = vpack.c.bf16 %v8903_v24, %v8901_v63  ;;  %v8751_v45 = vmul.f32 %v10563_v62, %v15642_v26  ;;  %v10565_v34 = vadd.f32 %v8569_v41, %v5346_v47  ;;  %v5352_v51 = vpop.f32.mrb[37].mxu1 }
 0x5ff   : > { %10498 = vst [vmem:[%s15670_s9 + $0x38] sm:$0xff] %v10370_v7   ;;  %v8827_v39 = vadd.f32 %v15644_v20, %v8750_v43  ;;  %v8752_v1 = vmul.f32 %v10564_v12, %v15640_v3  ;;  %v5354_v37 = vpop.f32.mrb[38].mxu1 }
 0x600   : > { %10513 = vst [vmem:[%s15677_s11 + $0x38] sm:$0xff] %v10450_v36   ;;  %v8828_v28 = vadd.f32 %v15649_v56, %v8751_v45  ;;  %v8753_v40 = vmul.f32 %v10565_v34, %v15642_v26  ;;  %v5356_v18 = vpop.f32.mrb[39].mxu1 }
 0x601   : > { %v8829_v22 = vadd.f32 %v15644_v20, %v8752_v1  ;;  %v8904_v15 = vmax.f32 %v8827_v39, %v15654_v35 }
 0x602   : > { %v8830_v29 = vadd.f32 %v15649_v56, %v8753_v40  ;;  %v8573_v61 = vpop.f32.mrb[36].mxu0  ;;  %v8905_v19 = vmax.f32 %v8828_v28, %v15658_v11 }
 0x603   : > { %v8906_v59 = vmax.f32 %v8829_v22, %v15654_v35  ;;  %v10566_v32 = vadd.f32 %v8573_v61, %v5350_v8  ;;  %v8575_v46 = vpop.f32.mrb[37].mxu0 }
 0x604   : > { %v8907_v30 = vmax.f32 %v8830_v29, %v15658_v11  ;;  %v10567_v2 = vadd.f32 %v8575_v46, %v5352_v51  ;;  %v8577_v5 = vpop.f32.mrb[38].mxu0 }
 0x605   : > { %v10375_v58 = vpack.c.bf16 %v8906_v59, %v8904_v15  ;;  %v8754_v33 = vmul.f32 %v10566_v32, %v15640_v3  ;;  %v10568_v25 = vadd.f32 %v8577_v5, %v5354_v37  ;;  %v8579_v16 = vpop.f32.mrb[39].mxu0  ;;  %v5360_v44 = vpop.f32.mrb[40].mxu1 }
 0x606   : > { %v10455_v21 = vpack.c.bf16 %v8907_v30, %v8905_v19  ;;  %v8755_v13 = vmul.f32 %v10567_v2, %v15642_v26  ;;  %v10569_v10 = vadd.f32 %v8579_v16, %v5356_v18  ;;  %v5362_v53 = vpop.f32.mrb[41].mxu1 }
 0x607   : > { %10499 = vst [vmem:[%s15670_s9 + $0x40] sm:$0xff] %v10375_v58   ;;  %v8831_v4 = vadd.f32 %v15644_v20, %v8754_v33  ;;  %v8756_v52 = vmul.f32 %v10568_v25, %v15640_v3  ;;  %v5364_v49 = vpop.f32.mrb[42].mxu1 }
 0x608   : > { %10514 = vst [vmem:[%s15677_s11 + $0x40] sm:$0xff] %v10455_v21   ;;  %v8832_v54 = vadd.f32 %v15649_v56, %v8755_v13  ;;  %v8757_v9 = vmul.f32 %v10569_v10, %v15642_v26  ;;  %v5366_v17 = vpop.f32.mrb[43].mxu1 }
 0x609   : > { %v8833_v14 = vadd.f32 %v15644_v20, %v8756_v52  ;;  %v8908_v0 = vmax.f32 %v8831_v4, %v15654_v35 }
 0x60a   : > { %v8834_v23 = vadd.f32 %v15649_v56, %v8757_v9  ;;  %v8583_v50 = vpop.f32.mrb[40].mxu0  ;;  %v8909_v6 = vmax.f32 %v8832_v54, %v15658_v11 }
 0x60b   : > { %v8910_v31 = vmax.f32 %v8833_v14, %v15654_v35  ;;  %v10570_v47 = vadd.f32 %v8583_v50, %v5360_v44  ;;  %v8585_v38 = vpop.f32.mrb[41].mxu0 }
 0x60c   : > { %v8911_v57 = vmax.f32 %v8834_v23, %v15658_v11  ;;  %v10571_v60 = vadd.f32 %v8585_v38, %v5362_v53  ;;  %v8587_v27 = vpop.f32.mrb[42].mxu0 }
 0x60d   : > { %v10380_v42 = vpack.c.bf16 %v8910_v31, %v8908_v0  ;;  %v8758_v48 = vmul.f32 %v10570_v47, %v15640_v3  ;;  %v10572_v63 = vadd.f32 %v8587_v27, %v5364_v49  ;;  %v8589_v24 = vpop.f32.mrb[43].mxu0  ;;  %v5370_v62 = vpop.f32.mrb[44].mxu1 }
 0x60e   : > { %v10460_v55 = vpack.c.bf16 %v8911_v57, %v8909_v6  ;;  %v8759_v7 = vmul.f32 %v10571_v60, %v15642_v26  ;;  %v10573_v43 = vadd.f32 %v8589_v24, %v5366_v17  ;;  %v5372_v12 = vpop.f32.mrb[45].mxu1 }
 0x60f   : > { %10500 = vst [vmem:[%s15670_s9 + $0x48] sm:$0xff] %v10380_v42   ;;  %v8835_v41 = vadd.f32 %v15644_v20, %v8758_v48  ;;  %v8760_v8 = vmul.f32 %v10572_v63, %v15640_v3  ;;  %v5374_v36 = vpop.f32.mrb[46].mxu1 }
 0x610   : > { %10515 = vst [vmem:[%s15677_s11 + $0x48] sm:$0xff] %v10460_v55   ;;  %v8836_v45 = vadd.f32 %v15649_v56, %v8759_v7  ;;  %v8761_v34 = vmul.f32 %v10573_v43, %v15642_v26  ;;  %v5376_v51 = vpop.f32.mrb[47].mxu1 }
 0x611   : > { %v8837_v39 = vadd.f32 %v15644_v20, %v8760_v8  ;;  %v8912_v28 = vmax.f32 %v8835_v41, %v15654_v35 }
 0x612   : > { %v8838_v1 = vadd.f32 %v15649_v56, %v8761_v34  ;;  %v8593_v37 = vpop.f32.mrb[44].mxu0  ;;  %v8913_v29 = vmax.f32 %v8836_v45, %v15658_v11 }
 0x613   : > { %v8914_v40 = vmax.f32 %v8837_v39, %v15654_v35  ;;  %v10574_v18 = vadd.f32 %v8593_v37, %v5370_v62  ;;  %v8595_v22 = vpop.f32.mrb[45].mxu0 }
 0x614   : > { %v8915_v61 = vmax.f32 %v8838_v1, %v15658_v11  ;;  %v10575_v15 = vadd.f32 %v8595_v22, %v5372_v12  ;;  %v8597_v59 = vpop.f32.mrb[46].mxu0 }
 0x615   : > { %v10385_v32 = vpack.c.bf16 %v8914_v40, %v8912_v28  ;;  %v8762_v46 = vmul.f32 %v10574_v18, %v15640_v3  ;;  %v10576_v19 = vadd.f32 %v8597_v59, %v5374_v36  ;;  %v8599_v30 = vpop.f32.mrb[47].mxu0  ;;  %v5380_v2 = vpop.f32.mrb[48].mxu1 }
 0x616   : > { %v10465_v5 = vpack.c.bf16 %v8915_v61, %v8913_v29  ;;  %v8763_v58 = vmul.f32 %v10575_v15, %v15642_v26  ;;  %v10577_v33 = vadd.f32 %v8599_v30, %v5376_v51  ;;  %v5382_v25 = vpop.f32.mrb[49].mxu1 }
 0x617   : > { %10501 = vst [vmem:[%s15670_s9 + $0x50] sm:$0xff] %v10385_v32   ;;  %v8839_v16 = vadd.f32 %v15644_v20, %v8762_v46  ;;  %v8764_v44 = vmul.f32 %v10576_v19, %v15640_v3  ;;  %v5384_v21 = vpop.f32.mrb[50].mxu1 }
 0x618   : > { %10516 = vst [vmem:[%s15677_s11 + $0x50] sm:$0xff] %v10465_v5   ;;  %v8840_v13 = vadd.f32 %v15649_v56, %v8763_v58  ;;  %v8765_v10 = vmul.f32 %v10577_v33, %v15642_v26  ;;  %v5386_v53 = vpop.f32.mrb[51].mxu1 }
 0x619   : > { %v8841_v4 = vadd.f32 %v15644_v20, %v8764_v44  ;;  %v8916_v54 = vmax.f32 %v8839_v16, %v15654_v35 }
 0x61a   : > { %v8842_v52 = vadd.f32 %v15649_v56, %v8765_v10  ;;  %v8603_v49 = vpop.f32.mrb[48].mxu0  ;;  %v8917_v23 = vmax.f32 %v8840_v13, %v15658_v11 }
 0x61b   : > { %v8918_v9 = vmax.f32 %v8841_v4, %v15654_v35  ;;  %v10578_v17 = vadd.f32 %v8603_v49, %v5380_v2  ;;  %v8605_v14 = vpop.f32.mrb[49].mxu0 }
 0x61c   : > { %v8919_v50 = vmax.f32 %v8842_v52, %v15658_v11  ;;  %v10579_v0 = vadd.f32 %v8605_v14, %v5382_v25  ;;  %v8607_v31 = vpop.f32.mrb[50].mxu0 }
 0x61d   : > { %v10390_v47 = vpack.c.bf16 %v8918_v9, %v8916_v54  ;;  %v8766_v38 = vmul.f32 %v10578_v17, %v15640_v3  ;;  %v10580_v6 = vadd.f32 %v8607_v31, %v5384_v21  ;;  %v8609_v57 = vpop.f32.mrb[51].mxu0  ;;  %v5390_v60 = vpop.f32.mrb[52].mxu1 }
 0x61e   : > { %v10470_v27 = vpack.c.bf16 %v8919_v50, %v8917_v23  ;;  %v8767_v42 = vmul.f32 %v10579_v0, %v15642_v26  ;;  %v10581_v48 = vadd.f32 %v8609_v57, %v5386_v53  ;;  %v5392_v63 = vpop.f32.mrb[53].mxu1 }
 0x61f   : > { %10502 = vst [vmem:[%s15670_s9 + $0x58] sm:$0xff] %v10390_v47   ;;  %v8843_v24 = vadd.f32 %v15644_v20, %v8766_v38  ;;  %v8768_v62 = vmul.f32 %v10580_v6, %v15640_v3  ;;  %v5394_v55 = vpop.f32.mrb[54].mxu1 }
 0x620   : > { %10517 = vst [vmem:[%s15677_s11 + $0x58] sm:$0xff] %v10470_v27   ;;  %v8844_v7 = vadd.f32 %v15649_v56, %v8767_v42  ;;  %v8769_v43 = vmul.f32 %v10581_v48, %v15642_v26  ;;  %v5396_v12 = vpop.f32.mrb[55].mxu1 }
 0x621   : > { %v8845_v41 = vadd.f32 %v15644_v20, %v8768_v62  ;;  %v8920_v45 = vmax.f32 %v8843_v24, %v15654_v35 }
 0x622   : > { %v8846_v8 = vadd.f32 %v15649_v56, %v8769_v43  ;;  %v8613_v36 = vpop.f32.mrb[52].mxu0  ;;  %v8921_v1 = vmax.f32 %v8844_v7, %v15658_v11 }
 0x623   : > { %v8922_v34 = vmax.f32 %v8845_v41, %v15654_v35  ;;  %v10582_v51 = vadd.f32 %v8613_v36, %v5390_v60  ;;  %v8615_v39 = vpop.f32.mrb[53].mxu0 }
 0x624   : > { %v8923_v37 = vmax.f32 %v8846_v8, %v15658_v11  ;;  %v10583_v28 = vadd.f32 %v8615_v39, %v5392_v63  ;;  %v8617_v40 = vpop.f32.mrb[54].mxu0 }
 0x625   : > { %v10395_v18 = vpack.c.bf16 %v8922_v34, %v8920_v45  ;;  %v8770_v22 = vmul.f32 %v10582_v51, %v15640_v3  ;;  %v10584_v29 = vadd.f32 %v8617_v40, %v5394_v55  ;;  %v8619_v61 = vpop.f32.mrb[55].mxu0  ;;  %v5400_v15 = vpop.f32.mrb[56].mxu1 }
 0x626   : > { %v10475_v59 = vpack.c.bf16 %v8923_v37, %v8921_v1  ;;  %v8771_v32 = vmul.f32 %v10583_v28, %v15642_v26  ;;  %v10585_v46 = vadd.f32 %v8619_v61, %v5396_v12  ;;  %v5402_v19 = vpop.f32.mrb[57].mxu1 }
 0x627   : > { %10503 = vst [vmem:[%s15670_s9 + $0x60] sm:$0xff] %v10395_v18   ;;  %v8847_v30 = vadd.f32 %v15644_v20, %v8770_v22  ;;  %v8772_v2 = vmul.f32 %v10584_v29, %v15640_v3  ;;  %v5404_v5 = vpop.f32.mrb[58].mxu1 }
 0x628   : > { %10518 = vst [vmem:[%s15677_s11 + $0x60] sm:$0xff] %v10475_v59   ;;  %v8848_v58 = vadd.f32 %v15649_v56, %v8771_v32  ;;  %v8773_v33 = vmul.f32 %v10585_v46, %v15642_v26  ;;  %v5406_v25 = vpop.f32.mrb[59].mxu1 }
 0x629   : > { %v8849_v16 = vadd.f32 %v15644_v20, %v8772_v2  ;;  %v8924_v13 = vmax.f32 %v8847_v30, %v15654_v35 }
 0x62a   : > { %v8850_v44 = vadd.f32 %v15649_v56, %v8773_v33  ;;  %v8623_v21 = vpop.f32.mrb[56].mxu0  ;;  %v8925_v52 = vmax.f32 %v8848_v58, %v15658_v11 }
 0x62b   : > { %v8926_v10 = vmax.f32 %v8849_v16, %v15654_v35  ;;  %v10586_v53 = vadd.f32 %v8623_v21, %v5400_v15  ;;  %v8625_v4 = vpop.f32.mrb[57].mxu0 }
 0x62c   : > { %v8927_v49 = vmax.f32 %v8850_v44, %v15658_v11  ;;  %v10587_v54 = vadd.f32 %v8625_v4, %v5402_v19  ;;  %v8627_v9 = vpop.f32.mrb[58].mxu0 }
 0x62d   : > { %v10400_v17 = vpack.c.bf16 %v8926_v10, %v8924_v13  ;;  %v8774_v14 = vmul.f32 %v10586_v53, %v15640_v3  ;;  %v10588_v23 = vadd.f32 %v8627_v9, %v5404_v5  ;;  %v8629_v50 = vpop.f32.mrb[59].mxu0  ;;  %v5410_v0 = vpop.f32.mrb[60].mxu1 }
 0x62e   : > { %v10480_v31 = vpack.c.bf16 %v8927_v49, %v8925_v52  ;;  %v8775_v47 = vmul.f32 %v10587_v54, %v15642_v26  ;;  %v10589_v38 = vadd.f32 %v8629_v50, %v5406_v25  ;;  %v5412_v6 = vpop.f32.mrb[61].mxu1 }
 0x62f   : > { %10504 = vst [vmem:[%s15670_s9 + $0x68] sm:$0xff] %v10400_v17   ;;  %v8851_v57 = vadd.f32 %v15644_v20, %v8774_v14  ;;  %v8776_v60 = vmul.f32 %v10588_v23, %v15640_v3  ;;  %v5414_v27 = vpop.f32.mrb[62].mxu1 }
 0x630   : > { %10519 = vst [vmem:[%s15677_s11 + $0x68] sm:$0xff] %v10480_v31   ;;  %v8852_v42 = vadd.f32 %v15649_v56, %v8775_v47  ;;  %v8777_v48 = vmul.f32 %v10589_v38, %v15642_v26  ;;  %v5416_v63 = vpop.f32.mrb[63].mxu1 }
 0x631   : > { %v8853_v24 = vadd.f32 %v15644_v20, %v8776_v60  ;;  %v8928_v7 = vmax.f32 %v8851_v57, %v15654_v35 }
 0x632   : > { %v8854_v62 = vadd.f32 %v15649_v56, %v8777_v48  ;;  %v8633_v55 = vpop.f32.mrb[60].mxu0  ;;  %v8929_v8 = vmax.f32 %v8852_v42, %v15658_v11 }
 0x633   : > { %v8930_v43 = vmax.f32 %v8853_v24, %v15654_v35  ;;  %v10590_v12 = vadd.f32 %v8633_v55, %v5410_v0  ;;  %v8635_v41 = vpop.f32.mrb[61].mxu0 }
 0x634   : > { %v8931_v36 = vmax.f32 %v8854_v62, %v15658_v11  ;;  %v10591_v45 = vadd.f32 %v8635_v41, %v5412_v6  ;;  %v8637_v34 = vpop.f32.mrb[62].mxu0 }
 0x635   : > { %v10405_v51 = vpack.c.bf16 %v8930_v43, %v8928_v7  ;;  %v8778_v39 = vmul.f32 %v10590_v12, %v15640_v3  ;;  %v10592_v1 = vadd.f32 %v8637_v34, %v5414_v27  ;;  %v8639_v37 = vpop.f32.mrb[63].mxu0 }
 0x636   : > { %v10485_v28 = vpack.c.bf16 %v8931_v36, %v8929_v8  ;;  %v8779_v40 = vmul.f32 %v10591_v45, %v15642_v26  ;;  %v10593_v18 = vadd.f32 %v8639_v37, %v5416_v63 }
 0x637   : > { %10505 = vst [vmem:[%s15670_s9 + $0x70] sm:$0xff] %v10405_v51   ;;  %v8855_v22 = vadd.f32 %v15644_v20, %v8778_v39  ;;  %v8780_v29 = vmul.f32 %v10592_v1, %v15640_v3 }
 0x638   : > { %10520 = vst [vmem:[%s15677_s11 + $0x70] sm:$0xff] %v10485_v28   ;;  %v8856_v61 = vadd.f32 %v15649_v56, %v8779_v40  ;;  %v8781_v15 = vmul.f32 %v10593_v18, %v15642_v26 }
 0x639   : > { %v8857_v59 = vadd.f32 %v15644_v20, %v8780_v29  ;;  %v8932_v46 = vmax.f32 %v8855_v22, %v15654_v35 }
 0x63a   : > { %v8858_v32 = vadd.f32 %v15649_v56, %v8781_v15  ;;  %v8933_v30 = vmax.f32 %v8856_v61, %v15658_v11 }
 0x63b   : > { %v8934_v19 = vmax.f32 %v8857_v59, %v15654_v35 }
 0x63c   : > { %v8935_v2 = vmax.f32 %v8858_v32, %v15658_v11 }
 0x63d   : > { %v10410_v5 = vpack.c.bf16 %v8934_v19, %v8932_v46 }
 0x63e   : > { %v10490_v58 = vpack.c.bf16 %v8935_v2, %v8933_v30 }
 0x63f   : > { %10506 = vst [vmem:[%s15670_s9 + $0x78] sm:$0xff] %v10410_v5  }
 0x640   : > { %10521 = vst [vmem:[%s15677_s11 + $0x78] sm:$0xff] %v10490_v58  }
 0x641 PF: > { %s15_s15 = sadd.s32 1, %s12172_s15  }
 0x642   : > { %p12_p4 = scmp.ge.s32.totalorder %s15_s15, 4  }
 0x644   :  { %14 = sbr.rel (!%p12_p4) target bundleno = 1 (0x1), region = 96 }

// kernel: seblock_forward.4
= control target key start
LH: loop header
LB: loop body
LE: loop exit
PB: predicated region body
PF: predicated region fallthrough
CT: control target
= control target key end

     0   :  { %s11107_s12 = smov 0   ;;  %s14007_s0 = inlined_call_operand.vmem [shape: bf16[2,18,22,128], index: 0, kind: input, shape index: {}]   ;;  %s14008_s1 = inlined_call_operand.vmem [shape: bf16[21,128,128], index: 1, kind: input, shape index: {}]   ;;  %s14009_s2 = inlined_call_operand.vmem [shape: f32[8,128], index: 2, kind: input, shape index: {}]   ;;  %s14010_s3 = inlined_call_operand.vmem [shape: bf16[2,16,16,128], index: 3, kind: output, shape index: {}]  }
   0x1 LB: > { %s7795_s13 = sadd.s32 4294967295, %s11085_s12   ;;  %p7799_p0 = scmp.ge.s32.totalorder %s11085_s12, 1  ;;  %s11085_s12 = sphi %s11107_s12, %s13_s12  }
   0x2   : > { %p137_p1 = scmp.lt.s32.totalorder %s11085_s12, 3 }
   0x4   : > { %p138_p2 = pnand %p7799_p0, %p137_p1 }
   0x6   : > { %141 = sbr.rel (%p138_p2) target bundleno = 977 (0x3d1), region = 32 }
   0xd   : > { %v10813_v0 = vld [vmem:[%s14008_s1 + $0x40] sm:$0xff]   ;;  %p161_p3 = scmp.lt.s32.totalorder %s7795_s13, 1  ;;  %v10815_v2 = vld [vmem:[%s14008_s1 + $0x48] sm:$0xff]   ;;  %v10817_v4 = vld [vmem:[%s14008_s1 + $0x50] sm:$0xff]   ;;  %vm242_vm0 = vsmask.f32 3328 }
   0xe   : > { %v10814_v1 = vld [vmem:[%s14008_s1 + $0x280] sm:$0xff]   ;;  %9140 = vmatprep.subr.bf16.mxu1 %v10813_v0  ;;  %v10816_v3 = vld [vmem:[%s14008_s1 + $0x288] sm:$0xff]   ;;  %v10818_v5 = vld [vmem:[%s14008_s1 + $0x290] sm:$0xff]   ;;  %vm243_vm1 = vsmask.f32 7440  ;;  %v14355_v35 = vmov 0 }
   0xf   : > { %9620 = vmatprep.subr.bf16.mxu0 %v10814_v1  ;;  %9141 = vmatpush3.bf16.msra.mxu1 %v10813_v0  ;;  %s14852_s13 = smov (!%p161_p3, %s7795_s13), 1  ;;  %v10819_v6 = vld [vmem:[%s14008_s1 + $0x58] sm:$0xff]   ;;  %v10821_v8 = vld [vmem:[%s14008_s1 + $0x60] sm:$0xff]   ;;  %v10823_v10 = vld [vmem:[%s14008_s1 + $0x68] sm:$0xff]   ;;  %vm1677_vm3 = vsmask.f32 2304 }
  0x10   : > { %9621 = vmatpush3.bf16.msra.mxu0 %v10814_v1  ;;  %9142 = vmatprep.subr.bf16.mxu1 %v10815_v2  ;;  %v10820_v7 = vld [vmem:[%s14008_s1 + $0x298] sm:$0xff]   ;;  %s10804_s30 = smul.u32 216, %s14852_s13  ;;  %v10822_v9 = vld [vmem:[%s14008_s1 + $0x2a0] sm:$0xff]   ;;  %v10824_v11 = vld [vmem:[%s14008_s1 + $0x2a8] sm:$0xff]   ;;  %vm1678_vm4 = vsmask.f32 6416 }
  0x11   : > { %9622 = vmatprep.subr.bf16.mxu0 %v10816_v3  ;;  %v10825_v17 = vld [vmem:[%s14008_s1 + $0x70] sm:$0xff]   ;;  %vm11206_vm2 = vmor %vm242_vm0, %vm243_vm1  ;;  %v10827_v38 = vld [vmem:[%s14008_s1 + $0x78] sm:$0xff]   ;;  %v14358_v55 = vmov 0  ;;  %vm2242_vm6 = vcmask 1041408   ;;  %vm2243_vm7 = vcmask 1045508   ;;  %vm1240_vm12 = vcmask 1042432  }
  0x12   : > { %s11151_s10 = scalar_lea.vmem %s14007_s0, %s10804_s30  ;;  %v10826_v30 = vld [vmem:[%s14008_s1 + $0x2b0] sm:$0xff]   ;;  %v14356_v35 = vsel %vm11206_vm2, 4294967295, %v14355_v35  ;;  %v10828_v39 = vld [vmem:[%s14008_s1 + $0x2b8] sm:$0xff]   ;;  %vm11239_vm5 = vmor %vm1677_vm3, %vm1678_vm4  ;;  %vm2679_vm9 = vsmask.f32 1280  ;;  %vm1241_vm13 = vcmask 1046532  }
  0x13   : > { %9143 = vmatpush3.bf16.msra.mxu1 %v10815_v2  ;;  %v172_v12 = vld [vmem:[%s11151_s10] sm:$0xf]  ;;  %v173_v13 = vld [vmem:[%s11151_s10 + $0x4] sm:$0xf]  ;;  %v174_v14 = vld [vmem:[%s11151_s10 + $0x8] sm:$0x7] }
  0x14   : > { %9623 = vmatpush3.bf16.msra.mxu0 %v10816_v3  ;;  %9144 = vmatprep.subr.bf16.mxu1 %v10817_v4  ;;  %v11162_v15 = vshrl.u32 %v172_v12, 16  ;;  %v11164_v16 = vshll.u32 %v172_v12, 16  ;;  %v11169_v18 = vshll.u32 %v173_v13, 16  ;;  %v11171_v19 = vshrl.u32 %v173_v13, 16  ;;  %v11176_v21 = vld [vmem:[%s11151_s10 + $0xc] sm:$0xf]  ;;  %vm11668_vm8 = vmor %vm2242_vm6, %vm2243_vm7 }
  0x15   : > { %9624 = vmatprep.subr.bf16.mxu0 %v10818_v5  ;;  %v11173_v20 = vshll.u32 %v174_v14, 16  ;;  %v11181_v24 = vld [vmem:[%s11151_s10 + $0x10] sm:$0xf]  ;;  %v11184_v25 = vld [vmem:[%s11151_s10 + $0x14] sm:$0x7]  ;;  %v11190_v29 = vshrl.u32 %v11176_v21, 16  ;;  %vm12384_vm14 = vmor %vm1240_vm12, %vm1241_vm13 }
  0x16   : > { %14350 = vst [vmem:[#allocation2_spill] sm:$0xff] %v11162_v15  ;;  %14351 = vst [vmem:[#allocation3_spill] sm:$0xff] %v11164_v16  ;;  %v248_v22 = vrot.slane %v11162_v15, 4  ;;  %v251_v23 = vrot.slane %v11164_v16, 5  ;;  %v257_v26 = vrot.slane %v11169_v18, 5  ;;  %v261_v27 = vrot.slane %v11171_v19, 4 }
  0x17   : > { %9145 = vmatpush3.bf16.msra.mxu1 %v10817_v4  ;;  %14352 = vst [vmem:[#allocation4_spill] sm:$0xff] %v11169_v18  ;;  %14353 = vst [vmem:[#allocation5_spill] sm:$0xff] %v11171_v19  ;;  %v267_v28 = vrot.slane %v11173_v20, 5  ;;  %v11196_v32 = vshll.u32 %v11176_v21, 16  ;;  %v11199_v33 = vshll.u32 %v11181_v24, 16  ;;  %v11202_v34 = vshrl.u32 %v11181_v24, 16 }
  0x18   : > { %9625 = vmatpush3.bf16.msra.mxu0 %v10818_v5  ;;  %9146 = vmatprep.subr.bf16.mxu1 %v10819_v6  ;;  %14354 = vst [vmem:[#allocation6_spill] sm:$0xff] %v11173_v20  ;;  %v252_v31 = vor.u32 %v251_v23, %v248_v22  ;;  %14357 = vst [vmem:[#allocation7_spill] sm:$0xff] %v14356_v35  ;;  %v262_v36 = vor.u32 %v261_v27, %v257_v26  ;;  %v11211_v37 = vshll.u32 %v11184_v25, 16  ;;  %v11226_v48 = vld [vmem:[%s11151_s10 + $0x18] sm:$0xf]  ;;  %v10829_v3 = vld [vmem:[%s14008_s1] sm:$0xff]  }
  0x19   : > { %9626 = vmatprep.subr.bf16.mxu0 %v10820_v7  ;;  %v1695_v41 = vrot.slane %v11190_v29, 5  ;;  %v1696_v42 = vrot.slane %v11196_v32, 6  ;;  %v1699_v43 = vrot.slane %v11202_v34, 5  ;;  %v1700_v45 = vrot.slane %v11199_v33, 6  ;;  %v11233_v53 = vld [vmem:[%s11151_s10 + $0x1c] sm:$0xf] }
  0x1a   : > { %v253_v40 = vrot.slane %v252_v31, 4  ;;  %v263_v44 = vrot.slane %v262_v36, 4  ;;  %v14012_v46 = vshrl.u32 %v11184_v25, 16  ;;  %v1707_v47 = vrot.slane %v11211_v37, 6  ;;  %v11248_v63 = vld [vmem:[%s11151_s10 + $0x20] sm:$0x7] }
  0x1b   : > { %9147 = vmatpush3.bf16.msra.mxu1 %v10819_v6  ;;  %v1697_v50 = vor.u32 %v1696_v42, %v1695_v41  ;;  %v272_v51 = vrot.slane %v11190_v29, 4  ;;  %v275_v52 = vrot.slane %v11196_v32, 5  ;;  %v14359_v55 = vsel %vm11239_vm5, 4294967295, %v14358_v55  ;;  %v11288_v31 = vld [vmem:[%s11151_s10 + $0x24] sm:$0xf]  ;;  %s8508_s14 = sshll.u32 %s14852_s13, 7 }
  0x1c   : > { %9627 = vmatpush3.bf16.msra.mxu0 %v10820_v7  ;;  %9148 = vmatprep.subr.bf16.mxu1 %v10821_v8  ;;  %v258_v49 = vsel %vm11206_vm2, %v253_v40, %v257_v26  ;;  %v268_v54 = vsel %vm11206_vm2, %v263_v44, %v267_v28  ;;  %14360 = vst [vmem:[#allocation8_spill] sm:$0xff] %v14359_v55  ;;  %v1706_v57 = vrot.slane %v14012_v46, 5  ;;  %v281_v58 = vrot.slane %v11199_v33, 5  ;;  %v11298_v41 = vld [vmem:[%s11151_s10 + $0x28] sm:$0xf]  ;;  %s13896_s17 = scalar_lea.vmem %s14010_s3, %s8508_s14 }
  0x1d   : > { %9628 = vmatprep.subr.bf16.mxu0 %v10822_v9  ;;  %v1701_v56 = vor.u32 %v1700_v45, %v1699_v43  ;;  %v7819_v59 = vcombine.low %v258_v49, %v268_v54  ;;  %v1698_v60 = vrot.slane %v1697_v50, 4  ;;  %v276_v61 = vor.u32 %v275_v52, %v272_v51  ;;  %v11479_v15 = vld [vmem:[%s11151_s10 + $0x48] sm:$0xf] }
  0x1e   : > { %v285_v62 = vrot.slane %v11202_v34, 4  ;;  %v1708_v1 = vor.u32 %v1707_v47, %v1706_v57  ;;  %v291_v2 = vrot.slane %v11211_v37, 5  ;;  %v11255_v4 = vshrl.u32 %v11226_v48, 16  ;;  %v10832_v47 = vld [vmem:[%s14008_s1 + $0x8] sm:$0xff]  }
  0x1f   : > { %9149 = vmatpush3.bf16.msra.mxu1 %v10821_v8  ;;  %v1703_v0 = vrot.slane %v1701_v56, 4  ;;  %9156 = vmatprep.mubr.bf16.mxu1 %v7819_v59  ;;  %v1702_v5 = vsel %vm11239_vm5, %v1698_v60, %v1701_v56  ;;  %v277_v6 = vrot.slane %v276_v61, 4  ;;  %v11260_v8 = vshll.u32 %v11226_v48, 16  ;;  %v11312_v59 = vld [vmem:[%s11151_s10 + $0x2c] sm:$0x7] }
  0x20   : > { %9629 = vmatpush3.bf16.msra.mxu0 %v10822_v9  ;;  %9150 = vmatprep.subr.bf16.mxu1 %v10823_v10  ;;  %v286_v7 = vor.u32 %v285_v62, %v281_v58  ;;  %v11265_v9 = vld [vmem:[%s14008_s1 + $0x2c0] sm:$0xff]   ;;  %v11273_v12 = vshrl.u32 %v11233_v53, 16  ;;  %v11276_v13 = vshll.u32 %v11248_v63, 16  ;;  %v1710_v23 = vrot.slane %v11255_v4, 5  ;;  %14364 = vst [vmem:[#allocation12_spill] sm:$0xff] %v11312_v59 }
  0x21   : > { %9630 = vmatprep.subr.bf16.mxu0 %v10824_v11  ;;  %v1711_v26 = vrot.slane %v11260_v8, 6  ;;  %v299_v40 = vrot.slane %v11260_v8, 5  ;;  %v11315_v62 = vshrl.u32 %v11288_v31, 16  ;;  %v2261_v55 = vrot.slane %v11233_v53, 6 }
  0x22   : > { %v287_v22 = vrot.slane %v286_v7, 4  ;;  %v1714_v27 = vrot.slane %v11273_v12, 5  ;;  %v309_v52 = vrot.slane %v11273_v12, 4  ;;  %v10835_v7 = vld [vmem:[%s14008_s1 + $0x10] sm:$0xff]   ;;  %vm2680_vm10 = vsmask.f32 5392 }
  0x23   : > { %9151 = vmatpush3.bf16.msra.mxu1 %v10823_v10  ;;  %v1709_v10 = vsel %vm11239_vm5, %v1703_v0, %v1708_v1  ;;  %v1712_v43 = vor.u32 %v1711_v26, %v1710_v23  ;;  %v11318_v0 = vshll.u32 %v11288_v31, 16  ;;  %v11341_v23 = vshll.u32 %v11312_v59, 16  ;;  %v11344_v26 = vld [vmem:[%s11151_s10 + $0x30] sm:$0xf]  ;;  %vm12222_vm11 = vmor %vm2679_vm9, %vm2680_vm10 }
  0x24   : > { %9631 = vmatpush3.bf16.msra.mxu0 %v10824_v11  ;;  %9152 = vmatprep.subr.bf16.mxu1 %v10825_v17  ;;  %v11270_v11 = vshll.u32 %v11233_v53, 16  ;;  %v11278_v14 = vcombine.low %v1702_v5, %v1709_v10  ;;  %v292_v36 = vsel %vm11206_vm2, %v287_v22, %v291_v2  ;;  %v11328_v5 = vshll.u32 %v11298_v41, 16 }
  0x25   : > { %9632 = vmatprep.subr.bf16.mxu0 %v10826_v30  ;;  %v1713_v54 = vrot.slane %v1712_v43, 4  ;;  %14368 = vst [vmem:[#allocation16_spill] sm:$0xff] %v11341_v23  ;;  %v1737_v43 = vrot.slane %v11341_v23, 6  ;;  %vm3212_vm15 = vcmask 1040384   ;;  %vm3213_vm0 = vcmask 1044484  }
  0x26   : > { %14361 = vst [vmem:[#allocation9_spill] sm:$0xff] %v11278_v14  ;;  %v1715_v28 = vrot.slane %v11270_v11, 6  ;;  %9636 = vmatprep.mubr.bf16.mxu0 %v11278_v14  ;;  %v305_v51 = vrot.slane %v11270_v11, 5  ;;  %14365 = vst [vmem:[#allocation13_spill] sm:$0xff] %v11328_v5 }
  0x27   : > { %9153 = vmatpush3.bf16.msra.mxu1 %v10825_v17  ;;  %v282_v17 = vsel %vm11206_vm2, %v277_v6, %v281_v58  ;;  %v315_v58 = vrot.slane %v11276_v13, 5  ;;  %v11331_v6 = vshrl.u32 %v11298_v41, 16  ;;  %vm12720_vm1 = vmor %vm3212_vm15, %vm3213_vm0 }
  0x28   : > { %9633 = vmatpush3.bf16.msra.mxu0 %v10826_v30  ;;  %9154 = vmatprep.subr.bf16.mxu1 %v10827_v38  ;;  %v1719_v30 = vshrl.u32 %v11248_v63, 16  ;;  %v11300_v42 = vcombine.low %v282_v17, %v292_v36  ;;  %v1716_v44 = vor.u32 %v1715_v28, %v1714_v27  ;;  %v310_v61 = vor.u32 %v309_v52, %v305_v51 }
  0x29   : > { %9634 = vmatprep.subr.bf16.mxu0 %v10828_v39  ;;  %14366 = vst [vmem:[#allocation14_spill] sm:$0xff] %v11331_v6  ;;  %v1725_v27 = vrot.slane %v11315_v62, 5  ;;  %v1726_v28 = vrot.slane %v11318_v0, 6  ;;  %v1730_v36 = vrot.slane %v11328_v5, 6 }
  0x2a   : > { %14362 = vst [vmem:[#allocation10_spill] sm:$0xff] %v11300_v42  ;;  %v1721_v45 = vrot.slane %v1719_v30, 5  ;;  %v11305_v49 = vrot.slane %v1719_v30, 6  ;;  %v1718_v56 = vrot.slane %v1716_v44, 4  ;;  %v1717_v1 = vsel %vm11239_vm5, %v1713_v54, %v1716_v44 }
  0x2b   : > { %9155 = vmatpush3.bf16.msra.mxu1 %v10827_v38  ;;  %v1722_v38 = vrot.slane %v11276_v13, 6  ;;  %v311_v22 = vrot.slane %v310_v61, 4  ;;  %v1729_v30 = vrot.slane %v11331_v6, 5  ;;  %v320_v44 = vrot.slane %v11315_v62, 4 }
  0x2c   : > { %9635 = vmatpush3.bf16.msra.mxu0 %v10828_v39  ;;  %9188 = vmatprep.subr.bf16.mxu1 %v10829_v3  ;;  %v296_v39 = vrot.slane %v11255_v4, 4  ;;  %14363 = vst [vmem:[#allocation11_spill] sm:$0xff] %v11305_v49  ;;  %v1727_v52 = vor.u32 %v1726_v28, %v1725_v27  ;;  %v11382_v28 = vshll.u32 %v11344_v26, 16 }
  0x2d   : > { %9668 = vmatprep.subr.bf16.mxu0 %v11265_v9  ;;  %v1723_v57 = vor.u32 %v1722_v38, %v1721_v45  ;;  %v11351_v38 = vld [vmem:[%s11151_s10 + $0x34] sm:$0xf]  ;;  %v11360_v45 = vld [vmem:[%s11151_s10 + $0x38] sm:$0x7]  ;;  %v1731_v54 = vor.u32 %v1730_v36, %v1729_v30 }
  0x2e   : > { %v300_v50 = vor.u32 %v299_v40, %v296_v39  ;;  %9157 = vmatmul.mubr.bf16.vlgmr.msra.gmra.mrb[0].mxu1 %v11300_v42  ;;  %v316_v39 = vsel %vm11206_vm2, %v311_v22, %v315_v58  ;;  %v14011_v40 = vshrl.u32 %v11312_v59, 16  ;;  %14369 = vst [vmem:[#allocation17_spill] sm:$0xff] %v11360_v45  ;;  %v1728_v61 = vrot.slane %v1727_v52, 4  ;;  %14372 = vst [vmem:[#allocation20_spill] sm:$0xff] %v11382_v28 }
  0x2f   : > { %9189 = vmatpush3.bf16.msra.mxu1 %v10829_v3  ;;  %v1724_v2 = vsel %vm11239_vm5, %v1718_v56, %v1723_v57  ;;  %v10831_v3 = vld [vmem:[%s14008_s1 + $0x2c8] sm:$0xff]   ;;  %v323_v56 = vrot.slane %v11318_v0, 5  ;;  %v10838_v57 = vld [vmem:[%s14008_s1 + $0x18] sm:$0xff]   ;;  %v11385_v30 = vshll.u32 %v11351_v38, 16  ;;  %v11393_v52 = vshll.u32 %v11360_v45, 16 }
  0x30   : > { %v301_v60 = vrot.slane %v300_v50, 4  ;;  %9190 = vmatprep.subr.bf16.mxu1 %v10832_v47  ;;  %v11336_v10 = vcombine.low %v1717_v1, %v1724_v2  ;;  %v10833_v50 = vld [vmem:[%s14008_s1 + $0x2d0] sm:$0xff]   ;;  %v1736_v58 = vrot.slane %v14011_v40, 5  ;;  %v1733_v1 = vrot.slane %v1731_v54, 4 }
  0x31   : > { %v324_v2 = vor.u32 %v323_v56, %v320_v44  ;;  %14373 = vst [vmem:[#allocation21_spill] sm:$0xff] %v11385_v30  ;;  %v1732_v36 = vsel %vm11239_vm5, %v1728_v61, %v1731_v54  ;;  %v11390_v44 = vshrl.u32 %v11351_v38, 16  ;;  %14375 = vst [vmem:[#allocation23_spill] sm:$0xff] %v11393_v52  ;;  %v1741_v56 = vrot.slane %v11382_v28, 6 }
  0x32   : > { %14367 = vst [vmem:[#allocation15_spill] sm:$0xff] %v11336_v10  ;;  %v306_v17 = vsel %vm11206_vm2, %v301_v60, %v305_v51  ;;  %9637 = vmatmul.mubr.bf16.vlgmr.msra.gmra.mrb[0].mxu0 %v11336_v10  ;;  %v329_v60 = vrot.slane %v11328_v5, 5  ;;  %v1738_v22 = vor.u32 %v1737_v43, %v1736_v58  ;;  %v10834_v43 = vld [vmem:[%s14008_s1 + $0x2d8] sm:$0xff]   ;;  %v10841_v58 = vld [vmem:[%s14008_s1 + $0x20] sm:$0xff]   ;;  %v14019_v46 = vshrl.u32 %v11360_v45, 16 }
  0x33   : > { %9191 = vmatpush3.bf16.msra.mxu1 %v10832_v47  ;;  %9669 = vmatpush3.bf16.msra.mxu0 %v11265_v9  ;;  %v11366_v51 = vcombine.low %v306_v17, %v316_v39  ;;  %v333_v47 = vrot.slane %v11331_v6, 4  ;;  %v339_v9 = vrot.slane %v11341_v23, 5  ;;  %v11379_v17 = vshrl.u32 %v11344_v26, 16  ;;  %14374 = vst [vmem:[#allocation22_spill] sm:$0xff] %v11390_v44 }
  0x34   : > { %9192 = vmatprep.subr.bf16.mxu1 %v10835_v7  ;;  %9670 = vmatprep.subr.bf16.mxu0 %v10831_v3  ;;  %v325_v39 = vrot.slane %v324_v2, 4  ;;  %v1744_v2 = vrot.slane %v11390_v44, 5  ;;  %v1752_v42 = vrot.slane %v11393_v52, 6  ;;  %v1751_v10 = vrot.slane %v14019_v46, 5 }
  0x35   : > { %14370 = vst [vmem:[#allocation18_spill] sm:$0xff] %v11366_v51  ;;  %9160 = vmatprep.mubr.bf16.mxu1 %v11366_v51  ;;  %14371 = vst [vmem:[#allocation19_spill] sm:$0xff] %v11379_v17  ;;  %v334_v27 = vor.u32 %v333_v47, %v329_v60  ;;  %v1740_v54 = vrot.slane %v11379_v17, 5  ;;  %v11419_v51 = vld [vmem:[%s11151_s10 + $0x40] sm:$0xf]  ;;  %v357_v14 = vrot.slane %v11390_v44, 4 }
  0x36   : > { %v330_v61 = vsel %vm11206_vm2, %v325_v39, %v329_v60  ;;  %v10836_v60 = vld [vmem:[%s14008_s1 + $0x2e0] sm:$0xff]   ;;  %v10843_v39 = vld [vmem:[%s14008_s1 + $0x28] sm:$0xff]  }
  0x37   : > { %9193 = vmatpush3.bf16.msra.mxu1 %v10835_v7  ;;  %9671 = vmatpush3.bf16.msra.mxu0 %v10831_v3  ;;  %v1739_v3 = vsel %vm11239_vm5, %v1733_v1, %v1738_v22  ;;  %v335_v7 = vrot.slane %v334_v27, 4  ;;  %v1745_v1 = vrot.slane %v11385_v30, 6  ;;  %v11412_v22 = vld [vmem:[%s11151_s10 + $0x3c] sm:$0xf]  ;;  %v1742_v40 = vor.u32 %v1741_v56, %v1740_v54 }
  0x38   : > { %9194 = vmatprep.subr.bf16.mxu1 %v10838_v57  ;;  %9672 = vmatprep.subr.bf16.mxu0 %v10833_v50  ;;  %v11405_v47 = vcombine.low %v1732_v36, %v1739_v3  ;;  %v11422_v36 = vld [vmem:[%s11151_s10 + $0x44] sm:$0x7]  ;;  %v347_v54 = vrot.slane %v11382_v28, 5  ;;  %v11552_v28 = vld [vmem:[%s11151_s10 + $0x58] sm:$0xf] }
  0x39   : > { %v340_v27 = vsel %vm11206_vm2, %v335_v7, %v339_v9  ;;  %14377 = vst [vmem:[#allocation25_spill] sm:$0xff] %v11422_v36  ;;  %v1746_v3 = vor.u32 %v1745_v1, %v1744_v2  ;;  %v344_v7 = vrot.slane %v11379_v17, 4  ;;  %v1743_v56 = vrot.slane %v1742_v40, 4 }
  0x3a   : > { %14376 = vst [vmem:[#allocation24_spill] sm:$0xff] %v11405_v47  ;;  %9640 = vmatprep.mubr.bf16.mxu0 %v11405_v47  ;;  %v11431_v9 = vcombine.low %v330_v61, %v340_v27  ;;  %v11442_v2 = vshrl.u32 %v11412_v22, 16  ;;  %v1753_v1 = vor.u32 %v1752_v42, %v1751_v10  ;;  %v11447_v47 = vshll.u32 %v11412_v22, 16 }
  0x3b   : > { %9195 = vmatpush3.bf16.msra.mxu1 %v10838_v57  ;;  %9673 = vmatpush3.bf16.msra.mxu0 %v10833_v50  ;;  %v353_v57 = vrot.slane %v11385_v30, 5  ;;  %v1748_v61 = vrot.slane %v1746_v3, 4  ;;  %v348_v27 = vor.u32 %v347_v54, %v344_v7  ;;  %v363_v50 = vrot.slane %v11393_v52, 5  ;;  %v11487_v52 = vld [vmem:[%s11151_s10 + $0x4c] sm:$0xf] }
  0x3c   : > { %14378 = vst [vmem:[#allocation26_spill] sm:$0xff] %v11431_v9  ;;  %9674 = vmatprep.subr.bf16.mxu0 %v10834_v43  ;;  %9196 = vmatprep.subr.bf16.mxu1 %v10841_v58  ;;  %14379 = vst [vmem:[#allocation27_spill] sm:$0xff] %v11442_v2  ;;  %v1747_v40 = vsel %vm11239_vm5, %v1743_v56, %v1746_v3  ;;  %v11453_v7 = vshrl.u32 %v11419_v51, 16  ;;  %v11456_v54 = vshll.u32 %v11422_v36, 16  ;;  %v10837_v3 = vld [vmem:[%s14008_s1 + $0x2e8] sm:$0xff]   ;;  %v14035_v19 = vshrl.u32 %v11422_v36, 16 }
  0x3d   : > { %9161 = vmatmul.mubr.bf16.gmra.mrb[4].mxu1 %v11431_v9  ;;  %v358_v46 = vor.u32 %v357_v14, %v353_v57  ;;  %14380 = vst [vmem:[#allocation28_spill] sm:$0xff] %v11447_v47  ;;  %v349_v20 = vrot.slane %v348_v27, 4  ;;  %v11450_v9 = vshll.u32 %v11419_v51, 16  ;;  %v10845_v14 = vld [vmem:[%s14008_s1 + $0x30] sm:$0xff]   ;;  %v1754_v42 = vsel %vm11239_vm5, %v1748_v61, %v1753_v1 }
  0x3e   : > { %14382 = vst [vmem:[#allocation30_spill] sm:$0xff] %v11453_v7  ;;  %14383 = vst [vmem:[#allocation31_spill] sm:$0xff] %v11456_v54  ;;  %v11468_v56 = vcombine.low %v1747_v40, %v1754_v42  ;;  %v1759_v18 = vrot.slane %v11453_v7, 5  ;;  %v1767_v16 = vrot.slane %v11456_v54, 6  ;;  %v371_v42 = vrot.slane %v11447_v47, 5 }
  0x3f   : > { %9197 = vmatpush3.bf16.msra.mxu1 %v10841_v58  ;;  %9675 = vmatpush3.bf16.msra.mxu0 %v10834_v43  ;;  %14381 = vst [vmem:[#allocation29_spill] sm:$0xff] %v11450_v9  ;;  %v359_v10 = vrot.slane %v358_v46, 4  ;;  %v1755_v43 = vrot.slane %v11442_v2, 5  ;;  %v1756_v58 = vrot.slane %v11447_v47, 6  ;;  %v354_v27 = vsel %vm11206_vm2, %v349_v20, %v353_v57 }
  0x40   : > { %9198 = vmatprep.subr.bf16.mxu1 %v10843_v39  ;;  %9676 = vmatprep.subr.bf16.mxu0 %v10836_v60  ;;  %14384 = vst [vmem:[#allocation32_spill] sm:$0xff] %v11468_v56  ;;  %v1760_v61 = vrot.slane %v11450_v9, 6  ;;  %v368_v57 = vrot.slane %v11442_v2, 4 }
  0x41   : > { %v364_v46 = vsel %vm11206_vm2, %v359_v10, %v363_v50  ;;  %v1757_v1 = vor.u32 %v1756_v58, %v1755_v43  ;;  %9641 = vmatmul.mubr.bf16.gmra.mrb[4].mxu0 %v11468_v56  ;;  %v1766_v10 = vrot.slane %v14035_v19, 5  ;;  %v377_v43 = vrot.slane %v11450_v9, 5  ;;  %v11494_v58 = vld [vmem:[%s11151_s10 + $0x50] sm:$0x7]  ;;  %v10847_v19 = vld [vmem:[%s14008_s1 + $0x38] sm:$0xff]  }
  0x42   : > { %v11482_v40 = vcombine.low %v354_v27, %v364_v46  ;;  %v1761_v20 = vor.u32 %v1760_v61, %v1759_v18  ;;  %14386 = vst [vmem:[#allocation34_spill] sm:$0xff] %v11494_v58  ;;  %v372_v27 = vor.u32 %v371_v42, %v368_v57  ;;  %v387_v61 = vrot.slane %v11456_v54, 5 }
  0x43   : > { %9199 = vmatpush3.bf16.msra.mxu1 %v10843_v39  ;;  %v1758_v50 = vrot.slane %v1757_v1, 4  ;;  %v381_v39 = vrot.slane %v11453_v7, 4  ;;  %9677 = vmatpush3.bf16.msra.mxu0 %v10836_v60  ;;  %v11499_v46 = vshrl.u32 %v11479_v15, 16  ;;  %v10839_v1 = vld [vmem:[%s14008_s1 + $0x2f0] sm:$0xff]   ;;  %v11510_v57 = vshll.u32 %v11479_v15, 16 }
  0x44   : > { %14385 = vst [vmem:[#allocation33_spill] sm:$0xff] %v11482_v40  ;;  %9200 = vmatprep.subr.bf16.mxu1 %v10845_v14  ;;  %9164 = vmatprep.mubr.bf16.mxu1 %v11482_v40  ;;  %v1763_v18 = vrot.slane %v1761_v20, 4  ;;  %v1768_v40 = vor.u32 %v1767_v16, %v1766_v10  ;;  %v373_v42 = vrot.slane %v372_v27, 4  ;;  %v11513_v54 = vshll.u32 %v11487_v52, 16  ;;  %v11528_v10 = vld [vmem:[%s14008_s1 + $0x80] sm:$0xff]  }
  0x45   : > { %14387 = vst [vmem:[#allocation35_spill] sm:$0xff] %v11499_v46  ;;  %9678 = vmatprep.subr.bf16.mxu0 %v10837_v3  ;;  %v1762_v60 = vsel %vm11239_vm5, %v1758_v50, %v1761_v20  ;;  %v382_v56 = vor.u32 %v381_v39, %v377_v43  ;;  %14388 = vst [vmem:[#allocation36_spill] sm:$0xff] %v11510_v57  ;;  %v11516_v9 = vshrl.u32 %v11487_v52, 16  ;;  %v11519_v7 = vshll.u32 %v11494_v58, 16 }
  0x46   : > { %14389 = vst [vmem:[#allocation37_spill] sm:$0xff] %v11513_v54  ;;  %v1769_v20 = vsel %vm11239_vm5, %v1763_v18, %v1768_v40  ;;  %v1770_v50 = vrot.slane %v11499_v46, 5  ;;  %v378_v27 = vsel %vm11206_vm2, %v373_v42, %v377_v43  ;;  %v11544_v43 = vld [vmem:[%s11151_s10 + $0x54] sm:$0xf]  ;;  %v392_v30 = vrot.slane %v11499_v46, 4 }
  0x47   : > { %9201 = vmatpush3.bf16.msra.mxu1 %v10845_v14  ;;  %14390 = vst [vmem:[#allocation38_spill] sm:$0xff] %v11516_v9  ;;  %14391 = vst [vmem:[#allocation39_spill] sm:$0xff] %v11519_v7  ;;  %v383_v16 = vrot.slane %v382_v56, 4  ;;  %v1771_v14 = vrot.slane %v11510_v57, 6  ;;  %9679 = vmatpush3.bf16.msra.mxu0 %v10837_v3  ;;  %v11530_v39 = vcombine.low %v1762_v60, %v1769_v20  ;;  %v1774_v40 = vrot.slane %v11516_v9, 5  ;;  %v10840_v3 = vld [vmem:[%s14008_s1 + $0x2f8] sm:$0xff]  }
  0x48   : > { %9202 = vmatprep.subr.bf16.mxu1 %v10847_v19  ;;  %v1775_v56 = vrot.slane %v11513_v54, 6  ;;  %9680 = vmatprep.subr.bf16.mxu0 %v10839_v1  ;;  %v14048_v60 = vshrl.u32 %v11494_v58, 16  ;;  %v1782_v20 = vrot.slane %v11519_v7, 6  ;;  %v395_v44 = vrot.slane %v11510_v57, 5 }
  0x49   : > { %14392 = vst [vmem:[#allocation40_spill] sm:$0xff] %v11530_v39  ;;  %v388_v18 = vsel %vm11206_vm2, %v383_v16, %v387_v61  ;;  %v1772_v47 = vor.u32 %v1771_v14, %v1770_v50  ;;  %9644 = vmatprep.mubr.bf16.mxu0 %v11530_v39  ;;  %v401_v50 = vrot.slane %v11513_v54, 5  ;;  %v11560_v14 = vld [vmem:[%s11151_s10 + $0x5c] sm:$0x7] }
  0x4a   : > { %v11547_v42 = vcombine.low %v378_v27, %v388_v18  ;;  %v1776_v2 = vor.u32 %v1775_v56, %v1774_v40  ;;  %v1781_v16 = vrot.slane %v14048_v60, 5  ;;  %v396_v40 = vor.u32 %v395_v44, %v392_v30 }
  0x4b   : > { %9203 = vmatpush3.bf16.msra.mxu1 %v10847_v19  ;;  %v1773_v61 = vrot.slane %v1772_v47, 4  ;;  %v405_v19 = vrot.slane %v11516_v9, 4  ;;  %9681 = vmatpush3.bf16.msra.mxu0 %v10839_v1  ;;  %v411_v56 = vrot.slane %v11519_v7, 5  ;;  %v11565_v18 = vshrl.u32 %v11544_v43, 16  ;;  %v11570_v47 = vld [vmem:[%s14008_s1 + $0x300] sm:$0xff]  }
  0x4c   : > { %14393 = vst [vmem:[#allocation41_spill] sm:$0xff] %v11547_v42  ;;  %9236 = vmatprep.subr.bf16.mxu1 %v11528_v10  ;;  %9165 = vmatmul.mubr.bf16.gmra.mrb[8].mxu1 %v11547_v42  ;;  %v1778_v27 = vrot.slane %v1776_v2, 4  ;;  %v1783_v39 = vor.u32 %v1782_v20, %v1781_v16  ;;  %v11575_v42 = vshll.u32 %v11544_v43, 16  ;;  %v397_v30 = vrot.slane %v396_v40, 4 }
  0x4d   : > { %14394 = vst [vmem:[#allocation42_spill] sm:$0xff] %v11565_v18  ;;  %9682 = vmatprep.subr.bf16.mxu0 %v10840_v3  ;;  %v1777_v60 = vsel %vm11239_vm5, %v1773_v61, %v1776_v2  ;;  %v406_v1 = vor.u32 %v405_v19, %v401_v50  ;;  %v11578_v44 = vshll.u32 %v11552_v28, 16  ;;  %v11581_v7 = vshrl.u32 %v11552_v28, 16 }
  0x4e   : > { %14395 = vst [vmem:[#allocation43_spill] sm:$0xff] %v11575_v42  ;;  %v11584_v54 = vshll.u32 %v11560_v14, 16  ;;  %v1784_v2 = vsel %vm11239_vm5, %v1778_v27, %v1783_v39  ;;  %v1785_v61 = vrot.slane %v11565_v18, 5  ;;  %v1786_v16 = vrot.slane %v11575_v42, 6 }
  0x4f   : > { %14396 = vst [vmem:[#allocation44_spill] sm:$0xff] %v11578_v44  ;;  %14397 = vst [vmem:[#allocation45_spill] sm:$0xff] %v11581_v7  ;;  %v407_v20 = vrot.slane %v406_v1, 4  ;;  %9683 = vmatpush3.bf16.msra.mxu0 %v10840_v3  ;;  %v11590_v19 = vcombine.low %v1777_v60, %v1784_v2  ;;  %v402_v40 = vsel %vm11206_vm2, %v397_v30, %v401_v50  ;;  %v1789_v9 = vrot.slane %v11581_v7, 5  ;;  %v11602_v60 = vld [vmem:[%s11151_s10 + $0x60] sm:$0xf] }
  0x50   : > { %14398 = vst [vmem:[#allocation46_spill] sm:$0xff] %v11584_v54  ;;  %v1790_v57 = vrot.slane %v11578_v44, 6  ;;  %9716 = vmatprep.subr.bf16.mxu0 %v11570_v47  ;;  %v1787_v27 = vor.u32 %v1786_v16, %v1785_v61  ;;  %v14063_v1 = vshrl.u32 %v11560_v14, 16  ;;  %v1797_v3 = vrot.slane %v11584_v54, 6  ;;  %v11605_v2 = vld [vmem:[%s11151_s10 + $0x64] sm:$0xf] }
  0x51   : > { %14399 = vst [vmem:[#allocation47_spill] sm:$0xff] %v11590_v19  ;;  %v412_v39 = vsel %vm11206_vm2, %v407_v20, %v411_v56  ;;  %9645 = vmatmul.mubr.bf16.gmra.mrb[8].mxu0 %v11590_v19  ;;  %v416_v46 = vrot.slane %v11565_v18, 4  ;;  %v419_v56 = vrot.slane %v11575_v42, 5  ;;  %v11613_v20 = vld [vmem:[%s11151_s10 + $0x68] sm:$0x7]  ;;  %v425_v17 = vrot.slane %v11578_v44, 5 }
  0x52   : > { %v11608_v50 = vcombine.low %v402_v40, %v412_v39  ;;  %v1791_v30 = vor.u32 %v1790_v57, %v1789_v9  ;;  %v1788_v61 = vrot.slane %v1787_v27, 4  ;;  %v1796_v16 = vrot.slane %v14063_v1, 5 }
  0x53   : > { %v429_v23 = vrot.slane %v11581_v7, 4  ;;  %v420_v40 = vor.u32 %v419_v56, %v416_v46  ;;  %v435_v9 = vrot.slane %v11584_v54, 5  ;;  %v11622_v57 = vshrl.u32 %v11602_v60, 16 }
  0x54   : > { %14400 = vst [vmem:[#allocation48_spill] sm:$0xff] %v11608_v50  ;;  %9168 = vmatprep.mubr.bf16.mxu1 %v11608_v50  ;;  %v1793_v19 = vrot.slane %v1791_v30, 4  ;;  %v1792_v39 = vsel %vm11239_vm5, %v1788_v61, %v1791_v30  ;;  %v1798_v27 = vor.u32 %v1797_v3, %v1796_v16  ;;  %v11627_v1 = vshll.u32 %v11602_v60, 16 }
  0x55   : > { %14401 = vst [vmem:[#allocation49_spill] sm:$0xff] %v11622_v57  ;;  %v430_v42 = vor.u32 %v429_v23, %v425_v17  ;;  %v421_v44 = vrot.slane %v420_v40, 4  ;;  %v11630_v7 = vshll.u32 %v11605_v2, 16  ;;  %v11633_v46 = vshrl.u32 %v11605_v2, 16 }
  0x56   : > { %14402 = vst [vmem:[#allocation50_spill] sm:$0xff] %v11627_v1  ;;  %v11636_v56 = vshll.u32 %v11613_v20, 16  ;;  %v1799_v50 = vsel %vm11239_vm5, %v1793_v19, %v1798_v27  ;;  %v1800_v23 = vrot.slane %v11622_v57, 5  ;;  %v1801_v3 = vrot.slane %v11627_v1, 6  ;;  %v11653_v27 = vld [vmem:[%s11151_s10 + $0x6c] sm:$0xf] }
  0x57   : > { %14403 = vst [vmem:[#allocation51_spill] sm:$0xff] %v11630_v7  ;;  %14404 = vst [vmem:[#allocation52_spill] sm:$0xff] %v11633_v46  ;;  %v431_v30 = vrot.slane %v430_v42, 4  ;;  %v11642_v61 = vcombine.low %v1792_v39, %v1799_v50  ;;  %v426_v16 = vsel %vm11206_vm2, %v421_v44, %v425_v17  ;;  %v1804_v40 = vrot.slane %v11633_v46, 5 }
  0x58   : > { %14405 = vst [vmem:[#allocation53_spill] sm:$0xff] %v11636_v56  ;;  %v1805_v54 = vrot.slane %v11630_v7, 6  ;;  %v1802_v5 = vor.u32 %v1801_v3, %v1800_v23  ;;  %v14072_v19 = vshrl.u32 %v11613_v20, 16  ;;  %v1812_v42 = vrot.slane %v11636_v56, 6 }
  0x59   : > { %14406 = vst [vmem:[#allocation54_spill] sm:$0xff] %v11642_v61  ;;  %v436_v18 = vsel %vm11206_vm2, %v431_v30, %v435_v9  ;;  %9648 = vmatprep.mubr.bf16.mxu0 %v11642_v61  ;;  %v440_v44 = vrot.slane %v11622_v57, 4  ;;  %v443_v39 = vrot.slane %v11627_v1, 5  ;;  %v449_v30 = vrot.slane %v11630_v7, 5  ;;  %v11700_v1 = vld [vmem:[%s11151_s10 + $0x78] sm:$0xf] }
  0x5a   : > { %v11656_v50 = vcombine.low %v426_v16, %v436_v18  ;;  %v1806_v17 = vor.u32 %v1805_v54, %v1804_v40  ;;  %v1803_v6 = vrot.slane %v1802_v5, 4  ;;  %v1811_v9 = vrot.slane %v14072_v19, 5  ;;  %v11674_v16 = vld [vmem:[%s11151_s10 + $0x70] sm:$0xf]  ;;  %v11820_v57 = vld [vmem:[%s11151_s10 + $0x94] sm:$0xf] }
  0x5b   : > { %v453_v23 = vrot.slane %v11633_v46, 4  ;;  %v444_v49 = vor.u32 %v443_v39, %v440_v44  ;;  %v459_v18 = vrot.slane %v11636_v56, 5  ;;  %v14408_v54 = vmov 0 }
  0x5c   : > { %14407 = vst [vmem:[#allocation55_spill] sm:$0xff] %v11656_v50  ;;  %9169 = vmatmul.mubr.bf16.gmra.mrb[12].mxu1 %v11656_v50  ;;  %v1808_v3 = vrot.slane %v1806_v17, 4  ;;  %v14409_v54 = vsel %vm11668_vm8, 4294967295, %v14408_v54  ;;  %v7964_v5 = vrot.slane %v11176_v21, 10  ;;  %v1807_v40 = vsel %vm11239_vm5, %v1803_v6, %v1806_v17  ;;  %v11691_v17 = vld [vmem:[%s11151_s10 + $0x74] sm:$0x7] }
  0x5d   : > { %14410 = vst [vmem:[#allocation56_spill] sm:$0xff] %v14409_v54  ;;  %v1813_v19 = vor.u32 %v1812_v42, %v1811_v9  ;;  %v454_v50 = vor.u32 %v453_v23, %v449_v30  ;;  %v2254_v44 = vrot.slane %v11181_v24, 6  ;;  %v445_v39 = vrot.slane %v444_v49, 4 }
  0x5e   : > { %v2257_v61 = vrot.slane %v11184_v25, 6  ;;  %v11681_v56 = vshrl.u32 %v11653_v27, 16  ;;  %v11684_v7 = vshll.u32 %v11653_v27, 16  ;;  %v11740_v53 = vshll.u32 %v11700_v1, 16 }
  0x5f   : > { %v1814_v21 = vsel %vm11239_vm5, %v1808_v3, %v1813_v19  ;;  %v455_v46 = vrot.slane %v454_v50, 4  ;;  %v2255_v6 = vsel %vm11668_vm8, %v7964_v5, %v2254_v44  ;;  %v2256_v42 = vrot.slane %v2254_v44, 4 }
  0x60   : > { %14411 = vst [vmem:[#allocation57_spill] sm:$0xff] %v11681_v56  ;;  %14412 = vst [vmem:[#allocation58_spill] sm:$0xff] %v11684_v7  ;;  %v11693_v24 = vcombine.low %v1807_v40, %v1814_v21  ;;  %v450_v49 = vsel %vm11206_vm2, %v445_v39, %v449_v30  ;;  %v464_v9 = vrot.slane %v11681_v56, 4  ;;  %v467_v23 = vrot.slane %v11684_v7, 5  ;;  %v11713_v40 = vld [vmem:[%s11151_s10 + $0x7c] sm:$0xf] }
  0x61   : > { %v460_v19 = vsel %vm11206_vm2, %v455_v46, %v459_v18  ;;  %v2258_v50 = vsel %vm11668_vm8, %v2256_v42, %v2257_v61  ;;  %v11707_v3 = vshll.u32 %v11674_v16, 16  ;;  %v11710_v5 = vshrl.u32 %v11674_v16, 16  ;;  %v11724_v61 = vld [vmem:[%s11151_s10 + $0x80] sm:$0x7]  ;;  %14420 = vst [vmem:[#allocation66_spill] sm:$0xff] %v11740_v53 }
  0x62   : > { %14413 = vst [vmem:[#allocation59_spill] sm:$0xff] %v11693_v24  ;;  %9649 = vmatmul.mubr.bf16.gmra.mrb[12].mxu0 %v11693_v24  ;;  %v11716_v30 = vcombine.low %v450_v49, %v460_v19  ;;  %v11718_v44 = vcombine.low %v2255_v6, %v2258_v50  ;;  %v468_v39 = vor.u32 %v467_v23, %v464_v9  ;;  %v11721_v46 = vshll.u32 %v11691_v17, 16  ;;  %v11769_v7 = vld [vmem:[%s11151_s10 + $0x8c] sm:$0x7] }
  0x63   : > { %14414 = vst [vmem:[#allocation60_spill] sm:$0xff] %v11707_v3  ;;  %14415 = vst [vmem:[#allocation61_spill] sm:$0xff] %v11710_v5  ;;  %v473_v18 = vrot.slane %v11707_v3, 5  ;;  %v477_v21 = vrot.slane %v11710_v5, 4  ;;  %v7965_v42 = vrot.slane %v11226_v48, 10  ;;  %v2264_v9 = vrot.slane %v11248_v63, 6 }
  0x64   : > { %14416 = vst [vmem:[#allocation62_spill] sm:$0xff] %v11716_v30  ;;  %14417 = vst [vmem:[#allocation63_spill] sm:$0xff] %v11718_v44  ;;  %9172 = vmatprep.mubr.bf16.mxu1 %v11716_v30  ;;  %9684 = vmatprep.mubr.bf16.mxu0 %v11718_v44  ;;  %v469_v6 = vrot.slane %v468_v39, 4  ;;  %v483_v49 = vrot.slane %v11721_v46, 5  ;;  %v11735_v23 = vshrl.u32 %v11700_v1, 16  ;;  %v2263_v48 = vrot.slane %v2261_v55, 4 }
  0x65   : > { %14418 = vst [vmem:[#allocation64_spill] sm:$0xff] %v11721_v46  ;;  %v478_v19 = vor.u32 %v477_v21, %v473_v18  ;;  %v2262_v50 = vsel %vm11668_vm8, %v7965_v42, %v2261_v55  ;;  %v11743_v30 = vld [vmem:[%s11151_s10 + $0x84] sm:$0xf]  ;;  %v11749_v63 = vshll.u32 %v11713_v40, 16  ;;  %v11752_v21 = vshrl.u32 %v11713_v40, 16 }
  0x66   : > { %14419 = vst [vmem:[#allocation65_spill] sm:$0xff] %v11735_v23  ;;  %v474_v39 = vsel %vm11206_vm2, %v469_v6, %v473_v18  ;;  %v488_v44 = vrot.slane %v11735_v23, 4  ;;  %v2265_v55 = vsel %vm11668_vm8, %v2263_v48, %v2264_v9  ;;  %v491_v42 = vrot.slane %v11740_v53, 5  ;;  %v11761_v3 = vld [vmem:[%s11151_s10 + $0x88] sm:$0xf] }
  0x67   : > { %14421 = vst [vmem:[#allocation67_spill] sm:$0xff] %v11749_v63  ;;  %14422 = vst [vmem:[#allocation68_spill] sm:$0xff] %v11752_v21  ;;  %v479_v24 = vrot.slane %v478_v19, 4  ;;  %v11758_v46 = vshll.u32 %v11724_v61, 16  ;;  %v11763_v18 = vcombine.low %v2262_v50, %v2265_v55  ;;  %v497_v6 = vrot.slane %v11749_v63, 5  ;;  %v10844_v9 = vld [vmem:[%s14008_s1 + $0x308] sm:$0xff]  }
  0x68   : > { %v501_v23 = vrot.slane %v11752_v21, 4  ;;  %v7966_v5 = vrot.slane %v11288_v31, 10  ;;  %v492_v48 = vor.u32 %v491_v42, %v488_v44  ;;  %v2268_v55 = vrot.slane %v11298_v41, 6  ;;  %v11792_v41 = vld [vmem:[%s11151_s10 + $0x90] sm:$0xf] }
  0x69   : > { %14423 = vst [vmem:[#allocation69_spill] sm:$0xff] %v11758_v46  ;;  %14424 = vst [vmem:[#allocation70_spill] sm:$0xff] %v11763_v18  ;;  %v484_v19 = vsel %vm11206_vm2, %v479_v24, %v483_v49  ;;  %v507_v50 = vrot.slane %v11758_v46, 5  ;;  %v2271_v21 = vrot.slane %v11312_v59, 6  ;;  %v11783_v53 = vshrl.u32 %v11743_v30, 16 }
  0x6a   : > { %v11778_v63 = vcombine.low %v474_v39, %v484_v19  ;;  %9685 = vmatmul.mubr.bf16.vlgmr.msra.gmra.mrb[0].mxu0 %v11763_v18  ;;  %v502_v31 = vor.u32 %v501_v23, %v497_v6  ;;  %v493_v56 = vrot.slane %v492_v48, 4  ;;  %v2269_v24 = vsel %vm11668_vm8, %v7966_v5, %v2268_v55  ;;  %v10846_v23 = vld [vmem:[%s14008_s1 + $0x310] sm:$0xff]   ;;  %v11980_v59 = vld [vmem:[%s11151_s10 + $0xbc] sm:$0x7] }
  0x6b   : > { %14426 = vst [vmem:[#allocation72_spill] sm:$0xff] %v11783_v53  ;;  %9717 = vmatpush3.bf16.msra.mxu0 %v11570_v47  ;;  %v2270_v44 = vrot.slane %v2268_v55, 4  ;;  %v11789_v49 = vshll.u32 %v11743_v30, 16  ;;  %v512_v47 = vrot.slane %v11783_v53, 4  ;;  %v11800_v42 = vshll.u32 %v11761_v3, 16 }
  0x6c   : > { %14425 = vst [vmem:[#allocation71_spill] sm:$0xff] %v11778_v63  ;;  %9173 = vmatmul.mubr.bf16.gmra.mrb[16].mxu1 %v11778_v63  ;;  %v503_v39 = vrot.slane %v502_v31, 4  ;;  %v11803_v5 = vshrl.u32 %v11761_v3, 16  ;;  %9718 = vmatprep.subr.bf16.mxu0 %v10844_v9  ;;  %v498_v19 = vsel %vm11206_vm2, %v493_v56, %v497_v6  ;;  %v11811_v31 = vshll.u32 %v11769_v7, 16 }
  0x6d   : > { %14427 = vst [vmem:[#allocation73_spill] sm:$0xff] %v11789_v49  ;;  %14428 = vst [vmem:[#allocation74_spill] sm:$0xff] %v11800_v42  ;;  %v2272_v48 = vsel %vm11668_vm8, %v2270_v44, %v2271_v21  ;;  %v515_v55 = vrot.slane %v11789_v49, 5  ;;  %v521_v53 = vrot.slane %v11800_v42, 5  ;;  %v7967_v44 = vrot.slane %v11344_v26, 10 }
  0x6e   : > { %14429 = vst [vmem:[#allocation75_spill] sm:$0xff] %v11803_v5  ;;  %14430 = vst [vmem:[#allocation76_spill] sm:$0xff] %v11811_v31  ;;  %v508_v63 = vsel %vm11206_vm2, %v503_v39, %v507_v50  ;;  %v11815_v18 = vcombine.low %v2269_v24, %v2272_v48  ;;  %v525_v46 = vrot.slane %v11803_v5, 4  ;;  %v531_v21 = vrot.slane %v11811_v31, 5  ;;  %v11827_v49 = vld [vmem:[%s11151_s10 + $0x98] sm:$0x7] }
  0x6f   : > { %v11822_v56 = vcombine.low %v498_v19, %v508_v63  ;;  %v516_v6 = vor.u32 %v515_v55, %v512_v47  ;;  %9719 = vmatpush3.bf16.msra.mxu0 %v10844_v9  ;;  %v2275_v24 = vrot.slane %v11351_v38, 6  ;;  %v2278_v39 = vrot.slane %v11360_v45, 6  ;;  %v10848_v47 = vld [vmem:[%s14008_s1 + $0x318] sm:$0xff]  }
  0x70   : > { %14431 = vst [vmem:[#allocation77_spill] sm:$0xff] %v11815_v18  ;;  %9688 = vmatprep.mubr.bf16.mxu0 %v11815_v18  ;;  %v526_v50 = vor.u32 %v525_v46, %v521_v53  ;;  %v11833_v63 = vshrl.u32 %v11792_v41, 16  ;;  %9720 = vmatprep.subr.bf16.mxu0 %v10846_v23  ;;  %v11840_v9 = vshll.u32 %v11792_v41, 16  ;;  %v11843_v46 = vshll.u32 %v11820_v57, 16  ;;  %v11849_v19 = vld [vmem:[%s11151_s10 + $0x9c] sm:$0xf] }
  0x71   : > { %14432 = vst [vmem:[#allocation78_spill] sm:$0xff] %v11822_v56  ;;  %9176 = vmatprep.mubr.bf16.mxu1 %v11822_v56  ;;  %v517_v26 = vrot.slane %v516_v6, 4  ;;  %v11846_v38 = vshrl.u32 %v11820_v57, 16  ;;  %v2276_v55 = vsel %vm11668_vm8, %v7967_v44, %v2275_v24  ;;  %v2277_v18 = vrot.slane %v2275_v24, 4  ;;  %v11855_v6 = vld [vmem:[%s11151_s10 + $0xa0] sm:$0xf] }
  0x72   : > { %14433 = vst [vmem:[#allocation79_spill] sm:$0xff] %v11833_v63  ;;  %14434 = vst [vmem:[#allocation80_spill] sm:$0xff] %v11840_v9  ;;  %v527_v48 = vrot.slane %v526_v50, 4  ;;  %v536_v31 = vrot.slane %v11833_v63, 4  ;;  %v539_v42 = vrot.slane %v11840_v9, 5  ;;  %v545_v5 = vrot.slane %v11843_v46, 5 }
  0x73   : > { %14435 = vst [vmem:[#allocation81_spill] sm:$0xff] %v11843_v46  ;;  %14436 = vst [vmem:[#allocation82_spill] sm:$0xff] %v11846_v38  ;;  %v522_v56 = vsel %vm11206_vm2, %v517_v26, %v521_v53  ;;  %v549_v45 = vrot.slane %v11846_v38, 4  ;;  %9721 = vmatpush3.bf16.msra.mxu0 %v10846_v23  ;;  %v2279_v44 = vsel %vm11668_vm8, %v2277_v18, %v2278_v39  ;;  %v11867_v24 = vshll.u32 %v11827_v49, 16  ;;  %v11875_v23 = vld [vmem:[%s11151_s10 + $0xa4] sm:$0x7] }
  0x74   : > { %v532_v50 = vsel %vm11206_vm2, %v527_v48, %v531_v21  ;;  %v7968_v63 = vrot.slane %v11412_v22, 10  ;;  %9722 = vmatprep.subr.bf16.mxu0 %v10848_v47  ;;  %v11872_v26 = vcombine.low %v2276_v55, %v2279_v44  ;;  %v540_v46 = vor.u32 %v539_v42, %v536_v31  ;;  %v10852_v21 = vld [vmem:[%s14008_s1 + $0x320] sm:$0xff]   ;;  %v11895_v55 = vld [vmem:[%s11151_s10 + $0xa8] sm:$0xf] }
  0x75   : > { %14437 = vst [vmem:[#allocation83_spill] sm:$0xff] %v11867_v24  ;;  %v11870_v53 = vcombine.low %v522_v56, %v532_v50  ;;  %v550_v38 = vor.u32 %v549_v45, %v545_v5  ;;  %v555_v18 = vrot.slane %v11867_v24, 5  ;;  %v2282_v39 = vrot.slane %v11419_v51, 6  ;;  %v11913_v24 = vld [vmem:[%s11151_s10 + $0xac] sm:$0xf] }
  0x76   : > { %14439 = vst [vmem:[#allocation85_spill] sm:$0xff] %v11872_v26  ;;  %v2285_v22 = vrot.slane %v11422_v36, 6  ;;  %v11884_v56 = vshrl.u32 %v11849_v19, 16  ;;  %9689 = vmatmul.mubr.bf16.gmra.mrb[4].mxu0 %v11872_v26  ;;  %v541_v45 = vrot.slane %v540_v46, 4  ;;  %v11889_v31 = vshll.u32 %v11849_v19, 16  ;;  %v10856_v46 = vld [vmem:[%s14008_s1 + $0x328] sm:$0xff]  }
  0x77   : > { %14438 = vst [vmem:[#allocation84_spill] sm:$0xff] %v11870_v53  ;;  %9177 = vmatmul.mubr.bf16.gmra.mrb[20].mxu1 %v11870_v53  ;;  %v551_v42 = vrot.slane %v550_v38, 4  ;;  %v11892_v48 = vshll.u32 %v11855_v6, 16  ;;  %v2283_v51 = vsel %vm11668_vm8, %v7968_v63, %v2282_v39  ;;  %v2284_v50 = vrot.slane %v2282_v39, 4  ;;  %9723 = vmatpush3.bf16.msra.mxu0 %v10848_v47 }
  0x78   : > { %14440 = vst [vmem:[#allocation86_spill] sm:$0xff] %v11884_v56  ;;  %14441 = vst [vmem:[#allocation87_spill] sm:$0xff] %v11889_v31  ;;  %v560_v44 = vrot.slane %v11884_v56, 4  ;;  %v11901_v53 = vshrl.u32 %v11855_v6, 16  ;;  %v546_v38 = vsel %vm11206_vm2, %v541_v45, %v545_v5  ;;  %v563_v63 = vrot.slane %v11889_v31, 5  ;;  %9724 = vmatprep.subr.bf16.mxu0 %v10852_v21 }
  0x79   : > { %14442 = vst [vmem:[#allocation88_spill] sm:$0xff] %v11892_v48  ;;  %v556_v26 = vsel %vm11206_vm2, %v551_v42, %v555_v18  ;;  %v569_v39 = vrot.slane %v11892_v48, 5  ;;  %v2286_v47 = vsel %vm11668_vm8, %v2284_v50, %v2285_v22  ;;  %v11921_v36 = vshll.u32 %v11875_v23, 16  ;;  %v11924_v5 = vld [vmem:[%s11151_s10 + $0xb0] sm:$0x7] }
  0x7a   : > { %14443 = vst [vmem:[#allocation89_spill] sm:$0xff] %v11901_v53  ;;  %v11915_v56 = vcombine.low %v546_v38, %v556_v26  ;;  %v573_v9 = vrot.slane %v11901_v53, 4  ;;  %v11926_v18 = vcombine.low %v2283_v51, %v2286_v47  ;;  %v564_v45 = vor.u32 %v563_v63, %v560_v44  ;;  %v10860_v63 = vld [vmem:[%s14008_s1 + $0x330] sm:$0xff]  }
  0x7b   : > { %14445 = vst [vmem:[#allocation91_spill] sm:$0xff] %v11921_v36  ;;  %v7969_v42 = vrot.slane %v11479_v15, 10  ;;  %v2289_v48 = vrot.slane %v11487_v52, 6  ;;  %v579_v22 = vrot.slane %v11921_v36, 5  ;;  %v2292_v50 = vrot.slane %v11494_v58, 6  ;;  %9725 = vmatpush3.bf16.msra.mxu0 %v10852_v21 }
  0x7c   : > { %14444 = vst [vmem:[#allocation90_spill] sm:$0xff] %v11915_v56  ;;  %14446 = vst [vmem:[#allocation92_spill] sm:$0xff] %v11926_v18  ;;  %9180 = vmatprep.mubr.bf16.mxu1 %v11915_v56  ;;  %v574_v26 = vor.u32 %v573_v9, %v569_v39  ;;  %v11934_v38 = vshrl.u32 %v11895_v55, 16  ;;  %9692 = vmatprep.mubr.bf16.mxu0 %v11926_v18  ;;  %v565_v51 = vrot.slane %v564_v45, 4  ;;  %v11940_v52 = vshll.u32 %v11895_v55, 16 }
  0x7d   : > { %v2290_v15 = vsel %vm11668_vm8, %v7969_v42, %v2289_v48  ;;  %v2291_v44 = vrot.slane %v2289_v48, 4  ;;  %v11943_v9 = vld [vmem:[%s11151_s10 + $0xb4] sm:$0xf]  ;;  %9726 = vmatprep.subr.bf16.mxu0 %v10856_v46  ;;  %v11950_v56 = vshll.u32 %v11913_v24, 16  ;;  %v11953_v45 = vshrl.u32 %v11913_v24, 16 }
  0x7e   : > { %14447 = vst [vmem:[#allocation93_spill] sm:$0xff] %v11934_v38  ;;  %14448 = vst [vmem:[#allocation94_spill] sm:$0xff] %v11940_v52  ;;  %v575_v47 = vrot.slane %v574_v26, 4  ;;  %v584_v21 = vrot.slane %v11934_v38, 4  ;;  %v11956_v48 = vld [vmem:[%s11151_s10 + $0xb8] sm:$0xf]  ;;  %v570_v42 = vsel %vm11206_vm2, %v565_v51, %v569_v39 }
  0x7f   : > { %14449 = vst [vmem:[#allocation95_spill] sm:$0xff] %v11950_v56  ;;  %14450 = vst [vmem:[#allocation96_spill] sm:$0xff] %v11953_v45  ;;  %v2293_v18 = vsel %vm11668_vm8, %v2291_v44, %v2292_v50  ;;  %v587_v36 = vrot.slane %v11940_v52, 5  ;;  %v11964_v26 = vshll.u32 %v11924_v5, 16  ;;  %v593_v31 = vrot.slane %v11950_v56, 5  ;;  %9727 = vmatpush3.bf16.msra.mxu0 %v10856_v46  ;;  %v10864_v39 = vld [vmem:[%s14008_s1 + $0x338] sm:$0xff]  }
  0x80   : > { %v580_v38 = vsel %vm11206_vm2, %v575_v47, %v579_v22  ;;  %v11968_v53 = vcombine.low %v2290_v15, %v2293_v18  ;;  %v597_v58 = vrot.slane %v11953_v45, 4  ;;  %v7970_v52 = vrot.slane %v11544_v43, 10  ;;  %9728 = vmatprep.subr.bf16.mxu0 %v10860_v63 }
  0x81   : > { %14451 = vst [vmem:[#allocation97_spill] sm:$0xff] %v11964_v26  ;;  %v11975_v50 = vcombine.low %v570_v42, %v580_v38  ;;  %v588_v51 = vor.u32 %v587_v36, %v584_v21  ;;  %v603_v44 = vrot.slane %v11964_v26, 5  ;;  %v2296_v22 = vrot.slane %v11552_v28, 6 }
  0x82   : > { %14452 = vst [vmem:[#allocation98_spill] sm:$0xff] %v11968_v53  ;;  %9693 = vmatmul.mubr.bf16.gmra.mrb[8].mxu0 %v11968_v53  ;;  %v598_v18 = vor.u32 %v597_v58, %v593_v31  ;;  %v2299_v46 = vrot.slane %v11560_v14, 6  ;;  %v11986_v15 = vshrl.u32 %v11943_v9, 16  ;;  %v11990_v38 = vshll.u32 %v11943_v9, 16 }
  0x83   : > { %14453 = vst [vmem:[#allocation99_spill] sm:$0xff] %v11975_v50  ;;  %9181 = vmatmul.mubr.bf16.gmra.mrb[24].mxu1 %v11975_v50  ;;  %v589_v36 = vrot.slane %v588_v51, 4  ;;  %v11993_v43 = vshll.u32 %v11956_v48, 16  ;;  %v11996_v47 = vshrl.u32 %v11956_v48, 16  ;;  %v2297_v21 = vsel %vm11668_vm8, %v7970_v52, %v2296_v22  ;;  %9729 = vmatpush3.bf16.msra.mxu0 %v10860_v63 }
  0x84   : > { %14454 = vst [vmem:[#allocation100_spill] sm:$0xff] %v11986_v15  ;;  %14455 = vst [vmem:[#allocation101_spill] sm:$0xff] %v11990_v38  ;;  %v599_v58 = vrot.slane %v598_v18, 4  ;;  %v2298_v42 = vrot.slane %v2296_v22, 4  ;;  %v608_v53 = vrot.slane %v11986_v15, 4  ;;  %v611_v50 = vrot.slane %v11990_v38, 5  ;;  %9730 = vmatprep.subr.bf16.mxu0 %v10864_v39 }
  0x85   : > { %14456 = vst [vmem:[#allocation102_spill] sm:$0xff] %v11993_v43  ;;  %14457 = vst [vmem:[#allocation103_spill] sm:$0xff] %v11996_v47  ;;  %v594_v51 = vsel %vm11206_vm2, %v589_v36, %v593_v31  ;;  %v617_v26 = vrot.slane %v11993_v43, 5  ;;  %v621_v56 = vrot.slane %v11996_v47, 4  ;;  %v12011_v22 = vshll.u32 %v11980_v59, 16  ;;  %v12017_v31 = vld [vmem:[%s14008_s1 + $0x340] sm:$0xff]  }
  0x86   : > { %v604_v18 = vsel %vm11206_vm2, %v599_v58, %v603_v44  ;;  %v2300_v52 = vsel %vm11668_vm8, %v2298_v42, %v2299_v46  ;;  %v7971_v63 = vrot.slane %v11602_v60, 10  ;;  %v612_v47 = vor.u32 %v611_v50, %v608_v53 }
  0x87   : > { %14458 = vst [vmem:[#allocation104_spill] sm:$0xff] %v12011_v22  ;;  %v12019_v36 = vcombine.low %v594_v51, %v604_v18  ;;  %v12021_v43 = vcombine.low %v2297_v21, %v2300_v52  ;;  %v622_v44 = vor.u32 %v621_v56, %v617_v26  ;;  %v627_v46 = vrot.slane %v12011_v22, 5  ;;  %9731 = vmatpush3.bf16.msra.mxu0 %v10864_v39  ;;  %v12034_v52 = vld [vmem:[%s11151_s10] sm:$0xf]  ;;  %v12037_v22 = vld [vmem:[%s11151_s10 + $0x4] sm:$0xf] }
  0x88   : > { %v2303_v58 = vrot.slane %v11605_v2, 6  ;;  %v2306_v42 = vrot.slane %v11613_v20, 6  ;;  %v7972_v38 = vrot.slane %v11653_v27, 10  ;;  %v613_v51 = vrot.slane %v612_v47, 4  ;;  %14461 = vst [vmem:[#allocation107_spill] sm:$0xff] %v12037_v22  ;;  %9764 = vmatprep.subr.bf16.mxu0 %v12017_v31 }
  0x89   : > { %14459 = vst [vmem:[#allocation105_spill] sm:$0xff] %v12019_v36  ;;  %14460 = vst [vmem:[#allocation106_spill] sm:$0xff] %v12021_v43  ;;  %9184 = vmatprep.mubr.bf16.mxu1 %v12019_v36  ;;  %9696 = vmatprep.mubr.bf16.mxu0 %v12021_v43  ;;  %v623_v21 = vrot.slane %v622_v44, 4  ;;  %v2310_v18 = vrot.slane %v11674_v16, 6  ;;  %v2313_v53 = vrot.slane %v11691_v17, 6  ;;  %v7843_v39 = vcombine.low %v12034_v52, %v12037_v22 }
  0x8a   : > { %v2304_v56 = vsel %vm11668_vm8, %v7971_v63, %v2303_v58  ;;  %v2305_v50 = vrot.slane %v2303_v58, 4  ;;  %v7973_v47 = vrot.slane %v11700_v1, 10  ;;  %v618_v17 = vsel %vm11206_vm2, %v613_v51, %v617_v26 }
  0x8b   : > { %v628_v63 = vsel %vm11206_vm2, %v623_v21, %v627_v46  ;;  %v2311_v44 = vsel %vm11668_vm8, %v7972_v38, %v2310_v18  ;;  %v2312_v58 = vrot.slane %v2310_v18, 4  ;;  %v2317_v15 = vrot.slane %v11713_v40, 6  ;;  %v12060_v46 = vld [vmem:[%s11151_s10 + $0xc] sm:$0xf]  ;;  %v12063_v38 = vld [vmem:[%s11151_s10 + $0x10] sm:$0xf] }
  0x8c   : > { %v12049_v36 = vcombine.low %v618_v17, %v628_v63  ;;  %v2307_v43 = vsel %vm11668_vm8, %v2305_v50, %v2306_v42  ;;  %v2320_v45 = vrot.slane %v11724_v61, 6  ;;  %14464 = vst [vmem:[#allocation110_spill] sm:$0xff] %v12060_v46  ;;  %14465 = vst [vmem:[#allocation111_spill] sm:$0xff] %v12063_v38  ;;  %v12067_v51 = vcombine.low %v12060_v46, %v12063_v38 }
  0x8d   : > { %v12055_v22 = vcombine.low %v2304_v56, %v2307_v43  ;;  %v2314_v26 = vsel %vm11668_vm8, %v2312_v58, %v2313_v53  ;;  %v7974_v42 = vrot.slane %v11743_v30, 10  ;;  %v2318_v61 = vsel %vm11668_vm8, %v7973_v47, %v2317_v15  ;;  %v12078_v53 = vld [vmem:[%s11151_s10 + $0x18] sm:$0xf]  ;;  %v12081_v56 = vld [vmem:[%s11151_s10 + $0x1c] sm:$0xf] }
  0x8e   : > { %14462 = vst [vmem:[#allocation108_spill] sm:$0xff] %v12049_v36  ;;  %14466 = vst [vmem:[#allocation112_spill] sm:$0xff] %v12067_v51  ;;  %9185 = vmatmul.mubr.bf16.gmra.mrb[28].mxu1 %v12049_v36  ;;  %v12071_v21 = vcombine.low %v2311_v44, %v2314_v26  ;;  %v2319_v43 = vrot.slane %v2317_v15, 4  ;;  %v2324_v18 = vrot.slane %v11761_v3, 6  ;;  %v12085_v50 = vcombine.low %v12078_v53, %v12081_v56  ;;  %v12102_v36 = vld [vmem:[%s11151_s10 + $0x28] sm:$0xf] }
  0x8f   : > { %14463 = vst [vmem:[#allocation109_spill] sm:$0xff] %v12055_v22  ;;  %9697 = vmatmul.mubr.bf16.gmra.mrb[12].mxu0 %v12055_v22  ;;  %9204 = vmatprep.mubr.bf16.mxu1 %v7843_v39  ;;  %14468 = vst [vmem:[#allocation114_spill] sm:$0xff] %v12078_v53  ;;  %v2327_v17 = vrot.slane %v11769_v7, 6  ;;  %v7975_v47 = vrot.slane %v11792_v41, 10  ;;  %v2331_v15 = vrot.slane %v11820_v57, 6  ;;  %v2334_v58 = vrot.slane %v11827_v49, 6 }
  0x90   : > { %14467 = vst [vmem:[#allocation113_spill] sm:$0xff] %v12071_v21  ;;  %14469 = vst [vmem:[#allocation115_spill] sm:$0xff] %v12081_v56  ;;  %9700 = vmatprep.mubr.bf16.mxu0 %v12071_v21  ;;  %v2321_v63 = vsel %vm11668_vm8, %v2319_v43, %v2320_v45  ;;  %v2325_v39 = vsel %vm11668_vm8, %v7974_v42, %v2324_v18  ;;  %v2326_v44 = vrot.slane %v2324_v18, 4  ;;  %v12099_v7 = vld [vmem:[%s11151_s10 + $0x24] sm:$0xf]  ;;  %v2338_v18 = vrot.slane %v11855_v6, 6 }
  0x91   : > { %14470 = vst [vmem:[#allocation116_spill] sm:$0xff] %v12085_v50  ;;  %v12096_v26 = vcombine.low %v2318_v61, %v2321_v63  ;;  %14472 = vst [vmem:[#allocation118_spill] sm:$0xff] %v12099_v7  ;;  %v12106_v45 = vcombine.low %v12099_v7, %v12102_v36  ;;  %v2332_v42 = vsel %vm11668_vm8, %v7975_v47, %v2331_v15  ;;  %v2333_v43 = vrot.slane %v2331_v15, 4  ;;  %v12120_v22 = vld [vmem:[%s11151_s10 + $0x30] sm:$0xf] }
  0x92   : > { %14473 = vst [vmem:[#allocation119_spill] sm:$0xff] %v12102_v36  ;;  %v2328_v49 = vsel %vm11668_vm8, %v2326_v44, %v2327_v17  ;;  %v7976_v61 = vrot.slane %v11849_v19, 10  ;;  %v2341_v63 = vrot.slane %v11875_v23, 6  ;;  %14476 = vst [vmem:[#allocation122_spill] sm:$0xff] %v12120_v22  ;;  %v12123_v47 = vld [vmem:[%s11151_s10 + $0x34] sm:$0xf] }
  0x93   : > { %14471 = vst [vmem:[#allocation117_spill] sm:$0xff] %v12096_v26  ;;  %14474 = vst [vmem:[#allocation120_spill] sm:$0xff] %v12106_v45  ;;  %v12115_v35 = vcombine.low %v2325_v39, %v2328_v49  ;;  %v2335_v21 = vsel %vm11668_vm8, %v2333_v43, %v2334_v58  ;;  %v12127_v15 = vcombine.low %v12120_v22, %v12123_v47  ;;  %v7977_v17 = vrot.slane %v11895_v55, 10  ;;  %v220_v44 = vld [vmem:[%s11151_s10 + $0xc0] sm:$0xf]  ;;  %v10855_v22 = vld [vmem:[%s14008_s1 + $0x88] sm:$0xff]  }
  0x94   : > { %14477 = vst [vmem:[#allocation123_spill] sm:$0xff] %v12123_v47  ;;  %v221_v36 = vld [vmem:[%s11151_s10 + $0xc4] sm:$0xf]  ;;  %v222_v7 = vld [vmem:[%s11151_s10 + $0xc8] sm:$0x7]  ;;  %v2339_v23 = vsel %vm11668_vm8, %v7976_v61, %v2338_v18  ;;  %v2340_v39 = vrot.slane %v2338_v18, 4  ;;  %v12149_v56 = vcombine.low %v2332_v42, %v2335_v21 }
  0x95   : > { %14475 = vst [vmem:[#allocation121_spill] sm:$0xff] %v12115_v35  ;;  %14478 = vst [vmem:[#allocation124_spill] sm:$0xff] %v12127_v15  ;;  %v12136_v49 = vld [vmem:[%s11151_s10 + $0x3c] sm:$0xf]  ;;  %v12139_v58 = vld [vmem:[%s11151_s10 + $0x40] sm:$0xf] }
  0x96   : > { %14479 = vst [vmem:[#allocation125_spill] sm:$0xff] %v12136_v49  ;;  %14480 = vst [vmem:[#allocation126_spill] sm:$0xff] %v12139_v58  ;;  %v12143_v43 = vcombine.low %v12136_v49, %v12139_v58  ;;  %v2345_v47 = vrot.slane %v11913_v24, 6  ;;  %v2348_v61 = vrot.slane %v11924_v5, 6  ;;  %v7978_v18 = vrot.slane %v11943_v9, 10  ;;  %9205 = vmatmul.mubr.bf16.vlgmr.msra.gmra.mrb[0].mxu1 %v12067_v51 }
  0x97   : > { %14482 = vst [vmem:[#allocation128_spill] sm:$0xff] %v12149_v56  ;;  %v2352_v53 = vrot.slane %v11956_v48, 6  ;;  %v2342_v58 = vsel %vm11668_vm8, %v2340_v39, %v2341_v63  ;;  %v2355_v46 = vrot.slane %v11980_v59, 6  ;;  %9701 = vmatmul.mubr.bf16.gmra.mrb[16].mxu0 %v12096_v26  ;;  %9237 = vmatpush3.bf16.msra.mxu1 %v11528_v10  ;;  %v12165_v21 = vld [vmem:[%s11151_s10 + $0x48] sm:$0xf]  ;;  %v10859_v59 = vld [vmem:[%s14008_s1 + $0x90] sm:$0xff]  }
  0x98   : > { %14481 = vst [vmem:[#allocation127_spill] sm:$0xff] %v12143_v43  ;;  %v2346_v49 = vsel %vm11668_vm8, %v7977_v17, %v2345_v47  ;;  %v2347_v38 = vrot.slane %v2345_v47, 4  ;;  %v12162_v5 = vcombine.low %v2339_v23, %v2342_v58  ;;  %v12168_v42 = vld [vmem:[%s11151_s10 + $0x4c] sm:$0xf]  ;;  %9208 = vmatprep.mubr.bf16.mxu1 %v12085_v50  ;;  %9704 = vmatprep.mubr.bf16.mxu0 %v12115_v35  ;;  %v8216_v23 = vrot.slane %v220_v44, 10 }
  0x99   : > { %v12172_v63 = vcombine.low %v12165_v21, %v12168_v42  ;;  %v2353_v47 = vsel %vm11668_vm8, %v7978_v18, %v2352_v53  ;;  %v2354_v17 = vrot.slane %v2352_v53, 4  ;;  %v4748_v39 = vrot.slane %v221_v36, 6  ;;  %9238 = vmatprep.subr.bf16.mxu1 %v10855_v22  ;;  %v12188_v18 = vld [vmem:[%s11151_s10 + $0x54] sm:$0xf] }
  0x9a   : > { %14483 = vst [vmem:[#allocation129_spill] sm:$0xff] %v12162_v5  ;;  %v2349_v10 = vsel %vm11668_vm8, %v2347_v38, %v2348_v61  ;;  %v4751_v58 = vrot.slane %v222_v7, 6  ;;  %v12192_v35 = vcombine.low %v12188_v18, %v11552_v28  ;;  %v12198_v36 = vcombine.low %v11602_v60, %v11605_v2 }
  0x9b   : > { %14484 = vst [vmem:[#allocation130_spill] sm:$0xff] %v12172_v63  ;;  %v12183_v51 = vcombine.low %v2346_v49, %v2349_v10  ;;  %v2356_v53 = vsel %vm11668_vm8, %v2354_v17, %v2355_v46  ;;  %v4750_v50 = vrot.slane %v4748_v39, 4  ;;  %9239 = vmatpush3.bf16.msra.mxu1 %v10855_v22  ;;  %v2695_v38 = vrot.slane %v11190_v29, 6  ;;  %v10863_v29 = vld [vmem:[%s14008_s1 + $0x98] sm:$0xff]  }
  0x9c   : > { %14486 = vst [vmem:[#allocation132_spill] sm:$0xff] %v12192_v35  ;;  %v12194_v26 = vcombine.low %v2353_v47, %v2356_v53  ;;  %14488 = vst [vmem:[#allocation134_spill] sm:$0xff] %v12198_v36  ;;  %v2696_v46 = vrot.slane %v11196_v32, 7  ;;  %v2699_v7 = vrot.slane %v11202_v34, 6  ;;  %v2700_v44 = vrot.slane %v11199_v33, 7  ;;  %9240 = vmatprep.subr.bf16.mxu1 %v10859_v59  ;;  %v14495_v53 = vld [vmem:[#allocation11_spill] sm:$0xff] }
  0x9d   : > { %14485 = vst [vmem:[#allocation131_spill] sm:$0xff] %v12183_v51  ;;  %v4749_v28 = vsel %vm11668_vm8, %v8216_v23, %v4748_v39  ;;  %v4752_v49 = vsel %vm11668_vm8, %v4750_v50, %v4751_v58  ;;  %v14489_v60 = vshrl.u32 %v11184_v25, 16  ;;  %v2705_v22 = vrot.slane %v11211_v37, 7 }
  0x9e   : > { %14487 = vst [vmem:[#allocation133_spill] sm:$0xff] %v12194_v26  ;;  %v2697_v32 = vor.u32 %v2696_v46, %v2695_v38  ;;  %v2701_v34 = vor.u32 %v2700_v44, %v2699_v7  ;;  %v12216_v33 = vcombine.low %v11653_v27, %v11674_v16  ;;  %v2708_v61 = vrot.slane %v11255_v4, 6  ;;  %9209 = vmatmul.mubr.bf16.gmra.mrb[4].mxu1 %v12106_v45 }
  0x9f   : > { %v2704_v2 = vrot.slane %v14489_v60, 6  ;;  %v14491_v25 = vmov 0  ;;  %v2709_v50 = vrot.slane %v11260_v8, 7  ;;  %v2712_v47 = vrot.slane %v11273_v12, 6  ;;  %9705 = vmatmul.mubr.bf16.gmra.mrb[20].mxu0 %v12149_v56  ;;  %9212 = vmatprep.mubr.bf16.mxu1 %v12127_v15 }
  0xa0   : > { %14490 = vst [vmem:[#allocation135_spill] sm:$0xff] %v12216_v33  ;;  %v14492_v25 = vsel %vm12222_vm11, 4294967295, %v14491_v25  ;;  %v2713_v17 = vrot.slane %v11270_v11, 7  ;;  %v12231_v4 = vcombine.low %v4749_v28, %v4752_v49  ;;  %v2698_v27 = vrot.slane %v2697_v32, 4  ;;  %9708 = vmatprep.mubr.bf16.mxu0 %v12162_v5  ;;  %9241 = vmatpush3.bf16.msra.mxu1 %v10859_v59  ;;  %v14496_v59 = vld [vmem:[#allocation14_spill] sm:$0xff]  ;;  %v14499_v49 = vld [vmem:[#allocation13_spill] sm:$0xff] }
  0xa1   : > { %14493 = vst [vmem:[#allocation136_spill] sm:$0xff] %v14492_v25  ;;  %v2706_v37 = vor.u32 %v2705_v22, %v2704_v2  ;;  %v2703_v16 = vrot.slane %v2701_v34, 4  ;;  %v2718_v10 = vrot.slane %v11276_v13, 7  ;;  %v2710_v23 = vor.u32 %v2709_v50, %v2708_v61  ;;  %9242 = vmatprep.subr.bf16.mxu1 %v10863_v29  ;;  %v10867_v13 = vld [vmem:[%s14008_s1 + $0xa0] sm:$0xff]   ;;  %v14500_v2 = vld [vmem:[#allocation12_spill] sm:$0xff] }
  0xa2   : > { %14494 = vst [vmem:[#allocation137_spill] sm:$0xff] %v12231_v4  ;;  %v2714_v39 = vor.u32 %v2713_v17, %v2712_v47  ;;  %v2721_v8 = vrot.slane %v11315_v62, 6  ;;  %v2722_v12 = vrot.slane %v11318_v0, 7  ;;  %v2702_v11 = vsel %vm12222_vm11, %v2698_v27, %v2701_v34  ;;  %v14502_v34 = vld [vmem:[#allocation16_spill] sm:$0xff]  ;;  %v14565_v5 = vld [vmem:[#allocation114_spill] sm:$0xff] }
  0xa3   : > { %v2707_v58 = vsel %vm12222_vm11, %v2703_v16, %v2706_v37  ;;  %v2719_v38 = vor.u32 %v2718_v10, %v14495_v53  ;;  %v2725_v46 = vrot.slane %v14496_v59, 6  ;;  %v2711_v7 = vrot.slane %v2710_v23, 4  ;;  %v14505_v10 = vld [vmem:[#allocation20_spill] sm:$0xff]  ;;  %v14510_v59 = vld [vmem:[#allocation23_spill] sm:$0xff] }
  0xa4   : > { %v2716_v44 = vrot.slane %v2714_v39, 4  ;;  %v12248_v62 = vcombine.low %v11700_v1, %v11713_v40  ;;  %v2723_v0 = vor.u32 %v2722_v12, %v2721_v8  ;;  %v12250_v28 = vcombine.low %v2702_v11, %v2707_v58  ;;  %9243 = vmatpush3.bf16.msra.mxu1 %v10863_v29  ;;  %v14503_v1 = vld [vmem:[#allocation19_spill] sm:$0xff]  ;;  %v14507_v12 = vld [vmem:[#allocation21_spill] sm:$0xff] }
  0xa5   : > { %v2726_v60 = vrot.slane %v14499_v49, 7  ;;  %v14501_v22 = vshrl.u32 %v14500_v2, 16  ;;  %v2731_v61 = vrot.slane %v14502_v34, 7  ;;  %v2715_v37 = vsel %vm12222_vm11, %v2711_v7, %v2714_v39  ;;  %9244 = vmatprep.subr.bf16.mxu1 %v10867_v13  ;;  %v10871_v29 = vld [vmem:[%s14008_s1 + $0xa8] sm:$0xff]   ;;  %v14506_v39 = vld [vmem:[#allocation22_spill] sm:$0xff]  ;;  %v14508_v58 = vld [vmem:[#allocation17_spill] sm:$0xff] }
  0xa6   : > { %14497 = vst [vmem:[#allocation11_spill] sm:$0xff] %v12248_v62  ;;  %14498 = vst [vmem:[#allocation14_spill] sm:$0xff] %v12250_v28  ;;  %v2720_v50 = vsel %vm12222_vm11, %v2716_v44, %v2719_v38  ;;  %v2724_v47 = vrot.slane %v2723_v0, 4  ;;  %v2734_v40 = vrot.slane %v14503_v1, 6  ;;  %v12263_v16 = vcombine.low %v11743_v30, %v11761_v3  ;;  %9213 = vmatmul.mubr.bf16.gmra.mrb[8].mxu1 %v12143_v43  ;;  %v14515_v1 = vld [vmem:[#allocation29_spill] sm:$0xff] }
  0xa7   : > { %v2730_v32 = vrot.slane %v14501_v22, 6  ;;  %v2727_v17 = vor.u32 %v2726_v60, %v2725_v46  ;;  %v2735_v23 = vrot.slane %v14505_v10, 7  ;;  %v2738_v8 = vrot.slane %v14506_v39, 6  ;;  %9709 = vmatmul.mubr.bf16.gmra.mrb[24].mxu0 %v12183_v51  ;;  %9216 = vmatprep.mubr.bf16.mxu1 %v12172_v63  ;;  %v14512_v60 = vld [vmem:[#allocation27_spill] sm:$0xff]  ;;  %v14513_v22 = vld [vmem:[#allocation28_spill] sm:$0xff] }
  0xa8   : > { %14504 = vst [vmem:[#allocation13_spill] sm:$0xff] %v12263_v16  ;;  %v2739_v11 = vrot.slane %v14507_v12, 7  ;;  %v14509_v53 = vshrl.u32 %v14508_v58, 16  ;;  %v2744_v46 = vrot.slane %v14510_v59, 7  ;;  %v12277_v3 = vcombine.low %v2715_v37, %v2720_v50  ;;  %9712 = vmatprep.mubr.bf16.mxu0 %v12194_v26  ;;  %9245 = vmatpush3.bf16.msra.mxu1 %v10867_v13  ;;  %v14514_v37 = vld [vmem:[#allocation30_spill] sm:$0xff]  ;;  %v14520_v58 = vld [vmem:[#allocation31_spill] sm:$0xff] }
  0xa9   : > { %v2732_v27 = vor.u32 %v2731_v61, %v2730_v32  ;;  %v2728_v30 = vsel %vm12222_vm11, %v2724_v47, %v2727_v17  ;;  %v2729_v7 = vrot.slane %v2727_v17, 4  ;;  %v2736_v44 = vor.u32 %v2735_v23, %v2734_v40  ;;  %9246 = vmatprep.subr.bf16.mxu1 %v10871_v29  ;;  %v10875_v40 = vld [vmem:[%s14008_s1 + $0xb0] sm:$0xff]   ;;  %v14517_v23 = vld [vmem:[#allocation25_spill] sm:$0xff] }
  0xaa   : > { %v2743_v38 = vrot.slane %v14509_v53, 6  ;;  %14511 = vst [vmem:[#allocation12_spill] sm:$0xff] %v12277_v3  ;;  %v2740_v0 = vor.u32 %v2739_v11, %v2738_v8  ;;  %v2747_v2 = vrot.slane %v14512_v60, 6  ;;  %v2748_v32 = vrot.slane %v14513_v22, 7 }
  0xab   : > { %v2733_v34 = vsel %vm12222_vm11, %v2729_v7, %v2732_v27  ;;  %v2737_v61 = vrot.slane %v2736_v44, 4  ;;  %v2751_v50 = vrot.slane %v14514_v37, 6  ;;  %v2752_v47 = vrot.slane %v14515_v1, 7  ;;  %v14529_v1 = vld [vmem:[#allocation39_spill] sm:$0xff] }
  0xac   : > { %v2745_v49 = vor.u32 %v2744_v46, %v2743_v38  ;;  %v2742_v13 = vrot.slane %v2740_v0, 4  ;;  %v12293_v17 = vcombine.low %v11792_v41, %v11820_v57  ;;  %v2749_v10 = vor.u32 %v2748_v32, %v2747_v2  ;;  %9247 = vmatpush3.bf16.msra.mxu1 %v10871_v29  ;;  %v14521_v46 = vld [vmem:[#allocation35_spill] sm:$0xff]  ;;  %v14522_v41 = vld [vmem:[#allocation36_spill] sm:$0xff]  ;;  %v14524_v2 = vld [vmem:[#allocation38_spill] sm:$0xff] }
  0xad   : > { %v14518_v39 = vshrl.u32 %v14517_v23, 16  ;;  %v12297_v27 = vcombine.low %v2728_v30, %v2733_v34  ;;  %v2741_v12 = vsel %vm12222_vm11, %v2737_v61, %v2740_v0  ;;  %v2753_v11 = vor.u32 %v2752_v47, %v2751_v50  ;;  %v10879_v30 = vld [vmem:[%s14008_s1 + $0xb8] sm:$0xff]   ;;  %9248 = vmatprep.subr.bf16.mxu1 %v10875_v40  ;;  %v14527_v61 = vld [vmem:[#allocation34_spill] sm:$0xff] }
  0xae   : > { %14516 = vst [vmem:[#allocation16_spill] sm:$0xff] %v12293_v17  ;;  %v2757_v53 = vrot.slane %v14520_v58, 7  ;;  %v2746_v38 = vsel %vm12222_vm11, %v2742_v13, %v2745_v49  ;;  %v2750_v59 = vrot.slane %v2749_v10, 4  ;;  %v2760_v57 = vrot.slane %v14521_v46, 6  ;;  %9217 = vmatmul.mubr.bf16.gmra.mrb[12].mxu1 %v12192_v35  ;;  %v14526_v32 = vld [vmem:[#allocation37_spill] sm:$0xff]  ;;  %v14530_v13 = vld [vmem:[#allocation42_spill] sm:$0xff] }
  0xaf   : > { %v2756_v8 = vrot.slane %v14518_v39, 6  ;;  %14519 = vst [vmem:[#allocation19_spill] sm:$0xff] %v12297_v27  ;;  %v2761_v7 = vrot.slane %v14522_v41, 7  ;;  %v2755_v44 = vrot.slane %v2753_v11, 4  ;;  %v12311_v0 = vcombine.low %v11849_v19, %v11855_v6  ;;  %9713 = vmatmul.mubr.bf16.gmra.mrb[28].mxu0 %v12231_v4  ;;  %9220 = vmatprep.mubr.bf16.mxu1 %v12198_v36  ;;  %v12495_v35 = vld [vmem:[%s11151_s10 + $0x2c] sm:$0x7] }
  0xb0   : > { %v2764_v22 = vrot.slane %v14524_v2, 6  ;;  %v12315_v29 = vcombine.low %v2741_v12, %v2746_v38  ;;  %v2765_v34 = vrot.slane %v14526_v32, 7  ;;  %v14528_v37 = vshrl.u32 %v14527_v61, 16  ;;  %9732 = vmatprep.mubr.bf16.mxu0 %v12250_v28  ;;  %9249 = vmatpush3.bf16.msra.mxu1 %v10875_v40  ;;  %v14532_v12 = vld [vmem:[#allocation43_spill] sm:$0xff] }
  0xb1   : > { %v2758_v60 = vor.u32 %v2757_v53, %v2756_v8  ;;  %14523 = vst [vmem:[#allocation20_spill] sm:$0xff] %v12311_v0  ;;  %v2762_v49 = vor.u32 %v2761_v7, %v2760_v57  ;;  %v2754_v19 = vsel %vm12222_vm11, %v2750_v59, %v2753_v11  ;;  %v2770_v47 = vrot.slane %v14529_v1, 7  ;;  %v14533_v11 = vld [vmem:[#allocation45_spill] sm:$0xff]  ;;  %v14534_v59 = vld [vmem:[#allocation44_spill] sm:$0xff]  ;;  %9250 = vmatprep.subr.bf16.mxu1 %v10879_v30  ;;  %v12341_v7 = vld [vmem:[%s14008_s1 + $0xc0] sm:$0xff]  }
  0xb2   : > { %14525 = vst [vmem:[#allocation22_spill] sm:$0xff] %v12315_v29  ;;  %v2769_v50 = vrot.slane %v14528_v37, 6  ;;  %v2773_v10 = vrot.slane %v14530_v13, 6  ;;  %v2766_v39 = vor.u32 %v2765_v34, %v2764_v22  ;;  %v12331_v8 = vcombine.low %v11895_v55, %v11913_v24  ;;  %v10872_v2 = vld [vmem:[%s14008_s1 + $0x348] sm:$0xff]   ;;  %v14539_v34 = vld [vmem:[#allocation50_spill] sm:$0xff] }
  0xb3   : > { %v2759_v6 = vsel %vm12222_vm11, %v2755_v44, %v2758_v60  ;;  %v2763_v23 = vrot.slane %v2762_v49, 4  ;;  %v2774_v58 = vrot.slane %v14532_v12, 7  ;;  %v2777_v38 = vrot.slane %v14533_v11, 6  ;;  %v14537_v44 = vld [vmem:[#allocation46_spill] sm:$0xff]  ;;  %v14538_v49 = vld [vmem:[#allocation49_spill] sm:$0xff] }
  0xb4   : > { %14531 = vst [vmem:[#allocation21_spill] sm:$0xff] %v12331_v8  ;;  %v2771_v53 = vor.u32 %v2770_v47, %v2769_v50  ;;  %v2778_v46 = vrot.slane %v14534_v59, 7  ;;  %v14535_v57 = vshrl.u32 %v11560_v14, 16  ;;  %v12343_v40 = vcombine.low %v2754_v19, %v2759_v6  ;;  %v14541_v6 = vld [vmem:[#allocation52_spill] sm:$0xff]  ;;  %9251 = vmatpush3.bf16.msra.mxu1 %v10879_v30 }
  0xb5   : > { %v2768_v24 = vrot.slane %v2766_v39, 4  ;;  %v2775_v55 = vor.u32 %v2774_v58, %v2773_v10  ;;  %v2783_v60 = vrot.slane %v14537_v44, 7  ;;  %v2767_v14 = vsel %vm12222_vm11, %v2763_v23, %v2766_v39  ;;  %v14542_v23 = vld [vmem:[#allocation51_spill] sm:$0xff]  ;;  %9284 = vmatprep.subr.bf16.mxu1 %v12341_v7  ;;  %v14544_v58 = vld [vmem:[#allocation53_spill] sm:$0xff] }
  0xb6   : > { %v2782_v41 = vrot.slane %v14535_v57, 6  ;;  %14536 = vst [vmem:[#allocation17_spill] sm:$0xff] %v12343_v40  ;;  %v2779_v22 = vor.u32 %v2778_v46, %v2777_v38  ;;  %v2786_v32 = vrot.slane %v14538_v49, 6  ;;  %v2787_v61 = vrot.slane %v14539_v34, 7  ;;  %9221 = vmatmul.mubr.bf16.gmra.mrb[16].mxu1 %v12216_v33  ;;  %v14546_v57 = vld [vmem:[#allocation107_spill] sm:$0xff]  ;;  %v14550_v34 = vld [vmem:[#allocation57_spill] sm:$0xff] }
  0xb7   : > { %v2776_v37 = vrot.slane %v2775_v55, 4  ;;  %v12355_v19 = vcombine.low %v11943_v9, %v11956_v48  ;;  %v2790_v1 = vrot.slane %v14541_v6, 6  ;;  %v2772_v47 = vsel %vm12222_vm11, %v2768_v24, %v2771_v53  ;;  %9733 = vmatmul.mubr.bf16.vlgmr.msra.gmra.mrb[0].mxu0 %v12277_v3  ;;  %9224 = vmatprep.mubr.bf16.mxu1 %v12248_v62  ;;  %v10876_v24 = vld [vmem:[%s14008_s1 + $0x350] sm:$0xff]   ;;  %v14574_v62 = vld [vmem:[#allocation118_spill] sm:$0xff]  ;;  %v14575_v33 = vld [vmem:[#allocation119_spill] sm:$0xff] }
  0xb8   : > { %v2784_v50 = vor.u32 %v2783_v60, %v2782_v41  ;;  %v2781_v13 = vrot.slane %v2779_v22, 4  ;;  %v2788_v10 = vor.u32 %v2787_v61, %v2786_v32  ;;  %v2791_v39 = vrot.slane %v14542_v23, 7  ;;  %9765 = vmatpush3.bf16.msra.mxu0 %v12017_v31  ;;  %9736 = vmatprep.mubr.bf16.mxu0 %v12297_v27  ;;  %v12389_v60 = vld [vmem:[%s11151_s10 + $0x8] sm:$0x7]  ;;  %v10963_v31 = vld [vmem:[%s14008_s1 + $0x200] sm:$0xff]  }
  0xb9   : > { %14540 = vst [vmem:[#allocation23_spill] sm:$0xff] %v12355_v19  ;;  %v2780_v12 = vsel %vm12222_vm11, %v2776_v37, %v2779_v22  ;;  %v14543_v9 = vshrl.u32 %v11613_v20, 16  ;;  %v2796_v11 = vrot.slane %v14544_v58, 7  ;;  %v12374_v20 = vcombine.low %v2767_v14, %v2772_v47  ;;  %9766 = vmatprep.subr.bf16.mxu0 %v10872_v2  ;;  %v14551_v37 = vld [vmem:[#allocation58_spill] sm:$0xff]  ;;  %v14554_v58 = vld [vmem:[#allocation64_spill] sm:$0xff] }
  0xba   : > { %v2785_v30 = vsel %vm12222_vm11, %v2781_v13, %v2784_v50  ;;  %v2789_v53 = vrot.slane %v2788_v10, 4  ;;  %v2792_v38 = vor.u32 %v2791_v39, %v2790_v1  ;;  %v7867_v46 = vrot.slane %v12034_v52, 9  ;;  %v12393_v52 = vld [vmem:[%s11151_s10 + $0x74] sm:$0x7]  ;;  %v14552_v1 = vld [vmem:[#allocation61_spill] sm:$0xff] }
  0xbb   : > { %v2795_v48 = vrot.slane %v14543_v9, 6  ;;  %14545 = vst [vmem:[#allocation27_spill] sm:$0xff] %v12374_v20  ;;  %v1245_v41 = vrot.slane %v14546_v57, 5  ;;  %v12381_v55 = vcombine.low %v2780_v12, %v2785_v30  ;;  %v1248_v14 = vrot.slane %v12389_v60, 5  ;;  %v14553_v13 = vld [vmem:[#allocation60_spill] sm:$0xff]  ;;  %v10880_v39 = vld [vmem:[%s14008_s1 + $0x358] sm:$0xff]  }
  0xbc   : > { %v2794_v44 = vrot.slane %v2792_v38, 4  ;;  %v14213_v22 = vshrl.u32 %v12393_v52, 16  ;;  %v2793_v49 = vsel %vm12222_vm11, %v2789_v53, %v2792_v38  ;;  %v2799_v61 = vrot.slane %v14550_v34, 6  ;;  %9767 = vmatpush3.bf16.msra.mxu0 %v10872_v2  ;;  %v14556_v53 = vld [vmem:[#allocation110_spill] sm:$0xff] }
  0xbd   : > { %v2797_v59 = vor.u32 %v2796_v11, %v2795_v48  ;;  %14547 = vst [vmem:[#allocation28_spill] sm:$0xff] %v12381_v55  ;;  %v1247_v32 = vrot.slane %v1245_v41, 4  ;;  %v2800_v50 = vrot.slane %v14551_v37, 7  ;;  %v2803_v47 = vrot.slane %v14552_v1, 6  ;;  %9768 = vmatprep.subr.bf16.mxu0 %v10876_v24 }
  0xbe   : > { %v2804_v10 = vrot.slane %v14553_v13, 7  ;;  %v2808_v23 = vrot.slane %v14213_v22, 6  ;;  %v12411_v12 = vsel %vm12384_vm14, %v7867_v46, %v1245_v41  ;;  %v2809_v11 = vrot.slane %v14554_v58, 7  ;;  %9225 = vmatmul.mubr.bf16.gmra.mrb[20].mxu1 %v12263_v16  ;;  %v12424_v41 = vld [vmem:[%s11151_s10 + $0x14] sm:$0x7]  ;;  %v14561_v22 = vld [vmem:[#allocation67_spill] sm:$0xff] }
  0xbf   : > { %v2798_v6 = vsel %vm12222_vm11, %v2794_v44, %v2797_v59  ;;  %v12415_v9 = vsel %vm12384_vm14, %v1247_v32, %v1248_v14  ;;  %v2801_v48 = vor.u32 %v2800_v50, %v2799_v61  ;;  %v7868_v38 = vrot.slane %v14556_v53, 9  ;;  %v14557_v59 = vld [vmem:[#allocation111_spill] sm:$0xff]  ;;  %v12428_v32 = vld [vmem:[%s11151_s10 + $0x80] sm:$0x7]  ;;  %9737 = vmatmul.mubr.bf16.gmra.mrb[4].mxu0 %v12315_v29  ;;  %9228 = vmatprep.mubr.bf16.mxu1 %v12293_v17  ;;  %v14560_v53 = vld [vmem:[#allocation68_spill] sm:$0xff] }
  0xc0   : > { %v12418_v30 = vcombine.low %v2793_v49, %v2798_v6  ;;  %v2805_v2 = vor.u32 %v2804_v10, %v2803_v47  ;;  %v1252_v57 = vrot.slane %v14557_v59, 5  ;;  %v2810_v46 = vor.u32 %v2809_v11, %v2808_v23  ;;  %v14558_v47 = vld [vmem:[#allocation65_spill] sm:$0xff]  ;;  %9740 = vmatprep.mubr.bf16.mxu0 %v12343_v40  ;;  %9769 = vmatpush3.bf16.msra.mxu0 %v10876_v24  ;;  %v10882_v49 = vld [vmem:[%s14008_s1 + $0x360] sm:$0xff]   ;;  %v12463_v16 = vld [vmem:[%s11151_s10 + $0x8c] sm:$0x7] }
  0xc1   : > { %v2802_v44 = vrot.slane %v2801_v48, 4  ;;  %v1255_v14 = vrot.slane %v12424_v41, 5  ;;  %v2812_v10 = vrot.slane %v14558_v47, 6  ;;  %v14559_v48 = vld [vmem:[#allocation66_spill] sm:$0xff]  ;;  %v2816_v59 = vrot.slane %v14560_v53, 6  ;;  %9770 = vmatprep.subr.bf16.mxu0 %v10880_v39  ;;  %v14563_v40 = vld [vmem:[#allocation69_spill] sm:$0xff] }
  0xc2   : > { %14555 = vst [vmem:[#allocation30_spill] sm:$0xff] %v12418_v30  ;;  %v2807_v50 = vrot.slane %v2805_v2, 4  ;;  %v1254_v6 = vrot.slane %v1252_v57, 4  ;;  %v2813_v11 = vrot.slane %v14559_v48, 7  ;;  %v2817_v61 = vrot.slane %v14561_v22, 7 }
  0xc3   : > { %v2806_v23 = vsel %vm12222_vm11, %v2802_v44, %v2805_v2  ;;  %v1253_v24 = vsel %vm12384_vm14, %v7868_v38, %v1252_v57  ;;  %v14562_v2 = vshrl.u32 %v12428_v32, 16  ;;  %v2822_v29 = vrot.slane %v14563_v40, 7  ;;  %v12459_v17 = vld [vmem:[%s11151_s10 + $0x20] sm:$0x7] }
  0xc4   : > { %v2811_v4 = vsel %vm12222_vm11, %v2807_v50, %v2810_v46  ;;  %v1256_v3 = vsel %vm12384_vm14, %v1254_v6, %v1255_v14  ;;  %v2814_v28 = vor.u32 %v2813_v11, %v2812_v10  ;;  %v2818_v26 = vor.u32 %v2817_v61, %v2816_v59  ;;  %v14566_v46 = vld [vmem:[#allocation115_spill] sm:$0xff]  ;;  %9771 = vmatpush3.bf16.msra.mxu0 %v10880_v39 }
  0xc5   : > { %v2821_v44 = vrot.slane %v14562_v2, 6  ;;  %v12452_v27 = vcombine.low %v2806_v23, %v2811_v4  ;;  %v7869_v56 = vrot.slane %v14565_v5, 9  ;;  %v1259_v50 = vrot.slane %v14566_v46, 5  ;;  %v14567_v23 = vld [vmem:[#allocation72_spill] sm:$0xff]  ;;  %9772 = vmatprep.subr.bf16.mxu0 %v10882_v49  ;;  %v14569_v5 = vld [vmem:[#allocation73_spill] sm:$0xff]  ;;  %v14570_v10 = vld [vmem:[#allocation75_spill] sm:$0xff] }
  0xc6   : > { %v1262_v38 = vrot.slane %v12459_v17, 5  ;;  %v2815_v57 = vrot.slane %v2814_v28, 4  ;;  %v2820_v2 = vrot.slane %v2818_v26, 4  ;;  %v14238_v4 = vshrl.u32 %v12463_v16, 16  ;;  %v10884_v39 = vld [vmem:[%s14008_s1 + $0x368] sm:$0xff]   ;;  %9229 = vmatmul.mubr.bf16.gmra.mrb[24].mxu1 %v12311_v0  ;;  %v14572_v0 = vld [vmem:[#allocation76_spill] sm:$0xff] }
  0xc7   : > { %14564 = vst [vmem:[#allocation29_spill] sm:$0xff] %v12452_v27  ;;  %v2823_v51 = vor.u32 %v2822_v29, %v2821_v44  ;;  %v2825_v14 = vrot.slane %v14567_v23, 6  ;;  %v12467_v6 = vcombine.low %v1253_v24, %v1256_v3  ;;  %v1261_v29 = vrot.slane %v1259_v50, 4  ;;  %v14571_v3 = vld [vmem:[#allocation74_spill] sm:$0xff]  ;;  %9741 = vmatmul.mubr.bf16.gmra.mrb[8].mxu0 %v12374_v20  ;;  %9232 = vmatprep.mubr.bf16.mxu1 %v12331_v8  ;;  %v11060_v23 = vld [vmem:[%s11151_s10 + $0x54] sm:$0xf] }
  0xc8   : > { %v2826_v61 = vrot.slane %v14569_v5, 7  ;;  %v2829_v11 = vrot.slane %v14570_v10, 6  ;;  %v2819_v28 = vsel %vm12222_vm11, %v2815_v57, %v2818_v26  ;;  %v2830_v24 = vrot.slane %v14571_v3, 7  ;;  %9744 = vmatprep.mubr.bf16.mxu0 %v12381_v55  ;;  %9773 = vmatpush3.bf16.msra.mxu0 %v10882_v49  ;;  %v10886_v49 = vld [vmem:[%s14008_s1 + $0x370] sm:$0xff]   ;;  %v12888_v5 = vld [vmem:[%s11151_s10 + $0xa8] sm:$0xf] }
  0xc9   : > { %14568 = vst [vmem:[#allocation25_spill] sm:$0xff] %v12467_v6  ;;  %v2824_v59 = vsel %vm12222_vm11, %v2820_v2, %v2823_v51  ;;  %v2834_v44 = vrot.slane %v14238_v4, 6  ;;  %v1260_v46 = vsel %vm12384_vm14, %v7869_v56, %v1259_v50  ;;  %v1263_v26 = vsel %vm12384_vm14, %v1261_v29, %v1262_v38  ;;  %v12499_v50 = vld [vmem:[%s11151_s10 + $0x98] sm:$0x7]  ;;  %9774 = vmatprep.subr.bf16.mxu0 %v10884_v39 }
  0xca   : > { %v2827_v57 = vor.u32 %v2826_v61, %v2825_v14  ;;  %v2835_v51 = vrot.slane %v14572_v0, 7  ;;  %v12490_v2 = vcombine.low %v2819_v28, %v2824_v59  ;;  %v2831_v4 = vor.u32 %v2830_v24, %v2829_v11  ;;  %v14578_v28 = vld [vmem:[#allocation80_spill] sm:$0xff]  ;;  %v14579_v24 = vld [vmem:[#allocation82_spill] sm:$0xff]  ;;  %v10888_v38 = vld [vmem:[%s14008_s1 + $0x378] sm:$0xff]  }
  0xcb   : > { %v7870_v20 = vrot.slane %v14574_v62, 9  ;;  %v1266_v54 = vrot.slane %v14575_v33, 5  ;;  %v1269_v56 = vrot.slane %v12495_v35, 5  ;;  %v12505_v14 = vcombine.low %v1260_v46, %v1263_v26  ;;  %v14577_v33 = vld [vmem:[#allocation79_spill] sm:$0xff] }
  0xcc   : > { %14573 = vst [vmem:[#allocation31_spill] sm:$0xff] %v12490_v2  ;;  %v2828_v8 = vrot.slane %v2827_v57, 4  ;;  %v2836_v36 = vor.u32 %v2835_v51, %v2834_v44  ;;  %v2833_v62 = vrot.slane %v2831_v4, 4  ;;  %v2838_v61 = vrot.slane %v14577_v33, 6  ;;  %v14580_v57 = vld [vmem:[#allocation81_spill] sm:$0xff]  ;;  %9775 = vmatpush3.bf16.msra.mxu0 %v10884_v39 }
  0xcd   : > { %14576 = vst [vmem:[#allocation35_spill] sm:$0xff] %v12505_v14  ;;  %v1268_v29 = vrot.slane %v1266_v54, 4  ;;  %v2839_v59 = vrot.slane %v14578_v28, 7  ;;  %v2842_v44 = vrot.slane %v14579_v24, 6  ;;  %v2843_v51 = vrot.slane %v14580_v57, 7  ;;  %9776 = vmatprep.subr.bf16.mxu0 %v10886_v49 }
  0xce   : > { %v2832_v11 = vsel %vm12222_vm11, %v2828_v8, %v2831_v4  ;;  %v2837_v46 = vsel %vm12222_vm11, %v2833_v62, %v2836_v36  ;;  %v1267_v26 = vsel %vm12384_vm14, %v7870_v20, %v1266_v54  ;;  %v14581_v55 = vshrl.u32 %v12499_v50, 16  ;;  %v14582_v4 = vld [vmem:[#allocation83_spill] sm:$0xff]  ;;  %9233 = vmatmul.mubr.bf16.gmra.mrb[28].mxu1 %v12355_v19  ;;  %v14584_v62 = vld [vmem:[#allocation122_spill] sm:$0xff] }
  0xcf   : > { %v2848_v63 = vrot.slane %v14582_v4, 7  ;;  %v12523_v43 = vcombine.low %v2832_v11, %v2837_v46  ;;  %v1270_v15 = vsel %vm12384_vm14, %v1268_v29, %v1269_v56  ;;  %v2840_v45 = vor.u32 %v2839_v59, %v2838_v61  ;;  %v14585_v20 = vld [vmem:[#allocation123_spill] sm:$0xff]  ;;  %9745 = vmatmul.mubr.bf16.gmra.mrb[12].mxu0 %v12418_v30  ;;  %v12539_v61 = vld [vmem:[%s11151_s10 + $0xa4] sm:$0x7] }
  0xd0   : > { %v2847_v8 = vrot.slane %v14581_v55, 6  ;;  %v2844_v0 = vor.u32 %v2843_v51, %v2842_v44  ;;  %v7871_v54 = vrot.slane %v14584_v62, 9  ;;  %v1273_v57 = vrot.slane %v14585_v20, 5  ;;  %v12531_v55 = vld [vmem:[%s11151_s10 + $0x38] sm:$0x7]  ;;  %v14587_v59 = vld [vmem:[#allocation86_spill] sm:$0xff]  ;;  %9748 = vmatprep.mubr.bf16.mxu0 %v12452_v27  ;;  %9777 = vmatpush3.bf16.msra.mxu0 %v10886_v49 }
  0xd1   : > { %14583 = vst [vmem:[#allocation36_spill] sm:$0xff] %v12523_v43  ;;  %v1276_v39 = vrot.slane %v12531_v55, 5  ;;  %v14586_v11 = vcombine.low %v12411_v12, %v12415_v9  ;;  %v2841_v56 = vrot.slane %v2840_v45, 4  ;;  %v2851_v44 = vrot.slane %v14587_v59, 6  ;;  %v14590_v20 = vld [vmem:[#allocation89_spill] sm:$0xff]  ;;  %v12551_v45 = vld [vmem:[%s14008_s1 + $0x380] sm:$0xff]   ;;  %9778 = vmatprep.subr.bf16.mxu0 %v10888_v38 }
  0xd2   : > { %v2849_v36 = vor.u32 %v2848_v63, %v2847_v8  ;;  %v2846_v29 = vrot.slane %v2844_v0, 4  ;;  %v14269_v63 = vshrl.u32 %v12539_v61, 16  ;;  %v12544_v51 = vcombine.low %v1267_v26, %v1270_v15  ;;  %v14589_v8 = vld [vmem:[#allocation87_spill] sm:$0xff]  ;;  %v14591_v15 = vld [vmem:[#allocation88_spill] sm:$0xff]  ;;  %v14595_v59 = vld [vmem:[#allocation126_spill] sm:$0xff] }
  0xd3   : > { %9252 = vmatprep.mubr.bf16.mxu1 %v14586_v11  ;;  %v1275_v46 = vrot.slane %v1273_v57, 4  ;;  %v2852_v62 = vrot.slane %v14589_v8, 7  ;;  %v2855_v30 = vrot.slane %v14590_v20, 6  ;;  %v2845_v12 = vsel %vm12222_vm11, %v2841_v56, %v2844_v0  ;;  %v14592_v20 = vld [vmem:[#allocation91_spill] sm:$0xff] }
  0xd4   : > { %14588 = vst [vmem:[#allocation38_spill] sm:$0xff] %v12544_v51  ;;  %v2850_v9 = vsel %vm12222_vm11, %v2846_v29, %v2849_v36  ;;  %v2856_v26 = vrot.slane %v14591_v15, 7  ;;  %v2860_v11 = vrot.slane %v14269_v63, 6  ;;  %v1274_v49 = vsel %vm12384_vm14, %v7871_v54, %v1273_v57  ;;  %v14594_v36 = vld [vmem:[#allocation125_spill] sm:$0xff]  ;;  %v12570_v63 = vld [vmem:[%s11151_s10 + $0x44] sm:$0x7]  ;;  %9779 = vmatpush3.bf16.msra.mxu0 %v10888_v38 }
  0xd5   : > { %v1277_v27 = vsel %vm12384_vm14, %v1275_v46, %v1276_v39  ;;  %v2853_v19 = vor.u32 %v2852_v62, %v2851_v44  ;;  %v2861_v8 = vrot.slane %v14592_v20, 7  ;;  %v12565_v0 = vcombine.low %v2845_v12, %v2850_v9  ;;  %v12574_v57 = vld [vmem:[%s11151_s10 + $0xb0] sm:$0x7]  ;;  %v10883_v39 = vld [vmem:[%s14008_s1 + $0xc8] sm:$0xff]   ;;  %9812 = vmatprep.subr.bf16.mxu0 %v12551_v45  ;;  %v14598_v62 = vld [vmem:[#allocation94_spill] sm:$0xff] }
  0xd6   : > { %v2857_v56 = vor.u32 %v2856_v26, %v2855_v30  ;;  %v7872_v29 = vrot.slane %v14594_v36, 9  ;;  %v1280_v15 = vrot.slane %v14595_v59, 5  ;;  %v1283_v28 = vrot.slane %v12570_v63, 5  ;;  %v14597_v59 = vld [vmem:[#allocation93_spill] sm:$0xff]  ;;  %9253 = vmatmul.mubr.bf16.vlgmr.msra.gmra.mrb[0].mxu1 %v12467_v6  ;;  %v14599_v38 = vld [vmem:[#allocation96_spill] sm:$0xff]  ;;  %v14600_v26 = vld [vmem:[#allocation95_spill] sm:$0xff] }
  0xd7   : > { %14593 = vst [vmem:[#allocation37_spill] sm:$0xff] %v12565_v0  ;;  %v2854_v4 = vrot.slane %v2853_v19, 4  ;;  %v2862_v24 = vor.u32 %v2861_v8, %v2860_v11  ;;  %v14271_v54 = vshrl.u32 %v12574_v57, 16  ;;  %v12580_v30 = vcombine.low %v1274_v49, %v1277_v27  ;;  %9749 = vmatmul.mubr.bf16.gmra.mrb[16].mxu0 %v12490_v2  ;;  %9285 = vmatpush3.bf16.msra.mxu1 %v12341_v7  ;;  %v14604_v20 = vld [vmem:[#allocation101_spill] sm:$0xff] }
  0xd8   : > { %v2859_v44 = vrot.slane %v2857_v56, 4  ;;  %v1282_v46 = vrot.slane %v1280_v15, 4  ;;  %v2864_v19 = vrot.slane %v14597_v59, 6  ;;  %v2865_v12 = vrot.slane %v14598_v62, 7  ;;  %9256 = vmatprep.mubr.bf16.mxu1 %v12505_v14  ;;  %9752 = vmatprep.mubr.bf16.mxu0 %v12523_v43  ;;  %v12611_v14 = vld [vmem:[%s11151_s10 + $0x50] sm:$0x7] }
  0xd9   : > { %14596 = vst [vmem:[#allocation34_spill] sm:$0xff] %v12580_v30  ;;  %v2858_v8 = vsel %vm12222_vm11, %v2854_v4, %v2857_v56  ;;  %v2868_v9 = vrot.slane %v14599_v38, 6  ;;  %v2869_v11 = vrot.slane %v14600_v26, 7  ;;  %v1281_v49 = vsel %vm12384_vm14, %v7872_v29, %v1280_v15  ;;  %v14601_v56 = vld [vmem:[#allocation97_spill] sm:$0xff]  ;;  %9286 = vmatprep.subr.bf16.mxu1 %v10883_v39 }
  0xda   : > { %v2863_v27 = vsel %vm12222_vm11, %v2859_v44, %v2862_v24  ;;  %v2873_v4 = vrot.slane %v14271_v54, 6  ;;  %v2874_v36 = vrot.slane %v14601_v56, 7  ;;  %v1284_v7 = vsel %vm12384_vm14, %v1282_v46, %v1283_v28  ;;  %v10885_v24 = vld [vmem:[%s14008_s1 + $0xd0] sm:$0xff]   ;;  %v12615_v43 = vld [vmem:[%s11151_s10 + $0xbc] sm:$0x7] }
  0xdb   : > { %v12601_v6 = vcombine.low %v2858_v8, %v2863_v27  ;;  %v2866_v15 = vor.u32 %v2865_v12, %v2864_v19  ;;  %v7873_v29 = vrot.slane %v12165_v21, 9  ;;  %v2870_v44 = vor.u32 %v2869_v11, %v2868_v9  ;;  %v14603_v46 = vld [vmem:[#allocation100_spill] sm:$0xff]  ;;  %9287 = vmatpush3.bf16.msra.mxu1 %v10883_v39  ;;  %v14606_v11 = vld [vmem:[#allocation103_spill] sm:$0xff]  ;;  %v11041_v59 = vld [vmem:[%s11151_s10 + $0x1c] sm:$0xf] }
  0xdc   : > { %v2875_v54 = vor.u32 %v2874_v36, %v2873_v4  ;;  %v1287_v2 = vrot.slane %v12168_v42, 5  ;;  %v1290_v8 = vrot.slane %v12611_v14, 5  ;;  %v14278_v28 = vshrl.u32 %v12615_v43, 16  ;;  %9288 = vmatprep.subr.bf16.mxu1 %v10885_v24 }
  0xdd   : > { %14602 = vst [vmem:[#allocation39_spill] sm:$0xff] %v12601_v6  ;;  %v2867_v27 = vrot.slane %v2866_v15, 4  ;;  %v2877_v56 = vrot.slane %v14603_v46, 6  ;;  %v2878_v19 = vrot.slane %v14604_v20, 7  ;;  %v12620_v21 = vcombine.low %v1281_v49, %v1284_v7  ;;  %v14607_v15 = vld [vmem:[#allocation102_spill] sm:$0xff] }
  0xde   : > { %v2872_v12 = vrot.slane %v2870_v44, 4  ;;  %v1289_v9 = vrot.slane %v1287_v2, 4  ;;  %v2881_v42 = vrot.slane %v14606_v11, 6  ;;  %v2882_v26 = vrot.slane %v14607_v15, 7  ;;  %v14608_v11 = vld [vmem:[#allocation104_spill] sm:$0xff]  ;;  %9257 = vmatmul.mubr.bf16.gmra.mrb[4].mxu1 %v12544_v51 }
  0xdf   : > { %14605 = vst [vmem:[#allocation42_spill] sm:$0xff] %v12620_v21  ;;  %v2871_v4 = vsel %vm12222_vm11, %v2867_v27, %v2870_v44  ;;  %v2879_v36 = vor.u32 %v2878_v19, %v2877_v56  ;;  %v2886_v46 = vrot.slane %v14278_v28, 6  ;;  %v1288_v49 = vsel %vm12384_vm14, %v7873_v29, %v1287_v2  ;;  %v10887_v56 = vld [vmem:[%s14008_s1 + $0xd8] sm:$0xff]   ;;  %9753 = vmatmul.mubr.bf16.gmra.mrb[20].mxu0 %v12565_v0 }
  0xe0   : > { %v2876_v39 = vsel %vm12222_vm11, %v2872_v12, %v2875_v54  ;;  %v1291_v7 = vsel %vm12384_vm14, %v1289_v9, %v1290_v8  ;;  %v2887_v44 = vrot.slane %v14608_v11, 7  ;;  %v2883_v28 = vor.u32 %v2882_v26, %v2881_v42  ;;  %9260 = vmatprep.mubr.bf16.mxu1 %v12580_v30  ;;  %v12645_v29 = vld [vmem:[%s11151_s10 + $0x58] sm:$0xf]  ;;  %v12649_v12 = vld [vmem:[%s11151_s10 + $0x5c] sm:$0x7]  ;;  %9756 = vmatprep.mubr.bf16.mxu0 %v12601_v6 }
  0xe1   : > { %v12639_v27 = vcombine.low %v2871_v4, %v2876_v39  ;;  %v2880_v19 = vrot.slane %v2879_v36, 4  ;;  %v7874_v54 = vrot.slane %v12188_v18, 9  ;;  %v1294_v8 = vrot.slane %v12645_v29, 5  ;;  %v12653_v4 = vld [vmem:[%s11151_s10 + $0xc0] sm:$0xf]  ;;  %9289 = vmatpush3.bf16.msra.mxu1 %v10885_v24 }
  0xe2   : > { %v2888_v2 = vor.u32 %v2887_v44, %v2886_v46  ;;  %v1297_v9 = vrot.slane %v12649_v12, 5  ;;  %v12656_v26 = vshrl.u32 %v12653_v4, 16  ;;  %v2885_v46 = vrot.slane %v2883_v28, 4  ;;  %v12665_v36 = vld [vmem:[%s11151_s10 + $0xc4] sm:$0xf]  ;;  %9290 = vmatprep.subr.bf16.mxu1 %v10887_v56 }
  0xe3   : > { %14609 = vst [vmem:[#allocation43_spill] sm:$0xff] %v12639_v27  ;;  %v2884_v18 = vsel %vm12222_vm11, %v2880_v19, %v2883_v28  ;;  %v12662_v42 = vshll.u32 %v12653_v4, 16  ;;  %v12668_v39 = vshll.u32 %v12665_v36, 16  ;;  %v12670_v44 = vcombine.low %v1288_v49, %v1291_v7  ;;  %v12676_v24 = vld [vmem:[%s11151_s10 + $0xc8] sm:$0x7]  ;;  %v10889_v28 = vld [vmem:[%s14008_s1 + $0xe0] sm:$0xff]  }
  0xe4   : > { %14610 = vst [vmem:[#allocation45_spill] sm:$0xff] %v12656_v26  ;;  %v1296_v0 = vrot.slane %v1294_v8, 4  ;;  %v12673_v30 = vshrl.u32 %v12665_v36, 16  ;;  %14615 = vst [vmem:[#allocation52_spill] sm:$0xff] %v12676_v24  ;;  %v12679_v19 = vshll.u32 %v12676_v24, 16  ;;  %v2889_v6 = vsel %vm12222_vm11, %v2885_v46, %v2888_v2 }
  0xe5   : > { %14611 = vst [vmem:[#allocation44_spill] sm:$0xff] %v12662_v42  ;;  %14612 = vst [vmem:[#allocation46_spill] sm:$0xff] %v12668_v39  ;;  %v14293_v49 = vshrl.u32 %v12676_v24, 16  ;;  %v5015_v7 = vrot.slane %v12656_v26, 6  ;;  %v5016_v51 = vrot.slane %v12662_v42, 7  ;;  %v12689_v11 = vcombine.low %v2884_v18, %v2889_v6  ;;  %9291 = vmatpush3.bf16.msra.mxu1 %v10887_v56 }
  0xe6   : > { %14613 = vst [vmem:[#allocation49_spill] sm:$0xff] %v12670_v44  ;;  %14614 = vst [vmem:[#allocation50_spill] sm:$0xff] %v12673_v30  ;;  %v1295_v15 = vsel %vm12384_vm14, %v7874_v54, %v1294_v8  ;;  %v5019_v20 = vrot.slane %v12673_v30, 6  ;;  %v5020_v38 = vrot.slane %v12668_v39, 7  ;;  %v1298_v2 = vsel %vm12384_vm14, %v1296_v0, %v1297_v9  ;;  %v12701_v6 = vld [vmem:[%s11151_s10 + $0x60] sm:$0xf]  ;;  %9292 = vmatprep.subr.bf16.mxu1 %v10889_v28 }
  0xe7   : > { %14616 = vst [vmem:[#allocation51_spill] sm:$0xff] %v12679_v19  ;;  %14617 = vst [vmem:[#allocation53_spill] sm:$0xff] %v12689_v11  ;;  %v5017_v46 = vor.u32 %v5016_v51, %v5015_v7  ;;  %v5024_v62 = vrot.slane %v14293_v49, 6  ;;  %v5025_v26 = vrot.slane %v12679_v19, 7  ;;  %v7875_v18 = vrot.slane %v12701_v6, 9  ;;  %v10891_v0 = vld [vmem:[%s14008_s1 + $0xe8] sm:$0xff]   ;;  %9261 = vmatmul.mubr.bf16.gmra.mrb[8].mxu1 %v12620_v21  ;;  %9757 = vmatmul.mubr.bf16.gmra.mrb[24].mxu0 %v12639_v27 }
  0xe8   : > { %v5021_v42 = vor.u32 %v5020_v38, %v5019_v20  ;;  %v12705_v54 = vld [vmem:[%s11151_s10 + $0x64] sm:$0xf]  ;;  %v12709_v30 = vld [vmem:[%s11151_s10 + $0x68] sm:$0x7]  ;;  %9264 = vmatprep.mubr.bf16.mxu1 %v12670_v44  ;;  %v14618_v49 = vmov 0  ;;  %9760 = vmatprep.mubr.bf16.mxu0 %v12689_v11  ;;  %v3227_v44 = vrot.slane %v12424_v41, 7 }
  0xe9   : > { %v1301_v8 = vrot.slane %v12705_v54, 5  ;;  %v1304_v51 = vrot.slane %v12709_v30, 5  ;;  %v5018_v20 = vrot.slane %v5017_v46, 4  ;;  %v5026_v38 = vor.u32 %v5025_v26, %v5024_v62  ;;  %v11036_v21 = vld [vmem:[%s11151_s10 + $0xc] sm:$0xf]  ;;  %9293 = vmatpush3.bf16.msra.mxu1 %v10889_v28 }
  0xea   : > { %v5023_v56 = vrot.slane %v5021_v42, 4  ;;  %v14619_v49 = vsel %vm12720_vm1, 4294967295, %v14618_v49  ;;  %v8060_v46 = vrot.slane %v11036_v21, 11  ;;  %v11037_v26 = vld [vmem:[%s11151_s10 + $0x10] sm:$0xf]  ;;  %9294 = vmatprep.subr.bf16.mxu1 %v10891_v0  ;;  %v12746_v28 = vcombine.low %v1295_v15, %v1298_v2 }
  0xeb   : > { %v1302_v9 = vsel %vm12384_vm14, %v7875_v18, %v1301_v8  ;;  %v1303_v7 = vrot.slane %v1301_v8, 4  ;;  %14620 = vst [vmem:[#allocation107_spill] sm:$0xff] %v14619_v49  ;;  %v5022_v62 = vsel %vm12222_vm11, %v5018_v20, %v5021_v42  ;;  %v3224_v27 = vrot.slane %v11037_v26, 7  ;;  %v12731_v19 = vld [vmem:[%s11151_s10 + $0x6c] sm:$0xf]  ;;  %v10893_v21 = vld [vmem:[%s14008_s1 + $0xf0] sm:$0xff]  }
  0xec   : > { %v7876_v18 = vrot.slane %v12731_v19, 9  ;;  %v5027_v8 = vsel %vm12222_vm11, %v5023_v56, %v5026_v38  ;;  %v12742_v20 = vld [vmem:[%s11151_s10 + $0x70] sm:$0xf]  ;;  %v1311_v26 = vrot.slane %v12393_v52, 5  ;;  %14621 = vst [vmem:[#allocation57_spill] sm:$0xff] %v12746_v28  ;;  %v3231_v33 = vrot.slane %v11041_v59, 7 }
  0xed   : > { %v1305_v42 = vsel %vm12384_vm14, %v1303_v7, %v1304_v51  ;;  %v1308_v41 = vrot.slane %v12742_v20, 5  ;;  %v12748_v11 = vcombine.low %v5022_v62, %v5027_v8  ;;  %v3225_v39 = vsel %vm12720_vm1, %v8060_v46, %v3224_v27  ;;  %v11040_v7 = vld [vmem:[%s11151_s10 + $0x18] sm:$0xf]  ;;  %v12764_v62 = vld [vmem:[%s11151_s10 + $0x7c] sm:$0xf]  ;;  %9295 = vmatpush3.bf16.msra.mxu1 %v10891_v0 }
  0xee   : > { %v3226_v38 = vrot.slane %v3224_v27, 4  ;;  %v12752_v56 = vcombine.low %v1302_v9, %v1305_v42  ;;  %v8061_v25 = vrot.slane %v11040_v7, 11  ;;  %v3234_v10 = vrot.slane %v12459_v17, 7  ;;  %v12760_v15 = vld [vmem:[%s11151_s10 + $0x78] sm:$0xf]  ;;  %9296 = vmatprep.subr.bf16.mxu1 %v10893_v21 }
  0xef   : > { %14622 = vst [vmem:[#allocation58_spill] sm:$0xff] %v12748_v11  ;;  %v1310_v51 = vrot.slane %v1308_v41, 4  ;;  %v7877_v2 = vrot.slane %v12760_v15, 9  ;;  %v1315_v27 = vrot.slane %v12764_v62, 5  ;;  %v1309_v59 = vsel %vm12384_vm14, %v7876_v18, %v1308_v41  ;;  %v10895_v46 = vld [vmem:[%s14008_s1 + $0xf8] sm:$0xff]   ;;  %9265 = vmatmul.mubr.bf16.gmra.mrb[12].mxu1 %v12746_v28  ;;  %9761 = vmatmul.mubr.bf16.gmra.mrb[28].mxu0 %v12748_v11 }
  0xf0   : > { %14623 = vst [vmem:[#allocation61_spill] sm:$0xff] %v12752_v56  ;;  %v3228_v3 = vsel %vm12720_vm1, %v3226_v38, %v3227_v44  ;;  %v3233_v17 = vrot.slane %v3231_v33, 4  ;;  %v3232_v0 = vsel %vm12720_vm1, %v8061_v25, %v3231_v33  ;;  %v1318_v18 = vrot.slane %v12428_v32, 5  ;;  %9268 = vmatprep.mubr.bf16.mxu1 %v12752_v56  ;;  %v11044_v42 = vld [vmem:[%s11151_s10 + $0x24] sm:$0xf] }
  0xf1   : > { %v12767_v9 = vcombine.low %v3225_v39, %v3228_v3  ;;  %v1312_v44 = vsel %vm12384_vm14, %v1310_v51, %v1311_v26  ;;  %v1316_v3 = vsel %vm12384_vm14, %v7877_v2, %v1315_v27  ;;  %v1317_v39 = vrot.slane %v1315_v27, 4  ;;  %v11045_v26 = vld [vmem:[%s11151_s10 + $0x28] sm:$0xf]  ;;  %v12792_v33 = vld [vmem:[%s14008_s1 + $0x100] sm:$0xff]   ;;  %9297 = vmatpush3.bf16.msra.mxu1 %v10893_v21 }
  0xf2   : > { %v3235_v8 = vsel %vm12720_vm1, %v3233_v17, %v3234_v10  ;;  %v8062_v41 = vrot.slane %v11044_v42, 11  ;;  %v3238_v38 = vrot.slane %v11045_v26, 7  ;;  %v3241_v25 = vrot.slane %v12495_v35, 7  ;;  %v12800_v7 = vld [vmem:[%s11151_s10 + $0x84] sm:$0xf]  ;;  %9298 = vmatprep.subr.bf16.mxu1 %v10895_v46 }
  0xf3   : > { %14624 = vst [vmem:[#allocation60_spill] sm:$0xff] %v12767_v9  ;;  %9780 = vmatprep.mubr.bf16.mxu0 %v12767_v9  ;;  %v12795_v51 = vcombine.low %v1309_v59, %v1312_v44  ;;  %v1319_v10 = vsel %vm12384_vm14, %v1317_v39, %v1318_v18  ;;  %v7878_v2 = vrot.slane %v12800_v7, 9  ;;  %v12804_v27 = vld [vmem:[%s11151_s10 + $0x88] sm:$0xf]  ;;  %v12807_v17 = vcombine.low %v3232_v0, %v3235_v8  ;;  %v11048_v26 = vld [vmem:[%s11151_s10 + $0x30] sm:$0xf] }
  0xf4   : > { %v1322_v35 = vrot.slane %v12804_v27, 5  ;;  %v3239_v59 = vsel %vm12720_vm1, %v8062_v41, %v3238_v38  ;;  %v3240_v44 = vrot.slane %v3238_v38, 4  ;;  %v1325_v42 = vrot.slane %v12463_v16, 5  ;;  %v11049_v9 = vld [vmem:[%s11151_s10 + $0x34] sm:$0xf] }
  0xf5   : > { %14625 = vst [vmem:[#allocation110_spill] sm:$0xff] %v12795_v51  ;;  %14626 = vst [vmem:[#allocation111_spill] sm:$0xff] %v12807_v17  ;;  %v12812_v39 = vcombine.low %v1316_v3, %v1319_v10  ;;  %v8063_v11 = vrot.slane %v11048_v26, 11  ;;  %v3245_v56 = vrot.slane %v11049_v9, 7  ;;  %v3248_v0 = vrot.slane %v12531_v55, 7  ;;  %v10892_v55 = vld [vmem:[%s14008_s1 + $0x388] sm:$0xff]   ;;  %9299 = vmatpush3.bf16.msra.mxu1 %v10895_v46 }
  0xf6   : > { %v1324_v18 = vrot.slane %v1322_v35, 4  ;;  %v3242_v21 = vsel %vm12720_vm1, %v3240_v44, %v3241_v25  ;;  %v12820_v8 = vld [vmem:[%s11151_s10 + $0x90] sm:$0xf]  ;;  %v12824_v38 = vld [vmem:[%s11151_s10 + $0x94] sm:$0xf]  ;;  %v1323_v9 = vsel %vm12384_vm14, %v7878_v2, %v1322_v35  ;;  %v1332_v2 = vrot.slane %v12499_v50, 5  ;;  %9332 = vmatprep.subr.bf16.mxu1 %v12792_v33 }
  0xf7   : > { %14627 = vst [vmem:[#allocation65_spill] sm:$0xff] %v12812_v39  ;;  %v7879_v41 = vrot.slane %v12820_v8, 9  ;;  %v1329_v3 = vrot.slane %v12824_v38, 5  ;;  %v12827_v10 = vcombine.low %v3239_v59, %v3242_v21  ;;  %v3247_v44 = vrot.slane %v3245_v56, 4  ;;  %9269 = vmatmul.mubr.bf16.gmra.mrb[16].mxu1 %v12795_v51  ;;  %9781 = vmatmul.mubr.bf16.vlgmr.msra.gmra.mrb[0].mxu0 %v12807_v17  ;;  %v12857_v51 = vld [vmem:[%s11151_s10 + $0xa0] sm:$0xf] }
  0xf8   : > { %v1326_v25 = vsel %vm12384_vm14, %v1324_v18, %v1325_v42  ;;  %v3246_v26 = vsel %vm12720_vm1, %v8063_v11, %v3245_v56  ;;  %v11052_v42 = vld [vmem:[%s11151_s10 + $0x3c] sm:$0xf]  ;;  %v11053_v18 = vld [vmem:[%s11151_s10 + $0x40] sm:$0xf]  ;;  %v3255_v11 = vrot.slane %v12570_v63, 7  ;;  %9272 = vmatprep.mubr.bf16.mxu1 %v12812_v39  ;;  %9813 = vmatpush3.bf16.msra.mxu0 %v12551_v45  ;;  %v8066_v40 = vrot.slane %v11060_v23, 11 }
  0xf9   : > { %14628 = vst [vmem:[#allocation66_spill] sm:$0xff] %v12827_v10  ;;  %v1330_v59 = vsel %vm12384_vm14, %v7879_v41, %v1329_v3  ;;  %v1331_v21 = vrot.slane %v1329_v3, 4  ;;  %v3249_v35 = vsel %vm12720_vm1, %v3247_v44, %v3248_v0  ;;  %v8064_v46 = vrot.slane %v11052_v42, 11  ;;  %v12853_v41 = vld [vmem:[%s11151_s10 + $0x9c] sm:$0xf]  ;;  %9784 = vmatprep.mubr.bf16.mxu0 %v12827_v10  ;;  %9814 = vmatprep.subr.bf16.mxu0 %v10892_v55 }
  0xfa   : > { %v3252_v28 = vrot.slane %v11053_v18, 7  ;;  %v7880_v3 = vrot.slane %v12853_v41, 9  ;;  %v1336_v0 = vrot.slane %v12857_v51, 5  ;;  %v12862_v63 = vcombine.low %v1323_v9, %v1326_v25  ;;  %v11056_v39 = vld [vmem:[%s11151_s10 + $0x4c] sm:$0xf]  ;;  %v10894_v9 = vld [vmem:[%s14008_s1 + $0x390] sm:$0xff]  }
  0xfb   : > { %v1333_v56 = vsel %vm12384_vm14, %v1331_v21, %v1332_v2  ;;  %v12864_v44 = vcombine.low %v3246_v26, %v3249_v35  ;;  %v1339_v21 = vrot.slane %v12539_v61, 5  ;;  %v3259_v45 = vrot.slane %v11056_v39, 7  ;;  %v11057_v26 = vld [vmem:[%s11151_s10 + $0x48] sm:$0xf] }
  0xfc   : > { %14629 = vst [vmem:[#allocation114_spill] sm:$0xff] %v12862_v63  ;;  %v3254_v42 = vrot.slane %v3252_v28, 4  ;;  %v12867_v2 = vcombine.low %v1330_v59, %v1333_v56  ;;  %v3253_v18 = vsel %vm12720_vm1, %v8064_v46, %v3252_v28  ;;  %v1338_v17 = vrot.slane %v1336_v0, 4  ;;  %v12880_v59 = vld [vmem:[%s11151_s10 + $0xac] sm:$0xf]  ;;  %9815 = vmatpush3.bf16.msra.mxu0 %v10892_v55 }
  0xfd   : > { %14630 = vst [vmem:[#allocation115_spill] sm:$0xff] %v12864_v44  ;;  %v8065_v35 = vrot.slane %v11057_v26, 11  ;;  %v3262_v10 = vrot.slane %v12611_v14, 7  ;;  %v1343_v56 = vrot.slane %v12880_v59, 5  ;;  %v1337_v28 = vsel %vm12384_vm14, %v7880_v3, %v1336_v0  ;;  %9816 = vmatprep.subr.bf16.mxu0 %v10894_v9 }
  0xfe   : > { %14631 = vst [vmem:[#allocation118_spill] sm:$0xff] %v12867_v2  ;;  %v3256_v25 = vsel %vm12720_vm1, %v3254_v42, %v3255_v11  ;;  %v1340_v39 = vsel %vm12384_vm14, %v1338_v17, %v1339_v21  ;;  %v3261_v46 = vrot.slane %v3259_v45, 4  ;;  %v7881_v11 = vrot.slane %v12888_v5, 9  ;;  %v10896_v17 = vld [vmem:[%s14008_s1 + $0x398] sm:$0xff]  }
  0xff   : > { %v12891_v42 = vcombine.low %v3253_v18, %v3256_v25  ;;  %v1345_v14 = vrot.slane %v1343_v56, 4  ;;  %v1346_v26 = vrot.slane %v12574_v57, 5  ;;  %v3266_v3 = vrot.slane %v12645_v29, 7  ;;  %9273 = vmatmul.mubr.bf16.gmra.mrb[20].mxu1 %v12862_v63  ;;  %v12906_v18 = vld [vmem:[%s11151_s10 + $0xb8] sm:$0xf]  ;;  %9785 = vmatmul.mubr.bf16.gmra.mrb[4].mxu0 %v12864_v44 }
 0x100   : > { %v3269_v0 = vrot.slane %v12649_v12, 7  ;;  %v12901_v55 = vcombine.low %v1337_v28, %v1340_v39  ;;  %v3260_v21 = vsel %vm12720_vm1, %v8065_v35, %v3259_v45  ;;  %v1350_v23 = vrot.slane %v12906_v18, 5  ;;  %9276 = vmatprep.mubr.bf16.mxu1 %v12867_v2  ;;  %9817 = vmatpush3.bf16.msra.mxu0 %v10894_v9  ;;  %v12921_v35 = vld [vmem:[%s11151_s10 + $0xb4] sm:$0xf] }
 0x101   : > { %14632 = vst [vmem:[#allocation119_spill] sm:$0xff] %v12891_v42  ;;  %v3263_v29 = vsel %vm12720_vm1, %v3261_v46, %v3262_v10  ;;  %v1344_v12 = vsel %vm12384_vm14, %v7881_v11, %v1343_v56  ;;  %v1347_v25 = vsel %vm12384_vm14, %v1345_v14, %v1346_v26  ;;  %v3268_v28 = vrot.slane %v3266_v3, 4  ;;  %9788 = vmatprep.mubr.bf16.mxu0 %v12891_v42  ;;  %v14634_v11 = vld [vmem:[#allocation2_spill] sm:$0xff]  ;;  %v14635_v26 = vld [vmem:[#allocation3_spill] sm:$0xff] }
 0x102   : > { %14633 = vst [vmem:[#allocation122_spill] sm:$0xff] %v12901_v55  ;;  %v3267_v45 = vsel %vm12720_vm1, %v8066_v40, %v3266_v3  ;;  %v7882_v39 = vrot.slane %v12921_v35, 9  ;;  %v1353_v44 = vrot.slane %v12615_v43, 5  ;;  %v3273_v10 = vrot.slane %v12705_v54, 7  ;;  %9818 = vmatprep.subr.bf16.mxu0 %v10896_v17  ;;  %v10898_v40 = vld [vmem:[%s14008_s1 + $0x3a0] sm:$0xff]  }
 0x103   : > { %v3270_v56 = vsel %vm12720_vm1, %v3268_v28, %v3269_v0  ;;  %v1352_v46 = vrot.slane %v1350_v23, 4  ;;  %v1680_v14 = vrot.slane %v14634_v11, 5  ;;  %v1681_v9 = vrot.slane %v14635_v26, 6  ;;  %v14636_v28 = vld [vmem:[#allocation5_spill] sm:$0xff]  ;;  %v14637_v11 = vld [vmem:[#allocation4_spill] sm:$0xff]  ;;  %v10900_v26 = vld [vmem:[%s14008_s1 + $0x3a8] sm:$0xff]  }
 0x104   : > { %v12933_v3 = vcombine.low %v3260_v21, %v3263_v29  ;;  %v12935_v42 = vcombine.low %v1344_v12, %v1347_v25  ;;  %v8067_v2 = vrot.slane %v12701_v6, 11  ;;  %v3276_v54 = vrot.slane %v12709_v30, 7  ;;  %9819 = vmatpush3.bf16.msra.mxu0 %v10896_v17  ;;  %v14638_v29 = vld [vmem:[#allocation6_spill] sm:$0xff] }
 0x105   : > { %v12939_v63 = vcombine.low %v3267_v45, %v3270_v56  ;;  %v1682_v0 = vor.u32 %v1681_v9, %v1680_v14  ;;  %v1684_v58 = vrot.slane %v14636_v28, 5  ;;  %v1685_v22 = vrot.slane %v14637_v11, 6  ;;  %9820 = vmatprep.subr.bf16.mxu0 %v10898_v40 }
 0x106   : > { %v3275_v53 = vrot.slane %v3273_v10, 4  ;;  %v14330_v21 = vshrl.u32 %v12389_v60, 16  ;;  %v1692_v12 = vrot.slane %v14638_v29, 6  ;;  %v8068_v6 = vrot.slane %v12731_v19, 11 }
 0x107   : > { %v1683_v30 = vrot.slane %v1682_v0, 4  ;;  %v1686_v25 = vor.u32 %v1685_v22, %v1684_v58  ;;  %v3280_v45 = vrot.slane %v12742_v20, 7  ;;  %9277 = vmatmul.mubr.bf16.gmra.mrb[24].mxu1 %v12901_v55  ;;  %v1351_v56 = vsel %vm12384_vm14, %v7882_v39, %v1350_v23  ;;  %9789 = vmatmul.mubr.bf16.gmra.mrb[8].mxu0 %v12933_v3  ;;  %v10937_v39 = vld [vmem:[%s14008_s1 + $0x198] sm:$0xff]  }
 0x108   : > { %v1691_v14 = vrot.slane %v14330_v21, 5  ;;  %v3283_v17 = vrot.slane %v12393_v52, 7  ;;  %9280 = vmatprep.mubr.bf16.mxu1 %v12935_v42  ;;  %v1354_v22 = vsel %vm12384_vm14, %v1352_v46, %v1353_v44  ;;  %v3274_v58 = vsel %vm12720_vm1, %v8067_v2, %v3273_v10  ;;  %9792 = vmatprep.mubr.bf16.mxu0 %v12939_v63 }
 0x109   : > { %v1688_v19 = vrot.slane %v1686_v25, 4  ;;  %v3282_v20 = vrot.slane %v3280_v45, 4  ;;  %v3277_v23 = vsel %vm12720_vm1, %v3275_v53, %v3276_v54  ;;  %v1687_v9 = vsel %vm11239_vm5, %v1683_v30, %v1686_v25  ;;  %9821 = vmatpush3.bf16.msra.mxu0 %v10898_v40  ;;  %v10902_v53 = vld [vmem:[%s14008_s1 + $0x3b0] sm:$0xff]  }
 0x10a   : > { %v1693_v0 = vor.u32 %v1692_v12, %v1691_v14  ;;  %v3287_v21 = vrot.slane %v12764_v62, 7  ;;  %v3281_v44 = vsel %vm12720_vm1, %v8068_v6, %v3280_v45  ;;  %v3294_v10 = vrot.slane %v12804_v27, 7  ;;  %9822 = vmatprep.subr.bf16.mxu0 %v10900_v26  ;;  %v10904_v14 = vld [vmem:[%s14008_s1 + $0x3b8] sm:$0xff]  }
 0x10b   : > { %v3284_v2 = vsel %vm12720_vm1, %v3282_v20, %v3283_v17  ;;  %v12976_v46 = vcombine.low %v1351_v56, %v1354_v22  ;;  %v12980_v62 = vcombine.low %v3274_v58, %v3277_v23  ;;  %v8069_v6 = vrot.slane %v12760_v15, 11 }
 0x10c   : > { %v1694_v54 = vsel %vm11239_vm5, %v1688_v19, %v1693_v0  ;;  %v12982_v12 = vcombine.low %v3281_v44, %v3284_v2  ;;  %v3289_v30 = vrot.slane %v3287_v21, 4  ;;  %v3290_v27 = vrot.slane %v12428_v32, 7  ;;  %v13007_v19 = vld [vmem:[%s14008_s1 + $0x3c0] sm:$0xff]  }
 0x10d   : > { %v7939_v40 = vcombine.low %v1687_v9, %v1694_v54  ;;  %9823 = vmatpush3.bf16.msra.mxu0 %v10900_v26  ;;  %v8070_v25 = vrot.slane %v12800_v7, 11  ;;  %v3296_v45 = vrot.slane %v3294_v10, 4  ;;  %v3297_v56 = vrot.slane %v12463_v16, 7 }
 0x10e   : > { %9824 = vmatprep.subr.bf16.mxu0 %v10902_v53  ;;  %v3288_v15 = vsel %vm12720_vm1, %v8069_v6, %v3287_v21  ;;  %v3291_v7 = vsel %vm12720_vm1, %v3289_v30, %v3290_v27  ;;  %v3301_v26 = vrot.slane %v12824_v38, 7  ;;  %v3308_v58 = vrot.slane %v12857_v51, 7  ;;  %v10899_v51 = vld [vmem:[%s14008_s1 + $0x108] sm:$0xff]  }
 0x10f   : > { %9281 = vmatmul.mubr.bf16.gmra.mrb[28].mxu1 %v12976_v46  ;;  %9793 = vmatmul.mubr.bf16.gmra.mrb[12].mxu0 %v12980_v62  ;;  %v3295_v17 = vsel %vm12720_vm1, %v8070_v25, %v3294_v10  ;;  %v3298_v22 = vsel %vm12720_vm1, %v3296_v45, %v3297_v56  ;;  %v13009_v21 = vcombine.low %v3288_v15, %v3291_v7  ;;  %v8071_v38 = vrot.slane %v12820_v8, 11  ;;  %v14640_v10 = vld [vmem:[#allocation9_spill] sm:$0xff] }
 0x110   : > { %9300 = vmatprep.mubr.bf16.mxu1 %v7939_v40  ;;  %9796 = vmatprep.mubr.bf16.mxu0 %v12982_v12  ;;  %v13011_v20 = vcombine.low %v3295_v17, %v3298_v22  ;;  %v3303_v23 = vrot.slane %v3301_v26, 4  ;;  %v3304_v9 = vrot.slane %v12499_v50, 7  ;;  %v8072_v0 = vrot.slane %v12853_v41, 11  ;;  %v10901_v40 = vld [vmem:[%s14008_s1 + $0x110] sm:$0xff]   ;;  %v10903_v7 = vld [vmem:[%s14008_s1 + $0x118] sm:$0xff]  }
 0x111   : > { %9825 = vmatpush3.bf16.msra.mxu0 %v10902_v53  ;;  %v3310_v44 = vrot.slane %v3308_v58, 4  ;;  %v3311_v2 = vrot.slane %v12539_v61, 7  ;;  %v3315_v8 = vrot.slane %v12880_v59, 7  ;;  %v14641_v53 = vld [vmem:[#allocation15_spill] sm:$0xff]  ;;  %v3302_v41 = vsel %vm12720_vm1, %v8071_v38, %v3301_v26  ;;  %v14642_v26 = vld [vmem:[#allocation24_spill] sm:$0xff] }
 0x112   : > { %9826 = vmatprep.subr.bf16.mxu0 %v10904_v14  ;;  %v3305_v54 = vsel %vm12720_vm1, %v3303_v23, %v3304_v9  ;;  %v3322_v6 = vrot.slane %v12906_v18, 7  ;;  %v8073_v27 = vrot.slane %v12888_v5, 11  ;;  %v3318_v45 = vrot.slane %v12574_v57, 7  ;;  %v14643_v5 = vld [vmem:[#allocation32_spill] sm:$0xff]  ;;  %v10905_v9 = vld [vmem:[%s14008_s1 + $0x120] sm:$0xff]  }
 0x113   : > { %v3312_v59 = vsel %vm12720_vm1, %v3310_v44, %v3311_v2  ;;  %v13039_v30 = vcombine.low %v3302_v41, %v3305_v54  ;;  %v3317_v25 = vrot.slane %v3315_v8, 4  ;;  %v8074_v18 = vrot.slane %v12921_v35, 11 }
 0x114   : > { %v3325_v15 = vrot.slane %v12615_v43, 7  ;;  %v3316_v17 = vsel %vm12720_vm1, %v8073_v27, %v3315_v8  ;;  %v5292_v22 = vrot.slane %v12665_v36, 7  ;;  %v8267_v23 = vrot.slane %v12653_v4, 11 }
 0x115   : > { %9827 = vmatpush3.bf16.msra.mxu0 %v10904_v14  ;;  %v3324_v14 = vrot.slane %v3322_v6, 4  ;;  %v3319_v35 = vsel %vm12720_vm1, %v3317_v25, %v3318_v45  ;;  %v1815_v36 = vrot.slane %v14550_v34, 5  ;;  %v1820_v44 = vrot.slane %v14553_v13, 6  ;;  %v14647_v13 = vld [vmem:[#allocation40_spill] sm:$0xff] }
 0x116   : > { %9860 = vmatprep.subr.bf16.mxu0 %v13007_v19  ;;  %v13071_v2 = vcombine.low %v3316_v17, %v3319_v35  ;;  %v5294_v8 = vrot.slane %v5292_v22, 4  ;;  %v5295_v41 = vrot.slane %v12676_v24, 7  ;;  %v1830_v4 = vrot.slane %v14558_v47, 5  ;;  %v14649_v45 = vld [vmem:[#allocation64_spill] sm:$0xff]  ;;  %v14652_v35 = vld [vmem:[#allocation69_spill] sm:$0xff] }
 0x117   : > { %9301 = vmatmul.mubr.bf16.vlgmr.msra.gmra.mrb[0].mxu1 %v14640_v10  ;;  %9797 = vmatmul.mubr.bf16.gmra.mrb[16].mxu0 %v13009_v21  ;;  %v3326_v38 = vsel %vm12720_vm1, %v3324_v14, %v3325_v15  ;;  %v1831_v54 = vrot.slane %v14559_v48, 6  ;;  %v14648_v27 = vshrl.u32 %v12393_v52, 16  ;;  %v1827_v47 = vrot.slane %v14649_v45, 6  ;;  %v14650_v48 = vld [vmem:[#allocation47_spill] sm:$0xff] }
 0x118   : > { %9333 = vmatpush3.bf16.msra.mxu1 %v12792_v33  ;;  %9304 = vmatprep.mubr.bf16.mxu1 %v14641_v53  ;;  %v3309_v33 = vsel %vm12720_vm1, %v8072_v0, %v3308_v58  ;;  %v3323_v58 = vsel %vm12720_vm1, %v8074_v18, %v3322_v6  ;;  %v1819_v0 = vrot.slane %v14552_v1, 5  ;;  %v14646_v6 = vld [vmem:[#allocation67_spill] sm:$0xff]  ;;  %v5293_v18 = vsel %vm12720_vm1, %v8267_v23, %v5292_v22  ;;  %v14656_v22 = vld [vmem:[#allocation74_spill] sm:$0xff] }
 0x119   : > { %9800 = vmatprep.mubr.bf16.mxu0 %v13011_v20  ;;  %9334 = vmatprep.subr.bf16.mxu1 %v10899_v51  ;;  %v13043_v56 = vcombine.low %v3309_v33, %v3312_v59  ;;  %v13073_v10 = vcombine.low %v3323_v58, %v3326_v38  ;;  %v10907_v1 = vld [vmem:[%s14008_s1 + $0x128] sm:$0xff]   ;;  %v1826_v25 = vrot.slane %v14648_v27, 5  ;;  %v5296_v14 = vsel %vm12720_vm1, %v5294_v8, %v5295_v41  ;;  %v14653_v38 = vld [vmem:[#allocation72_spill] sm:$0xff]  ;;  %v14660_v27 = vld [vmem:[#allocation82_spill] sm:$0xff] }
 0x11a   : > { %v1821_v59 = vor.u32 %v1820_v44, %v1819_v0  ;;  %v1832_v15 = vor.u32 %v1831_v54, %v1830_v4  ;;  %v14651_v52 = vshrl.u32 %v12428_v32, 16  ;;  %v1842_v58 = vrot.slane %v14652_v35, 6  ;;  %v14655_v44 = vld [vmem:[#allocation75_spill] sm:$0xff] }
 0x11b   : > { %14644 = vst [vmem:[#allocation123_spill] sm:$0xff] %v13073_v10  ;;  %v1850_v23 = vrot.slane %v14656_v22, 6  ;;  %v13104_v8 = vcombine.low %v5293_v18, %v5296_v14  ;;  %v1828_v4 = vor.u32 %v1827_v47, %v1826_v25  ;;  %v14658_v54 = vld [vmem:[#allocation79_spill] sm:$0xff]  ;;  %v1864_v45 = vrot.slane %v14660_v27, 5  ;;  %v10911_v25 = vld [vmem:[%s14008_s1 + $0x138] sm:$0xff]   ;;  %v14664_v47 = vld [vmem:[#allocation54_spill] sm:$0xff] }
 0x11c   : > { %9335 = vmatpush3.bf16.msra.mxu1 %v10899_v51  ;;  %v1816_v51 = vrot.slane %v14551_v37, 6  ;;  %v1835_v37 = vrot.slane %v14646_v6, 6  ;;  %v1841_v17 = vrot.slane %v14651_v52, 5  ;;  %v1823_v32 = vrot.slane %v1821_v59, 4  ;;  %v14659_v6 = vld [vmem:[#allocation80_spill] sm:$0xff]  ;;  %v14661_v52 = vld [vmem:[#allocation81_spill] sm:$0xff] }
 0x11d   : > { %9336 = vmatprep.subr.bf16.mxu1 %v10901_v40  ;;  %14657 = vst [vmem:[#allocation125_spill] sm:$0xff] %v13104_v8  ;;  %v1865_v35 = vrot.slane %v14661_v52, 6  ;;  %v14662_v18 = vshrl.u32 %v12463_v16, 16 }
 0x11e   : > { %v1817_v33 = vor.u32 %v1816_v51, %v1815_v36  ;;  %v1845_v36 = vrot.slane %v14653_v38, 5  ;;  %v14654_v51 = vld [vmem:[#allocation73_spill] sm:$0xff]  ;;  %v1833_v38 = vrot.slane %v1832_v15, 4 }
 0x11f   : > { %9305 = vmatmul.mubr.bf16.gmra.mrb[4].mxu1 %v14642_v26  ;;  %9801 = vmatmul.mubr.bf16.gmra.mrb[20].mxu0 %v13039_v30  ;;  %v1846_v0 = vrot.slane %v14654_v51, 6  ;;  %v1856_v14 = vrot.slane %v14662_v18, 5 }
 0x120   : > { %9308 = vmatprep.mubr.bf16.mxu1 %v14643_v5  ;;  %9804 = vmatprep.mubr.bf16.mxu0 %v13043_v56  ;;  %v1818_v41 = vrot.slane %v1817_v33, 4  ;;  %v14663_v33 = vld [vmem:[#allocation76_spill] sm:$0xff] }
 0x121   : > { %9337 = vmatpush3.bf16.msra.mxu1 %v10901_v40  ;;  %v14645_v40 = vld [vmem:[#allocation68_spill] sm:$0xff]  ;;  %v1847_v22 = vor.u32 %v1846_v0, %v1845_v36  ;;  %v14666_v36 = vshrl.u32 %v12499_v50, 16  ;;  %v13136_v50 = vld [vmem:[%s14008_s1 + $0x140] sm:$0xff]  }
 0x122   : > { %9338 = vmatprep.subr.bf16.mxu1 %v10903_v7  ;;  %v1834_v34 = vrot.slane %v14645_v40, 5  ;;  %v1849_v40 = vrot.slane %v14655_v44, 5  ;;  %v1843_v44 = vor.u32 %v1842_v58, %v1841_v17  ;;  %v1822_v15 = vsel %vm11239_vm5, %v1818_v41, %v1821_v59  ;;  %v14665_v17 = vld [vmem:[#allocation59_spill] sm:$0xff] }
 0x123   : > { %v1866_v58 = vor.u32 %v1865_v35, %v1864_v45  ;;  %v1871_v0 = vrot.slane %v14666_v36, 5  ;;  %v14670_v45 = vld [vmem:[#allocation87_spill] sm:$0xff] }
 0x124   : > { %v1851_v24 = vor.u32 %v1850_v23, %v1849_v40  ;;  %v14667_v40 = vld [vmem:[#allocation83_spill] sm:$0xff]  ;;  %v1876_v52 = vrot.slane %v14670_v45, 6 }
 0x125   : > { %9339 = vmatpush3.bf16.msra.mxu1 %v10903_v7  ;;  %v1836_v7 = vor.u32 %v1835_v37, %v1834_v34  ;;  %v1860_v34 = vrot.slane %v14658_v54, 5  ;;  %v1861_v37 = vrot.slane %v14659_v6, 6  ;;  %v1872_v23 = vrot.slane %v14667_v40, 6  ;;  %v14668_v54 = vld [vmem:[#allocation116_spill] sm:$0xff]  ;;  %v14676_v40 = vld [vmem:[#allocation95_spill] sm:$0xff] }
 0x126   : > { %9340 = vmatprep.subr.bf16.mxu1 %v10905_v9 }
 0x127   : > { %9309 = vmatmul.mubr.bf16.gmra.mrb[8].mxu1 %v14647_v13  ;;  %9805 = vmatmul.mubr.bf16.gmra.mrb[24].mxu0 %v13071_v2  ;;  %v1838_v51 = vrot.slane %v1836_v7, 4  ;;  %v1862_v16 = vor.u32 %v1861_v37, %v1860_v34  ;;  %v1837_v6 = vsel %vm11239_vm5, %v1833_v38, %v1836_v7  ;;  %v14669_v37 = vld [vmem:[#allocation86_spill] sm:$0xff]  ;;  %v14671_v7 = vld [vmem:[#allocation89_spill] sm:$0xff]  ;;  %v14672_v38 = vld [vmem:[#allocation88_spill] sm:$0xff]  ;;  %v1873_v18 = vor.u32 %v1872_v23, %v1871_v0 }
 0x128   : > { %9312 = vmatprep.mubr.bf16.mxu1 %v14650_v48  ;;  %9808 = vmatprep.mubr.bf16.mxu0 %v13073_v10  ;;  %v1857_v10 = vrot.slane %v14663_v33, 6  ;;  %v1875_v27 = vrot.slane %v14669_v37, 5  ;;  %v1879_v35 = vrot.slane %v14671_v7, 5  ;;  %v14674_v33 = vld [vmem:[#allocation94_spill] sm:$0xff] }
 0x129   : > { %9341 = vmatpush3.bf16.msra.mxu1 %v10905_v9  ;;  %v10909_v9 = vld [vmem:[%s14008_s1 + $0x130] sm:$0xff]   ;;  %v1844_v59 = vsel %vm11239_vm5, %v1838_v51, %v1843_v44  ;;  %v1880_v51 = vrot.slane %v14672_v38, 6  ;;  %v1863_v44 = vrot.slane %v1862_v16, 4  ;;  %v10908_v16 = vld [vmem:[%s14008_s1 + $0x3c8] sm:$0xff]  }
 0x12a   : > { %9342 = vmatprep.subr.bf16.mxu1 %v10907_v1  ;;  %v1858_v34 = vor.u32 %v1857_v10, %v1856_v14  ;;  %v14673_v10 = vld [vmem:[#allocation93_spill] sm:$0xff]  ;;  %v1877_v0 = vor.u32 %v1876_v52, %v1875_v27  ;;  %v14679_v38 = vld [vmem:[#allocation120_spill] sm:$0xff] }
 0x12b   : > { %v1890_v14 = vrot.slane %v14673_v10, 5  ;;  %v1881_v23 = vor.u32 %v1880_v51, %v1879_v35  ;;  %v14682_v35 = vld [vmem:[#allocation97_spill] sm:$0xff] }
 0x12c   : > { %v1902_v51 = vrot.slane %v14682_v35, 6  ;;  %v14690_v35 = vld [vmem:[#allocation130_spill] sm:$0xff] }
 0x12d   : > { %9343 = vmatpush3.bf16.msra.mxu1 %v10907_v1  ;;  %v1829_v1 = vsel %vm11239_vm5, %v1823_v32, %v1828_v4  ;;  %v1848_v32 = vrot.slane %v1847_v22, 4  ;;  %v1853_v4 = vrot.slane %v1851_v24, 4  ;;  %v1868_v22 = vrot.slane %v1866_v58, 4 }
 0x12e   : > { %9344 = vmatprep.subr.bf16.mxu1 %v10909_v9  ;;  %v13131_v41 = vcombine.low %v1822_v15, %v1829_v1  ;;  %v1891_v15 = vrot.slane %v14674_v33, 6  ;;  %v14675_v1 = vld [vmem:[#allocation96_spill] sm:$0xff] }
 0x12f   : > { %9313 = vmatmul.mubr.bf16.gmra.mrb[12].mxu1 %v14664_v47  ;;  %9809 = vmatmul.mubr.bf16.gmra.mrb[28].mxu0 %v13104_v8  ;;  %v1894_v36 = vrot.slane %v14675_v1, 5  ;;  %v1895_v8 = vrot.slane %v14676_v40, 6  ;;  %v1852_v37 = vsel %vm11239_vm5, %v1848_v32, %v1851_v24  ;;  %v1859_v45 = vsel %vm11239_vm5, %v1853_v4, %v1858_v34  ;;  %v14680_v4 = vld [vmem:[#allocation124_spill] sm:$0xff] }
 0x130   : > { %9316 = vmatprep.mubr.bf16.mxu1 %v14665_v17  ;;  %9828 = vmatprep.mubr.bf16.mxu0 %v14668_v54  ;;  %v1867_v24 = vsel %vm11239_vm5, %v1863_v44, %v1866_v58  ;;  %v1874_v32 = vsel %vm11239_vm5, %v1868_v22, %v1873_v18  ;;  %v1892_v34 = vor.u32 %v1891_v15, %v1890_v14  ;;  %v10910_v58 = vld [vmem:[%s14008_s1 + $0x3d0] sm:$0xff]   ;;  %v1878_v22 = vrot.slane %v1877_v0, 4  ;;  %v10912_v0 = vld [vmem:[%s14008_s1 + $0x3d8] sm:$0xff]  }
 0x131   : > { %9345 = vmatpush3.bf16.msra.mxu1 %v10909_v9  ;;  %v13142_v9 = vcombine.low %v1837_v6, %v1844_v59  ;;  %v14677_v6 = vshrl.u32 %v12539_v61, 16  ;;  %v1896_v27 = vor.u32 %v1895_v8, %v1894_v36  ;;  %v14681_v61 = vshrl.u32 %v12574_v57, 16  ;;  %v14683_v33 = vld [vmem:[#allocation100_spill] sm:$0xff]  ;;  %v14684_v8 = vld [vmem:[#allocation101_spill] sm:$0xff]  ;;  %v14685_v57 = vld [vmem:[#allocation103_spill] sm:$0xff] }
 0x132   : > { %9346 = vmatprep.subr.bf16.mxu1 %v10911_v25  ;;  %v13171_v10 = vcombine.low %v1852_v37, %v1859_v45  ;;  %v13176_v44 = vcombine.low %v1867_v24, %v1874_v32  ;;  %v1905_v14 = vrot.slane %v14683_v33, 5  ;;  %v1906_v15 = vrot.slane %v14684_v8, 6  ;;  %v14686_v36 = vld [vmem:[#allocation102_spill] sm:$0xff] }
 0x133   : > { %v1886_v59 = vrot.slane %v14677_v6, 5  ;;  %v1901_v52 = vrot.slane %v14681_v61, 5  ;;  %v1909_v1 = vrot.slane %v14685_v57, 5  ;;  %v1910_v40 = vrot.slane %v14686_v36, 6  ;;  %v14689_v61 = vld [vmem:[#allocation104_spill] sm:$0xff] }
 0x134   : > { %v1893_v37 = vrot.slane %v1892_v34, 4  ;;  %v1898_v45 = vrot.slane %v1896_v27, 4  ;;  %v14688_v32 = vshrl.u32 %v12615_v43, 16  ;;  %v10914_v43 = vld [vmem:[%s14008_s1 + $0x3e0] sm:$0xff]  }
 0x135   : > { %9347 = vmatpush3.bf16.msra.mxu1 %v10911_v25  ;;  %v14678_v25 = vld [vmem:[#allocation91_spill] sm:$0xff]  ;;  %v1903_v6 = vor.u32 %v1902_v51, %v1901_v52  ;;  %v1911_v24 = vor.u32 %v1910_v40, %v1909_v1  ;;  %v1917_v52 = vrot.slane %v14689_v61, 6  ;;  %v10922_v61 = vld [vmem:[%s14008_s1 + $0x3f8] sm:$0xff]  }
 0x136   : > { %9380 = vmatprep.subr.bf16.mxu1 %v13136_v50  ;;  %v1887_v7 = vrot.slane %v14678_v25, 6  ;;  %v1916_v34 = vrot.slane %v14688_v32, 5  ;;  %v13216_v1 = vld [vmem:[%s11151_s10 + $0x8] sm:$0x7]  ;;  %v10918_v32 = vld [vmem:[%s14008_s1 + $0x3f0] sm:$0xff]  }
 0x137   : > { %9317 = vmatmul.mubr.bf16.gmra.mrb[16].mxu1 %v13131_v41  ;;  %9829 = vmatmul.mubr.bf16.vlgmr.msra.gmra.mrb[0].mxu0 %v14679_v38  ;;  %v1904_v51 = vsel %vm11239_vm5, %v1898_v45, %v1903_v6  ;;  %v2250_v36 = vrot.slane %v13216_v1, 6  ;;  %v10916_v40 = vld [vmem:[%s14008_s1 + $0x3e8] sm:$0xff]  }
 0x138   : > { %9320 = vmatprep.mubr.bf16.mxu1 %v13142_v9  ;;  %9861 = vmatpush3.bf16.msra.mxu0 %v13007_v19  ;;  %v1883_v19 = vrot.slane %v1881_v23, 4  ;;  %v1888_v18 = vor.u32 %v1887_v7, %v1886_v59  ;;  %v1882_v59 = vsel %vm11239_vm5, %v1878_v22, %v1881_v23  ;;  %v14687_v7 = vld [vmem:[#allocation127_spill] sm:$0xff]  ;;  %v1897_v23 = vsel %vm11239_vm5, %v1893_v37, %v1896_v27  ;;  %v13201_v22 = vld [vmem:[%s11151_s10 + $0x4] sm:$0xf]  ;;  %v13212_v27 = vld [vmem:[%s11151_s10] sm:$0xf] }
 0x139   : > { %9832 = vmatprep.mubr.bf16.mxu0 %v14680_v4  ;;  %9862 = vmatprep.subr.bf16.mxu0 %v10908_v16  ;;  %v13209_v33 = vcombine.low %v1897_v23, %v1904_v51  ;;  %v1918_v8 = vor.u32 %v1917_v52, %v1916_v34  ;;  %v14693_v37 = vld [vmem:[#allocation132_spill] sm:$0xff]  ;;  %v14697_v52 = vld [vmem:[#allocation135_spill] sm:$0xff]  ;;  %v10924_v51 = vld [vmem:[%s14008_s1 + $0x400] sm:$0xff]  }
 0x13a   : > { %v1889_v25 = vsel %vm11239_vm5, %v1883_v19, %v1888_v18  ;;  %v2247_v19 = vrot.slane %v13201_v22, 6  ;;  %v14698_v23 = vld [vmem:[#allocation11_spill] sm:$0xff] }
 0x13b   : > { %v13207_v18 = vcombine.low %v1882_v59, %v1889_v25  ;;  %14692 = vst [vmem:[#allocation5_spill] sm:$0xff] %v13209_v33  ;;  %v13290_v59 = vld [vmem:[%s11151_s10 + $0xd0] sm:$0xf] }
 0x13c   : > { %9863 = vmatpush3.bf16.msra.mxu0 %v10908_v16  ;;  %v1907_v16 = vor.u32 %v1906_v15, %v1905_v14  ;;  %v1913_v14 = vrot.slane %v1911_v24, 4  ;;  %v7963_v15 = vrot.slane %v13212_v27, 10  ;;  %v2249_v57 = vrot.slane %v2247_v19, 4 }
 0x13d   : > { %9864 = vmatprep.subr.bf16.mxu0 %v10910_v58  ;;  %14691 = vst [vmem:[#allocation126_spill] sm:$0xff] %v13207_v18 }
 0x13e   : > { %v1919_v6 = vsel %vm11239_vm5, %v1913_v14, %v1918_v8  ;;  %v2248_v25 = vsel %vm11668_vm8, %v7963_v15, %v2247_v19  ;;  %v10915_v19 = vld [vmem:[%s14008_s1 + $0x148] sm:$0xff]   ;;  %v14701_v14 = vld [vmem:[#allocation70_spill] sm:$0xff]  ;;  %v14702_v8 = vld [vmem:[#allocation16_spill] sm:$0xff] }
 0x13f   : > { %9321 = vmatmul.mubr.bf16.gmra.mrb[20].mxu1 %v13171_v10  ;;  %9833 = vmatmul.mubr.bf16.gmra.mrb[4].mxu0 %v14687_v7  ;;  %v10917_v15 = vld [vmem:[%s14008_s1 + $0x150] sm:$0xff]  }
 0x140   : > { %9324 = vmatprep.mubr.bf16.mxu1 %v13176_v44  ;;  %9836 = vmatprep.mubr.bf16.mxu0 %v14690_v35 }
 0x141   : > { %9865 = vmatpush3.bf16.msra.mxu0 %v10910_v58  ;;  %v1908_v58 = vrot.slane %v1907_v16, 4  ;;  %v2251_v16 = vsel %vm11668_vm8, %v2249_v57, %v2250_v36  ;;  %v10920_v57 = vld [vmem:[%s14008_s1 + $0x158] sm:$0xff]  }
 0x142   : > { %9866 = vmatprep.subr.bf16.mxu0 %v10912_v0  ;;  %v14703_v36 = vld [vmem:[#allocation77_spill] sm:$0xff] }
 0x143   : > { %v1912_v45 = vsel %vm11239_vm5, %v1908_v58, %v1911_v24  ;;  %v7995_v24 = vcombine.low %v2248_v25, %v2251_v16  ;;  %v14700_v58 = vld [vmem:[#allocation13_spill] sm:$0xff]  ;;  %v13270_v25 = vld [vmem:[%s11151_s10 + $0xc0] sm:$0xf]  ;;  %v13273_v16 = vld [vmem:[%s11151_s10 + $0xc4] sm:$0xf] }
 0x144   : > { %v13237_v34 = vcombine.low %v1912_v45, %v1919_v6  ;;  %v14706_v45 = vld [vmem:[#allocation21_spill] sm:$0xff]  ;;  %v10923_v6 = vld [vmem:[%s14008_s1 + $0x160] sm:$0xff]  }
 0x145   : > { %9867 = vmatpush3.bf16.msra.mxu0 %v10912_v0  ;;  %v14694_v0 = vld [vmem:[#allocation134_spill] sm:$0xff] }
 0x146   : > { %9868 = vmatprep.subr.bf16.mxu0 %v10914_v43  ;;  %14696 = vst [vmem:[#allocation4_spill] sm:$0xff] %v13237_v34 }
 0x147   : > { %9325 = vmatmul.mubr.bf16.gmra.mrb[24].mxu1 %v13207_v18  ;;  %9837 = vmatmul.mubr.bf16.gmra.mrb[8].mxu0 %v14693_v37  ;;  %v14753_v18 = vld [vmem:[#allocation35_spill] sm:$0xff] }
 0x148   : > { %9328 = vmatprep.mubr.bf16.mxu1 %v13209_v33  ;;  %9840 = vmatprep.mubr.bf16.mxu0 %v14694_v0  ;;  %v14746_v33 = vld [vmem:[#allocation105_spill] sm:$0xff] }
 0x149   : > { %9869 = vmatpush3.bf16.msra.mxu0 %v10914_v43  ;;  %v14699_v43 = vld [vmem:[#allocation63_spill] sm:$0xff] }
 0x14a   : > { %9870 = vmatprep.subr.bf16.mxu0 %v10916_v40 }
 0x14d   : > { %9871 = vmatpush3.bf16.msra.mxu0 %v10916_v40  ;;  %v14704_v40 = vld [vmem:[#allocation20_spill] sm:$0xff] }
 0x14e   : > { %9872 = vmatprep.subr.bf16.mxu0 %v10918_v32 }
 0x14f   : > { %9329 = vmatmul.mubr.bf16.gmra.mrb[28].mxu1 %v13237_v34  ;;  %9841 = vmatmul.mubr.bf16.gmra.mrb[12].mxu0 %v14697_v52  ;;  %v14742_v34 = vld [vmem:[#allocation51_spill] sm:$0xff] }
 0x150   : > { %9348 = vmatprep.mubr.bf16.mxu1 %v7995_v24  ;;  %9844 = vmatprep.mubr.bf16.mxu0 %v14698_v23  ;;  %v10925_v24 = vld [vmem:[%s14008_s1 + $0x168] sm:$0xff]   ;;  %v10932_v23 = vld [vmem:[%s14008_s1 + $0x420] sm:$0xff]   ;;  %v3935_v35 = vrot.slane %v14742_v34, 5 }
 0x151   : > { %9873 = vmatpush3.bf16.msra.mxu0 %v10918_v32  ;;  %v13277_v32 = vcombine.low %v13270_v25, %v13273_v16 }
 0x152   : > { %9874 = vmatprep.subr.bf16.mxu0 %v10922_v61 }
 0x153   : > { %14707 = vst [vmem:[#allocation6_spill] sm:$0xff] %v13277_v32 }
 0x155   : > { %9875 = vmatpush3.bf16.msra.mxu0 %v10922_v61  ;;  %v14708_v61 = vld [vmem:[#allocation92_spill] sm:$0xff] }
 0x156   : > { %9908 = vmatprep.subr.bf16.mxu0 %v10924_v51 }
 0x157   : > { %9349 = vmatmul.mubr.bf16.vlgmr.msra.gmra.mrb[0].mxu1 %v14699_v43  ;;  %9845 = vmatmul.mubr.bf16.gmra.mrb[16].mxu0 %v14700_v58  ;;  %v14710_v43 = vld [vmem:[#allocation98_spill] sm:$0xff]  ;;  %v2686_v58 = vrot.slane %v14636_v28, 6  ;;  %v14724_v28 = vshrl.u32 %v12389_v60, 16  ;;  %v14726_v60 = vld [vmem:[#allocation55_spill] sm:$0xff] }
 0x158   : > { %9381 = vmatpush3.bf16.msra.mxu1 %v13136_v50  ;;  %9352 = vmatprep.mubr.bf16.mxu1 %v14701_v14  ;;  %v14705_v50 = vld [vmem:[#allocation85_spill] sm:$0xff] }
 0x159   : > { %9848 = vmatprep.mubr.bf16.mxu0 %v14702_v8  ;;  %9382 = vmatprep.subr.bf16.mxu1 %v10915_v19  ;;  %v14719_v8 = vld [vmem:[#allocation3_spill] sm:$0xff] }
 0x15c   : > { %9383 = vmatpush3.bf16.msra.mxu1 %v10915_v19  ;;  %v14709_v19 = vld [vmem:[#allocation23_spill] sm:$0xff] }
 0x15d   : > { %9384 = vmatprep.subr.bf16.mxu1 %v10917_v15 }
 0x15f   : > { %9353 = vmatmul.mubr.bf16.gmra.mrb[4].mxu1 %v14703_v36  ;;  %9849 = vmatmul.mubr.bf16.gmra.mrb[20].mxu0 %v14704_v40  ;;  %v13306_v40 = vld [vmem:[%s14008_s1 + $0x180] sm:$0xff]   ;;  %v2691_v36 = vrot.slane %v14724_v28, 6  ;;  %v10938_v28 = vld [vmem:[%s14008_s1 + $0x438] sm:$0xff]  }
 0x160   : > { %9356 = vmatprep.mubr.bf16.mxu1 %v14705_v50  ;;  %9852 = vmatprep.mubr.bf16.mxu0 %v14706_v45  ;;  %v2683_v50 = vrot.slane %v14719_v8, 7 }
 0x161   : > { %9385 = vmatpush3.bf16.msra.mxu1 %v10917_v15  ;;  %v13287_v15 = vld [vmem:[%s11151_s10 + $0xcc] sm:$0xf] }
 0x162   : > { %9386 = vmatprep.subr.bf16.mxu1 %v10920_v57  ;;  %v8309_v45 = vcombine.low %v13287_v15, %v13290_v59 }
 0x165   : > { %9387 = vmatpush3.bf16.msra.mxu1 %v10920_v57  ;;  %v10927_v57 = vld [vmem:[%s14008_s1 + $0x170] sm:$0xff]  }
 0x166   : > { %9388 = vmatprep.subr.bf16.mxu1 %v10923_v6 }
 0x167   : > { %9357 = vmatmul.mubr.bf16.gmra.mrb[8].mxu1 %v14708_v61  ;;  %9853 = vmatmul.mubr.bf16.gmra.mrb[24].mxu0 %v14709_v19  ;;  %v10929_v19 = vld [vmem:[%s14008_s1 + $0x178] sm:$0xff]  }
 0x168   : > { %9360 = vmatprep.mubr.bf16.mxu1 %v14710_v43  ;;  %9856 = vmatprep.mubr.bf16.mxu0 %v13277_v32  ;;  %v14711_v32 = vld [vmem:[#allocation106_spill] sm:$0xff]  ;;  %v14712_v43 = vld [vmem:[#allocation109_spill] sm:$0xff] }
 0x169   : > { %9389 = vmatpush3.bf16.msra.mxu1 %v10923_v6  ;;  %v14713_v6 = vld [vmem:[#allocation18_spill] sm:$0xff] }
 0x16a   : > { %9390 = vmatprep.subr.bf16.mxu1 %v10925_v24 }
 0x16d   : > { %9391 = vmatpush3.bf16.msra.mxu1 %v10925_v24  ;;  %v10926_v24 = vld [vmem:[%s14008_s1 + $0x408] sm:$0xff]  }
 0x16e   : > { %9392 = vmatprep.subr.bf16.mxu1 %v10927_v57 }
 0x16f   : > { %9361 = vmatmul.mubr.bf16.gmra.mrb[12].mxu1 %v14711_v32  ;;  %9857 = vmatmul.mubr.bf16.gmra.mrb[28].mxu0 %v8309_v45  ;;  %v14714_v32 = vld [vmem:[#allocation113_spill] sm:$0xff]  ;;  %v14715_v45 = vld [vmem:[#allocation26_spill] sm:$0xff] }
 0x170   : > { %9364 = vmatprep.mubr.bf16.mxu1 %v14712_v43  ;;  %9876 = vmatprep.mubr.bf16.mxu0 %v14713_v6  ;;  %v14716_v43 = vld [vmem:[#allocation117_spill] sm:$0xff]  ;;  %v14718_v6 = vld [vmem:[#allocation2_spill] sm:$0xff] }
 0x171   : > { %9393 = vmatpush3.bf16.msra.mxu1 %v10927_v57  ;;  %v14717_v57 = vld [vmem:[#allocation33_spill] sm:$0xff]  ;;  %v2682_v61 = vrot.slane %v14718_v6, 6 }
 0x172   : > { %9394 = vmatprep.subr.bf16.mxu1 %v10929_v19 }
 0x173   : > { %v2684_v6 = vor.u32 %v2683_v50, %v2682_v61  ;;  %v10934_v50 = vld [vmem:[%s14008_s1 + $0x428] sm:$0xff]   ;;  %v14736_v61 = vld [vmem:[#allocation50_spill] sm:$0xff] }
 0x175   : > { %9395 = vmatpush3.bf16.msra.mxu1 %v10929_v19  ;;  %v10928_v19 = vld [vmem:[%s14008_s1 + $0x410] sm:$0xff]  }
 0x176   : > { %9428 = vmatprep.subr.bf16.mxu1 %v13306_v40 }
 0x177   : > { %9365 = vmatmul.mubr.bf16.gmra.mrb[16].mxu1 %v14714_v32  ;;  %9877 = vmatmul.mubr.bf16.vlgmr.msra.gmra.mrb[0].mxu0 %v14715_v45  ;;  %v2687_v32 = vrot.slane %v14637_v11, 7  ;;  %v14721_v45 = vld [vmem:[#allocation41_spill] sm:$0xff]  ;;  %v2692_v11 = vrot.slane %v14638_v29, 7  ;;  %v14728_v29 = vld [vmem:[#allocation62_spill] sm:$0xff] }
 0x178   : > { %9368 = vmatprep.mubr.bf16.mxu1 %v14716_v43  ;;  %9909 = vmatpush3.bf16.msra.mxu0 %v10924_v51  ;;  %v10930_v51 = vld [vmem:[%s14008_s1 + $0x418] sm:$0xff]   ;;  %v14722_v43 = vld [vmem:[#allocation128_spill] sm:$0xff] }
 0x179   : > { %9880 = vmatprep.mubr.bf16.mxu0 %v14717_v57  ;;  %9910 = vmatprep.subr.bf16.mxu0 %v10926_v24  ;;  %v14720_v57 = vld [vmem:[#allocation121_spill] sm:$0xff]  ;;  %v2688_v8 = vor.u32 %v2687_v32, %v2686_v58  ;;  %v2693_v14 = vor.u32 %v2692_v11, %v2691_v36  ;;  %v14727_v32 = vld [vmem:[#allocation131_spill] sm:$0xff]  ;;  %v10936_v36 = vld [vmem:[%s14008_s1 + $0x430] sm:$0xff]  }
 0x17a   : > { %v14725_v58 = vld [vmem:[#allocation129_spill] sm:$0xff] }
 0x17b   : > { %v14730_v11 = vld [vmem:[#allocation133_spill] sm:$0xff] }
 0x17c   : > { %9911 = vmatpush3.bf16.msra.mxu0 %v10926_v24  ;;  %v14723_v24 = vld [vmem:[#allocation48_spill] sm:$0xff] }
 0x17d   : > { %9912 = vmatprep.subr.bf16.mxu0 %v10928_v19 }
 0x17f   : > { %9369 = vmatmul.mubr.bf16.gmra.mrb[20].mxu1 %v14720_v57  ;;  %9881 = vmatmul.mubr.bf16.gmra.mrb[4].mxu0 %v14721_v45  ;;  %v2685_v57 = vrot.slane %v2684_v6, 4  ;;  %v2690_v45 = vrot.slane %v2688_v8, 4 }
 0x180   : > { %9372 = vmatprep.mubr.bf16.mxu1 %v14722_v43  ;;  %9884 = vmatprep.mubr.bf16.mxu0 %v14723_v24  ;;  %v13378_v24 = vshrl.u32 %v13287_v15, 16 }
 0x181   : > { %9913 = vmatpush3.bf16.msra.mxu0 %v10928_v19  ;;  %v2689_v19 = vsel %vm12222_vm11, %v2685_v57, %v2688_v8  ;;  %v14732_v57 = vld [vmem:[#allocation78_spill] sm:$0xff] }
 0x182   : > { %9914 = vmatprep.subr.bf16.mxu0 %v10930_v51 }
 0x185   : > { %9915 = vmatpush3.bf16.msra.mxu0 %v10930_v51  ;;  %v2694_v51 = vsel %vm12222_vm11, %v2690_v45, %v2693_v14  ;;  %v10933_v14 = vld [vmem:[%s14008_s1 + $0x188] sm:$0xff]   ;;  %v14733_v45 = vld [vmem:[#allocation45_spill] sm:$0xff] }
 0x186   : > { %9916 = vmatprep.subr.bf16.mxu0 %v10932_v23  ;;  %v8035_v6 = vcombine.low %v2689_v19, %v2694_v51  ;;  %v3916_v8 = vrot.slane %v14733_v45, 4  ;;  %v14735_v51 = vld [vmem:[#allocation46_spill] sm:$0xff] }
 0x187   : > { %9373 = vmatmul.mubr.bf16.gmra.mrb[24].mxu1 %v14725_v58  ;;  %9885 = vmatmul.mubr.bf16.gmra.mrb[8].mxu0 %v14726_v60  ;;  %v14740_v60 = vld [vmem:[#allocation90_spill] sm:$0xff] }
 0x188   : > { %9376 = vmatprep.mubr.bf16.mxu1 %v14727_v32  ;;  %9888 = vmatprep.mubr.bf16.mxu0 %v14728_v29  ;;  %v14731_v29 = vld [vmem:[#allocation71_spill] sm:$0xff]  ;;  %v13381_v32 = vshll.u32 %v13287_v15, 16 }
 0x189   : > { %9917 = vmatpush3.bf16.msra.mxu0 %v10932_v23  ;;  %v13359_v23 = vld [vmem:[%s14008_s1 + $0x440] sm:$0xff]  }
 0x18a   : > { %9918 = vmatprep.subr.bf16.mxu0 %v10934_v50  ;;  %v5829_v58 = vrot.slane %v13381_v32, 5 }
 0x18d   : > { %9919 = vmatpush3.bf16.msra.mxu0 %v10934_v50  ;;  %v14734_v50 = vld [vmem:[#allocation44_spill] sm:$0xff] }
 0x18e   : > { %9920 = vmatprep.subr.bf16.mxu0 %v10936_v36  ;;  %v3919_v19 = vrot.slane %v14734_v50, 5 }
 0x18f   : > { %9377 = vmatmul.mubr.bf16.gmra.mrb[28].mxu1 %v14730_v11  ;;  %9889 = vmatmul.mubr.bf16.gmra.mrb[12].mxu0 %v14731_v29  ;;  %v14738_v29 = vld [vmem:[#allocation84_spill] sm:$0xff] }
 0x190   : > { %9396 = vmatprep.mubr.bf16.mxu1 %v8035_v6  ;;  %9892 = vmatprep.mubr.bf16.mxu0 %v14732_v57  ;;  %v3925_v6 = vrot.slane %v14735_v51, 5  ;;  %v3929_v57 = vrot.slane %v14736_v61, 4  ;;  %v10935_v11 = vld [vmem:[%s14008_s1 + $0x190] sm:$0xff]  }
 0x191   : > { %9921 = vmatpush3.bf16.msra.mxu0 %v10936_v36  ;;  %v14737_v36 = vld [vmem:[#allocation14_spill] sm:$0xff] }
 0x192   : > { %9922 = vmatprep.subr.bf16.mxu0 %v10938_v28 }
 0x195   : > { %9923 = vmatpush3.bf16.msra.mxu0 %v10938_v28  ;;  %v14739_v28 = vld [vmem:[#allocation12_spill] sm:$0xff] }
 0x196   : > { %9956 = vmatprep.subr.bf16.mxu0 %v13359_v23 }
 0x197   : > { %9397 = vmatmul.mubr.bf16.vlgmr.msra.gmra.mrb[0].mxu1 %v14737_v36  ;;  %9893 = vmatmul.mubr.bf16.gmra.mrb[16].mxu0 %v14738_v29  ;;  %v13384_v36 = vshll.u32 %v13290_v59, 16  ;;  %v3920_v29 = vor.u32 %v3919_v19, %v3916_v8  ;;  %v13398_v8 = vld [vmem:[%s11151_s10 + $0xd4] sm:$0x7]  ;;  %v14745_v19 = vld [vmem:[#allocation22_spill] sm:$0xff] }
 0x198   : > { %9429 = vmatpush3.bf16.msra.mxu1 %v13306_v40  ;;  %9400 = vmatprep.mubr.bf16.mxu1 %v14739_v28  ;;  %v13387_v40 = vshrl.u32 %v13290_v59, 16  ;;  %v5826_v28 = vrot.slane %v13378_v24, 4 }
 0x199   : > { %9896 = vmatprep.mubr.bf16.mxu0 %v14740_v60  ;;  %14741 = vst [vmem:[#allocation9_spill] sm:$0xff] %v13384_v36  ;;  %9430 = vmatprep.subr.bf16.mxu1 %v10933_v14  ;;  %v3930_v60 = vor.u32 %v3929_v57, %v3925_v6  ;;  %v5835_v43 = vrot.slane %v13384_v36, 5  ;;  %v3921_v0 = vrot.slane %v3920_v29, 4  ;;  %v14743_v57 = vld [vmem:[#allocation19_spill] sm:$0xff] }
 0x19a   : > { %v5839_v52 = vrot.slane %v13387_v40, 4  ;;  %v5830_v7 = vor.u32 %v5829_v58, %v5826_v28  ;;  %v14748_v58 = vld [vmem:[#allocation17_spill] sm:$0xff] }
 0x19b   : > { %v3931_v37 = vrot.slane %v3930_v60, 4  ;;  %v13405_v60 = vshll.u32 %v13398_v8, 16  ;;  %v3926_v4 = vsel %vm11206_vm2, %v3921_v0, %v3925_v6  ;;  %v10941_v0 = vld [vmem:[%s14008_s1 + $0x1a8] sm:$0xff]   ;;  %v10945_v28 = vld [vmem:[%s14008_s1 + $0x1b8] sm:$0xff]  }
 0x19c   : > { %9431 = vmatpush3.bf16.msra.mxu1 %v10933_v14  ;;  %v14744_v14 = vld [vmem:[#allocation99_spill] sm:$0xff]  ;;  %v5840_v29 = vor.u32 %v5839_v52, %v5835_v43 }
 0x19d   : > { %9432 = vmatprep.subr.bf16.mxu1 %v10935_v11  ;;  %v3936_v36 = vsel %vm11206_vm2, %v3931_v37, %v3935_v35  ;;  %v5845_v52 = vrot.slane %v13405_v60, 5  ;;  %v14749_v35 = vld [vmem:[#allocation108_spill] sm:$0xff]  ;;  %v14750_v37 = vld [vmem:[#allocation27_spill] sm:$0xff] }
 0x19f   : > { %9401 = vmatmul.mubr.bf16.gmra.mrb[4].mxu1 %v14743_v57  ;;  %9897 = vmatmul.mubr.bf16.gmra.mrb[20].mxu0 %v14744_v14  ;;  %v10939_v14 = vld [vmem:[%s14008_s1 + $0x1a0] sm:$0xff]  }
 0x1a0   : > { %9404 = vmatprep.mubr.bf16.mxu1 %v14745_v19  ;;  %9900 = vmatprep.mubr.bf16.mxu0 %v14746_v33  ;;  %v13414_v19 = vcombine.low %v3926_v4, %v3936_v36  ;;  %v5831_v33 = vrot.slane %v5830_v7, 4  ;;  %v14751_v36 = vld [vmem:[#allocation28_spill] sm:$0xff] }
 0x1a1   : > { %9433 = vmatpush3.bf16.msra.mxu1 %v10935_v11  ;;  %v5841_v11 = vrot.slane %v5840_v29, 4  ;;  %v14754_v29 = vld [vmem:[#allocation29_spill] sm:$0xff] }
 0x1a2   : > { %9434 = vmatprep.subr.bf16.mxu1 %v10937_v39  ;;  %v5836_v4 = vsel %vm11206_vm2, %v5831_v33, %v5835_v43  ;;  %v14752_v33 = vld [vmem:[#allocation30_spill] sm:$0xff] }
 0x1a3   : > { %v5846_v7 = vsel %vm11206_vm2, %v5841_v11, %v5845_v52  ;;  %v10947_v43 = vld [vmem:[%s14008_s1 + $0x1c0] sm:$0xff]   ;;  %v14756_v52 = vld [vmem:[#allocation31_spill] sm:$0xff] }
 0x1a4   : > { %v8334_v6 = vcombine.low %v5836_v4, %v5846_v7  ;;  %v14755_v11 = vld [vmem:[#allocation38_spill] sm:$0xff]  ;;  %v10944_v4 = vld [vmem:[%s14008_s1 + $0x450] sm:$0xff]   ;;  %v10946_v7 = vld [vmem:[%s14008_s1 + $0x458] sm:$0xff]  }
 0x1a5   : > { %9435 = vmatpush3.bf16.msra.mxu1 %v10937_v39  ;;  %v10943_v39 = vld [vmem:[%s14008_s1 + $0x1b0] sm:$0xff]  }
 0x1a6   : > { %9436 = vmatprep.subr.bf16.mxu1 %v10939_v14 }
 0x1a7   : > { %9405 = vmatmul.mubr.bf16.gmra.mrb[8].mxu1 %v14748_v58  ;;  %9901 = vmatmul.mubr.bf16.gmra.mrb[24].mxu0 %v14749_v35 }
 0x1a8   : > { %9408 = vmatprep.mubr.bf16.mxu1 %v14750_v37  ;;  %9904 = vmatprep.mubr.bf16.mxu0 %v13414_v19 }
 0x1a9   : > { %9437 = vmatpush3.bf16.msra.mxu1 %v10939_v14  ;;  %v10942_v14 = vld [vmem:[%s14008_s1 + $0x448] sm:$0xff]  }
 0x1aa   : > { %9438 = vmatprep.subr.bf16.mxu1 %v10941_v0 }
 0x1ad   : > { %9439 = vmatpush3.bf16.msra.mxu1 %v10941_v0  ;;  %v14757_v0 = vld [vmem:[#allocation34_spill] sm:$0xff] }
 0x1ae   : > { %9440 = vmatprep.subr.bf16.mxu1 %v10943_v39 }
 0x1af   : > { %9409 = vmatmul.mubr.bf16.gmra.mrb[12].mxu1 %v14751_v36  ;;  %9905 = vmatmul.mubr.bf16.gmra.mrb[28].mxu0 %v8334_v6  ;;  %v14759_v6 = vld [vmem:[#allocation42_spill] sm:$0xff] }
 0x1b0   : > { %9412 = vmatprep.mubr.bf16.mxu1 %v14752_v33  ;;  %9924 = vmatprep.mubr.bf16.mxu0 %v14753_v18 }
 0x1b1   : > { %9441 = vmatpush3.bf16.msra.mxu1 %v10943_v39  ;;  %v14758_v39 = vld [vmem:[#allocation36_spill] sm:$0xff] }
 0x1b2   : > { %9442 = vmatprep.subr.bf16.mxu1 %v10945_v28 }
 0x1b5   : > { %9443 = vmatpush3.bf16.msra.mxu1 %v10945_v28  ;;  %v14760_v28 = vld [vmem:[#allocation37_spill] sm:$0xff] }
 0x1b6   : > { %9476 = vmatprep.subr.bf16.mxu1 %v10947_v43 }
 0x1b7   : > { %9413 = vmatmul.mubr.bf16.gmra.mrb[16].mxu1 %v14754_v29  ;;  %9925 = vmatmul.mubr.bf16.vlgmr.msra.gmra.mrb[0].mxu0 %v14755_v11  ;;  %v8059_v11 = vrot.slane %v13212_v27, 11 }
 0x1b8   : > { %9416 = vmatprep.mubr.bf16.mxu1 %v14756_v52  ;;  %9957 = vmatpush3.bf16.msra.mxu0 %v13359_v23  ;;  %v14761_v23 = vld [vmem:[#allocation49_spill] sm:$0xff] }
 0x1b9   : > { %9928 = vmatprep.mubr.bf16.mxu0 %v14757_v0  ;;  %9958 = vmatprep.subr.bf16.mxu0 %v10942_v14  ;;  %v3217_v0 = vrot.slane %v13201_v22, 7  ;;  %v14764_v22 = vld [vmem:[#allocation43_spill] sm:$0xff] }
 0x1bb   : > { %v3219_v18 = vrot.slane %v3217_v0, 4 }
 0x1bc   : > { %9959 = vmatpush3.bf16.msra.mxu0 %v10942_v14  ;;  %v10948_v14 = vld [vmem:[%s14008_s1 + $0x460] sm:$0xff]  }
 0x1bd   : > { %9960 = vmatprep.subr.bf16.mxu0 %v10944_v4 }
 0x1bf   : > { %9417 = vmatmul.mubr.bf16.gmra.mrb[20].mxu1 %v14758_v39  ;;  %9929 = vmatmul.mubr.bf16.gmra.mrb[4].mxu0 %v14759_v6  ;;  %v3220_v39 = vrot.slane %v13216_v1, 7  ;;  %v10950_v6 = vld [vmem:[%s14008_s1 + $0x468] sm:$0xff]   ;;  %v10952_v1 = vld [vmem:[%s14008_s1 + $0x470] sm:$0xff]  }
 0x1c0   : > { %9420 = vmatprep.mubr.bf16.mxu1 %v14760_v28  ;;  %9932 = vmatprep.mubr.bf16.mxu0 %v14761_v23  ;;  %v14762_v23 = vld [vmem:[#allocation39_spill] sm:$0xff]  ;;  %v14765_v28 = vld [vmem:[#allocation61_spill] sm:$0xff] }
 0x1c1   : > { %9961 = vmatpush3.bf16.msra.mxu0 %v10944_v4  ;;  %v14763_v4 = vld [vmem:[#allocation57_spill] sm:$0xff]  ;;  %v3221_v27 = vsel %vm12720_vm1, %v3219_v18, %v3220_v39  ;;  %v10956_v18 = vld [vmem:[%s14008_s1 + $0x480] sm:$0xff]   ;;  %v14769_v39 = vld [vmem:[#allocation60_spill] sm:$0xff] }
 0x1c2   : > { %9962 = vmatprep.subr.bf16.mxu0 %v10946_v7 }
 0x1c5   : > { %9963 = vmatpush3.bf16.msra.mxu0 %v10946_v7  ;;  %v3218_v7 = vsel %vm12720_vm1, %v8059_v11, %v3217_v0  ;;  %v14768_v11 = vld [vmem:[#allocation65_spill] sm:$0xff]  ;;  %v10949_v0 = vld [vmem:[%s14008_s1 + $0x1c8] sm:$0xff]  }
 0x1c6   : > { %9964 = vmatprep.subr.bf16.mxu0 %v10948_v14  ;;  %v8091_v52 = vcombine.low %v3218_v7, %v3221_v27  ;;  %v10951_v7 = vld [vmem:[%s14008_s1 + $0x1d0] sm:$0xff]   ;;  %v8165_v27 = vrot.slane %v13270_v25, 9 }
 0x1c7   : > { %9421 = vmatmul.mubr.bf16.gmra.mrb[24].mxu1 %v14762_v23  ;;  %9933 = vmatmul.mubr.bf16.gmra.mrb[8].mxu0 %v14763_v4  ;;  %v10954_v4 = vld [vmem:[%s14008_s1 + $0x478] sm:$0xff]  }
 0x1c8   : > { %9424 = vmatprep.mubr.bf16.mxu1 %v14764_v22  ;;  %9936 = vmatprep.mubr.bf16.mxu0 %v14765_v28  ;;  %v14766_v28 = vld [vmem:[#allocation53_spill] sm:$0xff]  ;;  %v14767_v22 = vld [vmem:[#allocation110_spill] sm:$0xff] }
 0x1c9   : > { %9965 = vmatpush3.bf16.msra.mxu0 %v10948_v14  ;;  %v14772_v14 = vld [vmem:[#allocation118_spill] sm:$0xff] }
 0x1ca   : > { %9966 = vmatprep.subr.bf16.mxu0 %v10950_v6 }
 0x1cd   : > { %9967 = vmatpush3.bf16.msra.mxu0 %v10950_v6  ;;  %v14770_v6 = vld [vmem:[#allocation114_spill] sm:$0xff] }
 0x1ce   : > { %9968 = vmatprep.subr.bf16.mxu0 %v10952_v1 }
 0x1cf   : > { %9425 = vmatmul.mubr.bf16.gmra.mrb[28].mxu1 %v14766_v28  ;;  %9937 = vmatmul.mubr.bf16.gmra.mrb[12].mxu0 %v14767_v22 }
 0x1d0   : > { %9444 = vmatprep.mubr.bf16.mxu1 %v8091_v52  ;;  %9940 = vmatprep.mubr.bf16.mxu0 %v14768_v11  ;;  %v14771_v52 = vld [vmem:[#allocation111_spill] sm:$0xff] }
 0x1d1   : > { %9969 = vmatpush3.bf16.msra.mxu0 %v10952_v1 }
 0x1d2   : > { %9970 = vmatprep.subr.bf16.mxu0 %v10954_v4 }
 0x1d5   : > { %9971 = vmatpush3.bf16.msra.mxu0 %v10954_v4  ;;  %v4202_v4 = vrot.slane %v13273_v16, 5  ;;  %v6112_v16 = vrot.slane %v13290_v59, 5 }
 0x1d6   : > { %10004 = vmatprep.subr.bf16.mxu0 %v10956_v18 }
 0x1d7   : > { %9445 = vmatmul.mubr.bf16.vlgmr.msra.gmra.mrb[0].mxu1 %v14769_v39  ;;  %9941 = vmatmul.mubr.bf16.gmra.mrb[16].mxu0 %v14770_v6  ;;  %v4204_v1 = vrot.slane %v4202_v4, 4  ;;  %v11068_v39 = vld [vmem:[%s11151_s10 + $0xc8] sm:$0x7]  ;;  %v14773_v6 = vld [vmem:[#allocation66_spill] sm:$0xff]  ;;  %v4203_v25 = vsel %vm12384_vm14, %v8165_v27, %v4202_v4 }
 0x1d8   : > { %9477 = vmatpush3.bf16.msra.mxu1 %v10947_v43  ;;  %9448 = vmatprep.mubr.bf16.mxu1 %v14771_v52  ;;  %v4205_v49 = vrot.slane %v11068_v39, 5  ;;  %v10953_v43 = vld [vmem:[%s14008_s1 + $0x1d8] sm:$0xff]   ;;  %v10955_v39 = vld [vmem:[%s14008_s1 + $0x1e0] sm:$0xff]   ;;  %v10957_v4 = vld [vmem:[%s14008_s1 + $0x1e8] sm:$0xff]  }
 0x1d9   : > { %9944 = vmatprep.mubr.bf16.mxu0 %v14772_v14  ;;  %9478 = vmatprep.subr.bf16.mxu1 %v10949_v0  ;;  %v14774_v14 = vld [vmem:[#allocation115_spill] sm:$0xff] }
 0x1da   : > { %v14775_v27 = vld [vmem:[#allocation119_spill] sm:$0xff] }
 0x1dc   : > { %9479 = vmatpush3.bf16.msra.mxu1 %v10949_v0  ;;  %v4206_v0 = vsel %vm12384_vm14, %v4204_v1, %v4205_v49 }
 0x1dd   : > { %9480 = vmatprep.subr.bf16.mxu1 %v10951_v7 }
 0x1df   : > { %9449 = vmatmul.mubr.bf16.gmra.mrb[4].mxu1 %v14773_v6  ;;  %9945 = vmatmul.mubr.bf16.gmra.mrb[20].mxu0 %v12901_v55  ;;  %v13515_v6 = vcombine.low %v4203_v25, %v4206_v0  ;;  %v8343_v55 = vrot.slane %v13287_v15, 9  ;;  %v10961_v0 = vld [vmem:[%s14008_s1 + $0x1f8] sm:$0xff]  }
 0x1e0   : > { %9452 = vmatprep.mubr.bf16.mxu1 %v14774_v14  ;;  %9948 = vmatprep.mubr.bf16.mxu0 %v12935_v42  ;;  %v6114_v14 = vrot.slane %v6112_v16, 4 }
 0x1e1   : > { %9481 = vmatpush3.bf16.msra.mxu1 %v10951_v7  ;;  %v6115_v7 = vrot.slane %v13398_v8, 5  ;;  %v6113_v49 = vsel %vm12384_vm14, %v8343_v55, %v6112_v16  ;;  %v10958_v55 = vld [vmem:[%s14008_s1 + $0x488] sm:$0xff]  }
 0x1e2   : > { %9482 = vmatprep.subr.bf16.mxu1 %v10953_v43  ;;  %v10965_v16 = vld [vmem:[%s14008_s1 + $0x208] sm:$0xff]  }
 0x1e3   : > { %v6116_v1 = vsel %vm12384_vm14, %v6114_v14, %v6115_v7  ;;  %v10962_v14 = vld [vmem:[%s14008_s1 + $0x498] sm:$0xff]   ;;  %v4470_v7 = vrot.slane %v14734_v50, 6 }
 0x1e4   : > { %v8360_v25 = vcombine.low %v6113_v49, %v6116_v1  ;;  %v4474_v49 = vrot.slane %v14735_v51, 6  ;;  %v14778_v1 = vld [vmem:[#allocation52_spill] sm:$0xff] }
 0x1e5   : > { %9483 = vmatpush3.bf16.msra.mxu1 %v10953_v43  ;;  %v10959_v43 = vld [vmem:[%s14008_s1 + $0x1f0] sm:$0xff]   ;;  %v14779_v51 = vshrl.u32 %v14778_v1, 16 }
 0x1e6   : > { %9484 = vmatprep.subr.bf16.mxu1 %v10955_v39 }
 0x1e7   : > { %9453 = vmatmul.mubr.bf16.gmra.mrb[8].mxu1 %v14775_v27  ;;  %9949 = vmatmul.mubr.bf16.gmra.mrb[24].mxu0 %v12976_v46 }
 0x1e8   : > { %9456 = vmatprep.mubr.bf16.mxu1 %v12933_v3  ;;  %9952 = vmatprep.mubr.bf16.mxu0 %v13515_v6 }
 0x1e9   : > { %9485 = vmatpush3.bf16.msra.mxu1 %v10955_v39  ;;  %v4469_v39 = vrot.slane %v14733_v45, 5  ;;  %v10967_v45 = vld [vmem:[%s14008_s1 + $0x210] sm:$0xff]  }
 0x1ea   : > { %9486 = vmatprep.subr.bf16.mxu1 %v10957_v4 }
 0x1eb   : > { %v4471_v50 = vor.u32 %v4470_v7, %v4469_v39 }
 0x1ed   : > { %9487 = vmatpush3.bf16.msra.mxu1 %v10957_v4  ;;  %v4473_v4 = vrot.slane %v14736_v61, 5 }
 0x1ee   : > { %9488 = vmatprep.subr.bf16.mxu1 %v10959_v43 }
 0x1ef   : > { %9457 = vmatmul.mubr.bf16.gmra.mrb[12].mxu1 %v12939_v63  ;;  %9953 = vmatmul.mubr.bf16.gmra.mrb[28].mxu0 %v8360_v25  ;;  %v4475_v61 = vor.u32 %v4474_v49, %v4473_v4  ;;  %v4481_v25 = vrot.slane %v14742_v34, 6  ;;  %v14781_v34 = vld [vmem:[#allocation124_spill] sm:$0xff]  ;;  %v6391_v49 = vrot.slane %v13405_v60, 6 }
 0x1f0   : > { %9460 = vmatprep.mubr.bf16.mxu1 %v12980_v62  ;;  %9972 = vmatprep.mubr.bf16.mxu0 %v14641_v53  ;;  %v10960_v53 = vld [vmem:[%s14008_s1 + $0x490] sm:$0xff]  }
 0x1f1   : > { %9489 = vmatpush3.bf16.msra.mxu1 %v10959_v43  ;;  %v4480_v43 = vrot.slane %v14779_v51, 5 }
 0x1f2   : > { %9490 = vmatprep.subr.bf16.mxu1 %v10961_v0 }
 0x1f5   : > { %9491 = vmatpush3.bf16.msra.mxu1 %v10961_v0  ;;  %v6383_v0 = vrot.slane %v13387_v40, 5 }
 0x1f6   : > { %9524 = vmatprep.subr.bf16.mxu1 %v10963_v31 }
 0x1f7   : > { %9461 = vmatmul.mubr.bf16.gmra.mrb[16].mxu1 %v12982_v12  ;;  %9973 = vmatmul.mubr.bf16.vlgmr.msra.gmra.mrb[0].mxu0 %v14642_v26  ;;  %v10964_v26 = vld [vmem:[%s14008_s1 + $0x4a0] sm:$0xff]  }
 0x1f8   : > { %9464 = vmatprep.mubr.bf16.mxu1 %v13009_v21  ;;  %10005 = vmatpush3.bf16.msra.mxu0 %v10956_v18  ;;  %v14776_v18 = vld [vmem:[#allocation123_spill] sm:$0xff] }
 0x1f9   : > { %9976 = vmatprep.mubr.bf16.mxu0 %v14643_v5  ;;  %10006 = vmatprep.subr.bf16.mxu0 %v10958_v55  ;;  %v10966_v5 = vld [vmem:[%s14008_s1 + $0x4a8] sm:$0xff]  }
 0x1fc   : > { %10007 = vmatpush3.bf16.msra.mxu0 %v10958_v55 }
 0x1fd   : > { %10008 = vmatprep.subr.bf16.mxu0 %v10960_v53 }
 0x1ff   : > { %9465 = vmatmul.mubr.bf16.gmra.mrb[20].mxu1 %v13011_v20  ;;  %9977 = vmatmul.mubr.bf16.gmra.mrb[4].mxu0 %v14647_v13  ;;  %v10968_v13 = vld [vmem:[%s14008_s1 + $0x4b0] sm:$0xff]  }
 0x200   : > { %9468 = vmatprep.mubr.bf16.mxu1 %v13039_v30  ;;  %9980 = vmatprep.mubr.bf16.mxu0 %v14650_v48  ;;  %v10970_v48 = vld [vmem:[%s14008_s1 + $0x4b8] sm:$0xff]  }
 0x201   : > { %10009 = vmatpush3.bf16.msra.mxu0 %v10960_v53  ;;  %v6388_v53 = vshrl.u32 %v13398_v8, 16 }
 0x202   : > { %10010 = vmatprep.subr.bf16.mxu0 %v10962_v14 }
 0x203   : > { %v6390_v4 = vrot.slane %v6388_v53, 5 }
 0x205   : > { %10011 = vmatpush3.bf16.msra.mxu0 %v10962_v14  ;;  %v4472_v14 = vrot.slane %v4471_v50, 4  ;;  %v10974_v50 = vld [vmem:[%s14008_s1 + $0x4c8] sm:$0xff]  }
 0x206   : > { %10012 = vmatprep.subr.bf16.mxu0 %v10964_v26 }
 0x207   : > { %9469 = vmatmul.mubr.bf16.gmra.mrb[24].mxu1 %v13043_v56  ;;  %9981 = vmatmul.mubr.bf16.gmra.mrb[8].mxu0 %v14664_v47  ;;  %v14777_v47 = vld [vmem:[#allocation112_spill] sm:$0xff]  ;;  %v4476_v1 = vsel %vm11239_vm5, %v4472_v14, %v4475_v61 }
 0x208   : > { %9472 = vmatprep.mubr.bf16.mxu1 %v13071_v2  ;;  %9984 = vmatprep.mubr.bf16.mxu0 %v14665_v17  ;;  %v13582_v17 = vld [vmem:[%s14008_s1 + $0x4c0] sm:$0xff]   ;;  %v14788_v14 = vld [vmem:[#allocation132_spill] sm:$0xff] }
 0x209   : > { %10013 = vmatpush3.bf16.msra.mxu0 %v10964_v26  ;;  %v4477_v26 = vrot.slane %v4475_v61, 4  ;;  %v14786_v61 = vld [vmem:[#allocation130_spill] sm:$0xff] }
 0x20a   : > { %10014 = vmatprep.subr.bf16.mxu0 %v10966_v5 }
 0x20d   : > { %10015 = vmatpush3.bf16.msra.mxu0 %v10966_v5  ;;  %v4482_v5 = vor.u32 %v4481_v25, %v4480_v43  ;;  %v10971_v43 = vld [vmem:[%s14008_s1 + $0x220] sm:$0xff]  }
 0x20e   : > { %10016 = vmatprep.subr.bf16.mxu0 %v10968_v13 }
 0x20f   : > { %9473 = vmatmul.mubr.bf16.gmra.mrb[28].mxu1 %v14776_v18  ;;  %9985 = vmatmul.mubr.bf16.gmra.mrb[12].mxu0 %v13131_v41  ;;  %v4483_v51 = vsel %vm11239_vm5, %v4477_v26, %v4482_v5 }
 0x210   : > { %9492 = vmatprep.mubr.bf16.mxu1 %v14777_v47  ;;  %9988 = vmatprep.mubr.bf16.mxu0 %v13142_v9  ;;  %v14783_v47 = vld [vmem:[#allocation127_spill] sm:$0xff]  ;;  %v13624_v25 = vcombine.low %v4476_v1, %v4483_v51  ;;  %v14793_v51 = vld [vmem:[#allocation77_spill] sm:$0xff] }
 0x211   : > { %10017 = vmatpush3.bf16.msra.mxu0 %v10968_v13  ;;  %v10969_v13 = vld [vmem:[%s14008_s1 + $0x218] sm:$0xff]   ;;  %v14792_v1 = vld [vmem:[#allocation11_spill] sm:$0xff] }
 0x212   : > { %10018 = vmatprep.subr.bf16.mxu0 %v10970_v48 }
 0x215   : > { %10019 = vmatpush3.bf16.msra.mxu0 %v10970_v48  ;;  %v14782_v48 = vld [vmem:[#allocation126_spill] sm:$0xff] }
 0x216   : > { %10052 = vmatprep.subr.bf16.mxu0 %v13582_v17 }
 0x217   : > { %9493 = vmatmul.mubr.bf16.vlgmr.msra.gmra.mrb[0].mxu1 %v14668_v54  ;;  %9989 = vmatmul.mubr.bf16.gmra.mrb[16].mxu0 %v13171_v10  ;;  %v6379_v54 = vrot.slane %v13378_v24, 5 }
 0x218   : > { %9525 = vmatpush3.bf16.msra.mxu1 %v10963_v31  ;;  %9496 = vmatprep.mubr.bf16.mxu1 %v14679_v38  ;;  %v6380_v38 = vrot.slane %v13381_v32, 6  ;;  %v14780_v31 = vld [vmem:[#allocation9_spill] sm:$0xff] }
 0x219   : > { %9992 = vmatprep.mubr.bf16.mxu0 %v13176_v44  ;;  %9526 = vmatprep.subr.bf16.mxu1 %v10965_v16  ;;  %v6384_v55 = vrot.slane %v14780_v31, 6 }
 0x21a   : > { %v6381_v39 = vor.u32 %v6380_v38, %v6379_v54  ;;  %v6392_v38 = vor.u32 %v6391_v49, %v6390_v4  ;;  %v14791_v4 = vld [vmem:[#allocation70_spill] sm:$0xff] }
 0x21b   : > { %v6385_v7 = vor.u32 %v6384_v55, %v6383_v0  ;;  %v10973_v0 = vld [vmem:[%s14008_s1 + $0x228] sm:$0xff]   ;;  %v14787_v55 = vld [vmem:[#allocation4_spill] sm:$0xff]  ;;  %v10979_v49 = vld [vmem:[%s14008_s1 + $0x240] sm:$0xff]  }
 0x21c   : > { %9527 = vmatpush3.bf16.msra.mxu1 %v10965_v16  ;;  %v14784_v16 = vld [vmem:[#allocation5_spill] sm:$0xff] }
 0x21d   : > { %9528 = vmatprep.subr.bf16.mxu1 %v10967_v45  ;;  %v6387_v54 = vrot.slane %v6385_v7, 4 }
 0x21f   : > { %9497 = vmatmul.mubr.bf16.gmra.mrb[4].mxu1 %v14781_v34  ;;  %9993 = vmatmul.mubr.bf16.gmra.mrb[20].mxu0 %v14782_v48  ;;  %v6393_v5 = vsel %vm11239_vm5, %v6387_v54, %v6392_v38  ;;  %v10976_v54 = vld [vmem:[%s14008_s1 + $0x4d0] sm:$0xff]   ;;  %v10978_v38 = vld [vmem:[%s14008_s1 + $0x4d8] sm:$0xff]  }
 0x220   : > { %9500 = vmatprep.mubr.bf16.mxu1 %v14783_v47  ;;  %9996 = vmatprep.mubr.bf16.mxu0 %v14784_v16  ;;  %v10977_v47 = vld [vmem:[%s14008_s1 + $0x238] sm:$0xff]  }
 0x221   : > { %9529 = vmatpush3.bf16.msra.mxu1 %v10967_v45  ;;  %v6382_v45 = vrot.slane %v6381_v39, 4  ;;  %v14789_v39 = vld [vmem:[#allocation134_spill] sm:$0xff] }
 0x222   : > { %9530 = vmatprep.subr.bf16.mxu1 %v10969_v13 }
 0x223   : > { %v6386_v26 = vsel %vm11239_vm5, %v6382_v45, %v6385_v7  ;;  %v14790_v7 = vld [vmem:[#allocation135_spill] sm:$0xff]  ;;  %v14795_v45 = vld [vmem:[#allocation85_spill] sm:$0xff] }
 0x224   : > { %v8385_v34 = vcombine.low %v6386_v26, %v6393_v5  ;;  %v10980_v26 = vld [vmem:[%s14008_s1 + $0x4e0] sm:$0xff]   ;;  %v10982_v5 = vld [vmem:[%s14008_s1 + $0x4e8] sm:$0xff]  }
 0x225   : > { %9531 = vmatpush3.bf16.msra.mxu1 %v10969_v13  ;;  %v10975_v13 = vld [vmem:[%s14008_s1 + $0x230] sm:$0xff]  }
 0x226   : > { %9532 = vmatprep.subr.bf16.mxu1 %v10971_v43 }
 0x227   : > { %9501 = vmatmul.mubr.bf16.gmra.mrb[8].mxu1 %v14786_v61  ;;  %9997 = vmatmul.mubr.bf16.gmra.mrb[24].mxu0 %v14787_v55  ;;  %v14797_v61 = vld [vmem:[#allocation92_spill] sm:$0xff] }
 0x228   : > { %9504 = vmatprep.mubr.bf16.mxu1 %v14788_v14  ;;  %10000 = vmatprep.mubr.bf16.mxu0 %v13624_v25  ;;  %v14798_v14 = vld [vmem:[#allocation20_spill] sm:$0xff] }
 0x229   : > { %9533 = vmatpush3.bf16.msra.mxu1 %v10971_v43  ;;  %v14794_v43 = vld [vmem:[#allocation13_spill] sm:$0xff] }
 0x22a   : > { %9534 = vmatprep.subr.bf16.mxu1 %v10973_v0 }
 0x22d   : > { %9535 = vmatpush3.bf16.msra.mxu1 %v10973_v0  ;;  %v14796_v0 = vld [vmem:[#allocation16_spill] sm:$0xff] }
 0x22e   : > { %9536 = vmatprep.subr.bf16.mxu1 %v10975_v13 }
 0x22f   : > { %9505 = vmatmul.mubr.bf16.gmra.mrb[12].mxu1 %v14789_v39  ;;  %10001 = vmatmul.mubr.bf16.gmra.mrb[28].mxu0 %v8385_v34  ;;  %v14801_v34 = vld [vmem:[#allocation106_spill] sm:$0xff]  ;;  %v14803_v39 = vld [vmem:[#allocation109_spill] sm:$0xff] }
 0x230   : > { %9508 = vmatprep.mubr.bf16.mxu1 %v14790_v7  ;;  %10020 = vmatprep.mubr.bf16.mxu0 %v14791_v4  ;;  %v10984_v7 = vld [vmem:[%s14008_s1 + $0x4f0] sm:$0xff]   ;;  %v10986_v4 = vld [vmem:[%s14008_s1 + $0x4f8] sm:$0xff]  }
 0x231   : > { %9537 = vmatpush3.bf16.msra.mxu1 %v10975_v13  ;;  %v14800_v13 = vld [vmem:[#allocation21_spill] sm:$0xff] }
 0x232   : > { %9538 = vmatprep.subr.bf16.mxu1 %v10977_v47 }
 0x235   : > { %9539 = vmatpush3.bf16.msra.mxu1 %v10977_v47  ;;  %v14802_v47 = vld [vmem:[#allocation23_spill] sm:$0xff] }
 0x236   : > { %9572 = vmatprep.subr.bf16.mxu1 %v10979_v49 }
 0x237   : > { %9509 = vmatmul.mubr.bf16.gmra.mrb[16].mxu1 %v14792_v1  ;;  %10021 = vmatmul.mubr.bf16.vlgmr.msra.gmra.mrb[0].mxu0 %v14793_v51  ;;  %v14805_v1 = vld [vmem:[#allocation113_spill] sm:$0xff]  ;;  %v14806_v51 = vld [vmem:[#allocation10_spill] sm:$0xff] }
 0x238   : > { %9512 = vmatprep.mubr.bf16.mxu1 %v14794_v43  ;;  %10053 = vmatpush3.bf16.msra.mxu0 %v13582_v17  ;;  %v14799_v17 = vld [vmem:[#allocation98_spill] sm:$0xff]  ;;  %v14807_v43 = vld [vmem:[#allocation117_spill] sm:$0xff] }
 0x239   : > { %10024 = vmatprep.mubr.bf16.mxu0 %v14795_v45  ;;  %10054 = vmatprep.subr.bf16.mxu0 %v10974_v50  ;;  %v10988_v45 = vld [vmem:[%s14008_s1 + $0x500] sm:$0xff]  }
 0x23c   : > { %10055 = vmatpush3.bf16.msra.mxu0 %v10974_v50  ;;  %v14804_v50 = vld [vmem:[#allocation6_spill] sm:$0xff] }
 0x23d   : > { %10056 = vmatprep.subr.bf16.mxu0 %v10976_v54 }
 0x23f   : > { %9513 = vmatmul.mubr.bf16.gmra.mrb[20].mxu1 %v14796_v0  ;;  %10025 = vmatmul.mubr.bf16.gmra.mrb[4].mxu0 %v14797_v61  ;;  %v14809_v0 = vld [vmem:[#allocation121_spill] sm:$0xff]  ;;  %v14810_v61 = vld [vmem:[#allocation26_spill] sm:$0xff] }
 0x240   : > { %9516 = vmatprep.mubr.bf16.mxu1 %v14798_v14  ;;  %10028 = vmatprep.mubr.bf16.mxu0 %v14799_v17  ;;  %v14811_v14 = vld [vmem:[#allocation128_spill] sm:$0xff] }
 0x241   : > { %10057 = vmatpush3.bf16.msra.mxu0 %v10976_v54  ;;  %v10981_v54 = vld [vmem:[%s14008_s1 + $0x248] sm:$0xff]   ;;  %v10983_v17 = vld [vmem:[%s14008_s1 + $0x250] sm:$0xff]  }
 0x242   : > { %10058 = vmatprep.subr.bf16.mxu0 %v10978_v38 }
 0x245   : > { %10059 = vmatpush3.bf16.msra.mxu0 %v10978_v38  ;;  %v14808_v38 = vld [vmem:[#allocation18_spill] sm:$0xff] }
 0x246   : > { %10060 = vmatprep.subr.bf16.mxu0 %v10980_v26 }
 0x247   : > { %9517 = vmatmul.mubr.bf16.gmra.mrb[24].mxu1 %v14800_v13  ;;  %10029 = vmatmul.mubr.bf16.gmra.mrb[8].mxu0 %v14801_v34  ;;  %v14813_v13 = vld [vmem:[#allocation129_spill] sm:$0xff]  ;;  %v14815_v34 = vld [vmem:[#allocation131_spill] sm:$0xff] }
 0x248   : > { %9520 = vmatprep.mubr.bf16.mxu1 %v14802_v47  ;;  %10032 = vmatprep.mubr.bf16.mxu0 %v14803_v39  ;;  %v6658_v47 = vrot.slane %v13290_v59, 6  ;;  %v10987_v39 = vld [vmem:[%s14008_s1 + $0x260] sm:$0xff]   ;;  %v14818_v59 = vld [vmem:[#allocation55_spill] sm:$0xff] }
 0x249   : > { %10061 = vmatpush3.bf16.msra.mxu0 %v10980_v26  ;;  %v10985_v26 = vld [vmem:[%s14008_s1 + $0x258] sm:$0xff]  }
 0x24a   : > { %10062 = vmatprep.subr.bf16.mxu0 %v10982_v5 }
 0x24d   : > { %10063 = vmatpush3.bf16.msra.mxu0 %v10982_v5  ;;  %v14812_v5 = vld [vmem:[#allocation33_spill] sm:$0xff] }
 0x24e   : > { %10064 = vmatprep.subr.bf16.mxu0 %v10984_v7 }
 0x24f   : > { %9521 = vmatmul.mubr.bf16.gmra.mrb[28].mxu1 %v14804_v50  ;;  %10033 = vmatmul.mubr.bf16.gmra.mrb[12].mxu0 %v14805_v1  ;;  %v6661_v50 = vrot.slane %v13398_v8, 6  ;;  %v10989_v1 = vld [vmem:[%s14008_s1 + $0x268] sm:$0xff]  }
 0x250   : > { %9540 = vmatprep.mubr.bf16.mxu1 %v14806_v51  ;;  %10036 = vmatprep.mubr.bf16.mxu0 %v14807_v43  ;;  %v14816_v51 = vld [vmem:[#allocation48_spill] sm:$0xff]  ;;  %v14817_v43 = vld [vmem:[#allocation133_spill] sm:$0xff] }
 0x251   : > { %10065 = vmatpush3.bf16.msra.mxu0 %v10984_v7  ;;  %v8394_v7 = vrot.slane %v13287_v15, 10 }
 0x252   : > { %10066 = vmatprep.subr.bf16.mxu0 %v10986_v4 }
 0x253   : > { %v6659_v15 = vsel %vm11668_vm8, %v8394_v7, %v6658_v47  ;;  %v14826_v7 = vld [vmem:[#allocation22_spill] sm:$0xff] }
 0x255   : > { %10067 = vmatpush3.bf16.msra.mxu0 %v10986_v4  ;;  %v6660_v4 = vrot.slane %v6658_v47, 4  ;;  %v14824_v47 = vld [vmem:[#allocation78_spill] sm:$0xff] }
 0x256   : > { %10100 = vmatprep.subr.bf16.mxu0 %v10988_v45 }
 0x257   : > { %9541 = vmatmul.mubr.bf16.vlgmr.msra.gmra.mrb[0].mxu1 %v14808_v38  ;;  %10037 = vmatmul.mubr.bf16.gmra.mrb[16].mxu0 %v14809_v0  ;;  %v6662_v0 = vsel %vm11668_vm8, %v6660_v4, %v6661_v50  ;;  %v10992_v4 = vld [vmem:[%s14008_s1 + $0x510] sm:$0xff]   ;;  %v10994_v50 = vld [vmem:[%s14008_s1 + $0x518] sm:$0xff]  }
 0x258   : > { %9573 = vmatpush3.bf16.msra.mxu1 %v10979_v49  ;;  %9544 = vmatprep.mubr.bf16.mxu1 %v14810_v61  ;;  %v14814_v49 = vld [vmem:[#allocation41_spill] sm:$0xff]  ;;  %v10991_v61 = vld [vmem:[%s14008_s1 + $0x270] sm:$0xff]  }
 0x259   : > { %10040 = vmatprep.mubr.bf16.mxu0 %v14811_v14  ;;  %9574 = vmatprep.subr.bf16.mxu1 %v10981_v54  ;;  %v8411_v14 = vcombine.low %v6659_v15, %v6662_v0  ;;  %v14835_v38 = vld [vmem:[#allocation37_spill] sm:$0xff]  ;;  %v6925_v15 = vrot.slane %v13378_v24, 6  ;;  %v6926_v0 = vrot.slane %v13381_v32, 7  ;;  %v6934_v24 = vrot.slane %v6388_v53, 6 }
 0x25a   : > { %v6935_v32 = vrot.slane %v13405_v60, 7  ;;  %v14840_v53 = vld [vmem:[#allocation57_spill] sm:$0xff]  ;;  %v14841_v60 = vld [vmem:[#allocation58_spill] sm:$0xff] }
 0x25c   : > { %9575 = vmatpush3.bf16.msra.mxu1 %v10981_v54  ;;  %v14819_v54 = vld [vmem:[#allocation137_spill] sm:$0xff] }
 0x25d   : > { %9576 = vmatprep.subr.bf16.mxu1 %v10983_v17 }
 0x25f   : > { %9545 = vmatmul.mubr.bf16.gmra.mrb[4].mxu1 %v14812_v5  ;;  %10041 = vmatmul.mubr.bf16.gmra.mrb[20].mxu0 %v14813_v13  ;;  %v14822_v5 = vld [vmem:[#allocation71_spill] sm:$0xff]  ;;  %v14823_v13 = vld [vmem:[#allocation12_spill] sm:$0xff] }
 0x260   : > { %9548 = vmatprep.mubr.bf16.mxu1 %v14814_v49  ;;  %10044 = vmatprep.mubr.bf16.mxu0 %v14815_v34  ;;  %v10990_v49 = vld [vmem:[%s14008_s1 + $0x508] sm:$0xff]   ;;  %v11069_v34 = vld [vmem:[%s14008_s1 + $0x280] sm:$0xff]  }
 0x261   : > { %9577 = vmatpush3.bf16.msra.mxu1 %v10983_v17  ;;  %v10993_v17 = vld [vmem:[%s14008_s1 + $0x278] sm:$0xff]  }
 0x262   : > { %9578 = vmatprep.subr.bf16.mxu1 %v10985_v26 }
 0x265   : > { %9579 = vmatpush3.bf16.msra.mxu1 %v10985_v26  ;;  %v14821_v26 = vld [vmem:[#allocation62_spill] sm:$0xff] }
 0x266   : > { %9580 = vmatprep.subr.bf16.mxu1 %v10987_v39 }
 0x267   : > { %9549 = vmatmul.mubr.bf16.gmra.mrb[8].mxu1 %v14816_v51  ;;  %10045 = vmatmul.mubr.bf16.gmra.mrb[24].mxu0 %v14817_v43  ;;  %v10996_v51 = vld [vmem:[%s14008_s1 + $0x528] sm:$0xff]   ;;  %v14829_v43 = vld [vmem:[#allocation105_spill] sm:$0xff] }
 0x268   : > { %9552 = vmatprep.mubr.bf16.mxu1 %v14818_v59  ;;  %10048 = vmatprep.mubr.bf16.mxu0 %v14819_v54  ;;  %v14833_v59 = vld [vmem:[#allocation36_spill] sm:$0xff]  ;;  %v14834_v54 = vld [vmem:[#allocation38_spill] sm:$0xff] }
 0x269   : > { %9581 = vmatpush3.bf16.msra.mxu1 %v10987_v39  ;;  %v14825_v39 = vld [vmem:[#allocation84_spill] sm:$0xff] }
 0x26a   : > { %9582 = vmatprep.subr.bf16.mxu1 %v10989_v1 }
 0x26d   : > { %9583 = vmatpush3.bf16.msra.mxu1 %v10989_v1  ;;  %v14827_v1 = vld [vmem:[#allocation90_spill] sm:$0xff] }
 0x26e   : > { %9584 = vmatprep.subr.bf16.mxu1 %v10991_v61 }
 0x26f   : > { %9553 = vmatmul.mubr.bf16.gmra.mrb[12].mxu1 %v14821_v26  ;;  %10049 = vmatmul.mubr.bf16.gmra.mrb[28].mxu0 %v8411_v14  ;;  %v6930_v14 = vrot.slane %v14780_v31, 7  ;;  %v14837_v26 = vld [vmem:[#allocation42_spill] sm:$0xff] }
 0x270   : > { %9556 = vmatprep.mubr.bf16.mxu1 %v14822_v5  ;;  %10068 = vmatprep.mubr.bf16.mxu0 %v14823_v13  ;;  %v14838_v5 = vld [vmem:[#allocation43_spill] sm:$0xff]  ;;  %v6927_v13 = vor.u32 %v6926_v0, %v6925_v15 }
 0x271   : > { %9585 = vmatpush3.bf16.msra.mxu1 %v10991_v61  ;;  %v6929_v61 = vrot.slane %v13387_v40, 6  ;;  %v11072_v40 = vld [vmem:[%s14008_s1 + $0x298] sm:$0xff]  }
 0x272   : > { %9586 = vmatprep.subr.bf16.mxu1 %v10993_v17  ;;  %v6928_v31 = vrot.slane %v6927_v13, 4 }
 0x275   : > { %9587 = vmatpush3.bf16.msra.mxu1 %v10993_v17  ;;  %v14836_v17 = vld [vmem:[#allocation34_spill] sm:$0xff] }
 0x276   : > { %10148 = vmatprep.subr.bf16.mxu1 %v11069_v34 }
 0x277   : > { %9557 = vmatmul.mubr.bf16.gmra.mrb[16].mxu1 %v14824_v47  ;;  %10069 = vmatmul.mubr.bf16.vlgmr.msra.gmra.mrb[0].mxu0 %v14743_v57  ;;  %v14828_v57 = vld [vmem:[#allocation99_spill] sm:$0xff]  ;;  %v11073_v47 = vld [vmem:[%s14008_s1 + $0x2a0] sm:$0xff]  }
 0x278   : > { %9560 = vmatprep.mubr.bf16.mxu1 %v14825_v39  ;;  %10101 = vmatpush3.bf16.msra.mxu0 %v10988_v45  ;;  %v10995_v45 = vld [vmem:[%s14008_s1 + $0x520] sm:$0xff]   ;;  %v14839_v39 = vld [vmem:[#allocation49_spill] sm:$0xff] }
 0x279   : > { %10072 = vmatprep.mubr.bf16.mxu0 %v14826_v7  ;;  %10102 = vmatprep.subr.bf16.mxu0 %v10990_v49 }
 0x27c   : > { %10103 = vmatpush3.bf16.msra.mxu0 %v10990_v49  ;;  %v6931_v49 = vor.u32 %v6930_v14, %v6929_v61 }
 0x27d   : > { %10104 = vmatprep.subr.bf16.mxu0 %v10992_v4 }
 0x27f   : > { %9561 = vmatmul.mubr.bf16.gmra.mrb[20].mxu1 %v14827_v1  ;;  %10073 = vmatmul.mubr.bf16.gmra.mrb[4].mxu0 %v14748_v58  ;;  %v10997_v58 = vld [vmem:[%s14008_s1 + $0x530] sm:$0xff]   ;;  %v11074_v1 = vld [vmem:[%s14008_s1 + $0x2a8] sm:$0xff]  }
 0x280   : > { %9564 = vmatprep.mubr.bf16.mxu1 %v14828_v57  ;;  %10076 = vmatprep.mubr.bf16.mxu0 %v14750_v37  ;;  %v10998_v37 = vld [vmem:[%s14008_s1 + $0x538] sm:$0xff]  }
 0x281   : > { %10105 = vmatpush3.bf16.msra.mxu0 %v10992_v4  ;;  %v6932_v4 = vsel %vm12222_vm11, %v6928_v31, %v6931_v49 }
 0x282   : > { %10106 = vmatprep.subr.bf16.mxu0 %v10994_v50 }
 0x285   : > { %10107 = vmatpush3.bf16.msra.mxu0 %v10994_v50 }
 0x286   : > { %10108 = vmatprep.subr.bf16.mxu0 %v10995_v45 }
 0x287   : > { %9565 = vmatmul.mubr.bf16.gmra.mrb[24].mxu1 %v14829_v43  ;;  %10077 = vmatmul.mubr.bf16.gmra.mrb[8].mxu0 %v14751_v36  ;;  %v14830_v36 = vld [vmem:[#allocation25_spill] sm:$0xff]  ;;  %v14844_v43 = vld [vmem:[#allocation66_spill] sm:$0xff] }
 0x288   : > { %9568 = vmatprep.mubr.bf16.mxu1 %v14749_v35  ;;  %10080 = vmatprep.mubr.bf16.mxu0 %v14752_v33  ;;  %v14831_v35 = vld [vmem:[#allocation31_spill] sm:$0xff] }
 0x289   : > { %10109 = vmatpush3.bf16.msra.mxu0 %v10995_v45  ;;  %v14832_v33 = vld [vmem:[#allocation35_spill] sm:$0xff]  ;;  %v14843_v45 = vld [vmem:[#allocation61_spill] sm:$0xff] }
 0x28a   : > { %10110 = vmatprep.subr.bf16.mxu0 %v10996_v51 }
 0x28d   : > { %10111 = vmatpush3.bf16.msra.mxu0 %v10996_v51  ;;  %v11076_v51 = vld [vmem:[%s14008_s1 + $0x2b8] sm:$0xff]  }
 0x28e   : > { %10112 = vmatprep.subr.bf16.mxu0 %v10997_v58 }
 0x28f   : > { %9569 = vmatmul.mubr.bf16.gmra.mrb[28].mxu1 %v13414_v19  ;;  %10081 = vmatmul.mubr.bf16.gmra.mrb[12].mxu0 %v14754_v29  ;;  %v11070_v19 = vld [vmem:[%s14008_s1 + $0x288] sm:$0xff]   ;;  %v11071_v29 = vld [vmem:[%s14008_s1 + $0x290] sm:$0xff]  }
 0x290   : > { %9588 = vmatprep.mubr.bf16.mxu1 %v14830_v36  ;;  %10084 = vmatprep.mubr.bf16.mxu0 %v14831_v35  ;;  %v14847_v36 = vld [vmem:[#allocation118_spill] sm:$0xff] }
 0x291   : > { %10113 = vmatpush3.bf16.msra.mxu0 %v10997_v58  ;;  %v14845_v58 = vld [vmem:[#allocation114_spill] sm:$0xff] }
 0x292   : > { %10114 = vmatprep.subr.bf16.mxu0 %v10998_v37 }
 0x295   : > { %10115 = vmatpush3.bf16.msra.mxu0 %v10998_v37  ;;  %v14846_v37 = vld [vmem:[#allocation115_spill] sm:$0xff] }
 0x297   : > { %9589 = vmatmul.mubr.bf16.vlgmr.msra.gmra.mrb[0].mxu1 %v14832_v33  ;;  %10085 = vmatmul.mubr.bf16.gmra.mrb[16].mxu0 %v14833_v59 }
 0x298   : > { %10156 = vmatpush3.bf16.msra.mxu1 %v11069_v34  ;;  %9592 = vmatprep.mubr.bf16.mxu1 %v14834_v54  ;;  %v6933_v34 = vrot.slane %v6931_v49, 4  ;;  %v13869_v54 = vld [vmem:[%s14009_s2] ss:$0 sm:$0xff] }
 0x299   : > { %10088 = vmatprep.mubr.bf16.mxu0 %v14835_v38  ;;  %10149 = vmatprep.subr.bf16.mxu1 %v11070_v19 }
 0x29c   : > { %10157 = vmatpush3.bf16.msra.mxu1 %v11070_v19 }
 0x29d   : > { %10150 = vmatprep.subr.bf16.mxu1 %v11071_v29 }
 0x29f   : > { %9593 = vmatmul.mubr.bf16.gmra.mrb[4].mxu1 %v14836_v17  ;;  %10089 = vmatmul.mubr.bf16.gmra.mrb[20].mxu0 %v14762_v23  ;;  %v6936_v23 = vor.u32 %v6935_v32, %v6934_v24  ;;  %v13883_v24 = vld [vmem:[%s14009_s2 + $0x2] ss:$0 sm:$0xff] }
 0x2a0   : > { %9596 = vmatprep.mubr.bf16.mxu1 %v14837_v26  ;;  %10092 = vmatprep.mubr.bf16.mxu0 %v14838_v5 }
 0x2a1   : > { %10158 = vmatpush3.bf16.msra.mxu1 %v11071_v29  ;;  %v6937_v50 = vsel %vm12222_vm11, %v6933_v34, %v6936_v23  ;;  %v13874_v29 = vld [vmem:[%s14009_s2 + $0x1] ss:$0 sm:$0xff] }
 0x2a2   : > { %10151 = vmatprep.subr.bf16.mxu1 %v11072_v40  ;;  %v8436_v57 = vcombine.low %v6932_v4, %v6937_v50 }
 0x2a5   : > { %10159 = vmatpush3.bf16.msra.mxu1 %v11072_v40 }
 0x2a6   : > { %10152 = vmatprep.subr.bf16.mxu1 %v11073_v47 }
 0x2a7   : > { %9597 = vmatmul.mubr.bf16.gmra.mrb[8].mxu1 %v14839_v39  ;;  %10093 = vmatmul.mubr.bf16.gmra.mrb[24].mxu0 %v14766_v28  ;;  %v11075_v28 = vld [vmem:[%s14008_s1 + $0x2b0] sm:$0xff]  }
 0x2a8   : > { %9600 = vmatprep.mubr.bf16.mxu1 %v14840_v53  ;;  %10096 = vmatprep.mubr.bf16.mxu0 %v14841_v60 }
 0x2a9   : > { %10160 = vmatpush3.bf16.msra.mxu1 %v11073_v47 }
 0x2aa   : > { %10153 = vmatprep.subr.bf16.mxu1 %v11074_v1 }
 0x2ad   : > { %10161 = vmatpush3.bf16.msra.mxu1 %v11074_v1 }
 0x2ae   : > { %10154 = vmatprep.subr.bf16.mxu1 %v11075_v28 }
 0x2af   : > { %9601 = vmatmul.mubr.bf16.gmra.mrb[12].mxu1 %v14843_v45  ;;  %10097 = vmatmul.mubr.bf16.gmra.mrb[28].mxu0 %v8436_v57 }
 0x2b0   : > { %9604 = vmatprep.mubr.bf16.mxu1 %v14767_v22  ;;  %10116 = vmatprep.mubr.bf16.mxu0 %v14771_v52  ;;  %v14848_v22 = vld [vmem:[#allocation122_spill] sm:$0xff] }
 0x2b1   : > { %10162 = vmatpush3.bf16.msra.mxu1 %v11075_v28 }
 0x2b2   : > { %10155 = vmatprep.subr.bf16.mxu1 %v11076_v51 }
 0x2b5   : > { %10163 = vmatpush3.bf16.msra.mxu1 %v11076_v51 }
 0x2b7   : > { %9605 = vmatmul.mubr.bf16.gmra.mrb[16].mxu1 %v14768_v11  ;;  %10117 = vmatmul.mubr.bf16.vlgmr.msra.gmra.mrb[0].mxu0 %v14844_v43 }
 0x2b8   : > { %9608 = vmatprep.mubr.bf16.mxu1 %v14845_v58  ;;  %10120 = vmatprep.mubr.bf16.mxu0 %v14846_v37 }
 0x2bf   : > { %9609 = vmatmul.mubr.bf16.gmra.mrb[20].mxu1 %v14847_v36  ;;  %10121 = vmatmul.mubr.bf16.gmra.mrb[4].mxu0 %v14775_v27 }
 0x2c0   : > { %9612 = vmatprep.mubr.bf16.mxu1 %v14848_v22  ;;  %10124 = vmatprep.mubr.bf16.mxu0 %v12933_v3  ;;  %v11078_v3 = vld [vmem:[%s11151_s10 + $0xcc] sm:$0xf] }
 0x2c7   : > { %9613 = vmatmul.mubr.bf16.gmra.mrb[24].mxu1 %v12935_v42  ;;  %10125 = vmatmul.mubr.bf16.gmra.mrb[8].mxu0 %v12939_v63  ;;  %v11077_v63 = vld [vmem:[%s11151_s10 + $0xd0] sm:$0xf] }
 0x2c8   : > { %9616 = vmatprep.mubr.bf16.mxu1 %v12976_v46  ;;  %10128 = vmatprep.mubr.bf16.mxu0 %v12980_v62  ;;  %v7202_v42 = vrot.slane %v11077_v63, 7  ;;  %v8445_v46 = vrot.slane %v11078_v3, 11 }
 0x2ca   : > { %v7204_v62 = vrot.slane %v7202_v42, 4 }
 0x2cf   : > { %9617 = vmatmul.mubr.bf16.gmra.mrb[28].mxu1 %v13515_v6  ;;  %10129 = vmatmul.mubr.bf16.gmra.mrb[12].mxu0 %v12982_v12  ;;  %v7205_v12 = vrot.slane %v13398_v8, 7 }
 0x2d0   : > { %9652 = vmatprep.mubr.bf16.mxu1 %v13131_v41  ;;  %10132 = vmatprep.mubr.bf16.mxu0 %v13009_v21  ;;  %v14849_v21 = vld [vmem:[#allocation125_spill] sm:$0xff] }
 0x2d7   : > { %9653 = vmatmul.mubr.bf16.vlgmr.msra.gmra.mrb[16].mxu1 %v13142_v9  ;;  %10133 = vmatmul.mubr.bf16.gmra.mrb[16].mxu0 %v13011_v20 }
 0x2d8   : > { %9656 = vmatprep.mubr.bf16.mxu1 %v13171_v10  ;;  %10136 = vmatprep.mubr.bf16.mxu0 %v13039_v30  ;;  %v7203_v30 = vsel %vm12720_vm1, %v8445_v46, %v7202_v42 }
 0x2df   : > { %9657 = vmatmul.mubr.bf16.gmra.mrb[20].mxu1 %v13176_v44  ;;  %10137 = vmatmul.mubr.bf16.gmra.mrb[20].mxu0 %v13043_v56  ;;  %v7206_v56 = vsel %vm12720_vm1, %v7204_v62, %v7205_v12 }
 0x2e0   : > { %9660 = vmatprep.mubr.bf16.mxu1 %v14782_v48  ;;  %10140 = vmatprep.mubr.bf16.mxu0 %v13071_v2  ;;  %v8462_v2 = vcombine.low %v7203_v30, %v7206_v56 }
 0x2e7   : > { %9661 = vmatmul.mubr.bf16.gmra.mrb[24].mxu1 %v14784_v16  ;;  %10141 = vmatmul.mubr.bf16.gmra.mrb[24].mxu0 %v14776_v18 }
 0x2e8   : > { %9664 = vmatprep.mubr.bf16.mxu1 %v14787_v55  ;;  %10144 = vmatprep.mubr.bf16.mxu0 %v14849_v21 }
 0x2ef   : > { %9665 = vmatmul.mubr.bf16.gmra.mrb[28].mxu1 %v13624_v25  ;;  %10145 = vmatmul.mubr.bf16.gmra.mrb[28].mxu0 %v8462_v2 }
 0x36a   : > { %v9590_v41 = vpop.f32.mrb[0].mxu1 }
 0x36b   : > { %v4310_v9 = vpop.f32.mrb[1].mxu1 }
 0x36c   : > { %v9591_v10 = vpop.f32.mrb[2].mxu1 }
 0x36d   : > { %v4313_v44 = vpop.f32.mrb[3].mxu1 }
 0x372   : > { %v9594_v8 = vpop.f32.mrb[4].mxu1 }
 0x373   : > { %v4326_v11 = vpop.f32.mrb[5].mxu1 }
 0x374   : > { %v9595_v6 = vpop.f32.mrb[6].mxu1 }
 0x375   : > { %v4329_v52 = vpop.f32.mrb[7].mxu1 }
 0x37a   : > { %v9598_v27 = vpop.f32.mrb[8].mxu1 }
 0x37b   : > { %v4342_v18 = vpop.f32.mrb[9].mxu1 }
 0x37c   : > { %v9599_v48 = vpop.f32.mrb[10].mxu1 }
 0x37d   : > { %v13856_v16 = vpop.f32.mrb[11].mxu1 }
 0x382   : > { %v13858_v55 = vpop.f32.mrb[12].mxu1 }
 0x383   : > { %v13860_v35 = vpop.f32.mrb[13].mxu1 }
 0x384   : > { %v13862_v33 = vpop.f32.mrb[14].mxu1 }
 0x385   : > { %v13864_v25 = vpop.f32.mrb[15].mxu1 }
 0x38a   : > { %v10118_v59 = vpop.f32.mrb[0].mxu0 }
 0x38b   : > { %v10164_v38 = vadd.f32 %v10118_v59, %v9590_v41  ;;  %v7310_v19 = vpop.f32.mrb[1].mxu0 }
 0x38c   : > { %v10165_v15 = vadd.f32 %v7310_v19, %v4310_v9  ;;  %v10119_v0 = vpop.f32.mrb[2].mxu0 }
 0x38d   : > { %v7476_v61 = vmul.f32 %v10164_v38, %v13869_v54  ;;  %v10166_v14 = vadd.f32 %v10119_v0, %v9591_v10  ;;  %v7313_v17 = vpop.f32.mrb[3].mxu0 }
 0x38e   : > { %v7474_v26 = vmul.f32 %v10165_v15, %v13869_v54  ;;  %v10167_v5 = vadd.f32 %v7313_v17, %v4313_v44 }
 0x38f   : > { %v7513_v13 = vadd.f32 %v13874_v29, %v7476_v61  ;;  %v7477_v49 = vmul.f32 %v10166_v14, %v13869_v54 }
 0x390   : > { %v7511_v32 = vadd.f32 %v13874_v29, %v7474_v26  ;;  %v7475_v40 = vmul.f32 %v10167_v5, %v13869_v54 }
 0x391   : > { %v7514_v31 = vadd.f32 %v13874_v29, %v7477_v49  ;;  %v7550_v47 = vmax.f32 %v7513_v13, %v13883_v24 }
 0x392   : > { %v7512_v34 = vadd.f32 %v13874_v29, %v7475_v40  ;;  %v10122_v23 = vpop.f32.mrb[4].mxu0  ;;  %v7548_v7 = vmax.f32 %v7511_v32, %v13883_v24 }
 0x393   : > { %v7551_v39 = vmax.f32 %v7514_v31, %v13883_v24  ;;  %v10168_v53 = vadd.f32 %v10122_v23, %v9594_v8  ;;  %v7326_v60 = vpop.f32.mrb[5].mxu0 }
 0x394   : > { %v7549_v4 = vmax.f32 %v7512_v34, %v13883_v24  ;;  %v10169_v50 = vadd.f32 %v7326_v60, %v4326_v11  ;;  %v10123_v1 = vpop.f32.mrb[6].mxu0 }
 0x395   : > { %v8549_v57 = vpack.c.bf16 %v7551_v39, %v7550_v47  ;;  %v7480_v28 = vmul.f32 %v10168_v53, %v13869_v54  ;;  %v10170_v45 = vadd.f32 %v10123_v1, %v9595_v6  ;;  %v7329_v51 = vpop.f32.mrb[7].mxu0 }
 0x396   : > { %v8544_v43 = vpack.c.bf16 %v7549_v4, %v7548_v7  ;;  %v7478_v58 = vmul.f32 %v10169_v50, %v13869_v54  ;;  %v10171_v37 = vadd.f32 %v7329_v51, %v4329_v52 }
 0x397   : > { %8621 = vst [vmem:[%s13896_s17 + $0x8] sm:$0xff] %v8549_v57   ;;  %v7517_v36 = vadd.f32 %v13874_v29, %v7480_v28  ;;  %v7481_v22 = vmul.f32 %v10170_v45, %v13869_v54 }
 0x398   : > { %8545 = vst [vmem:[%s13896_s17] sm:$0xff] %v8544_v43   ;;  %v7515_v63 = vadd.f32 %v13874_v29, %v7478_v58  ;;  %v7479_v42 = vmul.f32 %v10171_v37, %v13869_v54 }
 0x399   : > { %v7518_v3 = vadd.f32 %v13874_v29, %v7481_v22  ;;  %v7554_v12 = vmax.f32 %v7517_v36, %v13883_v24 }
 0x39a   : > { %v7516_v46 = vadd.f32 %v13874_v29, %v7479_v42  ;;  %v10126_v62 = vpop.f32.mrb[8].mxu0  ;;  %v7552_v56 = vmax.f32 %v7515_v63, %v13883_v24 }
 0x39b   : > { %v7555_v21 = vmax.f32 %v7518_v3, %v13883_v24  ;;  %v10172_v20 = vadd.f32 %v10126_v62, %v9598_v27  ;;  %v7342_v30 = vpop.f32.mrb[9].mxu0 }
 0x39c   : > { %v7553_v2 = vmax.f32 %v7516_v46, %v13883_v24  ;;  %v10173_v41 = vadd.f32 %v7342_v30, %v4342_v18  ;;  %v10127_v9 = vpop.f32.mrb[10].mxu0 }
 0x39d   : > { %v8559_v10 = vpack.c.bf16 %v7555_v21, %v7554_v12  ;;  %v7484_v44 = vmul.f32 %v10172_v20, %v13869_v54  ;;  %v10174_v8 = vadd.f32 %v10127_v9, %v9599_v48  ;;  %v7345_v11 = vpop.f32.mrb[11].mxu0 }
 0x39e   : > { %v8554_v6 = vpack.c.bf16 %v7553_v2, %v7552_v56  ;;  %v7482_v52 = vmul.f32 %v10173_v41, %v13869_v54  ;;  %v10175_v59 = vadd.f32 %v7345_v11, %v13856_v16 }
 0x39f   : > { %8623 = vst [vmem:[%s13896_s17 + $0x18] sm:$0xff] %v8559_v10   ;;  %v7521_v27 = vadd.f32 %v13874_v29, %v7484_v44  ;;  %v7485_v38 = vmul.f32 %v10174_v8, %v13869_v54 }
 0x3a0   : > { %8622 = vst [vmem:[%s13896_s17 + $0x10] sm:$0xff] %v8554_v6   ;;  %v7519_v19 = vadd.f32 %v13874_v29, %v7482_v52  ;;  %v7483_v18 = vmul.f32 %v10175_v59, %v13869_v54 }
 0x3a1   : > { %v7522_v15 = vadd.f32 %v13874_v29, %v7485_v38  ;;  %v7558_v61 = vmax.f32 %v7521_v27, %v13883_v24 }
 0x3a2   : > { %v7520_v48 = vadd.f32 %v13874_v29, %v7483_v18  ;;  %v10130_v0 = vpop.f32.mrb[12].mxu0  ;;  %v7556_v26 = vmax.f32 %v7519_v19, %v13883_v24 }
 0x3a3   : > { %v7559_v16 = vmax.f32 %v7522_v15, %v13883_v24  ;;  %v10176_v14 = vadd.f32 %v10130_v0, %v13858_v55  ;;  %v7358_v17 = vpop.f32.mrb[13].mxu0 }
 0x3a4   : > { %v7557_v5 = vmax.f32 %v7520_v48, %v13883_v24  ;;  %v10177_v13 = vadd.f32 %v7358_v17, %v13860_v35  ;;  %v10131_v49 = vpop.f32.mrb[14].mxu0 }
 0x3a5   : > { %v8569_v32 = vpack.c.bf16 %v7559_v16, %v7558_v61  ;;  %v7488_v40 = vmul.f32 %v10176_v14, %v13869_v54  ;;  %v10178_v31 = vadd.f32 %v10131_v49, %v13862_v33  ;;  %v7361_v34 = vpop.f32.mrb[15].mxu0 }
 0x3a6   : > { %v8564_v23 = vpack.c.bf16 %v7557_v5, %v7556_v26  ;;  %v7486_v47 = vmul.f32 %v10177_v13, %v13869_v54  ;;  %v10179_v55 = vadd.f32 %v7361_v34, %v13864_v25 }
 0x3a7   : > { %8625 = vst [vmem:[%s13896_s17 + $0x28] sm:$0xff] %v8569_v32   ;;  %v7525_v39 = vadd.f32 %v13874_v29, %v7488_v40  ;;  %v7489_v53 = vmul.f32 %v10178_v31, %v13869_v54 }
 0x3a8   : > { %8624 = vst [vmem:[%s13896_s17 + $0x20] sm:$0xff] %v8564_v23   ;;  %v7523_v35 = vadd.f32 %v13874_v29, %v7486_v47  ;;  %v7487_v60 = vmul.f32 %v10179_v55, %v13869_v54 }
 0x3a9   : > { %v7526_v7 = vadd.f32 %v13874_v29, %v7489_v53  ;;  %v7562_v57 = vmax.f32 %v7525_v39, %v13883_v24 }
 0x3aa   : > { %v9654_v4 = vpop.f32.mrb[16].mxu1  ;;  %v7524_v33 = vadd.f32 %v13874_v29, %v7487_v60  ;;  %v10134_v50 = vpop.f32.mrb[16].mxu0  ;;  %v7560_v43 = vmax.f32 %v7523_v35, %v13883_v24 }
 0x3ab   : > { %v4651_v1 = vpop.f32.mrb[17].mxu1  ;;  %v7563_v25 = vmax.f32 %v7526_v7, %v13883_v24  ;;  %v10180_v28 = vadd.f32 %v10134_v50, %v9654_v4  ;;  %v7374_v45 = vpop.f32.mrb[17].mxu0 }
 0x3ac   : > { %v9655_v51 = vpop.f32.mrb[18].mxu1  ;;  %v7561_v58 = vmax.f32 %v7524_v33, %v13883_v24  ;;  %v10181_v37 = vadd.f32 %v7374_v45, %v4651_v1  ;;  %v10135_v36 = vpop.f32.mrb[18].mxu0 }
 0x3ad   : > { %v4654_v22 = vpop.f32.mrb[19].mxu1  ;;  %v8579_v63 = vpack.c.bf16 %v7563_v25, %v7562_v57  ;;  %v7492_v42 = vmul.f32 %v10180_v28, %v13869_v54  ;;  %v10182_v3 = vadd.f32 %v10135_v36, %v9655_v51  ;;  %v7377_v46 = vpop.f32.mrb[19].mxu0 }
 0x3ae   : > { %v8574_v62 = vpack.c.bf16 %v7561_v58, %v7560_v43  ;;  %v7490_v12 = vmul.f32 %v10181_v37, %v13869_v54  ;;  %v10183_v21 = vadd.f32 %v7377_v46, %v4654_v22 }
 0x3af   : > { %8627 = vst [vmem:[%s13896_s17 + $0x38] sm:$0xff] %v8579_v63   ;;  %v7529_v20 = vadd.f32 %v13874_v29, %v7492_v42  ;;  %v7493_v30 = vmul.f32 %v10182_v3, %v13869_v54 }
 0x3b0   : > { %8626 = vst [vmem:[%s13896_s17 + $0x30] sm:$0xff] %v8574_v62   ;;  %v7527_v56 = vadd.f32 %v13874_v29, %v7490_v12  ;;  %v7491_v2 = vmul.f32 %v10183_v21, %v13869_v54 }
 0x3b1   : > { %v7530_v41 = vadd.f32 %v13874_v29, %v7493_v30  ;;  %v7566_v11 = vmax.f32 %v7529_v20, %v13883_v24 }
 0x3b2   : > { %v9658_v9 = vpop.f32.mrb[20].mxu1  ;;  %v7528_v10 = vadd.f32 %v13874_v29, %v7491_v2  ;;  %v10138_v44 = vpop.f32.mrb[20].mxu0  ;;  %v7564_v38 = vmax.f32 %v7527_v56, %v13883_v24 }
 0x3b3   : > { %v4667_v8 = vpop.f32.mrb[21].mxu1  ;;  %v7567_v6 = vmax.f32 %v7530_v41, %v13883_v24  ;;  %v10184_v52 = vadd.f32 %v10138_v44, %v9658_v9  ;;  %v7390_v59 = vpop.f32.mrb[21].mxu0 }
 0x3b4   : > { %v9659_v27 = vpop.f32.mrb[22].mxu1  ;;  %v7565_v19 = vmax.f32 %v7528_v10, %v13883_v24  ;;  %v10185_v18 = vadd.f32 %v7390_v59, %v4667_v8  ;;  %v10139_v15 = vpop.f32.mrb[22].mxu0 }
 0x3b5   : > { %v4670_v48 = vpop.f32.mrb[23].mxu1  ;;  %v8589_v0 = vpack.c.bf16 %v7567_v6, %v7566_v11  ;;  %v7496_v61 = vmul.f32 %v10184_v52, %v13869_v54  ;;  %v10186_v16 = vadd.f32 %v10139_v15, %v9659_v27  ;;  %v7393_v14 = vpop.f32.mrb[23].mxu0 }
 0x3b6   : > { %v8584_v17 = vpack.c.bf16 %v7565_v19, %v7564_v38  ;;  %v7494_v26 = vmul.f32 %v10185_v18, %v13869_v54  ;;  %v10187_v5 = vadd.f32 %v7393_v14, %v4670_v48 }
 0x3b7   : > { %8629 = vst [vmem:[%s13896_s17 + $0x48] sm:$0xff] %v8589_v0   ;;  %v7533_v13 = vadd.f32 %v13874_v29, %v7496_v61  ;;  %v7497_v49 = vmul.f32 %v10186_v16, %v13869_v54 }
 0x3b8   : > { %8628 = vst [vmem:[%s13896_s17 + $0x40] sm:$0xff] %v8584_v17   ;;  %v7531_v32 = vadd.f32 %v13874_v29, %v7494_v26  ;;  %v7495_v40 = vmul.f32 %v10187_v5, %v13869_v54 }
 0x3b9   : > { %v7534_v31 = vadd.f32 %v13874_v29, %v7497_v49  ;;  %v7570_v39 = vmax.f32 %v7533_v13, %v13883_v24 }
 0x3ba   : > { %v9662_v34 = vpop.f32.mrb[24].mxu1  ;;  %v7532_v23 = vadd.f32 %v13874_v29, %v7495_v40  ;;  %v10142_v47 = vpop.f32.mrb[24].mxu0  ;;  %v7568_v4 = vmax.f32 %v7531_v32, %v13883_v24 }
 0x3bb   : > { %v4683_v55 = vpop.f32.mrb[25].mxu1  ;;  %v7571_v53 = vmax.f32 %v7534_v31, %v13883_v24  ;;  %v10188_v35 = vadd.f32 %v10142_v47, %v9662_v34  ;;  %v7406_v60 = vpop.f32.mrb[25].mxu0 }
 0x3bc   : > { %v9663_v7 = vpop.f32.mrb[26].mxu1  ;;  %v7569_v33 = vmax.f32 %v7532_v23, %v13883_v24  ;;  %v10189_v50 = vadd.f32 %v7406_v60, %v4683_v55  ;;  %v10143_v1 = vpop.f32.mrb[26].mxu0 }
 0x3bd   : > { %v4686_v57 = vpop.f32.mrb[27].mxu1  ;;  %v8599_v25 = vpack.c.bf16 %v7571_v53, %v7570_v39  ;;  %v7500_v28 = vmul.f32 %v10188_v35, %v13869_v54  ;;  %v10190_v45 = vadd.f32 %v10143_v1, %v9663_v7  ;;  %v7409_v51 = vpop.f32.mrb[27].mxu0 }
 0x3be   : > { %v8594_v43 = vpack.c.bf16 %v7569_v33, %v7568_v4  ;;  %v7498_v58 = vmul.f32 %v10189_v50, %v13869_v54  ;;  %v10191_v37 = vadd.f32 %v7409_v51, %v4686_v57 }
 0x3bf   : > { %8631 = vst [vmem:[%s13896_s17 + $0x58] sm:$0xff] %v8599_v25   ;;  %v7537_v36 = vadd.f32 %v13874_v29, %v7500_v28  ;;  %v7501_v22 = vmul.f32 %v10190_v45, %v13869_v54 }
 0x3c0   : > { %8630 = vst [vmem:[%s13896_s17 + $0x50] sm:$0xff] %v8594_v43   ;;  %v7535_v63 = vadd.f32 %v13874_v29, %v7498_v58  ;;  %v7499_v42 = vmul.f32 %v10191_v37, %v13869_v54 }
 0x3c1   : > { %v7538_v3 = vadd.f32 %v13874_v29, %v7501_v22  ;;  %v7574_v20 = vmax.f32 %v7537_v36, %v13883_v24 }
 0x3c2   : > { %v9666_v46 = vpop.f32.mrb[28].mxu1  ;;  %v7536_v62 = vadd.f32 %v13874_v29, %v7499_v42  ;;  %v10146_v12 = vpop.f32.mrb[28].mxu0  ;;  %v7572_v9 = vmax.f32 %v7535_v63, %v13883_v24 }
 0x3c3   : > { %v4699_v21 = vpop.f32.mrb[29].mxu1  ;;  %v7575_v30 = vmax.f32 %v7538_v3, %v13883_v24  ;;  %v10192_v56 = vadd.f32 %v10146_v12, %v9666_v46  ;;  %v7422_v2 = vpop.f32.mrb[29].mxu0 }
 0x3c4   : > { %v9667_v41 = vpop.f32.mrb[30].mxu1  ;;  %v7573_v10 = vmax.f32 %v7536_v62, %v13883_v24  ;;  %v10193_v44 = vadd.f32 %v7422_v2, %v4699_v21  ;;  %v10147_v8 = vpop.f32.mrb[30].mxu0 }
 0x3c5   : > { %v4702_v11 = vpop.f32.mrb[31].mxu1  ;;  %v8609_v6 = vpack.c.bf16 %v7575_v30, %v7574_v20  ;;  %v7504_v52 = vmul.f32 %v10192_v56, %v13869_v54  ;;  %v10194_v59 = vadd.f32 %v10147_v8, %v9667_v41  ;;  %v7425_v27 = vpop.f32.mrb[31].mxu0 }
 0x3c6   : > { %v8604_v38 = vpack.c.bf16 %v7573_v10, %v7572_v9  ;;  %v7502_v19 = vmul.f32 %v10193_v44, %v13869_v54  ;;  %v10195_v18 = vadd.f32 %v7425_v27, %v4702_v11 }
 0x3c7   : > { %8633 = vst [vmem:[%s13896_s17 + $0x68] sm:$0xff] %v8609_v6   ;;  %v7541_v15 = vadd.f32 %v13874_v29, %v7504_v52  ;;  %v7505_v48 = vmul.f32 %v10194_v59, %v13869_v54 }
 0x3c8   : > { %8632 = vst [vmem:[%s13896_s17 + $0x60] sm:$0xff] %v8604_v38   ;;  %v7539_v0 = vadd.f32 %v13874_v29, %v7502_v19  ;;  %v7503_v61 = vmul.f32 %v10195_v18, %v13869_v54 }
 0x3c9   : > { %v7542_v16 = vadd.f32 %v13874_v29, %v7505_v48  ;;  %v7578_v17 = vmax.f32 %v7541_v15, %v13883_v24 }
 0x3ca   : > { %v7540_v14 = vadd.f32 %v13874_v29, %v7503_v61  ;;  %v7576_v5 = vmax.f32 %v7539_v0, %v13883_v24 }
 0x3cb   : > { %v7579_v26 = vmax.f32 %v7542_v16, %v13883_v24 }
 0x3cc   : > { %v7577_v13 = vmax.f32 %v7540_v14, %v13883_v24 }
 0x3cd   : > { %v8619_v49 = vpack.c.bf16 %v7579_v26, %v7578_v17 }
 0x3ce   : > { %v8614_v32 = vpack.c.bf16 %v7577_v13, %v7576_v5 }
 0x3cf   : > { %8635 = vst [vmem:[%s13896_s17 + $0x78] sm:$0xff] %v8619_v49  }
 0x3d0   : > { %8634 = vst [vmem:[%s13896_s17 + $0x70] sm:$0xff] %v8614_v32  }
 0x3d1 PF: > { %s13_s12 = sadd.s32 1, %s11085_s12  }
 0x3d2   : > { %p10_p4 = scmp.ge.s32.totalorder %s13_s12, 4  }
 0x3d4   :  { %12 = sbr.rel (!%p10_p4) target bundleno = 1 (0x1), region = 82 }

</bundles_post_ra>
